<compile_context>
chip_gen: v5e
topology: v5e:2x2
jax: 0.10.0
libtpu: 0.0.40
codegen_flags: <defaults>
</compile_context>

<pallas_src>
import jax
import jax.numpy as jnp
from jax.experimental import pallas as pl
from jax.experimental.pallas import tpu as pltpu

_LANE = 128      # Cout tile width (keep 128 for v5e; TODO(synk): 256 on v6e/v7x)
_MCHUNK = 128    # row chunk: (128, 128) f32 acc + dot result stay in vregs
_EPS = 1e-5


def _round_up(x, m):
    return (x + m - 1) // m * m


def _fused_conv3x3drop(x_flat, w1, t1, w2, s2, t2, mask, *, H, W, n_cout_tiles):
    """conv1 + Dropout(id) + ReLU -> conv2 + BN(eval) + ReLU, fused.

    x_flat: (N, NR, Cip)   bf16  spatially padded image, rows flattened,
                                 channels padded to a multiple of 128.
    w1:     (9, Cip, Cmp)  bf16  3x3 taps flattened on the leading axis (HWIO).
    t1:     (1, Cmp)       f32   stage-1 shift (= conv1 bias).
    w2:     (9, Cmp, Cop)  bf16
    s2,t2:  (1, Cop)       f32   stage-2 affine (BN scale / BN shift + bias).
    mask:   (H*(W+2), 1)   f32   1.0 on valid columns, 0.0 on the 2 wrap cols.
    returns (N, H*(W+2), Cop) f32; wrapper strips wrap cols / channel padding.
    """
    N, NR, Cip = x_flat.shape
    Cmp = w1.shape[-1]
    Cop = w2.shape[-1]
    PW = W + 2
    ACC = H * PW                           # rows of the (padded-width) output
    HPAD = (-(PW + 1)) % 16                # 16-aligns the bf16 interior store
    HSTART = HPAD + PW + 1                 # first interior row of the h scratch
    HROWS = _round_up(HPAD + 2 * PW + 2 + ACC, 16)

    def kernel(x_ref, w1_ref, t1_ref, w2_ref, s2_ref, t2_ref, mask_ref,
               o_ref, h_ref):
        j = pl.program_id(1)

        # ---- stage 1: conv1 + Dropout(eval)=identity + ReLU, kept in VMEM ----
        @pl.when(j == 0)
        def _stage1():
            # zero ONLY the halo rows; the interior is fully overwritten below
            # and stays valid across the whole j sweep for this image.
            h_ref[0:HSTART, :] = jnp.zeros((HSTART, Cmp), h_ref.dtype)
            h_ref[HSTART + ACC:HROWS, :] = jnp.zeros(
                (HROWS - HSTART - ACC, Cmp), h_ref.dtype)
            for m0 in range(0, ACC, _MCHUNK):          # M-tiled accumulation
                m = min(_MCHUNK, ACC - m0)
                acc = jnp.zeros((m, Cmp), jnp.float32)
                for dy in range(3):
                    for dx in range(3):
                        d = dy * PW + dx + m0           # row shift of this tap
                        acc = acc + jnp.dot(
                            x_ref[0, d:d + m, :], w1_ref[dy * 3 + dx],
                            preferred_element_type=jnp.float32)
                # add-bias + ReLU, zero wrap columns so they act as the
                # left/right spatial padding of stage 2.
                h = jnp.maximum(acc + t1_ref[...], 0.0) * mask_ref[m0:m0 + m, :]
                h_ref[HSTART + m0:HSTART + m0 + m, :] = h.astype(h_ref.dtype)

        # ---- stage 2: conv2 + BatchNorm(eval) + ReLU for this Cout tile ------
        for m0 in range(0, ACC, _MCHUNK):
            m = min(_MCHUNK, ACC - m0)
            acc2 = jnp.zeros((m, o_ref.shape[2]), jnp.float32)
            for dy in range(3):
                for dx in range(3):
                    d = HPAD + dy * PW + dx + m0
                    acc2 = acc2 + jnp.dot(
                        h_ref[d:d + m, :], w2_ref[dy * 3 + dx],
                        preferred_element_type=jnp.float32)
            o_ref[0, m0:m0 + m, :] = jnp.maximum(
                acc2 * s2_ref[...] + t2_ref[...], 0.0)

    # explicit scoped-VMEM limit from the actual (double-buffered) footprint.
    foot = (2 * NR * Cip * 2             # x block, bf16
            + 2 * 9 * Cip * Cmp * 2      # w1, bf16
            + 2 * Cmp * 4                # t1
            + 2 * 9 * Cmp * _LANE * 2    # w2 tile, bf16
            + 2 * 2 * _LANE * 4          # s2, t2
            + 2 * ACC * 4                # column mask
            + 2 * ACC * _LANE * 4        # output tile
            + HROWS * Cmp * 2)           # h scratch, bf16
    vmem_limit = int(min(100 * 2**20, max(32 * 2**20, 2 * foot + (4 << 20))))

    return pl.pallas_call(
        kernel,
        out_shape=jax.ShapeDtypeStruct((N, ACC, Cop), jnp.float32),
        grid_spec=pltpu.PrefetchScalarGridSpec(
            num_scalar_prefetch=0,
            grid=(N, n_cout_tiles),
            in_specs=[
                pl.BlockSpec((1, NR, Cip), lambda n, j: (n, 0, 0)),
                pl.BlockSpec((9, Cip, Cmp), lambda n, j: (0, 0, 0)),
                pl.BlockSpec((1, Cmp), lambda n, j: (0, 0)),
                pl.BlockSpec((9, Cmp, _LANE), lambda n, j: (0, 0, j)),
                pl.BlockSpec((1, _LANE), lambda n, j: (0, j)),
                pl.BlockSpec((1, _LANE), lambda n, j: (0, j)),
                pl.BlockSpec((ACC, 1), lambda n, j: (0, 0)),
            ],
            out_specs=pl.BlockSpec((1, ACC, _LANE), lambda n, j: (n, 0, j)),
            scratch_shapes=[pltpu.VMEM((HROWS, Cmp), jnp.bfloat16)],
        ),
        compiler_params=pltpu.CompilerParams(
            dimension_semantics=("parallel", "arbitrary"),
            vmem_limit_bytes=vmem_limit),
    )(x_flat, w1, t1, w2, s2, t2, mask)


@jax.jit
def conv3x3drop_forward(x_nchw, w1, b1, w2, b2, bn_gamma, bn_beta,
                        bn_mean, bn_var):
    """Full Conv3x3Drop forward (inference). x_nchw: (N, Cin, H, W) f32."""
    N, Cin, H, W = x_nchw.shape
    Cout = w1.shape[0]
    PW, PH = W + 2, H + 2
    Cip = _round_up(Cin, _LANE)
    Cmp = _round_up(Cout, _LANE)
    Cop = _round_up(Cout, _LANE)
    ACC = H * PW
    NR = _round_up(PH * PW + 2, 16)

    # glue: NCHW -> NHWC, spatial pad 1, channel pad, flatten rows, bf16.
    x = jnp.transpose(x_nchw, (0, 2, 3, 1))
    xp = jnp.pad(x, ((0, 0), (1, 1), (1, 1), (0, Cip - Cin)))
    xf = jnp.pad(xp.reshape(N, PH * PW, Cip),
                 ((0, 0), (0, NR - PH * PW), (0, 0))).astype(jnp.bfloat16)

    # weights: OIHW -> (kh, kw, I, O) -> (9, Ipad, Opad), bf16 MXU inputs.
    w1p = jnp.pad(jnp.transpose(w1, (2, 3, 1, 0)),
                  ((0, 0), (0, 0), (0, Cip - Cin), (0, Cmp - Cout))
                  ).reshape(9, Cip, Cmp).astype(jnp.bfloat16)
    w2p = jnp.pad(jnp.transpose(w2, (2, 3, 1, 0)),
                  ((0, 0), (0, 0), (0, Cmp - Cout), (0, Cop - Cout))
                  ).reshape(9, Cmp, Cop).astype(jnp.bfloat16)

    # stage-1 shift = conv1 bias (Dropout(eval) = identity; scale dropped).
    t1 = jnp.pad(b1.astype(jnp.float32), (0, Cmp - Cout)).reshape(1, Cmp)
    # stage-2 affine: BatchNorm(eval) with the conv2 bias folded into the shift.
    bscale = bn_gamma / jnp.sqrt(bn_var + _EPS)
    bshift = bn_beta - bn_mean * bscale + b2 * bscale
    s2 = jnp.pad(bscale.astype(jnp.float32), (0, Cop - Cout)).reshape(1, Cop)
    t2 = jnp.pad(bshift.astype(jnp.float32), (0, Cop - Cout)).reshape(1, Cop)

    # column validity mask: zero the 2 wrapped columns of the flattened rows.
    col = jnp.arange(ACC, dtype=jnp.int32) % PW
    mask = (col < W).astype(jnp.float32).reshape(ACC, 1)

    out = _fused_conv3x3drop(xf, w1p, t1, w2p, s2, t2, mask,
                             H=H, W=W, n_cout_tiles=Cop // _LANE)
    # (N, H*(W+2), Cop) -> drop wrap columns and channel padding -> NCHW.
    y = out.reshape(N, H, PW, Cop)[:, :, :W, :Cout]
    return jnp.transpose(y, (0, 3, 1, 2))


def init_params(key, in_feat, out_feat):
    """Deterministic parameter init matching the PyTorch module's shapes."""
    k1, k2, k3, k4 = jax.random.split(key, 4)
    fan1 = in_feat * 9
    w1 = jax.random.uniform(k1, (out_feat, in_feat, 3, 3), jnp.float32,
                            -1.0 / jnp.sqrt(fan1), 1.0 / jnp.sqrt(fan1))
    b1 = jax.random.uniform(k2, (out_feat,), jnp.float32,
                            -1.0 / jnp.sqrt(fan1), 1.0 / jnp.sqrt(fan1))
    fan2 = out_feat * 9
    w2 = jax.random.uniform(k3, (out_feat, out_feat, 3, 3), jnp.float32,
                            -1.0 / jnp.sqrt(fan2), 1.0 / jnp.sqrt(fan2))
    b2 = jax.random.uniform(k4, (out_feat,), jnp.float32,
                            -1.0 / jnp.sqrt(fan2), 1.0 / jnp.sqrt(fan2))
    bn = dict(gamma=jnp.ones((out_feat,), jnp.float32),
              beta=jnp.zeros((out_feat,), jnp.float32),
              running_mean=jnp.zeros((out_feat,), jnp.float32),
              running_var=jnp.ones((out_feat,), jnp.float32))
    return w1, b1, w2, b2, bn


def _reference_forward(x_nchw, w1, b1, w2, b2, bn_gamma, bn_beta, bn_mean,
                       bn_var):
    """Pure-XLA reference (same inference semantics) for a sanity check."""
    dn = ("NCHW", "OIHW", "NCHW")
    h = jax.lax.conv_general_dilated(x_nchw, w1, (1, 1), ((1, 1), (1, 1)),
                                     dimension_numbers=dn)
    h = jnp.maximum(h + b1[None, :, None, None], 0.0)
    y = jax.lax.conv_general_dilated(h, w2, (1, 1), ((1, 1), (1, 1)),
                                     dimension_numbers=dn)
    y = y + b2[None, :, None, None]
    scale = (bn_gamma / jnp.sqrt(bn_var + _EPS))[None, :, None, None]
    shift = (bn_beta - bn_mean * bn_gamma / jnp.sqrt(bn_var + _EPS))[None, :, None, None]
    return jnp.maximum(y * scale + shift, 0.0)


if __name__ == "__main__":
    key = jax.random.PRNGKey(0)
    kx, kp = jax.random.split(key)

    N, Cin, Cout, HW = 2, 4, 8, 16
    x = jax.random.normal(kx, (N, Cin, HW, HW), dtype=jnp.float32)
    w1, b1, w2, b2, bn = init_params(kp, Cin, Cout)

    out = conv3x3drop_forward(x, w1, b1, w2, b2, bn["gamma"], bn["beta"],
                              bn["running_mean"], bn["running_var"])
    out = jax.block_until_ready(out)
    assert out.shape == (N, Cout, HW, HW), out.shape

    ref = _reference_forward(x, w1, b1, w2, b2, bn["gamma"], bn["beta"],
                             bn["running_mean"], bn["running_var"])
    assert jnp.allclose(out, ref, atol=2e-2, rtol=2e-2), \
        float(jnp.max(jnp.abs(out - ref)))

    print("KERNEL_OK")
</pallas_src>

<mosaic_0001>
module attributes {stable_mosaic.version = 11 : i64} {
  func.func @kernel(%arg0: i32, %arg1: i32, %arg2: memref<1x336x128xbf16, #tpu.memory_space<vmem>>, %arg3: memref<9x128x128xbf16, #tpu.memory_space<vmem>>, %arg4: memref<1x128xf32, #tpu.memory_space<vmem>>, %arg5: memref<9x128x128xbf16, #tpu.memory_space<vmem>>, %arg6: memref<1x128xf32, #tpu.memory_space<vmem>>, %arg7: memref<1x128xf32, #tpu.memory_space<vmem>>, %arg8: memref<288x1xf32, #tpu.memory_space<vmem>>, %arg9: memref<1x288x128xf32, #tpu.memory_space<vmem>>, %arg10: memref<352x128xbf16, #tpu.memory_space<vmem>>) attributes {dimension_semantics = [#tpu.dimension_semantics<parallel>, #tpu.dimension_semantics<arbitrary>], iteration_bounds = array<i64: 2, 1>, scalar_prefetch = 0 : i64, scratch_operands = 1 : i64, tpu.core_type = #tpu.core_type<tc>, window_params = [{transform_indices = @transform_0, window_bounds = array<i64: 1, 336, 128>}, {pipeline_mode = #tpu.pipeline_mode<synchronous>, transform_indices = @transform_1, window_bounds = array<i64: 9, 128, 128>}, {pipeline_mode = #tpu.pipeline_mode<synchronous>, transform_indices = @transform_2, window_bounds = array<i64: 1, 128>}, {transform_indices = @transform_3, window_bounds = array<i64: 9, 128, 128>}, {transform_indices = @transform_4, window_bounds = array<i64: 1, 128>}, {transform_indices = @transform_5, window_bounds = array<i64: 1, 128>}, {pipeline_mode = #tpu.pipeline_mode<synchronous>, transform_indices = @transform_6, window_bounds = array<i64: 288, 1>}, {transform_indices = @transform_7, window_bounds = array<i64: 1, 288, 128>}]} {
    %c0_i32 = arith.constant 0 : i32
    %0 = arith.cmpi eq, %arg1, %c0_i32 : i32
    %1 = arith.extui %0 : i1 to i32
    %c0_i32_0 = arith.constant 0 : i32
    %2 = arith.cmpi ne, %1, %c0_i32_0 : i32
    scf.if %2 {
      %cst_151 = arith.constant 0.000000e+00 : bf16
      %174 = vector.broadcast %cst_151 : bf16 to vector<32x128xbf16>
      %c0_152 = arith.constant 0 : index
      %c0_153 = arith.constant 0 : index
      %175 = vector.load %arg10[%c0_152, %c0_153] : memref<352x128xbf16, #tpu.memory_space<vmem>>, vector<32x128xbf16>
      tpu.vector_store %arg10[%c0_152, %c0_153], %174 {strides = array<i32>} : memref<352x128xbf16, #tpu.memory_space<vmem>>, vector<32x128xbf16>,
      %cst_154 = arith.constant 0.000000e+00 : bf16
      %176 = vector.broadcast %cst_154 : bf16 to vector<32x128xbf16>
      %c320 = arith.constant 320 : index
      %c0_155 = arith.constant 0 : index
      %177 = vector.load %arg10[%c320, %c0_155] : memref<352x128xbf16, #tpu.memory_space<vmem>>, vector<32x128xbf16>
      tpu.vector_store %arg10[%c320, %c0_155], %176 {strides = array<i32>} : memref<352x128xbf16, #tpu.memory_space<vmem>>, vector<32x128xbf16>,
      %cst_156 = arith.constant 0.000000e+00 : f32
      %178 = vector.broadcast %cst_156 : f32 to vector<128x128xf32>
      %c0_157 = arith.constant 0 : index
      %c0_158 = arith.constant 0 : index
      %c0_159 = arith.constant 0 : index
      %179 = vector.load %arg2[%c0_157, %c0_158, %c0_159] : memref<1x336x128xbf16, #tpu.memory_space<vmem>>, vector<1x128x128xbf16>
      %180 = vector.shape_cast %179 : vector<1x128x128xbf16> to vector<128x128xbf16>
      %c0_160 = arith.constant 0 : index
      %c0_161 = arith.constant 0 : index
      %c0_162 = arith.constant 0 : index
      %181 = vector.load %arg3[%c0_160, %c0_161, %c0_162] : memref<9x128x128xbf16, #tpu.memory_space<vmem>>, vector<1x128x128xbf16>
      %182 = vector.shape_cast %181 : vector<1x128x128xbf16> to vector<128x128xbf16>
      %cst_163 = arith.constant dense<0.000000e+00> : vector<128x128xf32>
      %183 = tpu.matmul %180, %182, %cst_163 {dimension_numbers = #tpu.dot_dimension_numbers<[1], [0], [0], [1], [0, 0, 1, 1], [], []>} : vector<128x128xbf16>, vector<128x128xbf16>, vector<128x128xf32> -> vector<128x128xf32>
      %184 = arith.addf %178, %183 : vector<128x128xf32>
      %c0_164 = arith.constant 0 : index
      %c1_165 = arith.constant 1 : index
      %c0_166 = arith.constant 0 : index
      %185 = vector.load %arg2[%c0_164, %c1_165, %c0_166] : memref<1x336x128xbf16, #tpu.memory_space<vmem>>, vector<1x128x128xbf16>
      %186 = vector.shape_cast %185 : vector<1x128x128xbf16> to vector<128x128xbf16>
      %c1_167 = arith.constant 1 : index
      %c0_168 = arith.constant 0 : index
      %c0_169 = arith.constant 0 : index
      %187 = vector.load %arg3[%c1_167, %c0_168, %c0_169] : memref<9x128x128xbf16, #tpu.memory_space<vmem>>, vector<1x128x128xbf16>
      %188 = vector.shape_cast %187 : vector<1x128x128xbf16> to vector<128x128xbf16>
      %cst_170 = arith.constant dense<0.000000e+00> : vector<128x128xf32>
      %189 = tpu.matmul %186, %188, %cst_170 {dimension_numbers = #tpu.dot_dimension_numbers<[1], [0], [0], [1], [0, 0, 1, 1], [], []>} : vector<128x128xbf16>, vector<128x128xbf16>, vector<128x128xf32> -> vector<128x128xf32>
      %190 = arith.addf %184, %189 : vector<128x128xf32>
      %c0_171 = arith.constant 0 : index
      %c2_172 = arith.constant 2 : index
      %c0_173 = arith.constant 0 : index
      %191 = vector.load %arg2[%c0_171, %c2_172, %c0_173] : memref<1x336x128xbf16, #tpu.memory_space<vmem>>, vector<1x128x128xbf16>
      %192 = vector.shape_cast %191 : vector<1x128x128xbf16> to vector<128x128xbf16>
      %c2_174 = arith.constant 2 : index
      %c0_175 = arith.constant 0 : index
      %c0_176 = arith.constant 0 : index
      %193 = vector.load %arg3[%c2_174, %c0_175, %c0_176] : memref<9x128x128xbf16, #tpu.memory_space<vmem>>, vector<1x128x128xbf16>
      %194 = vector.shape_cast %193 : vector<1x128x128xbf16> to vector<128x128xbf16>
      %cst_177 = arith.constant dense<0.000000e+00> : vector<128x128xf32>
      %195 = tpu.matmul %192, %194, %cst_177 {dimension_numbers = #tpu.dot_dimension_numbers<[1], [0], [0], [1], [0, 0, 1, 1], [], []>} : vector<128x128xbf16>, vector<128x128xbf16>, vector<128x128xf32> -> vector<128x128xf32>
      %196 = arith.addf %190, %195 : vector<128x128xf32>
      %c0_178 = arith.constant 0 : index
      %c18 = arith.constant 18 : index
      %c0_179 = arith.constant 0 : index
      %197 = vector.load %arg2[%c0_178, %c18, %c0_179] : memref<1x336x128xbf16, #tpu.memory_space<vmem>>, vector<1x128x128xbf16>
      %198 = vector.shape_cast %197 : vector<1x128x128xbf16> to vector<128x128xbf16>
      %c3_180 = arith.constant 3 : index
      %c0_181 = arith.constant 0 : index
      %c0_182 = arith.constant 0 : index
      %199 = vector.load %arg3[%c3_180, %c0_181, %c0_182] : memref<9x128x128xbf16, #tpu.memory_space<vmem>>, vector<1x128x128xbf16>
      %200 = vector.shape_cast %199 : vector<1x128x128xbf16> to vector<128x128xbf16>
      %cst_183 = arith.constant dense<0.000000e+00> : vector<128x128xf32>
      %201 = tpu.matmul %198, %200, %cst_183 {dimension_numbers = #tpu.dot_dimension_numbers<[1], [0], [0], [1], [0, 0, 1, 1], [], []>} : vector<128x128xbf16>, vector<128x128xbf16>, vector<128x128xf32> -> vector<128x128xf32>
      %202 = arith.addf %196, %201 : vector<128x128xf32>
      %c0_184 = arith.constant 0 : index
      %c19 = arith.constant 19 : index
      %c0_185 = arith.constant 0 : index
      %203 = vector.load %arg2[%c0_184, %c19, %c0_185] : memref<1x336x128xbf16, #tpu.memory_space<vmem>>, vector<1x128x128xbf16>
      %204 = vector.shape_cast %203 : vector<1x128x128xbf16> to vector<128x128xbf16>
      %c4_186 = arith.constant 4 : index
      %c0_187 = arith.constant 0 : index
      %c0_188 = arith.constant 0 : index
      %205 = vector.load %arg3[%c4_186, %c0_187, %c0_188] : memref<9x128x128xbf16, #tpu.memory_space<vmem>>, vector<1x128x128xbf16>
      %206 = vector.shape_cast %205 : vector<1x128x128xbf16> to vector<128x128xbf16>
      %cst_189 = arith.constant dense<0.000000e+00> : vector<128x128xf32>
      %207 = tpu.matmul %204, %206, %cst_189 {dimension_numbers = #tpu.dot_dimension_numbers<[1], [0], [0], [1], [0, 0, 1, 1], [], []>} : vector<128x128xbf16>, vector<128x128xbf16>, vector<128x128xf32> -> vector<128x128xf32>
      %208 = arith.addf %202, %207 : vector<128x128xf32>
      %c0_190 = arith.constant 0 : index
      %c20 = arith.constant 20 : index
      %c0_191 = arith.constant 0 : index
      %209 = vector.load %arg2[%c0_190, %c20, %c0_191] : memref<1x336x128xbf16, #tpu.memory_space<vmem>>, vector<1x128x128xbf16>
      %210 = vector.shape_cast %209 : vector<1x128x128xbf16> to vector<128x128xbf16>
      %c5_192 = arith.constant 5 : index
      %c0_193 = arith.constant 0 : index
      %c0_194 = arith.constant 0 : index
      %211 = vector.load %arg3[%c5_192, %c0_193, %c0_194] : memref<9x128x128xbf16, #tpu.memory_space<vmem>>, vector<1x128x128xbf16>
      %212 = vector.shape_cast %211 : vector<1x128x128xbf16> to vector<128x128xbf16>
      %cst_195 = arith.constant dense<0.000000e+00> : vector<128x128xf32>
      %213 = tpu.matmul %210, %212, %cst_195 {dimension_numbers = #tpu.dot_dimension_numbers<[1], [0], [0], [1], [0, 0, 1, 1], [], []>} : vector<128x128xbf16>, vector<128x128xbf16>, vector<128x128xf32> -> vector<128x128xf32>
      %214 = arith.addf %208, %213 : vector<128x128xf32>
      %c0_196 = arith.constant 0 : index
      %c36 = arith.constant 36 : index
      %c0_197 = arith.constant 0 : index
      %215 = vector.load %arg2[%c0_196, %c36, %c0_197] : memref<1x336x128xbf16, #tpu.memory_space<vmem>>, vector<1x128x128xbf16>
      %216 = vector.shape_cast %215 : vector<1x128x128xbf16> to vector<128x128xbf16>
      %c6_198 = arith.constant 6 : index
      %c0_199 = arith.constant 0 : index
      %c0_200 = arith.constant 0 : index
      %217 = vector.load %arg3[%c6_198, %c0_199, %c0_200] : memref<9x128x128xbf16, #tpu.memory_space<vmem>>, vector<1x128x128xbf16>
      %218 = vector.shape_cast %217 : vector<1x128x128xbf16> to vector<128x128xbf16>
      %cst_201 = arith.constant dense<0.000000e+00> : vector<128x128xf32>
      %219 = tpu.matmul %216, %218, %cst_201 {dimension_numbers = #tpu.dot_dimension_numbers<[1], [0], [0], [1], [0, 0, 1, 1], [], []>} : vector<128x128xbf16>, vector<128x128xbf16>, vector<128x128xf32> -> vector<128x128xf32>
      %220 = arith.addf %214, %219 : vector<128x128xf32>
      %c0_202 = arith.constant 0 : index
      %c37 = arith.constant 37 : index
      %c0_203 = arith.constant 0 : index
      %221 = vector.load %arg2[%c0_202, %c37, %c0_203] : memref<1x336x128xbf16, #tpu.memory_space<vmem>>, vector<1x128x128xbf16>
      %222 = vector.shape_cast %221 : vector<1x128x128xbf16> to vector<128x128xbf16>
      %c7_204 = arith.constant 7 : index
      %c0_205 = arith.constant 0 : index
      %c0_206 = arith.constant 0 : index
      %223 = vector.load %arg3[%c7_204, %c0_205, %c0_206] : memref<9x128x128xbf16, #tpu.memory_space<vmem>>, vector<1x128x128xbf16>
      %224 = vector.shape_cast %223 : vector<1x128x128xbf16> to vector<128x128xbf16>
      %cst_207 = arith.constant dense<0.000000e+00> : vector<128x128xf32>
      %225 = tpu.matmul %222, %224, %cst_207 {dimension_numbers = #tpu.dot_dimension_numbers<[1], [0], [0], [1], [0, 0, 1, 1], [], []>} : vector<128x128xbf16>, vector<128x128xbf16>, vector<128x128xf32> -> vector<128x128xf32>
      %226 = arith.addf %220, %225 : vector<128x128xf32>
      %c0_208 = arith.constant 0 : index
      %c38 = arith.constant 38 : index
      %c0_209 = arith.constant 0 : index
      %227 = vector.load %arg2[%c0_208, %c38, %c0_209] : memref<1x336x128xbf16, #tpu.memory_space<vmem>>, vector<1x128x128xbf16>
      %228 = vector.shape_cast %227 : vector<1x128x128xbf16> to vector<128x128xbf16>
      %c8_210 = arith.constant 8 : index
      %c0_211 = arith.constant 0 : index
      %c0_212 = arith.constant 0 : index
      %229 = vector.load %arg3[%c8_210, %c0_211, %c0_212] : memref<9x128x128xbf16, #tpu.memory_space<vmem>>, vector<1x128x128xbf16>
      %230 = vector.shape_cast %229 : vector<1x128x128xbf16> to vector<128x128xbf16>
      %cst_213 = arith.constant dense<0.000000e+00> : vector<128x128xf32>
      %231 = tpu.matmul %228, %230, %cst_213 {dimension_numbers = #tpu.dot_dimension_numbers<[1], [0], [0], [1], [0, 0, 1, 1], [], []>} : vector<128x128xbf16>, vector<128x128xbf16>, vector<128x128xf32> -> vector<128x128xf32>
      %232 = arith.addf %226, %231 : vector<128x128xf32>
      %c0_214 = arith.constant 0 : index
      %c0_215 = arith.constant 0 : index
      %233 = vector.load %arg4[%c0_214, %c0_215] : memref<1x128xf32, #tpu.memory_space<vmem>>, vector<1x128xf32>
      %234 = vector.broadcast %233 : vector<1x128xf32> to vector<128x128xf32>
      %235 = arith.addf %232, %234 : vector<128x128xf32>
      %cst_216 = arith.constant 0.000000e+00 : f32
      %236 = vector.broadcast %cst_216 : f32 to vector<128x128xf32>
      %237 = arith.maximumf %235, %236 : vector<128x128xf32>
      %c0_217 = arith.constant 0 : index
      %c0_218 = arith.constant 0 : index
      %238 = vector.load %arg8[%c0_217, %c0_218] : memref<288x1xf32, #tpu.memory_space<vmem>>, vector<128x1xf32>
      %239 = vector.broadcast %238 : vector<128x1xf32> to vector<128x128xf32>
      %240 = arith.mulf %237, %239 : vector<128x128xf32>
      %241 = arith.truncf %240 : vector<128x128xf32> to vector<128x128xbf16>
      %c32_219 = arith.constant 32 : index
      %c0_220 = arith.constant 0 : index
      %242 = vector.load %arg10[%c32_219, %c0_220] : memref<352x128xbf16, #tpu.memory_space<vmem>>, vector<128x128xbf16>
      tpu.vector_store %arg10[%c32_219, %c0_220], %241 {strides = array<i32>} : memref<352x128xbf16, #tpu.memory_space<vmem>>, vector<128x128xbf16>,
      %cst_221 = arith.constant 0.000000e+00 : f32
      %243 = vector.broadcast %cst_221 : f32 to vector<128x128xf32>
      %c0_222 = arith.constant 0 : index
      %c128_223 = arith.constant 128 : index
      %c0_224 = arith.constant 0 : index
      %244 = vector.load %arg2[%c0_222, %c128_223, %c0_224] : memref<1x336x128xbf16, #tpu.memory_space<vmem>>, vector<1x128x128xbf16>
      %245 = vector.shape_cast %244 : vector<1x128x128xbf16> to vector<128x128xbf16>
      %c0_225 = arith.constant 0 : index
      %c0_226 = arith.constant 0 : index
      %c0_227 = arith.constant 0 : index
      %246 = vector.load %arg3[%c0_225, %c0_226, %c0_227] : memref<9x128x128xbf16, #tpu.memory_space<vmem>>, vector<1x128x128xbf16>
      %247 = vector.shape_cast %246 : vector<1x128x128xbf16> to vector<128x128xbf16>
      %cst_228 = arith.constant dense<0.000000e+00> : vector<128x128xf32>
      %248 = tpu.matmul %245, %247, %cst_228 {dimension_numbers = #tpu.dot_dimension_numbers<[1], [0], [0], [1], [0, 0, 1, 1], [], []>} : vector<128x128xbf16>, vector<128x128xbf16>, vector<128x128xf32> -> vector<128x128xf32>
      %249 = arith.addf %243, %248 : vector<128x128xf32>
      %c0_229 = arith.constant 0 : index
      %c129 = arith.constant 129 : index
      %c0_230 = arith.constant 0 : index
      %250 = vector.load %arg2[%c0_229, %c129, %c0_230] : memref<1x336x128xbf16, #tpu.memory_space<vmem>>, vector<1x128x128xbf16>
      %251 = vector.shape_cast %250 : vector<1x128x128xbf16> to vector<128x128xbf16>
      %c1_231 = arith.constant 1 : index
      %c0_232 = arith.constant 0 : index
      %c0_233 = arith.constant 0 : index
      %252 = vector.load %arg3[%c1_231, %c0_232, %c0_233] : memref<9x128x128xbf16, #tpu.memory_space<vmem>>, vector<1x128x128xbf16>
      %253 = vector.shape_cast %252 : vector<1x128x128xbf16> to vector<128x128xbf16>
      %cst_234 = arith.constant dense<0.000000e+00> : vector<128x128xf32>
      %254 = tpu.matmul %251, %253, %cst_234 {dimension_numbers = #tpu.dot_dimension_numbers<[1], [0], [0], [1], [0, 0, 1, 1], [], []>} : vector<128x128xbf16>, vector<128x128xbf16>, vector<128x128xf32> -> vector<128x128xf32>
      %255 = arith.addf %249, %254 : vector<128x128xf32>
      %c0_235 = arith.constant 0 : index
      %c130 = arith.constant 130 : index
      %c0_236 = arith.constant 0 : index
      %256 = vector.load %arg2[%c0_235, %c130, %c0_236] : memref<1x336x128xbf16, #tpu.memory_space<vmem>>, vector<1x128x128xbf16>
      %257 = vector.shape_cast %256 : vector<1x128x128xbf16> to vector<128x128xbf16>
      %c2_237 = arith.constant 2 : index
      %c0_238 = arith.constant 0 : index
      %c0_239 = arith.constant 0 : index
      %258 = vector.load %arg3[%c2_237, %c0_238, %c0_239] : memref<9x128x128xbf16, #tpu.memory_space<vmem>>, vector<1x128x128xbf16>
      %259 = vector.shape_cast %258 : vector<1x128x128xbf16> to vector<128x128xbf16>
      %cst_240 = arith.constant dense<0.000000e+00> : vector<128x128xf32>
      %260 = tpu.matmul %257, %259, %cst_240 {dimension_numbers = #tpu.dot_dimension_numbers<[1], [0], [0], [1], [0, 0, 1, 1], [], []>} : vector<128x128xbf16>, vector<128x128xbf16>, vector<128x128xf32> -> vector<128x128xf32>
      %261 = arith.addf %255, %260 : vector<128x128xf32>
      %c0_241 = arith.constant 0 : index
      %c146 = arith.constant 146 : index
      %c0_242 = arith.constant 0 : index
      %262 = vector.load %arg2[%c0_241, %c146, %c0_242] : memref<1x336x128xbf16, #tpu.memory_space<vmem>>, vector<1x128x128xbf16>
      %263 = vector.shape_cast %262 : vector<1x128x128xbf16> to vector<128x128xbf16>
      %c3_243 = arith.constant 3 : index
      %c0_244 = arith.constant 0 : index
      %c0_245 = arith.constant 0 : index
      %264 = vector.load %arg3[%c3_243, %c0_244, %c0_245] : memref<9x128x128xbf16, #tpu.memory_space<vmem>>, vector<1x128x128xbf16>
      %265 = vector.shape_cast %264 : vector<1x128x128xbf16> to vector<128x128xbf16>
      %cst_246 = arith.constant dense<0.000000e+00> : vector<128x128xf32>
      %266 = tpu.matmul %263, %265, %cst_246 {dimension_numbers = #tpu.dot_dimension_numbers<[1], [0], [0], [1], [0, 0, 1, 1], [], []>} : vector<128x128xbf16>, vector<128x128xbf16>, vector<128x128xf32> -> vector<128x128xf32>
      %267 = arith.addf %261, %266 : vector<128x128xf32>
      %c0_247 = arith.constant 0 : index
      %c147 = arith.constant 147 : index
      %c0_248 = arith.constant 0 : index
      %268 = vector.load %arg2[%c0_247, %c147, %c0_248] : memref<1x336x128xbf16, #tpu.memory_space<vmem>>, vector<1x128x128xbf16>
      %269 = vector.shape_cast %268 : vector<1x128x128xbf16> to vector<128x128xbf16>
      %c4_249 = arith.constant 4 : index
      %c0_250 = arith.constant 0 : index
      %c0_251 = arith.constant 0 : index
      %270 = vector.load %arg3[%c4_249, %c0_250, %c0_251] : memref<9x128x128xbf16, #tpu.memory_space<vmem>>, vector<1x128x128xbf16>
      %271 = vector.shape_cast %270 : vector<1x128x128xbf16> to vector<128x128xbf16>
      %cst_252 = arith.constant dense<0.000000e+00> : vector<128x128xf32>
      %272 = tpu.matmul %269, %271, %cst_252 {dimension_numbers = #tpu.dot_dimension_numbers<[1], [0], [0], [1], [0, 0, 1, 1], [], []>} : vector<128x128xbf16>, vector<128x128xbf16>, vector<128x128xf32> -> vector<128x128xf32>
      %273 = arith.addf %267, %272 : vector<128x128xf32>
      %c0_253 = arith.constant 0 : index
      %c148 = arith.constant 148 : index
      %c0_254 = arith.constant 0 : index
      %274 = vector.load %arg2[%c0_253, %c148, %c0_254] : memref<1x336x128xbf16, #tpu.memory_space<vmem>>, vector<1x128x128xbf16>
      %275 = vector.shape_cast %274 : vector<1x128x128xbf16> to vector<128x128xbf16>
      %c5_255 = arith.constant 5 : index
      %c0_256 = arith.constant 0 : index
      %c0_257 = arith.constant 0 : index
      %276 = vector.load %arg3[%c5_255, %c0_256, %c0_257] : memref<9x128x128xbf16, #tpu.memory_space<vmem>>, vector<1x128x128xbf16>
      %277 = vector.shape_cast %276 : vector<1x128x128xbf16> to vector<128x128xbf16>
      %cst_258 = arith.constant dense<0.000000e+00> : vector<128x128xf32>
      %278 = tpu.matmul %275, %277, %cst_258 {dimension_numbers = #tpu.dot_dimension_numbers<[1], [0], [0], [1], [0, 0, 1, 1], [], []>} : vector<128x128xbf16>, vector<128x128xbf16>, vector<128x128xf32> -> vector<128x128xf32>
      %279 = arith.addf %273, %278 : vector<128x128xf32>
      %c0_259 = arith.constant 0 : index
      %c164 = arith.constant 164 : index
      %c0_260 = arith.constant 0 : index
      %280 = vector.load %arg2[%c0_259, %c164, %c0_260] : memref<1x336x128xbf16, #tpu.memory_space<vmem>>, vector<1x128x128xbf16>
      %281 = vector.shape_cast %280 : vector<1x128x128xbf16> to vector<128x128xbf16>
      %c6_261 = arith.constant 6 : index
      %c0_262 = arith.constant 0 : index
      %c0_263 = arith.constant 0 : index
      %282 = vector.load %arg3[%c6_261, %c0_262, %c0_263] : memref<9x128x128xbf16, #tpu.memory_space<vmem>>, vector<1x128x128xbf16>
      %283 = vector.shape_cast %282 : vector<1x128x128xbf16> to vector<128x128xbf16>
      %cst_264 = arith.constant dense<0.000000e+00> : vector<128x128xf32>
      %284 = tpu.matmul %281, %283, %cst_264 {dimension_numbers = #tpu.dot_dimension_numbers<[1], [0], [0], [1], [0, 0, 1, 1], [], []>} : vector<128x128xbf16>, vector<128x128xbf16>, vector<128x128xf32> -> vector<128x128xf32>
      %285 = arith.addf %279, %284 : vector<128x128xf32>
      %c0_265 = arith.constant 0 : index
      %c165 = arith.constant 165 : index
      %c0_266 = arith.constant 0 : index
      %286 = vector.load %arg2[%c0_265, %c165, %c0_266] : memref<1x336x128xbf16, #tpu.memory_space<vmem>>, vector<1x128x128xbf16>
      %287 = vector.shape_cast %286 : vector<1x128x128xbf16> to vector<128x128xbf16>
      %c7_267 = arith.constant 7 : index
      %c0_268 = arith.constant 0 : index
      %c0_269 = arith.constant 0 : index
      %288 = vector.load %arg3[%c7_267, %c0_268, %c0_269] : memref<9x128x128xbf16, #tpu.memory_space<vmem>>, vector<1x128x128xbf16>
      %289 = vector.shape_cast %288 : vector<1x128x128xbf16> to vector<128x128xbf16>
      %cst_270 = arith.constant dense<0.000000e+00> : vector<128x128xf32>
      %290 = tpu.matmul %287, %289, %cst_270 {dimension_numbers = #tpu.dot_dimension_numbers<[1], [0], [0], [1], [0, 0, 1, 1], [], []>} : vector<128x128xbf16>, vector<128x128xbf16>, vector<128x128xf32> -> vector<128x128xf32>
      %291 = arith.addf %285, %290 : vector<128x128xf32>
      %c0_271 = arith.constant 0 : index
      %c166 = arith.constant 166 : index
      %c0_272 = arith.constant 0 : index
      %292 = vector.load %arg2[%c0_271, %c166, %c0_272] : memref<1x336x128xbf16, #tpu.memory_space<vmem>>, vector<1x128x128xbf16>
      %293 = vector.shape_cast %292 : vector<1x128x128xbf16> to vector<128x128xbf16>
      %c8_273 = arith.constant 8 : index
      %c0_274 = arith.constant 0 : index
      %c0_275 = arith.constant 0 : index
      %294 = vector.load %arg3[%c8_273, %c0_274, %c0_275] : memref<9x128x128xbf16, #tpu.memory_space<vmem>>, vector<1x128x128xbf16>
      %295 = vector.shape_cast %294 : vector<1x128x128xbf16> to vector<128x128xbf16>
      %cst_276 = arith.constant dense<0.000000e+00> : vector<128x128xf32>
      %296 = tpu.matmul %293, %295, %cst_276 {dimension_numbers = #tpu.dot_dimension_numbers<[1], [0], [0], [1], [0, 0, 1, 1], [], []>} : vector<128x128xbf16>, vector<128x128xbf16>, vector<128x128xf32> -> vector<128x128xf32>
      %297 = arith.addf %291, %296 : vector<128x128xf32>
      %c0_277 = arith.constant 0 : index
      %c0_278 = arith.constant 0 : index
      %298 = vector.load %arg4[%c0_277, %c0_278] : memref<1x128xf32, #tpu.memory_space<vmem>>, vector<1x128xf32>
      %299 = vector.broadcast %298 : vector<1x128xf32> to vector<128x128xf32>
      %300 = arith.addf %297, %299 : vector<128x128xf32>
      %cst_279 = arith.constant 0.000000e+00 : f32
      %301 = vector.broadcast %cst_279 : f32 to vector<128x128xf32>
      %302 = arith.maximumf %300, %301 : vector<128x128xf32>
      %c128_280 = arith.constant 128 : index
      %c0_281 = arith.constant 0 : index
      %303 = vector.load %arg8[%c128_280, %c0_281] : memref<288x1xf32, #tpu.memory_space<vmem>>, vector<128x1xf32>
      %304 = vector.broadcast %303 : vector<128x1xf32> to vector<128x128xf32>
      %305 = arith.mulf %302, %304 : vector<128x128xf32>
      %306 = arith.truncf %305 : vector<128x128xf32> to vector<128x128xbf16>
      %c160_282 = arith.constant 160 : index
      %c0_283 = arith.constant 0 : index
      %307 = vector.load %arg10[%c160_282, %c0_283] : memref<352x128xbf16, #tpu.memory_space<vmem>>, vector<128x128xbf16>
      tpu.vector_store %arg10[%c160_282, %c0_283], %306 {strides = array<i32>} : memref<352x128xbf16, #tpu.memory_space<vmem>>, vector<128x128xbf16>,
      %cst_284 = arith.constant 0.000000e+00 : f32
      %308 = vector.broadcast %cst_284 : f32 to vector<32x128xf32>
      %c0_285 = arith.constant 0 : index
      %c256_286 = arith.constant 256 : index
      %c0_287 = arith.constant 0 : index
      %309 = vector.load %arg2[%c0_285, %c256_286, %c0_287] : memref<1x336x128xbf16, #tpu.memory_space<vmem>>, vector<1x32x128xbf16>
      %310 = vector.shape_cast %309 : vector<1x32x128xbf16> to vector<32x128xbf16>
      %c0_288 = arith.constant 0 : index
      %c0_289 = arith.constant 0 : index
      %c0_290 = arith.constant 0 : index
      %311 = vector.load %arg3[%c0_288, %c0_289, %c0_290] : memref<9x128x128xbf16, #tpu.memory_space<vmem>>, vector<1x128x128xbf16>
      %312 = vector.shape_cast %311 : vector<1x128x128xbf16> to vector<128x128xbf16>
      %cst_291 = arith.constant dense<0.000000e+00> : vector<32x128xf32>
      %313 = tpu.matmul %310, %312, %cst_291 {dimension_numbers = #tpu.dot_dimension_numbers<[1], [0], [0], [1], [0, 0, 1, 1], [], []>} : vector<32x128xbf16>, vector<128x128xbf16>, vector<32x128xf32> -> vector<32x128xf32>
      %314 = arith.addf %308, %313 : vector<32x128xf32>
      %c0_292 = arith.constant 0 : index
      %c257 = arith.constant 257 : index
      %c0_293 = arith.constant 0 : index
      %315 = vector.load %arg2[%c0_292, %c257, %c0_293] : memref<1x336x128xbf16, #tpu.memory_space<vmem>>, vector<1x32x128xbf16>
      %316 = vector.shape_cast %315 : vector<1x32x128xbf16> to vector<32x128xbf16>
      %c1_294 = arith.constant 1 : index
      %c0_295 = arith.constant 0 : index
      %c0_296 = arith.constant 0 : index
      %317 = vector.load %arg3[%c1_294, %c0_295, %c0_296] : memref<9x128x128xbf16, #tpu.memory_space<vmem>>, vector<1x128x128xbf16>
      %318 = vector.shape_cast %317 : vector<1x128x128xbf16> to vector<128x128xbf16>
      %cst_297 = arith.constant dense<0.000000e+00> : vector<32x128xf32>
      %319 = tpu.matmul %316, %318, %cst_297 {dimension_numbers = #tpu.dot_dimension_numbers<[1], [0], [0], [1], [0, 0, 1, 1], [], []>} : vector<32x128xbf16>, vector<128x128xbf16>, vector<32x128xf32> -> vector<32x128xf32>
      %320 = arith.addf %314, %319 : vector<32x128xf32>
      %c0_298 = arith.constant 0 : index
      %c258 = arith.constant 258 : index
      %c0_299 = arith.constant 0 : index
      %321 = vector.load %arg2[%c0_298, %c258, %c0_299] : memref<1x336x128xbf16, #tpu.memory_space<vmem>>, vector<1x32x128xbf16>
      %322 = vector.shape_cast %321 : vector<1x32x128xbf16> to vector<32x128xbf16>
      %c2_300 = arith.constant 2 : index
      %c0_301 = arith.constant 0 : index
      %c0_302 = arith.constant 0 : index
      %323 = vector.load %arg3[%c2_300, %c0_301, %c0_302] : memref<9x128x128xbf16, #tpu.memory_space<vmem>>, vector<1x128x128xbf16>
      %324 = vector.shape_cast %323 : vector<1x128x128xbf16> to vector<128x128xbf16>
      %cst_303 = arith.constant dense<0.000000e+00> : vector<32x128xf32>
      %325 = tpu.matmul %322, %324, %cst_303 {dimension_numbers = #tpu.dot_dimension_numbers<[1], [0], [0], [1], [0, 0, 1, 1], [], []>} : vector<32x128xbf16>, vector<128x128xbf16>, vector<32x128xf32> -> vector<32x128xf32>
      %326 = arith.addf %320, %325 : vector<32x128xf32>
      %c0_304 = arith.constant 0 : index
      %c274 = arith.constant 274 : index
      %c0_305 = arith.constant 0 : index
      %327 = vector.load %arg2[%c0_304, %c274, %c0_305] : memref<1x336x128xbf16, #tpu.memory_space<vmem>>, vector<1x32x128xbf16>
      %328 = vector.shape_cast %327 : vector<1x32x128xbf16> to vector<32x128xbf16>
      %c3_306 = arith.constant 3 : index
      %c0_307 = arith.constant 0 : index
      %c0_308 = arith.constant 0 : index
      %329 = vector.load %arg3[%c3_306, %c0_307, %c0_308] : memref<9x128x128xbf16, #tpu.memory_space<vmem>>, vector<1x128x128xbf16>
      %330 = vector.shape_cast %329 : vector<1x128x128xbf16> to vector<128x128xbf16>
      %cst_309 = arith.constant dense<0.000000e+00> : vector<32x128xf32>
      %331 = tpu.matmul %328, %330, %cst_309 {dimension_numbers = #tpu.dot_dimension_numbers<[1], [0], [0], [1], [0, 0, 1, 1], [], []>} : vector<32x128xbf16>, vector<128x128xbf16>, vector<32x128xf32> -> vector<32x128xf32>
      %332 = arith.addf %326, %331 : vector<32x128xf32>
      %c0_310 = arith.constant 0 : index
      %c275 = arith.constant 275 : index
      %c0_311 = arith.constant 0 : index
      %333 = vector.load %arg2[%c0_310, %c275, %c0_311] : memref<1x336x128xbf16, #tpu.memory_space<vmem>>, vector<1x32x128xbf16>
      %334 = vector.shape_cast %333 : vector<1x32x128xbf16> to vector<32x128xbf16>
      %c4_312 = arith.constant 4 : index
      %c0_313 = arith.constant 0 : index
      %c0_314 = arith.constant 0 : index
      %335 = vector.load %arg3[%c4_312, %c0_313, %c0_314] : memref<9x128x128xbf16, #tpu.memory_space<vmem>>, vector<1x128x128xbf16>
      %336 = vector.shape_cast %335 : vector<1x128x128xbf16> to vector<128x128xbf16>
      %cst_315 = arith.constant dense<0.000000e+00> : vector<32x128xf32>
      %337 = tpu.matmul %334, %336, %cst_315 {dimension_numbers = #tpu.dot_dimension_numbers<[1], [0], [0], [1], [0, 0, 1, 1], [], []>} : vector<32x128xbf16>, vector<128x128xbf16>, vector<32x128xf32> -> vector<32x128xf32>
      %338 = arith.addf %332, %337 : vector<32x128xf32>
      %c0_316 = arith.constant 0 : index
      %c276 = arith.constant 276 : index
      %c0_317 = arith.constant 0 : index
      %339 = vector.load %arg2[%c0_316, %c276, %c0_317] : memref<1x336x128xbf16, #tpu.memory_space<vmem>>, vector<1x32x128xbf16>
      %340 = vector.shape_cast %339 : vector<1x32x128xbf16> to vector<32x128xbf16>
      %c5_318 = arith.constant 5 : index
      %c0_319 = arith.constant 0 : index
      %c0_320 = arith.constant 0 : index
      %341 = vector.load %arg3[%c5_318, %c0_319, %c0_320] : memref<9x128x128xbf16, #tpu.memory_space<vmem>>, vector<1x128x128xbf16>
      %342 = vector.shape_cast %341 : vector<1x128x128xbf16> to vector<128x128xbf16>
      %cst_321 = arith.constant dense<0.000000e+00> : vector<32x128xf32>
      %343 = tpu.matmul %340, %342, %cst_321 {dimension_numbers = #tpu.dot_dimension_numbers<[1], [0], [0], [1], [0, 0, 1, 1], [], []>} : vector<32x128xbf16>, vector<128x128xbf16>, vector<32x128xf32> -> vector<32x128xf32>
      %344 = arith.addf %338, %343 : vector<32x128xf32>
      %c0_322 = arith.constant 0 : index
      %c292 = arith.constant 292 : index
      %c0_323 = arith.constant 0 : index
      %345 = vector.load %arg2[%c0_322, %c292, %c0_323] : memref<1x336x128xbf16, #tpu.memory_space<vmem>>, vector<1x32x128xbf16>
      %346 = vector.shape_cast %345 : vector<1x32x128xbf16> to vector<32x128xbf16>
      %c6_324 = arith.constant 6 : index
      %c0_325 = arith.constant 0 : index
      %c0_326 = arith.constant 0 : index
      %347 = vector.load %arg3[%c6_324, %c0_325, %c0_326] : memref<9x128x128xbf16, #tpu.memory_space<vmem>>, vector<1x128x128xbf16>
      %348 = vector.shape_cast %347 : vector<1x128x128xbf16> to vector<128x128xbf16>
      %cst_327 = arith.constant dense<0.000000e+00> : vector<32x128xf32>
      %349 = tpu.matmul %346, %348, %cst_327 {dimension_numbers = #tpu.dot_dimension_numbers<[1], [0], [0], [1], [0, 0, 1, 1], [], []>} : vector<32x128xbf16>, vector<128x128xbf16>, vector<32x128xf32> -> vector<32x128xf32>
      %350 = arith.addf %344, %349 : vector<32x128xf32>
      %c0_328 = arith.constant 0 : index
      %c293 = arith.constant 293 : index
      %c0_329 = arith.constant 0 : index
      %351 = vector.load %arg2[%c0_328, %c293, %c0_329] : memref<1x336x128xbf16, #tpu.memory_space<vmem>>, vector<1x32x128xbf16>
      %352 = vector.shape_cast %351 : vector<1x32x128xbf16> to vector<32x128xbf16>
      %c7_330 = arith.constant 7 : index
      %c0_331 = arith.constant 0 : index
      %c0_332 = arith.constant 0 : index
      %353 = vector.load %arg3[%c7_330, %c0_331, %c0_332] : memref<9x128x128xbf16, #tpu.memory_space<vmem>>, vector<1x128x128xbf16>
      %354 = vector.shape_cast %353 : vector<1x128x128xbf16> to vector<128x128xbf16>
      %cst_333 = arith.constant dense<0.000000e+00> : vector<32x128xf32>
      %355 = tpu.matmul %352, %354, %cst_333 {dimension_numbers = #tpu.dot_dimension_numbers<[1], [0], [0], [1], [0, 0, 1, 1], [], []>} : vector<32x128xbf16>, vector<128x128xbf16>, vector<32x128xf32> -> vector<32x128xf32>
      %356 = arith.addf %350, %355 : vector<32x128xf32>
      %c0_334 = arith.constant 0 : index
      %c294 = arith.constant 294 : index
      %c0_335 = arith.constant 0 : index
      %357 = vector.load %arg2[%c0_334, %c294, %c0_335] : memref<1x336x128xbf16, #tpu.memory_space<vmem>>, vector<1x32x128xbf16>
      %358 = vector.shape_cast %357 : vector<1x32x128xbf16> to vector<32x128xbf16>
      %c8_336 = arith.constant 8 : index
      %c0_337 = arith.constant 0 : index
      %c0_338 = arith.constant 0 : index
      %359 = vector.load %arg3[%c8_336, %c0_337, %c0_338] : memref<9x128x128xbf16, #tpu.memory_space<vmem>>, vector<1x128x128xbf16>
      %360 = vector.shape_cast %359 : vector<1x128x128xbf16> to vector<128x128xbf16>
      %cst_339 = arith.constant dense<0.000000e+00> : vector<32x128xf32>
      %361 = tpu.matmul %358, %360, %cst_339 {dimension_numbers = #tpu.dot_dimension_numbers<[1], [0], [0], [1], [0, 0, 1, 1], [], []>} : vector<32x128xbf16>, vector<128x128xbf16>, vector<32x128xf32> -> vector<32x128xf32>
      %362 = arith.addf %356, %361 : vector<32x128xf32>
      %c0_340 = arith.constant 0 : index
      %c0_341 = arith.constant 0 : index
      %363 = vector.load %arg4[%c0_340, %c0_341] : memref<1x128xf32, #tpu.memory_space<vmem>>, vector<1x128xf32>
      %364 = vector.broadcast %363 : vector<1x128xf32> to vector<32x128xf32>
      %365 = arith.addf %362, %364 : vector<32x128xf32>
      %cst_342 = arith.constant 0.000000e+00 : f32
      %366 = vector.broadcast %cst_342 : f32 to vector<32x128xf32>
      %367 = arith.maximumf %365, %366 : vector<32x128xf32>
      %c256_343 = arith.constant 256 : index
      %c0_344 = arith.constant 0 : index
      %368 = vector.load %arg8[%c256_343, %c0_344] : memref<288x1xf32, #tpu.memory_space<vmem>>, vector<32x1xf32>
      %369 = vector.broadcast %368 : vector<32x1xf32> to vector<32x128xf32>
      %370 = arith.mulf %367, %369 : vector<32x128xf32>
      %371 = arith.truncf %370 : vector<32x128xf32> to vector<32x128xbf16>
      %c288_345 = arith.constant 288 : index
      %c0_346 = arith.constant 0 : index
      %372 = vector.load %arg10[%c288_345, %c0_346] : memref<352x128xbf16, #tpu.memory_space<vmem>>, vector<32x128xbf16>
      tpu.vector_store %arg10[%c288_345, %c0_346], %371 {strides = array<i32>} : memref<352x128xbf16, #tpu.memory_space<vmem>>, vector<32x128xbf16>,
    } else {
    }
    %cst = arith.constant 0.000000e+00 : f32
    %3 = vector.broadcast %cst : f32 to vector<128x128xf32>
    %c13 = arith.constant 13 : index
    %c0 = arith.constant 0 : index
    %4 = vector.load %arg10[%c13, %c0] : memref<352x128xbf16, #tpu.memory_space<vmem>>, vector<128x128xbf16>
    %c0_1 = arith.constant 0 : index
    %c0_2 = arith.constant 0 : index
    %c0_3 = arith.constant 0 : index
    %5 = vector.load %arg5[%c0_1, %c0_2, %c0_3] : memref<9x128x128xbf16, #tpu.memory_space<vmem>>, vector<1x128x128xbf16>
    %6 = vector.shape_cast %5 : vector<1x128x128xbf16> to vector<128x128xbf16>
    %cst_4 = arith.constant dense<0.000000e+00> : vector<128x128xf32>
    %7 = tpu.matmul %4, %6, %cst_4 {dimension_numbers = #tpu.dot_dimension_numbers<[1], [0], [0], [1], [0, 0, 1, 1], [], []>} : vector<128x128xbf16>, vector<128x128xbf16>, vector<128x128xf32> -> vector<128x128xf32>
    %8 = arith.addf %3, %7 : vector<128x128xf32>
    %c14 = arith.constant 14 : index
    %c0_5 = arith.constant 0 : index
    %9 = vector.load %arg10[%c14, %c0_5] : memref<352x128xbf16, #tpu.memory_space<vmem>>, vector<128x128xbf16>
    %c1 = arith.constant 1 : index
    %c0_6 = arith.constant 0 : index
    %c0_7 = arith.constant 0 : index
    %10 = vector.load %arg5[%c1, %c0_6, %c0_7] : memref<9x128x128xbf16, #tpu.memory_space<vmem>>, vector<1x128x128xbf16>
    %11 = vector.shape_cast %10 : vector<1x128x128xbf16> to vector<128x128xbf16>
    %cst_8 = arith.constant dense<0.000000e+00> : vector<128x128xf32>
    %12 = tpu.matmul %9, %11, %cst_8 {dimension_numbers = #tpu.dot_dimension_numbers<[1], [0], [0], [1], [0, 0, 1, 1], [], []>} : vector<128x128xbf16>, vector<128x128xbf16>, vector<128x128xf32> -> vector<128x128xf32>
    %13 = arith.addf %8, %12 : vector<128x128xf32>
    %c15 = arith.constant 15 : index
    %c0_9 = arith.constant 0 : index
    %14 = vector.load %arg10[%c15, %c0_9] : memref<352x128xbf16, #tpu.memory_space<vmem>>, vector<128x128xbf16>
    %c2 = arith.constant 2 : index
    %c0_10 = arith.constant 0 : index
    %c0_11 = arith.constant 0 : index
    %15 = vector.load %arg5[%c2, %c0_10, %c0_11] : memref<9x128x128xbf16, #tpu.memory_space<vmem>>, vector<1x128x128xbf16>
    %16 = vector.shape_cast %15 : vector<1x128x128xbf16> to vector<128x128xbf16>
    %cst_12 = arith.constant dense<0.000000e+00> : vector<128x128xf32>
    %17 = tpu.matmul %14, %16, %cst_12 {dimension_numbers = #tpu.dot_dimension_numbers<[1], [0], [0], [1], [0, 0, 1, 1], [], []>} : vector<128x128xbf16>, vector<128x128xbf16>, vector<128x128xf32> -> vector<128x128xf32>
    %18 = arith.addf %13, %17 : vector<128x128xf32>
    %c31 = arith.constant 31 : index
    %c0_13 = arith.constant 0 : index
    %19 = vector.load %arg10[%c31, %c0_13] : memref<352x128xbf16, #tpu.memory_space<vmem>>, vector<128x128xbf16>
    %c3 = arith.constant 3 : index
    %c0_14 = arith.constant 0 : index
    %c0_15 = arith.constant 0 : index
    %20 = vector.load %arg5[%c3, %c0_14, %c0_15] : memref<9x128x128xbf16, #tpu.memory_space<vmem>>, vector<1x128x128xbf16>
    %21 = vector.shape_cast %20 : vector<1x128x128xbf16> to vector<128x128xbf16>
    %cst_16 = arith.constant dense<0.000000e+00> : vector<128x128xf32>
    %22 = tpu.matmul %19, %21, %cst_16 {dimension_numbers = #tpu.dot_dimension_numbers<[1], [0], [0], [1], [0, 0, 1, 1], [], []>} : vector<128x128xbf16>, vector<128x128xbf16>, vector<128x128xf32> -> vector<128x128xf32>
    %23 = arith.addf %18, %22 : vector<128x128xf32>
    %c32 = arith.constant 32 : index
    %c0_17 = arith.constant 0 : index
    %24 = vector.load %arg10[%c32, %c0_17] : memref<352x128xbf16, #tpu.memory_space<vmem>>, vector<128x128xbf16>
    %c4 = arith.constant 4 : index
    %c0_18 = arith.constant 0 : index
    %c0_19 = arith.constant 0 : index
    %25 = vector.load %arg5[%c4, %c0_18, %c0_19] : memref<9x128x128xbf16, #tpu.memory_space<vmem>>, vector<1x128x128xbf16>
    %26 = vector.shape_cast %25 : vector<1x128x128xbf16> to vector<128x128xbf16>
    %cst_20 = arith.constant dense<0.000000e+00> : vector<128x128xf32>
    %27 = tpu.matmul %24, %26, %cst_20 {dimension_numbers = #tpu.dot_dimension_numbers<[1], [0], [0], [1], [0, 0, 1, 1], [], []>} : vector<128x128xbf16>, vector<128x128xbf16>, vector<128x128xf32> -> vector<128x128xf32>
    %28 = arith.addf %23, %27 : vector<128x128xf32>
    %c33 = arith.constant 33 : index
    %c0_21 = arith.constant 0 : index
    %29 = vector.load %arg10[%c33, %c0_21] : memref<352x128xbf16, #tpu.memory_space<vmem>>, vector<128x128xbf16>
    %c5 = arith.constant 5 : index
    %c0_22 = arith.constant 0 : index
    %c0_23 = arith.constant 0 : index
    %30 = vector.load %arg5[%c5, %c0_22, %c0_23] : memref<9x128x128xbf16, #tpu.memory_space<vmem>>, vector<1x128x128xbf16>
    %31 = vector.shape_cast %30 : vector<1x128x128xbf16> to vector<128x128xbf16>
    %cst_24 = arith.constant dense<0.000000e+00> : vector<128x128xf32>
    %32 = tpu.matmul %29, %31, %cst_24 {dimension_numbers = #tpu.dot_dimension_numbers<[1], [0], [0], [1], [0, 0, 1, 1], [], []>} : vector<128x128xbf16>, vector<128x128xbf16>, vector<128x128xf32> -> vector<128x128xf32>
    %33 = arith.addf %28, %32 : vector<128x128xf32>
    %c49 = arith.constant 49 : index
    %c0_25 = arith.constant 0 : index
    %34 = vector.load %arg10[%c49, %c0_25] : memref<352x128xbf16, #tpu.memory_space<vmem>>, vector<128x128xbf16>
    %c6 = arith.constant 6 : index
    %c0_26 = arith.constant 0 : index
    %c0_27 = arith.constant 0 : index
    %35 = vector.load %arg5[%c6, %c0_26, %c0_27] : memref<9x128x128xbf16, #tpu.memory_space<vmem>>, vector<1x128x128xbf16>
    %36 = vector.shape_cast %35 : vector<1x128x128xbf16> to vector<128x128xbf16>
    %cst_28 = arith.constant dense<0.000000e+00> : vector<128x128xf32>
    %37 = tpu.matmul %34, %36, %cst_28 {dimension_numbers = #tpu.dot_dimension_numbers<[1], [0], [0], [1], [0, 0, 1, 1], [], []>} : vector<128x128xbf16>, vector<128x128xbf16>, vector<128x128xf32> -> vector<128x128xf32>
    %38 = arith.addf %33, %37 : vector<128x128xf32>
    %c50 = arith.constant 50 : index
    %c0_29 = arith.constant 0 : index
    %39 = vector.load %arg10[%c50, %c0_29] : memref<352x128xbf16, #tpu.memory_space<vmem>>, vector<128x128xbf16>
    %c7 = arith.constant 7 : index
    %c0_30 = arith.constant 0 : index
    %c0_31 = arith.constant 0 : index
    %40 = vector.load %arg5[%c7, %c0_30, %c0_31] : memref<9x128x128xbf16, #tpu.memory_space<vmem>>, vector<1x128x128xbf16>
    %41 = vector.shape_cast %40 : vector<1x128x128xbf16> to vector<128x128xbf16>
    %cst_32 = arith.constant dense<0.000000e+00> : vector<128x128xf32>
    %42 = tpu.matmul %39, %41, %cst_32 {dimension_numbers = #tpu.dot_dimension_numbers<[1], [0], [0], [1], [0, 0, 1, 1], [], []>} : vector<128x128xbf16>, vector<128x128xbf16>, vector<128x128xf32> -> vector<128x128xf32>
    %43 = arith.addf %38, %42 : vector<128x128xf32>
    %c51 = arith.constant 51 : index
    %c0_33 = arith.constant 0 : index
    %44 = vector.load %arg10[%c51, %c0_33] : memref<352x128xbf16, #tpu.memory_space<vmem>>, vector<128x128xbf16>
    %c8 = arith.constant 8 : index
    %c0_34 = arith.constant 0 : index
    %c0_35 = arith.constant 0 : index
    %45 = vector.load %arg5[%c8, %c0_34, %c0_35] : memref<9x128x128xbf16, #tpu.memory_space<vmem>>, vector<1x128x128xbf16>
    %46 = vector.shape_cast %45 : vector<1x128x128xbf16> to vector<128x128xbf16>
    %cst_36 = arith.constant dense<0.000000e+00> : vector<128x128xf32>
    %47 = tpu.matmul %44, %46, %cst_36 {dimension_numbers = #tpu.dot_dimension_numbers<[1], [0], [0], [1], [0, 0, 1, 1], [], []>} : vector<128x128xbf16>, vector<128x128xbf16>, vector<128x128xf32> -> vector<128x128xf32>
    %48 = arith.addf %43, %47 : vector<128x128xf32>
    %c0_37 = arith.constant 0 : index
    %c0_38 = arith.constant 0 : index
    %49 = vector.load %arg6[%c0_37, %c0_38] : memref<1x128xf32, #tpu.memory_space<vmem>>, vector<1x128xf32>
    %50 = vector.broadcast %49 : vector<1x128xf32> to vector<128x128xf32>
    %51 = arith.mulf %48, %50 : vector<128x128xf32>
    %c0_39 = arith.constant 0 : index
    %c0_40 = arith.constant 0 : index
    %52 = vector.load %arg7[%c0_39, %c0_40] : memref<1x128xf32, #tpu.memory_space<vmem>>, vector<1x128xf32>
    %53 = vector.broadcast %52 : vector<1x128xf32> to vector<128x128xf32>
    %54 = arith.addf %51, %53 : vector<128x128xf32>
    %cst_41 = arith.constant 0.000000e+00 : f32
    %55 = vector.broadcast %cst_41 : f32 to vector<128x128xf32>
    %56 = arith.maximumf %54, %55 : vector<128x128xf32>
    %c0_42 = arith.constant 0 : index
    %c0_43 = arith.constant 0 : index
    %c0_44 = arith.constant 0 : index
    %57 = vector.load %arg9[%c0_42, %c0_43, %c0_44] : memref<1x288x128xf32, #tpu.memory_space<vmem>>, vector<1x128x128xf32>
    %58 = vector.shape_cast %57 : vector<1x128x128xf32> to vector<128x128xf32>
    %59 = vector.shape_cast %56 : vector<128x128xf32> to vector<1x128x128xf32>
    tpu.vector_store %arg9[%c0_42, %c0_43, %c0_44], %59 {strides = array<i32>} : memref<1x288x128xf32, #tpu.memory_space<vmem>>, vector<1x128x128xf32>,
    %cst_45 = arith.constant 0.000000e+00 : f32
    %60 = vector.broadcast %cst_45 : f32 to vector<128x128xf32>
    %c141 = arith.constant 141 : index
    %c0_46 = arith.constant 0 : index
    %61 = vector.load %arg10[%c141, %c0_46] : memref<352x128xbf16, #tpu.memory_space<vmem>>, vector<128x128xbf16>
    %c0_47 = arith.constant 0 : index
    %c0_48 = arith.constant 0 : index
    %c0_49 = arith.constant 0 : index
    %62 = vector.load %arg5[%c0_47, %c0_48, %c0_49] : memref<9x128x128xbf16, #tpu.memory_space<vmem>>, vector<1x128x128xbf16>
    %63 = vector.shape_cast %62 : vector<1x128x128xbf16> to vector<128x128xbf16>
    %cst_50 = arith.constant dense<0.000000e+00> : vector<128x128xf32>
    %64 = tpu.matmul %61, %63, %cst_50 {dimension_numbers = #tpu.dot_dimension_numbers<[1], [0], [0], [1], [0, 0, 1, 1], [], []>} : vector<128x128xbf16>, vector<128x128xbf16>, vector<128x128xf32> -> vector<128x128xf32>
    %65 = arith.addf %60, %64 : vector<128x128xf32>
    %c142 = arith.constant 142 : index
    %c0_51 = arith.constant 0 : index
    %66 = vector.load %arg10[%c142, %c0_51] : memref<352x128xbf16, #tpu.memory_space<vmem>>, vector<128x128xbf16>
    %c1_52 = arith.constant 1 : index
    %c0_53 = arith.constant 0 : index
    %c0_54 = arith.constant 0 : index
    %67 = vector.load %arg5[%c1_52, %c0_53, %c0_54] : memref<9x128x128xbf16, #tpu.memory_space<vmem>>, vector<1x128x128xbf16>
    %68 = vector.shape_cast %67 : vector<1x128x128xbf16> to vector<128x128xbf16>
    %cst_55 = arith.constant dense<0.000000e+00> : vector<128x128xf32>
    %69 = tpu.matmul %66, %68, %cst_55 {dimension_numbers = #tpu.dot_dimension_numbers<[1], [0], [0], [1], [0, 0, 1, 1], [], []>} : vector<128x128xbf16>, vector<128x128xbf16>, vector<128x128xf32> -> vector<128x128xf32>
    %70 = arith.addf %65, %69 : vector<128x128xf32>
    %c143 = arith.constant 143 : index
    %c0_56 = arith.constant 0 : index
    %71 = vector.load %arg10[%c143, %c0_56] : memref<352x128xbf16, #tpu.memory_space<vmem>>, vector<128x128xbf16>
    %c2_57 = arith.constant 2 : index
    %c0_58 = arith.constant 0 : index
    %c0_59 = arith.constant 0 : index
    %72 = vector.load %arg5[%c2_57, %c0_58, %c0_59] : memref<9x128x128xbf16, #tpu.memory_space<vmem>>, vector<1x128x128xbf16>
    %73 = vector.shape_cast %72 : vector<1x128x128xbf16> to vector<128x128xbf16>
    %cst_60 = arith.constant dense<0.000000e+00> : vector<128x128xf32>
    %74 = tpu.matmul %71, %73, %cst_60 {dimension_numbers = #tpu.dot_dimension_numbers<[1], [0], [0], [1], [0, 0, 1, 1], [], []>} : vector<128x128xbf16>, vector<128x128xbf16>, vector<128x128xf32> -> vector<128x128xf32>
    %75 = arith.addf %70, %74 : vector<128x128xf32>
    %c159 = arith.constant 159 : index
    %c0_61 = arith.constant 0 : index
    %76 = vector.load %arg10[%c159, %c0_61] : memref<352x128xbf16, #tpu.memory_space<vmem>>, vector<128x128xbf16>
    %c3_62 = arith.constant 3 : index
    %c0_63 = arith.constant 0 : index
    %c0_64 = arith.constant 0 : index
    %77 = vector.load %arg5[%c3_62, %c0_63, %c0_64] : memref<9x128x128xbf16, #tpu.memory_space<vmem>>, vector<1x128x128xbf16>
    %78 = vector.shape_cast %77 : vector<1x128x128xbf16> to vector<128x128xbf16>
    %cst_65 = arith.constant dense<0.000000e+00> : vector<128x128xf32>
    %79 = tpu.matmul %76, %78, %cst_65 {dimension_numbers = #tpu.dot_dimension_numbers<[1], [0], [0], [1], [0, 0, 1, 1], [], []>} : vector<128x128xbf16>, vector<128x128xbf16>, vector<128x128xf32> -> vector<128x128xf32>
    %80 = arith.addf %75, %79 : vector<128x128xf32>
    %c160 = arith.constant 160 : index
    %c0_66 = arith.constant 0 : index
    %81 = vector.load %arg10[%c160, %c0_66] : memref<352x128xbf16, #tpu.memory_space<vmem>>, vector<128x128xbf16>
    %c4_67 = arith.constant 4 : index
    %c0_68 = arith.constant 0 : index
    %c0_69 = arith.constant 0 : index
    %82 = vector.load %arg5[%c4_67, %c0_68, %c0_69] : memref<9x128x128xbf16, #tpu.memory_space<vmem>>, vector<1x128x128xbf16>
    %83 = vector.shape_cast %82 : vector<1x128x128xbf16> to vector<128x128xbf16>
    %cst_70 = arith.constant dense<0.000000e+00> : vector<128x128xf32>
    %84 = tpu.matmul %81, %83, %cst_70 {dimension_numbers = #tpu.dot_dimension_numbers<[1], [0], [0], [1], [0, 0, 1, 1], [], []>} : vector<128x128xbf16>, vector<128x128xbf16>, vector<128x128xf32> -> vector<128x128xf32>
    %85 = arith.addf %80, %84 : vector<128x128xf32>
    %c161 = arith.constant 161 : index
    %c0_71 = arith.constant 0 : index
    %86 = vector.load %arg10[%c161, %c0_71] : memref<352x128xbf16, #tpu.memory_space<vmem>>, vector<128x128xbf16>
    %c5_72 = arith.constant 5 : index
    %c0_73 = arith.constant 0 : index
    %c0_74 = arith.constant 0 : index
    %87 = vector.load %arg5[%c5_72, %c0_73, %c0_74] : memref<9x128x128xbf16, #tpu.memory_space<vmem>>, vector<1x128x128xbf16>
    %88 = vector.shape_cast %87 : vector<1x128x128xbf16> to vector<128x128xbf16>
    %cst_75 = arith.constant dense<0.000000e+00> : vector<128x128xf32>
    %89 = tpu.matmul %86, %88, %cst_75 {dimension_numbers = #tpu.dot_dimension_numbers<[1], [0], [0], [1], [0, 0, 1, 1], [], []>} : vector<128x128xbf16>, vector<128x128xbf16>, vector<128x128xf32> -> vector<128x128xf32>
    %90 = arith.addf %85, %89 : vector<128x128xf32>
    %c177 = arith.constant 177 : index
    %c0_76 = arith.constant 0 : index
    %91 = vector.load %arg10[%c177, %c0_76] : memref<352x128xbf16, #tpu.memory_space<vmem>>, vector<128x128xbf16>
    %c6_77 = arith.constant 6 : index
    %c0_78 = arith.constant 0 : index
    %c0_79 = arith.constant 0 : index
    %92 = vector.load %arg5[%c6_77, %c0_78, %c0_79] : memref<9x128x128xbf16, #tpu.memory_space<vmem>>, vector<1x128x128xbf16>
    %93 = vector.shape_cast %92 : vector<1x128x128xbf16> to vector<128x128xbf16>
    %cst_80 = arith.constant dense<0.000000e+00> : vector<128x128xf32>
    %94 = tpu.matmul %91, %93, %cst_80 {dimension_numbers = #tpu.dot_dimension_numbers<[1], [0], [0], [1], [0, 0, 1, 1], [], []>} : vector<128x128xbf16>, vector<128x128xbf16>, vector<128x128xf32> -> vector<128x128xf32>
    %95 = arith.addf %90, %94 : vector<128x128xf32>
    %c178 = arith.constant 178 : index
    %c0_81 = arith.constant 0 : index
    %96 = vector.load %arg10[%c178, %c0_81] : memref<352x128xbf16, #tpu.memory_space<vmem>>, vector<128x128xbf16>
    %c7_82 = arith.constant 7 : index
    %c0_83 = arith.constant 0 : index
    %c0_84 = arith.constant 0 : index
    %97 = vector.load %arg5[%c7_82, %c0_83, %c0_84] : memref<9x128x128xbf16, #tpu.memory_space<vmem>>, vector<1x128x128xbf16>
    %98 = vector.shape_cast %97 : vector<1x128x128xbf16> to vector<128x128xbf16>
    %cst_85 = arith.constant dense<0.000000e+00> : vector<128x128xf32>
    %99 = tpu.matmul %96, %98, %cst_85 {dimension_numbers = #tpu.dot_dimension_numbers<[1], [0], [0], [1], [0, 0, 1, 1], [], []>} : vector<128x128xbf16>, vector<128x128xbf16>, vector<128x128xf32> -> vector<128x128xf32>
    %100 = arith.addf %95, %99 : vector<128x128xf32>
    %c179 = arith.constant 179 : index
    %c0_86 = arith.constant 0 : index
    %101 = vector.load %arg10[%c179, %c0_86] : memref<352x128xbf16, #tpu.memory_space<vmem>>, vector<128x128xbf16>
    %c8_87 = arith.constant 8 : index
    %c0_88 = arith.constant 0 : index
    %c0_89 = arith.constant 0 : index
    %102 = vector.load %arg5[%c8_87, %c0_88, %c0_89] : memref<9x128x128xbf16, #tpu.memory_space<vmem>>, vector<1x128x128xbf16>
    %103 = vector.shape_cast %102 : vector<1x128x128xbf16> to vector<128x128xbf16>
    %cst_90 = arith.constant dense<0.000000e+00> : vector<128x128xf32>
    %104 = tpu.matmul %101, %103, %cst_90 {dimension_numbers = #tpu.dot_dimension_numbers<[1], [0], [0], [1], [0, 0, 1, 1], [], []>} : vector<128x128xbf16>, vector<128x128xbf16>, vector<128x128xf32> -> vector<128x128xf32>
    %105 = arith.addf %100, %104 : vector<128x128xf32>
    %c0_91 = arith.constant 0 : index
    %c0_92 = arith.constant 0 : index
    %106 = vector.load %arg6[%c0_91, %c0_92] : memref<1x128xf32, #tpu.memory_space<vmem>>, vector<1x128xf32>
    %107 = vector.broadcast %106 : vector<1x128xf32> to vector<128x128xf32>
    %108 = arith.mulf %105, %107 : vector<128x128xf32>
    %c0_93 = arith.constant 0 : index
    %c0_94 = arith.constant 0 : index
    %109 = vector.load %arg7[%c0_93, %c0_94] : memref<1x128xf32, #tpu.memory_space<vmem>>, vector<1x128xf32>
    %110 = vector.broadcast %109 : vector<1x128xf32> to vector<128x128xf32>
    %111 = arith.addf %108, %110 : vector<128x128xf32>
    %cst_95 = arith.constant 0.000000e+00 : f32
    %112 = vector.broadcast %cst_95 : f32 to vector<128x128xf32>
    %113 = arith.maximumf %111, %112 : vector<128x128xf32>
    %c0_96 = arith.constant 0 : index
    %c128 = arith.constant 128 : index
    %c0_97 = arith.constant 0 : index
    %114 = vector.load %arg9[%c0_96, %c128, %c0_97] : memref<1x288x128xf32, #tpu.memory_space<vmem>>, vector<1x128x128xf32>
    %115 = vector.shape_cast %114 : vector<1x128x128xf32> to vector<128x128xf32>
    %116 = vector.shape_cast %113 : vector<128x128xf32> to vector<1x128x128xf32>
    tpu.vector_store %arg9[%c0_96, %c128, %c0_97], %116 {strides = array<i32>} : memref<1x288x128xf32, #tpu.memory_space<vmem>>, vector<1x128x128xf32>,
    %cst_98 = arith.constant 0.000000e+00 : f32
    %117 = vector.broadcast %cst_98 : f32 to vector<32x128xf32>
    %c269 = arith.constant 269 : index
    %c0_99 = arith.constant 0 : index
    %118 = vector.load %arg10[%c269, %c0_99] : memref<352x128xbf16, #tpu.memory_space<vmem>>, vector<32x128xbf16>
    %c0_100 = arith.constant 0 : index
    %c0_101 = arith.constant 0 : index
    %c0_102 = arith.constant 0 : index
    %119 = vector.load %arg5[%c0_100, %c0_101, %c0_102] : memref<9x128x128xbf16, #tpu.memory_space<vmem>>, vector<1x128x128xbf16>
    %120 = vector.shape_cast %119 : vector<1x128x128xbf16> to vector<128x128xbf16>
    %cst_103 = arith.constant dense<0.000000e+00> : vector<32x128xf32>
    %121 = tpu.matmul %118, %120, %cst_103 {dimension_numbers = #tpu.dot_dimension_numbers<[1], [0], [0], [1], [0, 0, 1, 1], [], []>} : vector<32x128xbf16>, vector<128x128xbf16>, vector<32x128xf32> -> vector<32x128xf32>
    %122 = arith.addf %117, %121 : vector<32x128xf32>
    %c270 = arith.constant 270 : index
    %c0_104 = arith.constant 0 : index
    %123 = vector.load %arg10[%c270, %c0_104] : memref<352x128xbf16, #tpu.memory_space<vmem>>, vector<32x128xbf16>
    %c1_105 = arith.constant 1 : index
    %c0_106 = arith.constant 0 : index
    %c0_107 = arith.constant 0 : index
    %124 = vector.load %arg5[%c1_105, %c0_106, %c0_107] : memref<9x128x128xbf16, #tpu.memory_space<vmem>>, vector<1x128x128xbf16>
    %125 = vector.shape_cast %124 : vector<1x128x128xbf16> to vector<128x128xbf16>
    %cst_108 = arith.constant dense<0.000000e+00> : vector<32x128xf32>
    %126 = tpu.matmul %123, %125, %cst_108 {dimension_numbers = #tpu.dot_dimension_numbers<[1], [0], [0], [1], [0, 0, 1, 1], [], []>} : vector<32x128xbf16>, vector<128x128xbf16>, vector<32x128xf32> -> vector<32x128xf32>
    %127 = arith.addf %122, %126 : vector<32x128xf32>
    %c271 = arith.constant 271 : index
    %c0_109 = arith.constant 0 : index
    %128 = vector.load %arg10[%c271, %c0_109] : memref<352x128xbf16, #tpu.memory_space<vmem>>, vector<32x128xbf16>
    %c2_110 = arith.constant 2 : index
    %c0_111 = arith.constant 0 : index
    %c0_112 = arith.constant 0 : index
    %129 = vector.load %arg5[%c2_110, %c0_111, %c0_112] : memref<9x128x128xbf16, #tpu.memory_space<vmem>>, vector<1x128x128xbf16>
    %130 = vector.shape_cast %129 : vector<1x128x128xbf16> to vector<128x128xbf16>
    %cst_113 = arith.constant dense<0.000000e+00> : vector<32x128xf32>
    %131 = tpu.matmul %128, %130, %cst_113 {dimension_numbers = #tpu.dot_dimension_numbers<[1], [0], [0], [1], [0, 0, 1, 1], [], []>} : vector<32x128xbf16>, vector<128x128xbf16>, vector<32x128xf32> -> vector<32x128xf32>
    %132 = arith.addf %127, %131 : vector<32x128xf32>
    %c287 = arith.constant 287 : index
    %c0_114 = arith.constant 0 : index
    %133 = vector.load %arg10[%c287, %c0_114] : memref<352x128xbf16, #tpu.memory_space<vmem>>, vector<32x128xbf16>
    %c3_115 = arith.constant 3 : index
    %c0_116 = arith.constant 0 : index
    %c0_117 = arith.constant 0 : index
    %134 = vector.load %arg5[%c3_115, %c0_116, %c0_117] : memref<9x128x128xbf16, #tpu.memory_space<vmem>>, vector<1x128x128xbf16>
    %135 = vector.shape_cast %134 : vector<1x128x128xbf16> to vector<128x128xbf16>
    %cst_118 = arith.constant dense<0.000000e+00> : vector<32x128xf32>
    %136 = tpu.matmul %133, %135, %cst_118 {dimension_numbers = #tpu.dot_dimension_numbers<[1], [0], [0], [1], [0, 0, 1, 1], [], []>} : vector<32x128xbf16>, vector<128x128xbf16>, vector<32x128xf32> -> vector<32x128xf32>
    %137 = arith.addf %132, %136 : vector<32x128xf32>
    %c288 = arith.constant 288 : index
    %c0_119 = arith.constant 0 : index
    %138 = vector.load %arg10[%c288, %c0_119] : memref<352x128xbf16, #tpu.memory_space<vmem>>, vector<32x128xbf16>
    %c4_120 = arith.constant 4 : index
    %c0_121 = arith.constant 0 : index
    %c0_122 = arith.constant 0 : index
    %139 = vector.load %arg5[%c4_120, %c0_121, %c0_122] : memref<9x128x128xbf16, #tpu.memory_space<vmem>>, vector<1x128x128xbf16>
    %140 = vector.shape_cast %139 : vector<1x128x128xbf16> to vector<128x128xbf16>
    %cst_123 = arith.constant dense<0.000000e+00> : vector<32x128xf32>
    %141 = tpu.matmul %138, %140, %cst_123 {dimension_numbers = #tpu.dot_dimension_numbers<[1], [0], [0], [1], [0, 0, 1, 1], [], []>} : vector<32x128xbf16>, vector<128x128xbf16>, vector<32x128xf32> -> vector<32x128xf32>
    %142 = arith.addf %137, %141 : vector<32x128xf32>
    %c289 = arith.constant 289 : index
    %c0_124 = arith.constant 0 : index
    %143 = vector.load %arg10[%c289, %c0_124] : memref<352x128xbf16, #tpu.memory_space<vmem>>, vector<32x128xbf16>
    %c5_125 = arith.constant 5 : index
    %c0_126 = arith.constant 0 : index
    %c0_127 = arith.constant 0 : index
    %144 = vector.load %arg5[%c5_125, %c0_126, %c0_127] : memref<9x128x128xbf16, #tpu.memory_space<vmem>>, vector<1x128x128xbf16>
    %145 = vector.shape_cast %144 : vector<1x128x128xbf16> to vector<128x128xbf16>
    %cst_128 = arith.constant dense<0.000000e+00> : vector<32x128xf32>
    %146 = tpu.matmul %143, %145, %cst_128 {dimension_numbers = #tpu.dot_dimension_numbers<[1], [0], [0], [1], [0, 0, 1, 1], [], []>} : vector<32x128xbf16>, vector<128x128xbf16>, vector<32x128xf32> -> vector<32x128xf32>
    %147 = arith.addf %142, %146 : vector<32x128xf32>
    %c305 = arith.constant 305 : index
    %c0_129 = arith.constant 0 : index
    %148 = vector.load %arg10[%c305, %c0_129] : memref<352x128xbf16, #tpu.memory_space<vmem>>, vector<32x128xbf16>
    %c6_130 = arith.constant 6 : index
    %c0_131 = arith.constant 0 : index
    %c0_132 = arith.constant 0 : index
    %149 = vector.load %arg5[%c6_130, %c0_131, %c0_132] : memref<9x128x128xbf16, #tpu.memory_space<vmem>>, vector<1x128x128xbf16>
    %150 = vector.shape_cast %149 : vector<1x128x128xbf16> to vector<128x128xbf16>
    %cst_133 = arith.constant dense<0.000000e+00> : vector<32x128xf32>
    %151 = tpu.matmul %148, %150, %cst_133 {dimension_numbers = #tpu.dot_dimension_numbers<[1], [0], [0], [1], [0, 0, 1, 1], [], []>} : vector<32x128xbf16>, vector<128x128xbf16>, vector<32x128xf32> -> vector<32x128xf32>
    %152 = arith.addf %147, %151 : vector<32x128xf32>
    %c306 = arith.constant 306 : index
    %c0_134 = arith.constant 0 : index
    %153 = vector.load %arg10[%c306, %c0_134] : memref<352x128xbf16, #tpu.memory_space<vmem>>, vector<32x128xbf16>
    %c7_135 = arith.constant 7 : index
    %c0_136 = arith.constant 0 : index
    %c0_137 = arith.constant 0 : index
    %154 = vector.load %arg5[%c7_135, %c0_136, %c0_137] : memref<9x128x128xbf16, #tpu.memory_space<vmem>>, vector<1x128x128xbf16>
    %155 = vector.shape_cast %154 : vector<1x128x128xbf16> to vector<128x128xbf16>
    %cst_138 = arith.constant dense<0.000000e+00> : vector<32x128xf32>
    %156 = tpu.matmul %153, %155, %cst_138 {dimension_numbers = #tpu.dot_dimension_numbers<[1], [0], [0], [1], [0, 0, 1, 1], [], []>} : vector<32x128xbf16>, vector<128x128xbf16>, vector<32x128xf32> -> vector<32x128xf32>
    %157 = arith.addf %152, %156 : vector<32x128xf32>
    %c307 = arith.constant 307 : index
    %c0_139 = arith.constant 0 : index
    %158 = vector.load %arg10[%c307, %c0_139] : memref<352x128xbf16, #tpu.memory_space<vmem>>, vector<32x128xbf16>
    %c8_140 = arith.constant 8 : index
    %c0_141 = arith.constant 0 : index
    %c0_142 = arith.constant 0 : index
    %159 = vector.load %arg5[%c8_140, %c0_141, %c0_142] : memref<9x128x128xbf16, #tpu.memory_space<vmem>>, vector<1x128x128xbf16>
    %160 = vector.shape_cast %159 : vector<1x128x128xbf16> to vector<128x128xbf16>
    %cst_143 = arith.constant dense<0.000000e+00> : vector<32x128xf32>
    %161 = tpu.matmul %158, %160, %cst_143 {dimension_numbers = #tpu.dot_dimension_numbers<[1], [0], [0], [1], [0, 0, 1, 1], [], []>} : vector<32x128xbf16>, vector<128x128xbf16>, vector<32x128xf32> -> vector<32x128xf32>
    %162 = arith.addf %157, %161 : vector<32x128xf32>
    %c0_144 = arith.constant 0 : index
    %c0_145 = arith.constant 0 : index
    %163 = vector.load %arg6[%c0_144, %c0_145] : memref<1x128xf32, #tpu.memory_space<vmem>>, vector<1x128xf32>
    %164 = vector.broadcast %163 : vector<1x128xf32> to vector<32x128xf32>
    %165 = arith.mulf %162, %164 : vector<32x128xf32>
    %c0_146 = arith.constant 0 : index
    %c0_147 = arith.constant 0 : index
    %166 = vector.load %arg7[%c0_146, %c0_147] : memref<1x128xf32, #tpu.memory_space<vmem>>, vector<1x128xf32>
    %167 = vector.broadcast %166 : vector<1x128xf32> to vector<32x128xf32>
    %168 = arith.addf %165, %167 : vector<32x128xf32>
    %cst_148 = arith.constant 0.000000e+00 : f32
    %169 = vector.broadcast %cst_148 : f32 to vector<32x128xf32>
    %170 = arith.maximumf %168, %169 : vector<32x128xf32>
    %c0_149 = arith.constant 0 : index
    %c256 = arith.constant 256 : index
    %c0_150 = arith.constant 0 : index
    %171 = vector.load %arg9[%c0_149, %c256, %c0_150] : memref<1x288x128xf32, #tpu.memory_space<vmem>>, vector<1x32x128xf32>
    %172 = vector.shape_cast %171 : vector<1x32x128xf32> to vector<32x128xf32>
    %173 = vector.shape_cast %170 : vector<32x128xf32> to vector<1x32x128xf32>
    tpu.vector_store %arg9[%c0_149, %c256, %c0_150], %173 {strides = array<i32>} : memref<1x288x128xf32, #tpu.memory_space<vmem>>, vector<1x32x128xf32>,
    return
  }
  func.func @transform_0(%arg0: i32, %arg1: i32) -> (i32, i32, i32) {
    %c0_i32 = arith.constant 0 : i32
    %c0_i32_0 = arith.constant 0 : i32
    %c0_i32_1 = arith.constant 0 : i32
    return %arg0, %c0_i32, %c0_i32_0 : i32, i32, i32
  }
  func.func @transform_1(%arg0: i32, %arg1: i32) -> (i32, i32, i32) {
    %c0_i32 = arith.constant 0 : i32
    %c0_i32_0 = arith.constant 0 : i32
    %c0_i32_1 = arith.constant 0 : i32
    %c0_i32_2 = arith.constant 0 : i32
    return %c0_i32, %c0_i32_0, %c0_i32_1 : i32, i32, i32
  }
  func.func @transform_2(%arg0: i32, %arg1: i32) -> (i32, i32) {
    %c0_i32 = arith.constant 0 : i32
    %c0_i32_0 = arith.constant 0 : i32
    %c0_i32_1 = arith.constant 0 : i32
    return %c0_i32, %c0_i32_0 : i32, i32
  }
  func.func @transform_3(%arg0: i32, %arg1: i32) -> (i32, i32, i32) {
    %c0_i32 = arith.constant 0 : i32
    %c0_i32_0 = arith.constant 0 : i32
    %c0_i32_1 = arith.constant 0 : i32
    return %c0_i32, %c0_i32_0, %arg1 : i32, i32, i32
  }
  func.func @transform_4(%arg0: i32, %arg1: i32) -> (i32, i32) {
    %c0_i32 = arith.constant 0 : i32
    %c0_i32_0 = arith.constant 0 : i32
    return %c0_i32, %arg1 : i32, i32
  }
  func.func @transform_5(%arg0: i32, %arg1: i32) -> (i32, i32) {
    %c0_i32 = arith.constant 0 : i32
    %c0_i32_0 = arith.constant 0 : i32
    return %c0_i32, %arg1 : i32, i32
  }
  func.func @transform_6(%arg0: i32, %arg1: i32) -> (i32, i32) {
    %c0_i32 = arith.constant 0 : i32
    %c0_i32_0 = arith.constant 0 : i32
    %c0_i32_1 = arith.constant 0 : i32
    return %c0_i32, %c0_i32_0 : i32, i32
  }
  func.func @transform_7(%arg0: i32, %arg1: i32) -> (i32, i32, i32) {
    %c0_i32 = arith.constant 0 : i32
    %c0_i32_0 = arith.constant 0 : i32
    return %arg0, %c0_i32, %arg1 : i32, i32, i32
  }
}

</mosaic_0001>

<bundles_post_ra>
// kernel: conv3x3drop_forward.1
= control target key start
LH: loop header
LB: loop body
LE: loop exit
PB: predicated region body
PF: predicated region fallthrough
CT: control target
= control target key end

     0   :  { %s14168_s24 = smov 0   ;;  %s14170_s25 = smov 0   ;;  %s18196_s0 = inlined_call_operand.vmem [shape: bf16[2,336,128], index: 0, kind: input, shape index: {}]   ;;  %s18197_s1 = inlined_call_operand.vmem [shape: bf16[9,128,128], index: 1, kind: input, shape index: {}]   ;;  %s18198_s2 = inlined_call_operand.vmem [shape: f32[1,128], index: 2, kind: input, shape index: {}]   ;;  %s18199_s3 = inlined_call_operand.vmem [shape: bf16[9,128,128], index: 3, kind: input, shape index: {}]   ;;  %s18200_s4 = inlined_call_operand.vmem [shape: f32[1,128], index: 4, kind: input, shape index: {}]   ;;  %s18201_s5 = inlined_call_operand.vmem [shape: f32[1,128], index: 5, kind: input, shape index: {}]   ;;  %s18202_s6 = inlined_call_operand.vmem [shape: f32[288,1], index: 6, kind: input, shape index: {}]   ;;  %s18203_s7 = inlined_call_operand.vmem [shape: f32[2,288,128], index: 7, kind: output, shape index: {}]  }
   0x1   :  { %s14172_s26 = smov 0  }
   0x2 LB: > { %s29_s27 = sadd.s32 1, %s14121_s25  ;;  %p10274_p0 = scmp.ge.s32.totalorder %s14125_s26, 1  ;;  %s14125_s26 = sphi %s14172_s26, %s17_s26   ;;  %s14121_s25 = sphi %s14170_s25, %s18301_s25   ;;  %s14117_s24 = sphi %s14168_s24, %s18300_s24  }
   0x3   : > { %p31_p1 = scmp.ge.s32.totalorder %s29_s27, 2  ;;  %p276_p2 = scmp.lt.s32.totalorder %s14125_s26, 3 }
   0x5   : > { %s18303_s27 = smov (%p31_p1, %s29_s27), 0  ;;  %p277_p3 = pnand %p10274_p0, %p276_p2 }
   0x7   : > { %280 = sbr.rel (%p277_p3) target bundleno = 1477 (0x5c5), region = 48 }
   0xc   : > { %v13169_v0 = vld [vmem:[%s18197_s1 + $0x78] sm:$0xff]  ;;  %p321_p4 = scmp.lt.s32.totalorder %s14117_s24, 1  ;;  %v13168_v4 = vld [vmem:[%s18197_s1 + $0x70] sm:$0xff]  ;;  %v13167_v8 = vld [vmem:[%s18197_s1 + $0x68] sm:$0xff]  ;;  %vm450_vm0 = vsmask.f32 7424 }
   0xd   : > { %v13161_v1 = vld [vmem:[%s18197_s1 + $0x38] sm:$0xff]  ;;  %575 = vmatpush.bf16.msra.mxu0 %v13169_v0  ;;  %v13160_v5 = vld [vmem:[%s18197_s1 + $0x30] sm:$0xff]  ;;  %v13159_v9 = vld [vmem:[%s18197_s1 + $0x28] sm:$0xff]  ;;  %vm750_vm1 = vcmask 1046528   ;;  %vm1125_vm2 = vsmask.f32 6400 }
   0xe   : > { %v13177_v2 = vld [vmem:[%s18197_s1 + $0xb8] sm:$0xff]  ;;  %680 = vmatpush.bf16.msra.mxu1 %v13161_v1  ;;  %v13176_v6 = vld [vmem:[%s18197_s1 + $0xb0] sm:$0xff]  ;;  %s18305_s24 = smov (!%p321_p4, %s14117_s24), 1  ;;  %v13175_v10 = vld [vmem:[%s18197_s1 + $0xa8] sm:$0xff]  ;;  %vm1348_vm3 = vcmask 1045504   ;;  %vm1946_vm5 = vcmask 1044480  }
   0xf   : > { %v13192_v3 = vld [vmem:[%s18197_s1 + $0xf8] sm:$0xff]  ;;  %824 = vmatpush.bf16.msra.mxu2 %v13177_v2  ;;  %v13191_v7 = vld [vmem:[%s18197_s1 + $0xf0] sm:$0xff]  ;;  %v13190_v11 = vld [vmem:[%s18197_s1 + $0xe8] sm:$0xff]  ;;  %s14053_s10 = smul.u32 168, %s18305_s24  ;;  %vm1723_vm4 = vsmask.f32 5376 }
  0x10   : > { %1039 = vmatpush.bf16.msra.mxu3 %v13192_v3  ;;  %v13166_v12 = vld [vmem:[%s18197_s1 + $0x60] sm:$0xff]  ;;  %v13165_v16 = vld [vmem:[%s18197_s1 + $0x58] sm:$0xff]  ;;  %v13164_v21 = vld [vmem:[%s18197_s1 + $0x50] sm:$0xff]  ;;  %vm5598_vm6 = vsmask.f32 4352  ;;  %s14054_s22 = smul.u32 288, %s18305_s24 }
  0x11   : > { %576 = vmatpush.bf16.msra.mxu0 %v13168_v4  ;;  %v13158_v13 = vld [vmem:[%s18197_s1 + $0x20] sm:$0xff]  ;;  %s14240_s21 = scalar_lea.vmem %s18196_s0, %s14053_s10  ;;  %v13157_v17 = vld [vmem:[%s18197_s1 + $0x18] sm:$0xff]  ;;  %v13156_v24 = vld [vmem:[%s18197_s1 + $0x10] sm:$0xff] }
  0x12   : > { %681 = vmatpush.bf16.msra.mxu1 %v13160_v5  ;;  %v13174_v14 = vld [vmem:[%s18197_s1 + $0xa0] sm:$0xff]  ;;  %v13173_v18 = vld [vmem:[%s18197_s1 + $0x98] sm:$0xff]  ;;  %v889_v22 = vld [vmem:[%s14240_s21 + $0x8] sm:$0xe]  ;;  %s17319_s28 = scalar_lea.vmem %s18203_s7, %s14054_s22 }
  0x13   : > { %825 = vmatpush.bf16.msra.mxu2 %v13176_v6  ;;  %v13189_v15 = vld [vmem:[%s18197_s1 + $0xe0] sm:$0xff]  ;;  %v13188_v19 = vld [vmem:[%s18197_s1 + $0xd8] sm:$0xff]  ;;  %v14260_v23 = vld [vmem:[%s14240_s21 + $0xc] sm:$0xf]  ;;  %v940_v30 = vunpack.c.l.b16 %v889_v22 }
  0x14   : > { %1040 = vmatpush.bf16.msra.mxu3 %v13191_v7  ;;  %v13673_v20 = vld [vmem:[%s14240_s21] sm:$0xff]   ;;  %v13172_v25 = vld [vmem:[%s18197_s1 + $0x90] sm:$0xff]  ;;  %v14269_v26 = vld [vmem:[%s14240_s21 + $0x8] sm:$0xff]  ;;  %v941_v31 = vunpack.c.l.b16 %v14260_v23 }
  0x15   : > { %577 = vmatpush.bf16.msra.mxu0 %v13167_v8  ;;  %v454_v27 = vshll.u32 %v13673_v20, 16  ;;  %v13187_v28 = vld [vmem:[%s18197_s1 + $0xd0] sm:$0xff]  ;;  %v13858_v29 = vld [vmem:[%s14240_s21] sm:$0xf0]  ;;  %v13859_v32 = vld [vmem:[%s14240_s21] sm:$0xe] }
  0x16   : > { %682 = vmatpush.bf16.msra.mxu1 %v13159_v9  ;;  %v13163_v33 = vld [vmem:[%s18197_s1 + $0x48] sm:$0xff]  ;;  %v452_v35 = vshrl.u32 %v13673_v20, 16  ;;  %v459_v37 = vshll.u32 %v14269_v26, 16  ;;  %v13860_v40 = vor.u32 %v13859_v32, %v13858_v29  ;;  %v14291_v41 = vld [vmem:[%s14240_s21 + $0x10] sm:$0xff]  ;;  %v14295_v42 = vpack.c.b16 %v941_v31, %v940_v30  ;;  %v13162_v43 = vld [vmem:[%s18197_s1 + $0x40] sm:$0xff] }
  0x17   : > { %826 = vmatpush.bf16.msra.mxu2 %v13175_v10  ;;  %v13155_v34 = vld [vmem:[%s18197_s1 + $0x8] sm:$0xff]  ;;  %v456_v36 = vrot.slane %v454_v27, 1  ;;  %v13154_v44 = vld [vmem:[%s18197_s1] sm:$0xff]  ;;  %v752_v50 = vrot.slane %v14269_v26, 1  ;;  %v967_v52 = vrot.slane %v14291_v41, 1  ;;  %v13223_v53 = vld [vmem:[%s18197_s1 + $0x1b8] sm:$0xff] }
  0x18   : > { %1041 = vmatpush.bf16.msra.mxu3 %v13190_v11  ;;  %v13171_v38 = vld [vmem:[%s18197_s1 + $0x88] sm:$0xff]  ;;  %v461_v46 = vrot.slane %v459_v37, 1  ;;  %v13170_v47 = vld [vmem:[%s18197_s1 + $0x80] sm:$0xff]  ;;  %v751_v49 = vrot.slane %v13860_v40, 1  ;;  %v966_v51 = vrot.slane %v14295_v42, 1  ;;  %v13231_v54 = vld [vmem:[%s18197_s1 + $0x1f8] sm:$0xff] }
  0x19   : > { %578 = vmatpush.bf16.msra.mxu0 %v13166_v12  ;;  %v13186_v39 = vld [vmem:[%s18197_s1 + $0xc8] sm:$0xff]  ;;  %v457_v45 = vor.u32 %v456_v36, %v452_v35  ;;  %v13185_v48 = vld [vmem:[%s18197_s1 + $0xc0] sm:$0xff]  ;;  %v13200_v58 = vld [vmem:[%s18197_s1 + $0x138] sm:$0xff]  ;;  %v463_v3 = vshrl.u32 %v14269_v26, 16  ;;  %v1350_v23 = vrot.slane %v14291_v41, 2 }
  0x1a   : > { %683 = vmatpush.bf16.msra.mxu1 %v13158_v13  ;;  %v753_v56 = vsel %vm750_vm1, %v751_v49, %v752_v50  ;;  %v968_v57 = vsel %vm750_vm1, %v966_v51, %v967_v52  ;;  %v13208_v59 = vld [vmem:[%s18197_s1 + $0x178] sm:$0xff]  ;;  %v13222_v60 = vld [vmem:[%s18197_s1 + $0x1b0] sm:$0xff]  ;;  %v13221_v1 = vld [vmem:[%s18197_s1 + $0x1a8] sm:$0xff] }
  0x1b   : > { %827 = vmatpush.bf16.msra.mxu2 %v13174_v14  ;;  %v462_v55 = vsel %vm450_vm0, %v457_v45, %v461_v46  ;;  %v13230_v61 = vld [vmem:[%s18197_s1 + $0x1f0] sm:$0xff]  ;;  %v13229_v2 = vld [vmem:[%s18197_s1 + $0x1e8] sm:$0xff]  ;;  %v14348_v5 = vld [vmem:[%s14240_s21 + $0x18] sm:$0xff]  ;;  %v465_v8 = vor.u32 %v463_v3, %v461_v46 }
  0x1c   : > { %1042 = vmatpush.bf16.msra.mxu3 %v13189_v15  ;;  %v13148_v62 = vld [vmem:[%s14240_s21 + $0x10] sm:$0xff]  ;;  %v13198_v6 = vld [vmem:[%s18197_s1 + $0x128] sm:$0xff]  ;;  %v969_v11 = vrot.slane %v14348_v5, 1  ;;  %v13149_v15 = vld [vmem:[%s14240_s21 + $0x18] sm:$0xff] }
  0x1d   : > { %579 = vmatpush.bf16.msra.mxu0 %v13165_v16  ;;  %v13199_v63 = vld [vmem:[%s18197_s1 + $0x130] sm:$0xff]  ;;  %v467_v4 = vshll.u32 %v13148_v62, 16  ;;  %v13206_v7 = vld [vmem:[%s18197_s1 + $0x168] sm:$0xff]  ;;  %v754_v10 = vrot.slane %v13148_v62, 1  ;;  %v13220_v16 = vld [vmem:[%s18197_s1 + $0x1a0] sm:$0xff]  ;;  %v479_v37 = vshrl.u32 %v13149_v15, 16 }
  0x1e   : > { %684 = vmatpush.bf16.msra.mxu1 %v13157_v17  ;;  %v13207_v0 = vld [vmem:[%s18197_s1 + $0x170] sm:$0xff]  ;;  %v970_v14 = vsel %vm750_vm1, %v967_v52, %v969_v11  ;;  %v13228_v17 = vld [vmem:[%s18197_s1 + $0x1e0] sm:$0xff]  ;;  %v13196_v35 = vld [vmem:[%s18197_s1 + $0x118] sm:$0xff] }
  0x1f   : > { %828 = vmatpush.bf16.msra.mxu2 %v13173_v18  ;;  %v469_v9 = vrot.slane %v467_v4, 1  ;;  %v755_v13 = vsel %vm750_vm1, %v752_v50, %v754_v10  ;;  %v13197_v18 = vld [vmem:[%s18197_s1 + $0x120] sm:$0xff]  ;;  %v13204_v36 = vld [vmem:[%s18197_s1 + $0x158] sm:$0xff]  ;;  %v13151_v49 = vld [vmem:[%s14240_s21 + $0x28] sm:$0xff] }
  0x20   : > { %1043 = vmatpush.bf16.msra.mxu3 %v13188_v19  ;;  %v13205_v19 = vld [vmem:[%s18197_s1 + $0x160] sm:$0xff]  ;;  %v13218_v50 = vld [vmem:[%s18197_s1 + $0x190] sm:$0xff]  ;;  %v13194_v3 = vld [vmem:[%s18197_s1 + $0x108] sm:$0xff] }
  0x21   : > { %580 = vmatpush.bf16.msra.mxu0 %v13164_v21  ;;  %v470_v12 = vsel %vm450_vm0, %v465_v8, %v469_v9  ;;  %v475_v21 = vshll.u32 %v13149_v15, 16  ;;  %v14375_v22 = vld [vmem:[%s14240_s21 + $0x20] sm:$0xff]  ;;  %v13226_v51 = vld [vmem:[%s18197_s1 + $0x1d0] sm:$0xff]  ;;  %v13202_v4 = vld [vmem:[%s18197_s1 + $0x148] sm:$0xff] }
  0x22   : > { %685 = vmatpush.bf16.msra.mxu1 %v13156_v24  ;;  %v971_v27 = vrot.slane %v14375_v22, 1  ;;  %v13150_v32 = vld [vmem:[%s14240_s21 + $0x20] sm:$0xff]  ;;  %v13195_v52 = vld [vmem:[%s18197_s1 + $0x110] sm:$0xff]  ;;  %v14435_v8 = vld [vmem:[%s14240_s21 + $0x38] sm:$0xff] }
  0x23   : > { %829 = vmatpush.bf16.msra.mxu2 %v13172_v25  ;;  %v477_v25 = vrot.slane %v475_v21, 1 }
  0x24   : > { %1044 = vmatpush.bf16.msra.mxu3 %v13187_v28  ;;  %v972_v30 = vsel %vm750_vm1, %v969_v11, %v971_v27 }
  0x25   : > { %581 = vmatpush.bf16.msra.mxu0 %v13163_v33  ;;  %v13219_v33 = vld [vmem:[%s18197_s1 + $0x198] sm:$0xff]  ;;  %v481_v40 = vor.u32 %v479_v37, %v477_v25 }
  0x26   : > { %686 = vmatpush.bf16.msra.mxu1 %v13155_v34  ;;  %v13227_v34 = vld [vmem:[%s18197_s1 + $0x1d8] sm:$0xff] }
  0x27   : > { %830 = vmatpush.bf16.msra.mxu2 %v13171_v38  ;;  %v483_v38 = vshll.u32 %v13150_v32, 16 }
  0x28   : > { %1045 = vmatpush.bf16.msra.mxu3 %v13186_v39  ;;  %v14395_v39 = vld [vmem:[%s14240_s21 + $0x28] sm:$0xff] }
  0x29   : > { %582 = vmatpush.bf16.msra.mxu0 %v13162_v43  ;;  %v485_v43 = vrot.slane %v483_v38, 1  ;;  %v973_v45 = vrot.slane %v14395_v39, 1  ;;  %v13254_v38 = vld [vmem:[%s18197_s1 + $0x38] sm:$0xff] }
  0x2a   : > { %687 = vmatpush.bf16.msra.mxu1 %v13154_v44  ;;  %v758_v44 = vrot.slane %v13150_v32, 1 }
  0x2b   : > { %831 = vmatpush.bf16.msra.mxu2 %v13170_v47  ;;  %v486_v46 = vsel %vm450_vm0, %v481_v40, %v485_v43  ;;  %v13270_v40 = vld [vmem:[%s18197_s1 + $0xb8] sm:$0xff] }
  0x2c   : > { %1046 = vmatpush.bf16.msra.mxu3 %v13185_v48  ;;  %583 = vmatmul.bf16.vlgmr.msra.gmra.mxu0 %v462_v55  ;;  %v974_v48 = vsel %vm750_vm1, %v971_v27, %v973_v45  ;;  %v491_v55 = vshll.u32 %v13151_v49, 16 }
  0x2d   : > { %688 = vmatmul.bf16.vlgmr.msra.gmra.mxu1 %v13673_v20  ;;  %1262 = vmatpush.bf16.msrb.mxu0 %v13200_v58  ;;  %v471_v20 = vshrl.u32 %v13148_v62, 16 }
  0x2e   : > { %832 = vmatmul.bf16.vlgmr.msra.gmra.mxu2 %v753_v56  ;;  %1422 = vmatpush.bf16.msrb.mxu1 %v13208_v59  ;;  %v14415_v56 = vld [vmem:[%s14240_s21 + $0x30] sm:$0xff]  ;;  %v493_v58 = vrot.slane %v491_v55, 1  ;;  %v760_v59 = vrot.slane %v13151_v49, 1 }
  0x2f   : > { %1637 = vmatpush.bf16.msrb.mxu2 %v13223_v53  ;;  %1047 = vmatmul.bf16.vlgmr.msra.gmra.mxu3 %v968_v57  ;;  %v473_v24 = vor.u32 %v471_v20, %v469_v9  ;;  %v13203_v53 = vld [vmem:[%s18197_s1 + $0x150] sm:$0xff]  ;;  %v13201_v20 = vld [vmem:[%s18197_s1 + $0x140] sm:$0xff] }
  0x30   : > { %1860 = vmatpush.bf16.msrb.mxu3 %v13231_v54  ;;  %v487_v54 = vshrl.u32 %v13150_v32, 16 }
  0x31   : > { %1263 = vmatpush.bf16.msrb.mxu0 %v13199_v63  ;;  %v478_v28 = vsel %vm450_vm0, %v473_v24, %v477_v25  ;;  %v14455_v25 = vld [vmem:[%s14240_s21 + $0x40] sm:$0xff] }
  0x32   : > { %1423 = vmatpush.bf16.msrb.mxu1 %v13207_v0  ;;  %v489_v57 = vor.u32 %v487_v54, %v485_v43  ;;  %v13152_v0 = vld [vmem:[%s14240_s21 + $0x30] sm:$0xff] }
  0x33   : > { %1638 = vmatpush.bf16.msrb.mxu2 %v13222_v60  ;;  %v975_v60 = vrot.slane %v14415_v56, 1  ;;  %v762_v11 = vrot.slane %v13152_v0, 1  ;;  %v503_v21 = vshrl.u32 %v13152_v0, 16 }
  0x34   : > { %1861 = vmatpush.bf16.msrb.mxu3 %v13230_v61  ;;  %v494_v61 = vsel %vm450_vm0, %v489_v57, %v493_v58 }
  0x35   : > { %1264 = vmatpush.bf16.msrb.mxu0 %v13198_v6  ;;  %v976_v63 = vsel %vm750_vm1, %v973_v45, %v975_v60  ;;  %v495_v6 = vshrl.u32 %v13151_v49, 16 }
  0x36   : > { %1424 = vmatpush.bf16.msrb.mxu1 %v13206_v7  ;;  %v499_v7 = vshll.u32 %v13152_v0, 16 }
  0x37   : > { %1639 = vmatpush.bf16.msrb.mxu2 %v13221_v1  ;;  %v13217_v1 = vld [vmem:[%s18197_s1 + $0x188] sm:$0xff]  ;;  %v497_v9 = vor.u32 %v495_v6, %v493_v58  ;;  %v13253_v6 = vld [vmem:[%s18197_s1 + $0x30] sm:$0xff] }
  0x38   : > { %1862 = vmatpush.bf16.msrb.mxu3 %v13229_v2  ;;  %v13225_v2 = vld [vmem:[%s18197_s1 + $0x1c8] sm:$0xff] }
  0x39   : > { %1265 = vmatpush.bf16.msrb.mxu0 %v13197_v18  ;;  %v13224_v18 = vld [vmem:[%s18197_s1 + $0x1c0] sm:$0xff] }
  0x3a   : > { %1425 = vmatpush.bf16.msrb.mxu1 %v13205_v19  ;;  %v13193_v19 = vld [vmem:[%s18197_s1 + $0x100] sm:$0xff] }
  0x3b   : > { %1640 = vmatpush.bf16.msrb.mxu2 %v13220_v16  ;;  %v13153_v16 = vld [vmem:[%s14240_s21 + $0x38] sm:$0xff] }
  0x3c   : > { %588 = vmatmul.bf16.gmra.mxu0 %v470_v12  ;;  %1863 = vmatpush.bf16.msrb.mxu3 %v13228_v17  ;;  %v977_v12 = vrot.slane %v14435_v8, 1  ;;  %v13216_v17 = vld [vmem:[%s18197_s1 + $0x180] sm:$0xff]  ;;  %v507_v24 = vshll.u32 %v13153_v16, 16 }
  0x3d   : > { %693 = vmatmul.bf16.gmra.mxu1 %v14269_v26  ;;  %v756_v26 = vrot.slane %v13149_v15, 1  ;;  %1266 = vmatpush.bf16.msrb.mxu0 %v13196_v35 }
  0x3e   : > { %837 = vmatmul.bf16.gmra.mxu2 %v755_v13  ;;  %1426 = vmatpush.bf16.msrb.mxu1 %v13204_v36  ;;  %v509_v27 = vrot.slane %v507_v24, 1  ;;  %v905_v36 = vld [vmem:[%s14240_s21 + $0x48] sm:$0x1]  ;;  %v13261_v24 = vld [vmem:[%s18197_s1 + $0x70] sm:$0xff] }
  0x3f   : > { %1052 = vmatmul.bf16.gmra.mxu3 %v970_v14  ;;  %v757_v29 = vsel %vm750_vm1, %v754_v10, %v756_v26  ;;  %1641 = vmatpush.bf16.msrb.mxu2 %v13219_v33  ;;  %v759_v47 = vsel %vm750_vm1, %v756_v26, %v758_v44  ;;  %v501_v10 = vrot.slane %v499_v7, 1  ;;  %v763_v14 = vsel %vm750_vm1, %v760_v59, %v762_v11  ;;  %v13269_v7 = vld [vmem:[%s18197_s1 + $0xb0] sm:$0xff] }
  0x40   : > { %1864 = vmatpush.bf16.msrb.mxu3 %v13227_v34  ;;  %v956_v43 = vunpack.c.l.b16 %v905_v36 }
  0x41   : > { %1267 = vmatpush.bf16.msrb.mxu0 %v13195_v52  ;;  %v502_v13 = vsel %vm450_vm0, %v497_v9, %v501_v10  ;;  %v505_v26 = vor.u32 %v503_v21, %v501_v10  ;;  %v13238_v21 = vld [vmem:[%s18197_s1 + $0x230] sm:$0xff] }
  0x42   : > { %1427 = vmatpush.bf16.msrb.mxu1 %v13203_v53 }
  0x43   : > { %1642 = vmatpush.bf16.msrb.mxu2 %v13218_v50  ;;  %v13262_v50 = vld [vmem:[%s18197_s1 + $0x78] sm:$0xff] }
  0x44   : > { %1865 = vmatpush.bf16.msrb.mxu3 %v13226_v51 }
  0x45   : > { %1268 = vmatpush.bf16.msrb.mxu0 %v13194_v3  ;;  %v1138_v3 = vshll.u32 %v14291_v41, 16 }
  0x46   : > { %1428 = vmatpush.bf16.msrb.mxu1 %v13202_v4 }
  0x47   : > { %1643 = vmatpush.bf16.msrb.mxu2 %v13217_v1  ;;  %v1130_v1 = vshll.u32 %v14295_v42, 16 }
  0x48   : > { %1866 = vmatpush.bf16.msrb.mxu3 %v13225_v2  ;;  %v1135_v2 = vshrl.u32 %v14291_v41, 16  ;;  %v14516_v41 = vld [vmem:[%s14240_s21 + $0x20] sm:$0xff] }
  0x49   : > { %1269 = vmatpush.bf16.msrb.mxu0 %v13193_v19 }
  0x4a   : > { %1429 = vmatpush.bf16.msrb.mxu1 %v13201_v20 }
  0x4b   : > { %1644 = vmatpush.bf16.msrb.mxu2 %v13216_v17 }
  0x4c   : > { %593 = vmatmul.bf16.gmra.mxu0 %v478_v28  ;;  %1867 = vmatpush.bf16.msrb.mxu3 %v13224_v18  ;;  %v764_v28 = vrot.slane %v13153_v16, 1 }
  0x4d   : > { %698 = vmatmul.bf16.gmra.mxu1 %v13148_v62  ;;  %v761_v62 = vsel %vm750_vm1, %v758_v44, %v760_v59  ;;  %v511_v44 = vshrl.u32 %v13153_v16, 16 }
  0x4e   : > { %842 = vmatmul.bf16.gmra.mxu2 %v757_v29  ;;  %v979_v29 = vrot.slane %v14455_v25, 1  ;;  %v765_v34 = vsel %vm750_vm1, %v762_v11, %v764_v28  ;;  %2481 = vmatpush.bf16.msra.mxu1 %v13262_v50 }
  0x4f   : > { %1057 = vmatmul.bf16.gmra.mxu3 %v972_v30  ;;  %v389_v30 = vld [vmem:[%s14240_s21 + $0x40] sm:$0x1]  ;;  %2586 = vmatpush.bf16.msra.mxu2 %v13254_v38  ;;  %v513_v51 = vor.u32 %v511_v44, %v509_v27  ;;  %v1147_v44 = vshll.u32 %v14348_v5, 16 }
  0x50   : > { %v440_v33 = vunpack.c.l.b16 %v389_v30  ;;  %v980_v35 = vsel %vm750_vm1, %v977_v12, %v979_v29  ;;  %2728 = vmatpush.bf16.msra.mxu3 %v13270_v40 }
  0x52   : > { %v449_v37 = vpack.c.b16 %v440_v33, %v440_v33  ;;  %2482 = vmatpush.bf16.msra.mxu1 %v13261_v24 }
  0x53   : > { %2587 = vmatpush.bf16.msra.mxu2 %v13253_v6 }
  0x54   : > { %v515_v45 = vshll.u32 %v449_v37, 16  ;;  %v766_v53 = vrot.slane %v449_v37, 1  ;;  %2729 = vmatpush.bf16.msra.mxu3 %v13269_v7 }
  0x56   : > { %v517_v52 = vrot.slane %v515_v45, 1  ;;  %v767_v59 = vsel %vm750_vm1, %v764_v28, %v766_v53  ;;  %v13252_v45 = vld [vmem:[%s18197_s1 + $0x28] sm:$0xff] }
  0x57   : > { %2588 = vmatpush.bf16.msra.mxu2 %v13252_v45 }
  0x58   : > { %v518_v58 = vsel %vm450_vm0, %v513_v51, %v517_v52 }
  0x5c   : > { %598 = vmatmul.bf16.gmra.mxu0 %v486_v46  ;;  %v965_v46 = vpack.c.b16 %v956_v43, %v956_v43  ;;  %v1144_v43 = vshrl.u32 %v14348_v5, 16 }
  0x5d   : > { %703 = vmatmul.bf16.gmra.mxu1 %v13149_v15  ;;  %v978_v15 = vsel %vm750_vm1, %v975_v60, %v977_v12 }
  0x5e   : > { %847 = vmatmul.bf16.gmra.mxu2 %v759_v47  ;;  %v1487_v47 = vld [vmem:[%s14240_s21 + $0x10] sm:$0xc]  ;;  %v981_v54 = vrot.slane %v965_v46, 1  ;;  %v13268_v46 = vld [vmem:[%s18197_s1 + $0xa8] sm:$0xff] }
  0x5f   : > { %1062 = vmatmul.bf16.gmra.mxu3 %v974_v48  ;;  %v14471_v48 = vld [vmem:[%s14240_s21 + $0x14] sm:$0xf]  ;;  %v1538_v55 = vunpack.c.l.b16 %v1487_v47  ;;  %v1742_v47 = vshrl.u32 %v14516_v41, 16 }
  0x60   : > { %v1539_v57 = vunpack.c.l.b16 %v14471_v48  ;;  %v982_v60 = vsel %vm750_vm1, %v979_v29, %v981_v54  ;;  %2730 = vmatpush.bf16.msra.mxu3 %v13268_v46  ;;  %v13284_v48 = vld [vmem:[%s18197_s1 + $0xf0] sm:$0xff] }
  0x6c   : > { %603 = vmatmul.bf16.gmra.mxu0 %v494_v61  ;;  %v1327_v61 = vld [vmem:[%s14240_s21 + $0x8] sm:$0xc] }
  0x6d   : > { %708 = vmatmul.bf16.gmra.mxu1 %v13150_v32  ;;  %v510_v32 = vsel %vm450_vm0, %v505_v26, %v509_v27  ;;  %v1346_v4 = vunpack.c.l.b16 %v1327_v61 }
  0x6e   : > { %852 = vmatmul.bf16.gmra.mxu2 %v761_v62  ;;  %v14485_v62 = vld [vmem:[%s14240_s21 + $0x18] sm:$0xff] }
  0x6f   : > { %1067 = vmatmul.bf16.gmra.mxu3 %v976_v63  ;;  %v1555_v63 = vpack.c.b16 %v1539_v57, %v1538_v55  ;;  %v1733_v11 = vshrl.u32 %v14485_v62, 16  ;;  %v1565_v29 = vrot.slane %v14485_v62, 2  ;;  %v1146_v55 = vrot.slane %v1144_v43, 1 }
  0x70   : > { %v1354_v43 = vrot.slane %v14375_v22, 2 }
  0x71   : > { %v1725_v9 = vshrl.u32 %v1555_v63, 16  ;;  %v1728_v10 = vshll.u32 %v1555_v63, 16  ;;  %v1735_v19 = vrot.slane %v1733_v11, 2 }
  0x73   : > { %v1727_v17 = vrot.slane %v1725_v9, 2  ;;  %v1730_v18 = vrot.slane %v1728_v10, 3 }
  0x75   : > { %v1731_v30 = vor.u32 %v1730_v18, %v1727_v17  ;;  %v1153_v18 = vshrl.u32 %v14375_v22, 16 }
  0x7c   : > { %608 = vmatmul.bf16.gmra.mxu0 %v502_v13  ;;  %v1132_v13 = vrot.slane %v1130_v1, 2  ;;  %v13260_v1 = vld [vmem:[%s18197_s1 + $0x68] sm:$0xff] }
  0x7d   : > { %713 = vmatmul.bf16.gmra.mxu1 %v13151_v49  ;;  %v13239_v49 = vld [vmem:[%s18197_s1 + $0x238] sm:$0xff] }
  0x7e   : > { %857 = vmatmul.bf16.gmra.mxu2 %v763_v14  ;;  %2020 = vmatpush.bf16.msra.mxu0 %v13239_v49  ;;  %v1137_v14 = vrot.slane %v1135_v2, 1  ;;  %v1745_v49 = vshll.u32 %v14516_v41, 16 }
  0x7f   : > { %1072 = vmatmul.bf16.gmra.mxu3 %v978_v15  ;;  %v1140_v15 = vrot.slane %v1138_v3, 2  ;;  %v1352_v3 = vrot.slane %v14348_v5, 2  ;;  %2483 = vmatpush.bf16.msra.mxu1 %v13260_v1  ;;  %v14543_v5 = vld [vmem:[%s14240_s21 + $0x28] sm:$0xff]  ;;  %v13266_v1 = vld [vmem:[%s18197_s1 + $0x98] sm:$0xff] }
  0x80   : > { %v1747_v61 = vrot.slane %v1745_v49, 3  ;;  %v1751_v24 = vshrl.u32 %v14543_v5, 16 }
  0x81   : > { %v1141_v27 = vor.u32 %v1140_v15, %v1137_v14 }
  0x82   : > { %2021 = vmatpush.bf16.msra.mxu0 %v13238_v21  ;;  %v13267_v21 = vld [vmem:[%s18197_s1 + $0xa0] sm:$0xff] }
  0x83   : > { %2731 = vmatpush.bf16.msra.mxu3 %v13267_v21 }
  0x87   : > { %2732 = vmatpush.bf16.msra.mxu3 %v13266_v1 }
  0x8c   : > { %613 = vmatmul.bf16.gmra.mxu0 %v510_v32 }
  0x8d   : > { %718 = vmatmul.bf16.gmra.mxu1 %v13152_v0  ;;  %v1127_v0 = vshrl.u32 %v14295_v42, 16  ;;  %v1736_v42 = vshll.u32 %v14485_v62, 16 }
  0x8e   : > { %862 = vmatmul.bf16.gmra.mxu2 %v765_v34 }
  0x8f   : > { %1077 = vmatmul.bf16.gmra.mxu3 %v980_v35  ;;  %v1129_v12 = vrot.slane %v1127_v0, 1  ;;  %v1738_v20 = vrot.slane %v1736_v42, 3  ;;  %v13237_v0 = vld [vmem:[%s18197_s1 + $0x228] sm:$0xff] }
  0x90   : > { %2022 = vmatpush.bf16.msra.mxu0 %v13237_v0  ;;  %v13250_v0 = vld [vmem:[%s18197_s1 + $0x18] sm:$0xff] }
  0x91   : > { %v1133_v26 = vor.u32 %v1132_v13, %v1129_v12  ;;  %v1739_v32 = vor.u32 %v1738_v20, %v1735_v19  ;;  %v1353_v13 = vsel %vm1348_vm3, %v1350_v23, %v1352_v3  ;;  %v1156_v19 = vshll.u32 %v14375_v22, 16  ;;  %v13251_v20 = vld [vmem:[%s18197_s1 + $0x20] sm:$0xff]  ;;  %v14572_v22 = vld [vmem:[%s14240_s21 + $0x30] sm:$0xff] }
  0x92   : > { %2589 = vmatpush.bf16.msra.mxu2 %v13251_v20  ;;  %v1356_v20 = vrot.slane %v14395_v39, 2  ;;  %v1571_v21 = vrot.slane %v14572_v22, 2 }
  0x93   : > { %v1142_v35 = vsel %vm1125_vm2, %v1133_v26, %v1141_v27  ;;  %v1740_v40 = vsel %vm1723_vm4, %v1731_v30, %v1739_v32  ;;  %v1754_v26 = vshll.u32 %v14543_v5, 16  ;;  %v1155_v30 = vrot.slane %v1153_v18, 1  ;;  %v13258_v18 = vld [vmem:[%s18197_s1 + $0x58] sm:$0xff] }
  0x96   : > { %2590 = vmatpush.bf16.msra.mxu2 %v13250_v0  ;;  %v13257_v0 = vld [vmem:[%s18197_s1 + $0x50] sm:$0xff] }
  0x9c   : > { %618 = vmatmul.bf16.gmra.mxu0 %v518_v58  ;;  %v1149_v58 = vrot.slane %v1147_v44, 2  ;;  %v1569_v44 = vrot.slane %v14543_v5, 2 }
  0x9d   : > { %723 = vmatmul.bf16.gmra.mxu1 %v13153_v16  ;;  %v1347_v16 = vpack.c.b16 %v941_v31, %v1346_v4  ;;  %v1564_v31 = vrot.slane %v1555_v63, 2  ;;  %v1567_v4 = vrot.slane %v14516_v41, 2 }
  0x9e   : > { %867 = vmatmul.bf16.gmra.mxu2 %v767_v59  ;;  %v1150_v2 = vor.u32 %v1149_v58, %v1146_v55 }
  0x9f   : > { %1082 = vmatmul.bf16.gmra.mxu3 %v982_v60  ;;  %v1349_v28 = vrot.slane %v1347_v16, 2  ;;  %v1566_v38 = vsel %vm1348_vm3, %v1564_v31, %v1565_v29  ;;  %v1744_v60 = vrot.slane %v1742_v47, 2  ;;  %v1568_v15 = vsel %vm1348_vm3, %v1565_v29, %v1567_v4 }
  0xa0   : > { %v1151_v12 = vsel %vm1125_vm2, %v1141_v27, %v1150_v2  ;;  %v1570_v55 = vsel %vm1348_vm3, %v1567_v4, %v1569_v44 }
  0xa1   : > { %v1351_v36 = vsel %vm1348_vm3, %v1349_v28, %v1350_v23  ;;  %v1748_v6 = vor.u32 %v1747_v61, %v1744_v60  ;;  %v1162_v60 = vshrl.u32 %v14395_v39, 16  ;;  %v1165_v61 = vshll.u32 %v14395_v39, 16  ;;  %v14601_v39 = vld [vmem:[%s14240_s21 + $0x38] sm:$0xff] }
  0xa3   : > { %v1749_v16 = vsel %vm1723_vm4, %v1739_v32, %v1748_v6  ;;  %v1158_v32 = vrot.slane %v1156_v19, 2 }
  0xa9   : > { %v584_v33 = vpop.f32.mrf.mxu0 }
  0xaa   : > { %v689_v34 = vpop.f32.mrf.mxu1 }
  0xab   : > { %v690_v37 = vadd.f32 %v689_v34, %v584_v33  ;;  %v1753_v34 = vrot.slane %v1751_v24, 2 }
  0xac   : > { %1270 = vmatmul.bf16.vlgmr.msrb.gmra.mxu0 %v1142_v35  ;;  %v1756_v35 = vrot.slane %v1754_v26, 3 }
  0xad   : > { %1430 = vmatmul.bf16.vlgmr.msrb.gmra.mxu1 %v1351_v36 }
  0xae   : > { %1645 = vmatmul.bf16.vlgmr.msrb.gmra.mxu2 %v1566_v38  ;;  %v13259_v38 = vld [vmem:[%s18197_s1 + $0x60] sm:$0xff]  ;;  %v1757_v45 = vor.u32 %v1756_v35, %v1753_v34 }
  0xaf   : > { %1868 = vmatmul.bf16.vlgmr.msrb.gmra.mxu3 %v1740_v40  ;;  %v1159_v40 = vor.u32 %v1158_v32, %v1155_v30  ;;  %2484 = vmatpush.bf16.msra.mxu1 %v13259_v38  ;;  %v1357_v30 = vsel %vm1348_vm3, %v1354_v43, %v1356_v20  ;;  %v1174_v38 = vshll.u32 %v14415_v56, 16 }
  0xb0   : > { %v1758_v58 = vsel %vm1723_vm4, %v1748_v6, %v1757_v45 }
  0xb1   : > { %v833_v50 = vpop.f32.mrf.mxu2  ;;  %v586_v53 = vpop.f32.mrf.mxu0 }
  0xb2   : > { %v1048_v51 = vpop.f32.mrf.mxu3  ;;  %v873_v52 = vadd.f32 %v833_v50, %v690_v37  ;;  %v691_v54 = vpop.f32.mrf.mxu1  ;;  %v13236_v37 = vld [vmem:[%s18197_s1 + $0x220] sm:$0xff] }
  0xb3   : > { %v692_v59 = vadd.f32 %v691_v54, %v586_v53  ;;  %2023 = vmatpush.bf16.msra.mxu0 %v13236_v37  ;;  %v1355_v53 = vsel %vm1348_vm3, %v1352_v3, %v1354_v43  ;;  %v1763_v3 = vshll.u32 %v14572_v22, 16  ;;  %2485 = vmatpush.bf16.msra.mxu1 %v13258_v18  ;;  %v1171_v37 = vshrl.u32 %v14415_v56, 16  ;;  %v13265_v43 = vld [vmem:[%s18197_s1 + $0x90] sm:$0xff] }
  0xb4   : > { %v14528_v63 = vadd.f32 %v1048_v51, %v873_v52  ;;  %v1160_v52 = vsel %vm1125_vm2, %v1150_v2, %v1159_v40  ;;  %v1760_v2 = vshrl.u32 %v14572_v22, 16  ;;  %2733 = vmatpush.bf16.msra.mxu3 %v13265_v43  ;;  %v13233_v43 = vld [vmem:[%s18197_s1 + $0x208] sm:$0xff] }
  0xb7   : > { %2486 = vmatpush.bf16.msra.mxu1 %v13257_v0 }
  0xb9   : > { %v835_v7 = vpop.f32.mrf.mxu2  ;;  %v589_v11 = vpop.f32.mrf.mxu0 }
  0xba   : > { %v1050_v9 = vpop.f32.mrf.mxu3  ;;  %v874_v10 = vadd.f32 %v835_v7, %v692_v59  ;;  %v694_v42 = vpop.f32.mrf.mxu1 }
  0xbb   : > { %v695_v14 = vadd.f32 %v694_v42, %v589_v11  ;;  %v1164_v11 = vrot.slane %v1162_v60, 1  ;;  %v1167_v42 = vrot.slane %v1165_v61, 2  ;;  %v13234_v61 = vld [vmem:[%s18197_s1 + $0x210] sm:$0xff] }
  0xbc   : > { %v14545_v17 = vadd.f32 %v1050_v9, %v874_v10  ;;  %1275 = vmatmul.bf16.gmra.mxu0 %v1151_v12 }
  0xbd   : > { %1435 = vmatmul.bf16.gmra.mxu1 %v1353_v13  ;;  %v1762_v13 = vrot.slane %v1760_v2, 2  ;;  %v1168_v19 = vor.u32 %v1167_v42, %v1164_v11  ;;  %v1358_v2 = vrot.slane %v14415_v56, 2  ;;  %v14630_v56 = vld [vmem:[%s14240_s21 + $0x40] sm:$0xff] }
  0xbe   : > { %1650 = vmatmul.bf16.gmra.mxu2 %v1568_v15 }
  0xbf   : > { %1873 = vmatmul.bf16.gmra.mxu3 %v1749_v16  ;;  %v13235_v16 = vld [vmem:[%s18197_s1 + $0x218] sm:$0xff] }
  0xc0   : > { %2024 = vmatpush.bf16.msra.mxu0 %v13235_v16 }
  0xc1   : > { %v838_v27 = vpop.f32.mrf.mxu2  ;;  %v591_v31 = vpop.f32.mrf.mxu0 }
  0xc2   : > { %v1053_v28 = vpop.f32.mrf.mxu3  ;;  %v875_v23 = vadd.f32 %v838_v27, %v695_v14  ;;  %v696_v29 = vpop.f32.mrf.mxu1  ;;  %v1765_v14 = vrot.slane %v1763_v3, 3  ;;  %v1573_v3 = vrot.slane %v14601_v39, 2 }
  0xc3   : > { %v697_v33 = vadd.f32 %v696_v29, %v591_v31  ;;  %v1169_v29 = vsel %vm1125_vm2, %v1159_v40, %v1168_v19  ;;  %v13249_v40 = vld [vmem:[%s18197_s1 + $0x10] sm:$0xff] }
  0xc4   : > { %v14557_v36 = vadd.f32 %v1053_v28, %v875_v23  ;;  %v1766_v24 = vor.u32 %v1765_v14, %v1762_v13  ;;  %2591 = vmatpush.bf16.msra.mxu2 %v13249_v40  ;;  %2025 = vmatpush.bf16.msra.mxu0 %v13234_v61  ;;  %v1574_v14 = vsel %vm1348_vm3, %v1571_v21, %v1573_v3 }
  0xc6   : > { %v1767_v34 = vsel %vm1723_vm4, %v1757_v45, %v1766_v24  ;;  %v1772_v45 = vshll.u32 %v14601_v39, 16 }
  0xc8   : > { %2026 = vmatpush.bf16.msra.mxu0 %v13233_v43 }
  0xc9   : > { %v840_v46 = vpop.f32.mrf.mxu2  ;;  %v594_v50 = vpop.f32.mrf.mxu0 }
  0xca   : > { %v1055_v47 = vpop.f32.mrf.mxu3  ;;  %v876_v49 = vadd.f32 %v840_v46, %v697_v33  ;;  %v699_v51 = vpop.f32.mrf.mxu1  ;;  %v1572_v33 = vsel %vm1348_vm3, %v1569_v44, %v1571_v21  ;;  %v1769_v44 = vshrl.u32 %v14601_v39, 16  ;;  %v1778_v21 = vshrl.u32 %v14630_v56, 16 }
  0xcb   : > { %v700_v54 = vadd.f32 %v699_v51, %v594_v50 }
  0xcc   : > { %v14574_v59 = vadd.f32 %v1055_v47, %v876_v49  ;;  %1280 = vmatmul.bf16.gmra.mxu0 %v1160_v52  ;;  %v1173_v52 = vrot.slane %v1171_v37, 1  ;;  %v1780_v37 = vrot.slane %v1778_v21, 2  ;;  %v1104_v21 = vld [vmem:[%s14240_s21 + $0x48] sm:$0x3] }
  0xcd   : > { %1440 = vmatmul.bf16.gmra.mxu1 %v1355_v53  ;;  %v1176_v53 = vrot.slane %v1174_v38, 2 }
  0xce   : > { %1655 = vmatmul.bf16.gmra.mxu2 %v1570_v55  ;;  %v1771_v55 = vrot.slane %v1769_v44, 2  ;;  %v13256_v44 = vld [vmem:[%s18197_s1 + $0x48] sm:$0xff] }
  0xcf   : > { %1878 = vmatmul.bf16.gmra.mxu3 %v1758_v58  ;;  %v1774_v58 = vrot.slane %v1772_v45, 3  ;;  %v1177_v1 = vor.u32 %v1176_v53, %v1173_v52  ;;  %2487 = vmatpush.bf16.msra.mxu1 %v13256_v44 }
  0xd1   : > { %v843_v4 = vpop.f32.mrf.mxu2  ;;  %v596_v9 = vpop.f32.mrf.mxu0  ;;  %v1178_v42 = vsel %vm1125_vm2, %v1168_v19, %v1177_v1  ;;  %v13248_v19 = vld [vmem:[%s18197_s1 + $0x8] sm:$0xff] }
  0xd2   : > { %v1058_v6 = vpop.f32.mrf.mxu3  ;;  %v877_v7 = vadd.f32 %v843_v4, %v700_v54  ;;  %v701_v10 = vpop.f32.mrf.mxu1  ;;  %v1775_v4 = vor.u32 %v1774_v58, %v1771_v55  ;;  %2592 = vmatpush.bf16.msra.mxu2 %v13248_v19 }
  0xd3   : > { %v702_v12 = vadd.f32 %v701_v10, %v596_v9 }
  0xd4   : > { %v14586_v15 = vadd.f32 %v1058_v6, %v877_v7  ;;  %v1776_v16 = vsel %vm1723_vm4, %v1766_v24, %v1775_v4  ;;  %v1781_v24 = vshll.u32 %v14630_v56, 16 }
  0xd6   : > { %v1783_v38 = vrot.slane %v1781_v24, 3 }
  0xd9   : > { %v845_v26 = vpop.f32.mrf.mxu2  ;;  %v599_v23 = vpop.f32.mrf.mxu0 }
  0xda   : > { %v1060_v27 = vpop.f32.mrf.mxu3  ;;  %v878_v28 = vadd.f32 %v845_v26, %v702_v12  ;;  %v704_v31 = vpop.f32.mrf.mxu1  ;;  %v1359_v12 = vsel %vm1348_vm3, %v1356_v20, %v1358_v2  ;;  %v1180_v26 = vshrl.u32 %v14435_v8, 16  ;;  %v13264_v20 = vld [vmem:[%s18197_s1 + $0x88] sm:$0xff] }
  0xdb   : > { %v705_v32 = vadd.f32 %v704_v31, %v599_v23  ;;  %2734 = vmatpush.bf16.msra.mxu3 %v13264_v20 }
  0xdc   : > { %v14603_v35 = vadd.f32 %v1060_v27, %v878_v28  ;;  %1285 = vmatmul.bf16.gmra.mxu0 %v1169_v29  ;;  %v1183_v27 = vshll.u32 %v14435_v8, 16 }
  0xdd   : > { %1445 = vmatmul.bf16.gmra.mxu1 %v1357_v30 }
  0xde   : > { %1660 = vmatmul.bf16.gmra.mxu2 %v1572_v33  ;;  %v1185_v33 = vrot.slane %v1183_v27, 2 }
  0xdf   : > { %1883 = vmatmul.bf16.gmra.mxu3 %v1767_v34 }
  0xe1   : > { %v848_v46 = vpop.f32.mrf.mxu2  ;;  %v601_v50 = vpop.f32.mrf.mxu0 }
  0xe2   : > { %v1063_v47 = vpop.f32.mrf.mxu3  ;;  %v879_v49 = vadd.f32 %v848_v46, %v705_v32  ;;  %v706_v51 = vpop.f32.mrf.mxu1  ;;  %v1182_v32 = vrot.slane %v1180_v26, 1  ;;  %v1360_v46 = vrot.slane %v14435_v8, 2  ;;  %v14659_v8 = vld [vmem:[%s14240_s21 + $0x48] sm:$0xff] }
  0xe3   : > { %v707_v54 = vadd.f32 %v706_v51, %v601_v50 }
  0xe4   : > { %v14615_v60 = vadd.f32 %v1063_v47, %v879_v49  ;;  %v1186_v45 = vor.u32 %v1185_v33, %v1182_v32  ;;  %v1575_v47 = vrot.slane %v14630_v56, 2  ;;  %v1784_v49 = vor.u32 %v1783_v38, %v1780_v37 }
  0xe5   : > { %v1361_v58 = vsel %vm1348_vm3, %v1358_v2, %v1360_v46  ;;  %v13263_v2 = vld [vmem:[%s18197_s1 + $0x80] sm:$0xff]  ;;  %v1123_v32 = vunpack.c.l.b16 %v1104_v21  ;;  %v1577_v33 = vrot.slane %v14659_v8, 2  ;;  %v13293_v21 = vld [vmem:[%s18197_s1 + $0x138] sm:$0xff] }
  0xe6   : > { %v1187_v55 = vsel %vm1125_vm2, %v1177_v1, %v1186_v45  ;;  %v1576_v0 = vsel %vm1348_vm3, %v1573_v3, %v1575_v47  ;;  %v13247_v1 = vld [vmem:[%s18197_s1] sm:$0xff]  ;;  %v1787_v3 = vshrl.u32 %v14659_v8, 16  ;;  %2735 = vmatpush.bf16.msra.mxu3 %v13263_v2 }
  0xe7   : > { %2593 = vmatpush.bf16.msra.mxu2 %v13247_v1 }
  0xe8   : > { %v1789_v19 = vrot.slane %v1787_v3, 2 }
  0xe9   : > { %v850_v6 = vpop.f32.mrf.mxu2  ;;  %v604_v10 = vpop.f32.mrf.mxu0 }
  0xea   : > { %v1065_v7 = vpop.f32.mrf.mxu3  ;;  %v880_v9 = vadd.f32 %v850_v6, %v707_v54  ;;  %v709_v11 = vpop.f32.mrf.mxu1  ;;  %v1785_v6 = vsel %vm1723_vm4, %v1775_v4, %v1784_v49  ;;  %v1790_v4 = vshll.u32 %v14659_v8, 16 }
  0xeb   : > { %v710_v13 = vadd.f32 %v709_v11, %v604_v10  ;;  %v1192_v10 = vshll.u32 %v14455_v25, 16 }
  0xec   : > { %v14632_v18 = vadd.f32 %v1065_v7, %v880_v9  ;;  %1290 = vmatmul.bf16.gmra.mxu0 %v1178_v42  ;;  %v1189_v9 = vshrl.u32 %v14455_v25, 16  ;;  %v1792_v20 = vrot.slane %v1790_v4, 3 }
  0xed   : > { %1450 = vmatmul.bf16.gmra.mxu1 %v1359_v12  ;;  %v1194_v26 = vrot.slane %v1192_v10, 2 }
  0xee   : > { %1665 = vmatmul.bf16.gmra.mxu2 %v1574_v14 }
  0xef   : > { %1888 = vmatmul.bf16.gmra.mxu3 %v1776_v16  ;;  %v1191_v16 = vrot.slane %v1189_v9, 1 }
  0xf1   : > { %v853_v28 = vpop.f32.mrf.mxu2  ;;  %v606_v29 = vpop.f32.mrf.mxu0 }
  0xf2   : > { %v1068_v23 = vpop.f32.mrf.mxu3  ;;  %v881_v31 = vadd.f32 %v853_v28, %v710_v13  ;;  %v711_v30 = vpop.f32.mrf.mxu1  ;;  %v1702_v28 = vld [vmem:[%s14240_s21 + $0x50] sm:$0x7] }
  0xf3   : > { %v712_v34 = vadd.f32 %v711_v30, %v606_v29  ;;  %v1195_v29 = vor.u32 %v1194_v26, %v1191_v16  ;;  %v1362_v30 = vrot.slane %v14455_v25, 2  ;;  %v1721_v37 = vunpack.c.l.b16 %v1702_v28 }
  0xf4   : > { %v14644_v40 = vadd.f32 %v1068_v23, %v881_v31  ;;  %v13232_v23 = vld [vmem:[%s18197_s1 + $0x200] sm:$0xff]  ;;  %v1578_v25 = vsel %vm1348_vm3, %v1575_v47, %v1577_v33 }
  0xf5   : > { %v13255_v31 = vld [vmem:[%s18197_s1 + $0x40] sm:$0xff]  ;;  %2027 = vmatpush.bf16.msra.mxu0 %v13232_v23 }
  0xf6   : > { %2488 = vmatpush.bf16.msra.mxu1 %v13255_v31 }
  0xf9   : > { %v855_v50 = vpop.f32.mrf.mxu2  ;;  %v609_v53 = vpop.f32.mrf.mxu0 }
  0xfa   : > { %v1070_v51 = vpop.f32.mrf.mxu3  ;;  %v882_v52 = vadd.f32 %v855_v50, %v712_v34  ;;  %v714_v54 = vpop.f32.mrf.mxu1  ;;  %v1793_v34 = vor.u32 %v1792_v20, %v1789_v19  ;;  %v13285_v20 = vld [vmem:[%s18197_s1 + $0xf8] sm:$0xff]  ;;  %3163 = vmatpush.bf16.msrb.mxu1 %v13293_v21  ;;  %v1948_v21 = vrot.slane %v14485_v62, 3 }
  0xfb   : > { %v715_v61 = vadd.f32 %v714_v54, %v609_v53  ;;  %v1363_v53 = vsel %vm1348_vm3, %v1360_v46, %v1362_v30  ;;  %v1124_v54 = vpack.c.b16 %v1123_v32, %v1123_v32  ;;  %v13316_v46 = vld [vmem:[%s18197_s1 + $0x1b8] sm:$0xff]  ;;  %2942 = vmatpush.bf16.msrb.mxu0 %v13285_v20 }
  0xfc   : > { %v14661_v7 = vadd.f32 %v1070_v51, %v882_v52  ;;  %1295 = vmatmul.bf16.gmra.mxu0 %v1187_v55  ;;  %v1196_v52 = vsel %vm1125_vm2, %v1186_v45, %v1195_v29  ;;  %v13301_v45 = vld [vmem:[%s18197_s1 + $0x178] sm:$0xff]  ;;  %3535 = vmatpush.bf16.msrb.mxu3 %v13316_v46  ;;  %v13870_v46 = vld [vmem:[%s14240_s21 + $0x40] sm:$0xf0] }
  0xfd   : > { %1455 = vmatmul.bf16.gmra.mxu1 %v1361_v58  ;;  %v1794_v58 = vsel %vm1723_vm4, %v1784_v49, %v1793_v34  ;;  %v1198_v9 = vshrl.u32 %v1124_v54, 16  ;;  %v1201_v10 = vshll.u32 %v1124_v54, 16  ;;  %3321 = vmatpush.bf16.msrb.mxu2 %v13301_v45  ;;  %v1364_v23 = vrot.slane %v1124_v54, 2 }
  0xfe   : > { %1670 = vmatmul.bf16.gmra.mxu2 %v1576_v0  ;;  %v14127_v45 = vmov 0  }
  0xff   : > { %1893 = vmatmul.bf16.gmra.mxu3 %v1785_v6  ;;  %v1503_v6 = vld [vmem:[%s14240_s21 + $0x50] sm:$0x3]  ;;  %14080 = vset.pattern.permute.xlu0 %v14127_v45  ;;  %350 = vst [vmem:[#allocation2 + $0x4] sm:$0xf] %v14127_v45 }
 0x100   : > { %v1554_v47 = vunpack.c.l.b16 %v1503_v6  ;;  %14081 = vset.pattern.permute.xlu1 %v14127_v45  ;;  %351 = vst [vmem:[#allocation2 + $0x8] sm:$0xf] %v14127_v45  ;;  %14082 = vset.pattern.permute.xlu2 %v14127_v45 }
 0x101   : > { %v858_v11 = vpop.f32.mrf.mxu2  ;;  %v611_v13 = vpop.f32.mrf.mxu0  ;;  %352 = vst [vmem:[#allocation2 + $0xc] sm:$0xf] %v14127_v45  ;;  %2943 = vmatpush.bf16.msrb.mxu0 %v13284_v48 }
 0x102   : > { %v1073_v42 = vpop.f32.mrf.mxu3  ;;  %v883_v12 = vadd.f32 %v858_v11, %v715_v61  ;;  %v716_v14 = vpop.f32.mrf.mxu1  ;;  %v14689_v61 = vpack.c.b16 %v1721_v37, %v1721_v37  ;;  %v1563_v16 = vpack.c.b16 %v1554_v47, %v1554_v47  ;;  %v13871_v47 = vld [vmem:[%s14240_s21 + $0x40] sm:$0xe]  ;;  %353 = vst [vmem:[#allocation2 + $0xa0] sm:$0xf] %v14127_v45 }
 0x103   : > { %v717_v27 = vadd.f32 %v716_v14, %v611_v13  ;;  %v1203_v13 = vrot.slane %v1201_v10, 2  ;;  %v14721_v10 = vld [vmem:[%s14240_s21 + $0x48] sm:$0xff]  ;;  %354 = vst [vmem:[#allocation2 + $0xa4] sm:$0xf] %v14127_v45 }
 0x104   : > { %v14674_v24 = vadd.f32 %v1073_v42, %v883_v12  ;;  %v1796_v49 = vshrl.u32 %v14689_v61, 16  ;;  %v1799_v1 = vshll.u32 %v14689_v61, 16  ;;  %v1200_v12 = vrot.slane %v1198_v9, 1  ;;  %355 = vst [vmem:[#allocation2 + $0xa8] sm:$0xf] %v14127_v45 }
 0x105   : > { %v1579_v31 = vrot.slane %v1563_v16, 2  ;;  %v13872_v16 = vor.u32 %v13871_v47, %v13870_v46  ;;  %v2369_v46 = vshrl.u32 %v14721_v10, 16 }
 0x106   : > { %v1798_v26 = vrot.slane %v1796_v49, 2  ;;  %v1204_v28 = vor.u32 %v1203_v13, %v1200_v12  ;;  %v2365_v13 = vshll.u32 %v14721_v10, 16 }
 0x109   : > { %v860_v38 = vpop.f32.mrf.mxu2  ;;  %v614_v50 = vpop.f32.mrf.mxu0 }
 0x10a   : > { %v1075_v43 = vpop.f32.mrf.mxu3  ;;  %v884_v44 = vadd.f32 %v860_v38, %v717_v27  ;;  %v719_v51 = vpop.f32.mrf.mxu1  ;;  %v1801_v27 = vrot.slane %v1799_v1, 3 }
 0x10b   : > { %v720_v55 = vadd.f32 %v719_v51, %v614_v50  ;;  %v1205_v51 = vsel %vm1125_vm2, %v1195_v29, %v1204_v28 }
 0x10c   : > { %v14691_v0 = vadd.f32 %v1075_v43, %v884_v44  ;;  %1300 = vmatmul.bf16.gmra.mxu0 %v1196_v52  ;;  %v1802_v32 = vor.u32 %v1801_v27, %v1798_v26  ;;  %v1365_v52 = vsel %vm1348_vm3, %v1362_v30, %v1364_v23  ;;  %v13300_v30 = vld [vmem:[%s18197_s1 + $0x170] sm:$0xff]  ;;  %v2122_v27 = vld [vmem:[%s18202_s6 + $0x8] sm:$0xff]  ;;  %v2367_v23 = vrot.slane %v2365_v13, 1 }
 0x10d   : > { %1460 = vmatmul.bf16.gmra.mxu1 %v1363_v53  ;;  %v1925_v53 = vld [vmem:[%s14240_s21 + $0x10] sm:$0x8]  ;;  %3322 = vmatpush.bf16.msrb.mxu2 %v13300_v30 }
 0x10e   : > { %1675 = vmatmul.bf16.gmra.mxu2 %v1578_v25  ;;  %v1580_v25 = vsel %vm1348_vm3, %v1577_v33, %v1579_v31  ;;  %v1803_v54 = vsel %vm1723_vm4, %v1793_v34, %v1802_v32  ;;  %v1944_v9 = vunpack.c.l.b16 %v1925_v53  ;;  %v2121_v33 = vld [vmem:[%s18202_s6] sm:$0xff]  ;;  %v13315_v34 = vld [vmem:[%s18197_s1 + $0x1b0] sm:$0xff]  ;;  %v2655_v31 = vrot.slane %v13872_v16, 1 }
 0x10f   : > { %1898 = vmatmul.bf16.gmra.mxu3 %v1794_v58  ;;  %v14716_v58 = vld [vmem:[%s14240_s21 + $0x40] sm:$0xff]   ;;  %2139 = vperm.xlu0 %14080, %v2121_v33   ;;  %v2656_v32 = vrot.slane %v14721_v10, 1 }
 0x110   : > { %v2360_v29 = vshll.u32 %v14716_v58, 16  ;;  %3536 = vmatpush.bf16.msrb.mxu3 %v13315_v34 }
 0x111   : > { %v863_v2 = vpop.f32.mrf.mxu2  ;;  %v616_v11 = vpop.f32.mrf.mxu0  ;;  %v2657_v53 = vsel %vm750_vm1, %v2655_v31, %v2656_v32 }
 0x112   : > { %v1078_v3 = vpop.f32.mrf.mxu3  ;;  %v885_v4 = vadd.f32 %v863_v2, %v720_v55  ;;  %v721_v42 = vpop.f32.mrf.mxu1  ;;  %v1945_v2 = vpack.c.b16 %v1539_v57, %v1944_v9  ;;  %v2362_v12 = vrot.slane %v2360_v29, 1  ;;  %v13292_v57 = vld [vmem:[%s18197_s1 + $0x130] sm:$0xff]  ;;  %v13299_v9 = vld [vmem:[%s18197_s1 + $0x168] sm:$0xff] }
 0x113   : > { %v722_v14 = vadd.f32 %v721_v42, %v616_v11  ;;  %v2358_v42 = vshrl.u32 %v14716_v58, 16  ;;  %3164 = vmatpush.bf16.msrb.mxu1 %v13292_v57  ;;  %v13314_v29 = vld [vmem:[%s18197_s1 + $0x1a8] sm:$0xff]  ;;  %3323 = vmatpush.bf16.msrb.mxu2 %v13299_v9  ;;  %v13282_v9 = vld [vmem:[%s18197_s1 + $0xe0] sm:$0xff] }
 0x114   : > { %v14702_v19 = vadd.f32 %v1078_v3, %v885_v4  ;;  %v1947_v20 = vrot.slane %v1945_v2, 3  ;;  %3537 = vmatpush.bf16.msrb.mxu3 %v13314_v29  ;;  %v1952_v29 = vrot.slane %v14543_v5, 3 }
 0x115   : > { %v2363_v28 = vor.u32 %v2362_v12, %v2358_v42  ;;  %v1950_v42 = vrot.slane %v14516_v41, 3  ;;  %v2371_v12 = vor.u32 %v2369_v46, %v2367_v23 }
 0x117   : > { %2144 = vperm.xlu0 %14080, %v2122_v27  }
 0x119   : > { %v865_v37 = vpop.f32.mrf.mxu2  ;;  %v619_v44 = vpop.f32.mrf.mxu0 }
 0x11a   : > { %v1080_v38 = vpop.f32.mrf.mxu3  ;;  %v886_v43 = vadd.f32 %v865_v37, %v722_v14  ;;  %v724_v50 = vpop.f32.mrf.mxu1 }
 0x11b   : > { %v725_v55 = vadd.f32 %v724_v50, %v619_v44 }
 0x11c   : > { %v14718_v6 = vadd.f32 %v1080_v38, %v886_v43  ;;  %1305 = vmatmul.bf16.gmra.mxu0 %v1205_v51  ;;  %v1949_v51 = vsel %vm1946_vm5, %v1947_v20, %v1948_v21  ;;  %v1951_v20 = vsel %vm1946_vm5, %v1948_v21, %v1950_v42  ;;  %v13298_v21 = vld [vmem:[%s18197_s1 + $0x160] sm:$0xff] }
 0x11d   : > { %1465 = vmatmul.bf16.gmra.mxu1 %v1365_v52  ;;  %v2368_v52 = vsel %vm450_vm0, %v2363_v28, %v2367_v23  ;;  %3324 = vmatpush.bf16.msrb.mxu2 %v13298_v21  ;;  %v2125_v21 = vld [vmem:[%s18202_s6 + $0x20] sm:$0xff] }
 0x11e   : > { %1680 = vmatmul.bf16.gmra.mxu2 %v1580_v25  ;;  %2159 = vperm.xlu2 %14082, %v2125_v21  }
 0x11f   : > { %1903 = vmatmul.bf16.gmra.mxu3 %v1803_v54  ;;  %v14759_v54 = vld [vmem:[%s14240_s21 + $0x50] sm:$0xff] }
 0x120   : > { %v2373_v47 = vshll.u32 %v14759_v54, 16 }
 0x121   : > { %v868_v49 = vpop.f32.mrf.mxu2  ;;  %v621_v4 = vpop.f32.mrf.mxu0 }
 0x122   : > { %v1083_v1 = vpop.f32.mrf.mxu3  ;;  %v887_v3 = vadd.f32 %v868_v49, %v725_v55  ;;  %v726_v11 = vpop.f32.mrf.mxu1  ;;  %v2375_v13 = vrot.slane %v2373_v47, 1 }
 0x123   : > { %v727_v14 = vadd.f32 %v726_v11, %v621_v4  ;;  %v13291_v4 = vld [vmem:[%s18197_s1 + $0x128] sm:$0xff]  ;;  %v2124_v11 = vld [vmem:[%s18202_s6 + $0x18] sm:$0xff] }
 0x124   : > { %v14739_v26 = vadd.f32 %v1083_v1, %v887_v3  ;;  %v13283_v3 = vld [vmem:[%s18197_s1 + $0xe8] sm:$0xff]  ;;  %3165 = vmatpush.bf16.msrb.mxu1 %v13291_v4  ;;  %v2376_v28 = vsel %vm450_vm0, %v2371_v12, %v2375_v13  ;;  %v14823_v12 = vld [vmem:[%s14240_s21 + $0x60] sm:$0xff] }
 0x125   : > { %2944 = vmatpush.bf16.msrb.mxu0 %v13283_v3 }
 0x129   : > { %v870_v37 = vpop.f32.mrf.mxu2  ;;  %v1271_v44 = vpop.f32.mrf.mxu0  ;;  %2945 = vmatpush.bf16.msrb.mxu0 %v13282_v9 }
 0x12a   : > { %v1085_v38 = vpop.f32.mrf.mxu3  ;;  %v888_v43 = vadd.f32 %v870_v37, %v727_v14  ;;  %v1431_v50 = vpop.f32.mrf.mxu1  ;;  %v1311_v62 = vadd.f32 %v1271_v44, %v14528_v63  ;;  %v2123_v63 = vld [vmem:[%s18202_s6 + $0x10] sm:$0xff] }
 0x12b   : > { %2149 = vperm.xlu1 %14081, %v2123_v63   ;;  %v13290_v63 = vld [vmem:[%s18197_s1 + $0x120] sm:$0xff] }
 0x12c   : > { %v14756_v55 = vadd.f32 %v1085_v38, %v888_v43  ;;  %v1471_v25 = vadd.f32 %v1431_v50, %v1311_v62  ;;  %2028 = vmatmul.bf16.vlgmr.msra.gmra.mxu0 %v1949_v51  ;;  %v14795_v38 = vld [vmem:[%s14240_s21 + $0x58] sm:$0xff]  ;;  %3166 = vmatpush.bf16.msrb.mxu1 %v13290_v63 }
 0x12d   : > { %2489 = vmatmul.bf16.vlgmr.msra.gmra.mxu1 %v2368_v52  ;;  %v2381_v52 = vshll.u32 %v14795_v38, 16 }
 0x12e   : > { %2594 = vmatmul.bf16.vlgmr.msra.gmra.mxu2 %v14716_v58 }
 0x12f   : > { %2736 = vmatmul.bf16.vlgmr.msra.gmra.mxu3 %v2657_v53 }
 0x131   : > { %v1646_v30 = vpop.f32.mrf.mxu2  ;;  %v1273_v58 = vpop.f32.mrf.mxu0 }
 0x132   : > { %v1869_v33 = vpop.f32.mrf.mxu3  ;;  %v1686_v34 = vadd.f32 %v1646_v30, %v1471_v25  ;;  %v1433_v45 = vpop.f32.mrf.mxu1  ;;  %v1312_v49 = vadd.f32 %v1273_v58, %v14545_v17  ;;  %v2658_v17 = vrot.slane %v14759_v54, 1 }
 0x133   : > { %2154 = vperm.xlu1 %14081, %v2124_v11  }
 0x134   : > { %v14774_v1 = vadd.f32 %v1869_v33, %v1686_v34  ;;  %v1472_v2 = vadd.f32 %v1433_v45, %v1312_v49  ;;  %v2659_v41 = vsel %vm750_vm1, %v2656_v32, %v2658_v17  ;;  %v2383_v33 = vrot.slane %v2381_v52, 1 }
 0x135   : > { %v2660_v34 = vrot.slane %v14795_v38, 1  ;;  %v1953_v49 = vsel %vm1946_vm5, %v1950_v42, %v1952_v29  ;;  %v13297_v42 = vld [vmem:[%s18197_s1 + $0x158] sm:$0xff] }
 0x136   : > { %3325 = vmatpush.bf16.msrb.mxu2 %v13297_v42  ;;  %v13280_v42 = vld [vmem:[%s18197_s1 + $0xd0] sm:$0xff] }
 0x137   : > { %v2661_v5 = vsel %vm750_vm1, %v2658_v17, %v2660_v34 }
 0x139   : > { %v1648_v14 = vpop.f32.mrf.mxu2  ;;  %v1276_v57 = vpop.f32.mrf.mxu0 }
 0x13a   : > { %v1871_v16 = vpop.f32.mrf.mxu3  ;;  %v1687_v48 = vadd.f32 %v1648_v14, %v1472_v2  ;;  %v1436_v27 = vpop.f32.mrf.mxu1  ;;  %v1313_v31 = vadd.f32 %v1276_v57, %v14557_v36  ;;  %v13313_v36 = vld [vmem:[%s18197_s1 + $0x1a0] sm:$0xff]  ;;  %v2385_v57 = vshrl.u32 %v14795_v38, 16 }
 0x13b   : > { %3538 = vmatpush.bf16.msrb.mxu3 %v13313_v36  ;;  %v1954_v36 = vrot.slane %v14572_v22, 3 }
 0x13c   : > { %v14791_v23 = vadd.f32 %v1871_v16, %v1687_v48  ;;  %v1473_v37 = vadd.f32 %v1436_v27, %v1313_v31  ;;  %2033 = vmatmul.bf16.gmra.mxu0 %v1951_v20  ;;  %v2389_v27 = vshll.u32 %v14823_v12, 16 }
 0x13d   : > { %2494 = vmatmul.bf16.gmra.mxu1 %v2376_v28  ;;  %v1955_v22 = vsel %vm1946_vm5, %v1952_v29, %v1954_v36  ;;  %v13296_v29 = vld [vmem:[%s18197_s1 + $0x150] sm:$0xff] }
 0x13e   : > { %2599 = vmatmul.bf16.gmra.mxu2 %v14721_v10  ;;  %v2377_v10 = vshrl.u32 %v14759_v54, 16 }
 0x13f   : > { %2741 = vmatmul.bf16.gmra.mxu3 %v2659_v41  ;;  %v13281_v41 = vld [vmem:[%s18197_s1 + $0xd8] sm:$0xff]  ;;  %3326 = vmatpush.bf16.msrb.mxu2 %v13296_v29  ;;  %v2129_v29 = vld [vmem:[%s18202_s6 + $0x40] sm:$0xff] }
 0x140   : > { %v2379_v30 = vor.u32 %v2377_v10, %v2375_v13  ;;  %v13312_v13 = vld [vmem:[%s18197_s1 + $0x198] sm:$0xff]  ;;  %2946 = vmatpush.bf16.msrb.mxu0 %v13281_v41 }
 0x141   : > { %v1651_v32 = vpop.f32.mrf.mxu2  ;;  %v1278_v50 = vpop.f32.mrf.mxu0  ;;  %3539 = vmatpush.bf16.msrb.mxu3 %v13312_v13  ;;  %v2130_v13 = vld [vmem:[%s18202_s6 + $0x48] sm:$0xff] }
 0x142   : > { %v1874_v43 = vpop.f32.mrf.mxu3  ;;  %v1688_v44 = vadd.f32 %v1651_v32, %v1473_v37  ;;  %v1438_v51 = vpop.f32.mrf.mxu1  ;;  %v1314_v62 = vadd.f32 %v1278_v50, %v14574_v59  ;;  %v2384_v2 = vsel %vm450_vm0, %v2379_v30, %v2383_v33  ;;  %v13289_v37 = vld [vmem:[%s18197_s1 + $0x118] sm:$0xff]  ;;  %v2387_v32 = vor.u32 %v2385_v57, %v2383_v33 }
 0x143   : > { %3167 = vmatpush.bf16.msrb.mxu1 %v13289_v37 }
 0x144   : > { %v14806_v53 = vadd.f32 %v1874_v43, %v1688_v44  ;;  %v1474_v25 = vadd.f32 %v1438_v51, %v1314_v62  ;;  %v2391_v43 = vrot.slane %v2389_v27, 1  ;;  %v2662_v44 = vrot.slane %v14823_v12, 1  ;;  %2947 = vmatpush.bf16.msrb.mxu0 %v13280_v42 }
 0x146   : > { %v2663_v63 = vsel %vm750_vm1, %v2660_v34, %v2662_v44  ;;  %v13311_v34 = vld [vmem:[%s18197_s1 + $0x190] sm:$0xff] }
 0x147   : > { %3540 = vmatpush.bf16.msrb.mxu3 %v13311_v34 }
 0x149   : > { %v1653_v59 = vpop.f32.mrf.mxu2  ;;  %v1281_v46 = vpop.f32.mrf.mxu0 }
 0x14a   : > { %v1876_v58 = vpop.f32.mrf.mxu3  ;;  %v1689_v45 = vadd.f32 %v1653_v59, %v1474_v25  ;;  %v1441_v47 = vpop.f32.mrf.mxu1  ;;  %v1315_v3 = vadd.f32 %v1281_v46, %v14586_v15  ;;  %v2127_v15 = vld [vmem:[%s18202_s6 + $0x30] sm:$0xff]  ;;  %v2392_v25 = vsel %vm450_vm0, %v2387_v32, %v2391_v43  ;;  %v14861_v59 = vld [vmem:[%s14240_s21 + $0x68] sm:$0xff] }
 0x14b   : > { %2169 = vperm.xlu0 %14080, %v2127_v15   ;;  %v13288_v15 = vld [vmem:[%s18197_s1 + $0x110] sm:$0xff] }
 0x14c   : > { %v14820_v4 = vadd.f32 %v1876_v58, %v1689_v45  ;;  %v1475_v11 = vadd.f32 %v1441_v47, %v1315_v3  ;;  %2038 = vmatmul.bf16.gmra.mxu0 %v1953_v49  ;;  %v2393_v49 = vshrl.u32 %v14823_v12, 16  ;;  %3168 = vmatpush.bf16.msrb.mxu1 %v13288_v15 }
 0x14d   : > { %2499 = vmatmul.bf16.gmra.mxu1 %v2384_v2  ;;  %v2397_v2 = vshll.u32 %v14861_v59, 16 }
 0x14e   : > { %2604 = vmatmul.bf16.gmra.mxu2 %v14759_v54 }
 0x14f   : > { %2746 = vmatmul.bf16.gmra.mxu3 %v2661_v5 }
 0x151   : > { %v1656_v17 = vpop.f32.mrf.mxu2  ;;  %v1283_v54 = vpop.f32.mrf.mxu0 }
 0x152   : > { %v1879_v14 = vpop.f32.mrf.mxu3  ;;  %v1690_v16 = vadd.f32 %v1656_v17, %v1475_v11  ;;  %v1443_v48 = vpop.f32.mrf.mxu1  ;;  %v1316_v20 = vadd.f32 %v1283_v54, %v14603_v35  ;;  %v2128_v35 = vld [vmem:[%s18202_s6 + $0x38] sm:$0xff]  ;;  %v1956_v17 = vrot.slane %v14601_v39, 3 }
 0x153   : > { %2174 = vperm.xlu1 %14081, %v2128_v35   ;;  %2184 = vperm.xlu0 %14080, %v2130_v13   ;;  %v13310_v35 = vld [vmem:[%s18197_s1 + $0x188] sm:$0xff]  ;;  %v14931_v13 = vld [vmem:[%s14240_s21 + $0x78] sm:$0xff] }
 0x154   : > { %v14838_v28 = vadd.f32 %v1879_v14, %v1690_v16  ;;  %v1476_v31 = vadd.f32 %v1443_v48, %v1316_v20  ;;  %v2395_v14 = vor.u32 %v2393_v49, %v2391_v43  ;;  %v2399_v16 = vrot.slane %v2397_v2, 1  ;;  %v14896_v43 = vld [vmem:[%s14240_s21 + $0x70] sm:$0xff]  ;;  %3541 = vmatpush.bf16.msrb.mxu3 %v13310_v35 }
 0x156   : > { %v2400_v41 = vsel %vm450_vm0, %v2395_v14, %v2399_v16  ;;  %v13309_v14 = vld [vmem:[%s18197_s1 + $0x180] sm:$0xff] }
 0x158   : > { %3542 = vmatpush.bf16.msrb.mxu3 %v13309_v14 }
 0x159   : > { %v1658_v50 = vpop.f32.mrf.mxu2  ;;  %v1286_v52 = vpop.f32.mrf.mxu0 }
 0x15a   : > { %v1881_v51 = vpop.f32.mrf.mxu3  ;;  %v1691_v10 = vadd.f32 %v1658_v50, %v1476_v31  ;;  %v1446_v62 = vpop.f32.mrf.mxu1  ;;  %v1317_v9 = vadd.f32 %v1286_v52, %v14615_v60  ;;  %v2126_v60 = vld [vmem:[%s18202_s6 + $0x28] sm:$0xff]  ;;  %v1957_v31 = vsel %vm1946_vm5, %v1954_v36, %v1956_v17  ;;  %v2401_v52 = vshrl.u32 %v14861_v59, 16 }
 0x15b   : > { %2164 = vperm.xlu2 %14082, %v2126_v60   ;;  %v13295_v36 = vld [vmem:[%s18197_s1 + $0x148] sm:$0xff]  ;;  %v1958_v60 = vrot.slane %v14630_v56, 3 }
 0x15c   : > { %v14858_v30 = vadd.f32 %v1881_v51, %v1691_v10  ;;  %v1477_v33 = vadd.f32 %v1446_v62, %v1317_v9  ;;  %2043 = vmatmul.bf16.gmra.mxu0 %v1955_v22  ;;  %3327 = vmatpush.bf16.msrb.mxu2 %v13295_v36  ;;  %v2405_v62 = vshll.u32 %v14896_v43, 16  ;;  %v2403_v34 = vor.u32 %v2401_v52, %v2399_v16 }
 0x15d   : > { %2504 = vmatmul.bf16.gmra.mxu1 %v2392_v25  ;;  %v1959_v2 = vsel %vm1946_vm5, %v1956_v17, %v1958_v60  ;;  %v13294_v17 = vld [vmem:[%s18197_s1 + $0x140] sm:$0xff]  ;;  %v1960_v36 = vrot.slane %v14659_v8, 3 }
 0x15e   : > { %2609 = vmatmul.bf16.gmra.mxu2 %v14795_v38 }
 0x15f   : > { %2751 = vmatmul.bf16.gmra.mxu3 %v2663_v63  ;;  %v13279_v63 = vld [vmem:[%s18197_s1 + $0xc8] sm:$0xff] }
 0x160   : > { %2948 = vmatpush.bf16.msrb.mxu0 %v13279_v63  ;;  %3328 = vmatpush.bf16.msrb.mxu2 %v13294_v17  ;;  %v13332_v17 = vld [vmem:[%s18197_s1 + $0x238] sm:$0xff] }
 0x161   : > { %v1661_v58 = vpop.f32.mrf.mxu2  ;;  %v1288_v38 = vpop.f32.mrf.mxu0 }
 0x162   : > { %v1884_v45 = vpop.f32.mrf.mxu3  ;;  %v1692_v46 = vadd.f32 %v1661_v58, %v1477_v33  ;;  %v1448_v47 = vpop.f32.mrf.mxu1  ;;  %v1318_v3 = vadd.f32 %v1288_v38, %v14632_v18  ;;  %v2664_v18 = vrot.slane %v14861_v59, 1  ;;  %v13287_v33 = vld [vmem:[%s18197_s1 + $0x108] sm:$0xff]  ;;  %v2407_v58 = vrot.slane %v2405_v62, 1 }
 0x163   : > { %2179 = vperm.xlu2 %14082, %v2129_v29   ;;  %3169 = vmatpush.bf16.msrb.mxu1 %v13287_v33  ;;  %v1961_v62 = vsel %vm1946_vm5, %v1958_v60, %v1960_v36  ;;  %v13349_v60 = vld [vmem:[%s18197_s1 + $0x78] sm:$0xff] }
 0x164   : > { %v14876_v5 = vadd.f32 %v1884_v45, %v1692_v46  ;;  %v1478_v11 = vadd.f32 %v1448_v47, %v1318_v3  ;;  %v2665_v39 = vsel %vm750_vm1, %v2662_v44, %v2664_v18  ;;  %v2408_v3 = vsel %vm450_vm0, %v2403_v34, %v2407_v58  ;;  %4279 = vmatpush.bf16.msra.mxu2 %v13349_v60 }
 0x169   : > { %v1663_v54 = vpop.f32.mrf.mxu2  ;;  %v1291_v27 = vpop.f32.mrf.mxu0 }
 0x16a   : > { %v1886_v48 = vpop.f32.mrf.mxu3  ;;  %v1693_v57 = vadd.f32 %v1663_v54, %v1478_v11  ;;  %v1451_v20 = vpop.f32.mrf.mxu1  ;;  %v1319_v37 = vadd.f32 %v1291_v27, %v14644_v40  ;;  %v2131_v40 = vld [vmem:[%s18202_s6 + $0x50] sm:$0xff]  ;;  %v2413_v27 = vshll.u32 %v14931_v13, 16 }
 0x16b   : > { %2189 = vperm.xlu1 %14081, %v2131_v40  }
 0x16c   : > { %v14893_v21 = vadd.f32 %v1886_v48, %v1693_v57  ;;  %v1479_v32 = vadd.f32 %v1451_v20, %v1319_v37  ;;  %2048 = vmatmul.bf16.gmra.mxu0 %v1957_v31  ;;  %v2409_v57 = vshrl.u32 %v14896_v43, 16  ;;  %v13278_v37 = vld [vmem:[%s18197_s1 + $0xc0] sm:$0xff]  ;;  %v2415_v35 = vrot.slane %v2413_v27, 1 }
 0x16d   : > { %2509 = vmatmul.bf16.gmra.mxu1 %v2400_v41  ;;  %2949 = vmatpush.bf16.msrb.mxu0 %v13278_v37 }
 0x16e   : > { %2614 = vmatmul.bf16.gmra.mxu2 %v14823_v12  ;;  %v2411_v40 = vor.u32 %v2409_v57, %v2407_v58  ;;  %v13341_v58 = vld [vmem:[%s18197_s1 + $0x38] sm:$0xff] }
 0x16f   : > { %2756 = vmatmul.bf16.gmra.mxu3 %v2665_v39  ;;  %v13286_v39 = vld [vmem:[%s18197_s1 + $0x100] sm:$0xff] }
 0x170   : > { %3170 = vmatpush.bf16.msrb.mxu1 %v13286_v39  ;;  %4348 = vmatpush.bf16.msra.mxu3 %v13341_v58 }
 0x171   : > { %v1666_v44 = vpop.f32.mrf.mxu2  ;;  %v1293_v12 = vpop.f32.mrf.mxu0 }
 0x172   : > { %v1889_v50 = vpop.f32.mrf.mxu3  ;;  %v1694_v51 = vadd.f32 %v1666_v44, %v1479_v32  ;;  %v1453_v10 = vpop.f32.mrf.mxu1  ;;  %v1320_v22 = vadd.f32 %v1293_v12, %v14661_v7  ;;  %v2666_v7 = vrot.slane %v14896_v43, 1  ;;  %v2134_v32 = vld [vmem:[%s18202_s6 + $0x68] sm:$0xff]  ;;  %v2297_v44 = vld [vmem:[%s14240_s21 + $0x80] sm:$0x1] }
 0x173   : > { %2204 = vperm.xlu1 %14081, %v2134_v32  }
 0x174   : > { %v14911_v25 = vadd.f32 %v1889_v50, %v1694_v51  ;;  %v1480_v9 = vadd.f32 %v1453_v10, %v1320_v22  ;;  %v2667_v56 = vsel %vm750_vm1, %v2664_v18, %v2666_v7  ;;  %v2416_v22 = vsel %vm450_vm0, %v2411_v40, %v2415_v35  ;;  %3914 = vmatpush.bf16.msra.mxu1 %v13332_v17 }
 0x179   : > { %v1668_v45 = vpop.f32.mrf.mxu2  ;;  %v1296_v47 = vpop.f32.mrf.mxu0 }
 0x17a   : > { %v1891_v46 = vpop.f32.mrf.mxu3  ;;  %v1695_v38 = vadd.f32 %v1668_v45, %v1480_v9  ;;  %v1456_v49 = vpop.f32.mrf.mxu1  ;;  %v1321_v11 = vadd.f32 %v1296_v47, %v14674_v24  ;;  %v2133_v24 = vld [vmem:[%s18202_s6 + $0x60] sm:$0xff]  ;;  %v2347_v9 = vunpack.c.l.b16 %v2297_v44  ;;  %v2417_v47 = vshrl.u32 %v14931_v13, 16 }
 0x17b   : > { %2199 = vperm.xlu0 %14080, %v2133_v24   ;;  %v2136_v24 = vld [vmem:[%s18202_s6 + $0x78] sm:$0xff] }
 0x17c   : > { %v14928_v42 = vadd.f32 %v1891_v46, %v1695_v38  ;;  %v1481_v15 = vadd.f32 %v1456_v49, %v1321_v11  ;;  %2053 = vmatmul.bf16.gmra.mxu0 %v1959_v2  ;;  %v2356_v34 = vpack.c.b16 %v2347_v9, %v2347_v9  ;;  %v2793_v2 = vld [vmem:[%s14240_s21 + $0x48] sm:$0xe]  ;;  %v13340_v9 = vld [vmem:[%s18197_s1 + $0x30] sm:$0xff] }
 0x17d   : > { %2514 = vmatmul.bf16.gmra.mxu1 %v2408_v3  ;;  %v2794_v3 = vld [vmem:[%s14240_s21 + $0x4c] sm:$0xf]  ;;  %4349 = vmatpush.bf16.msra.mxu3 %v13340_v9 }
 0x17e   : > { %2619 = vmatmul.bf16.gmra.mxu2 %v14861_v59  ;;  %v2421_v49 = vshll.u32 %v2356_v34, 16 }
 0x17f   : > { %2761 = vmatmul.bf16.gmra.mxu3 %v2667_v56 }
 0x181   : > { %v1671_v16 = vpop.f32.mrf.mxu2  ;;  %v1298_v59 = vpop.f32.mrf.mxu0 }
 0x182   : > { %v1894_v18 = vpop.f32.mrf.mxu3  ;;  %v1696_v54 = vadd.f32 %v1671_v16, %v1481_v15  ;;  %v1458_v48 = vpop.f32.mrf.mxu1  ;;  %v1322_v20 = vadd.f32 %v1298_v59, %v14691_v0  ;;  %v2668_v0 = vrot.slane %v14931_v13, 1  ;;  %v13324_v15 = vld [vmem:[%s18197_s1 + $0x1f8] sm:$0xff]  ;;  %v2843_v16 = vunpack.c.l.b16 %v2793_v2 }
 0x183   : > { %2214 = vperm.xlu0 %14080, %v2136_v24   ;;  %v2423_v59 = vrot.slane %v2421_v49, 1  ;;  %3756 = vmatpush.bf16.msra.mxu0 %v13324_v15  ;;  %v15022_v49 = vld [vmem:[%s14240_s21 + $0x58] sm:$0xff]  ;;  %v13331_v15 = vld [vmem:[%s18197_s1 + $0x230] sm:$0xff] }
 0x184   : > { %v14946_v31 = vadd.f32 %v1894_v18, %v1696_v54  ;;  %v1482_v41 = vadd.f32 %v1458_v48, %v1322_v20  ;;  %v2669_v63 = vsel %vm750_vm1, %v2666_v7, %v2668_v0  ;;  %v2844_v18 = vunpack.c.l.b16 %v2794_v3  ;;  %3915 = vmatpush.bf16.msra.mxu1 %v13331_v15 }
 0x185   : > { %v2419_v54 = vor.u32 %v2417_v47, %v2415_v35  ;;  %v2670_v48 = vrot.slane %v2356_v34, 1 }
 0x186   : > { %v14992_v20 = vpack.c.b16 %v2844_v18, %v2843_v16 }
 0x187   : > { %v2424_v40 = vsel %vm450_vm0, %v2419_v54, %v2423_v59  ;;  %v2671_v44 = vsel %vm750_vm1, %v2668_v0, %v2670_v48  ;;  %v3463_v48 = vrot.slane %v15022_v49, 2 }
 0x188   : > { %v2869_v24 = vrot.slane %v14992_v20, 1 }
 0x189   : > { %v1673_v50 = vpop.f32.mrf.mxu2  ;;  %v1301_v10 = vpop.f32.mrf.mxu0 }
 0x18a   : > { %v1896_v51 = vpop.f32.mrf.mxu3  ;;  %v1697_v12 = vadd.f32 %v1673_v50, %v1482_v41  ;;  %v1461_v52 = vpop.f32.mrf.mxu1  ;;  %v1323_v8 = vadd.f32 %v1301_v10, %v14702_v19  ;;  %v2132_v19 = vld [vmem:[%s18202_s6 + $0x58] sm:$0xff]  ;;  %v15006_v10 = vld [vmem:[%s14240_s21 + $0x54] sm:$0xf] }
 0x18b   : > { %2194 = vperm.xlu2 %14082, %v2132_v19  }
 0x18c   : > { %v14964_v33 = vadd.f32 %v1896_v51, %v1697_v12  ;;  %v1483_v29 = vadd.f32 %v1461_v52, %v1323_v8  ;;  %2058 = vmatmul.bf16.gmra.mxu0 %v1961_v62  ;;  %v3228_v51 = vld [vmem:[%s14240_s21 + $0x48] sm:$0xc]  ;;  %v3386_v12 = vld [vmem:[%s14240_s21 + $0x50] sm:$0xc]  ;;  %v3028_v62 = vshrl.u32 %v14992_v20, 16 }
 0x18d   : > { %2519 = vmatmul.bf16.gmra.mxu1 %v2416_v22  ;;  %v13348_v22 = vld [vmem:[%s18197_s1 + $0x70] sm:$0xff]  ;;  %v3246_v8 = vunpack.c.l.b16 %v3228_v51 }
 0x18e   : > { %2624 = vmatmul.bf16.gmra.mxu2 %v14896_v43  ;;  %v3030_v60 = vrot.slane %v3028_v62, 1  ;;  %v15062_v62 = vld [vmem:[%s18198_s2] ss:$0 sm:$0xff] }
 0x18f   : > { %2766 = vmatmul.bf16.gmra.mxu3 %v2669_v63  ;;  %v3436_v63 = vunpack.c.l.b16 %v3386_v12  ;;  %4280 = vmatpush.bf16.msra.mxu2 %v13348_v22  ;;  %v3247_v47 = vpack.c.b16 %v2844_v18, %v3246_v8  ;;  %v2140_v12 = vpop.permute.xlu0 %2139 }
 0x191   : > { %v1676_v43 = vpop.f32.mrf.mxu2  ;;  %v1303_v46 = vpop.f32.mrf.mxu0 }
 0x192   : > { %v1899_v7 = vpop.f32.mrf.mxu3  ;;  %v1698_v45 = vadd.f32 %v1676_v43, %v1483_v29  ;;  %v1463_v38 = vpop.f32.mrf.mxu1  ;;  %v1324_v11 = vadd.f32 %v1303_v46, %v14718_v6  ;;  %v1962_v6 = vrot.slane %v14689_v61, 3  ;;  %v14997_v61 = vld [vmem:[%s14240_s21 + $0x50] sm:$0xff] }
 0x193   : > { %v3039_v0 = vshll.u32 %v14997_v61, 16  ;;  %v3249_v54 = vrot.slane %v14997_v61, 2 }
 0x194   : > { %v14980_v56 = vadd.f32 %v1899_v7, %v1698_v45  ;;  %v1484_v14 = vadd.f32 %v1463_v38, %v1324_v11  ;;  %v1963_v32 = vsel %vm1946_vm5, %v1960_v36, %v1962_v6  ;;  %v3031_v36 = vshll.u32 %v14992_v20, 16  ;;  %v13323_v11 = vld [vmem:[%s18197_s1 + $0x1f0] sm:$0xff] }
 0x195   : > { %v3041_v46 = vrot.slane %v3039_v0, 2  ;;  %3757 = vmatpush.bf16.msra.mxu0 %v13323_v11  ;;  %v3248_v6 = vrot.slane %v3247_v47, 2  ;;  %v13347_v0 = vld [vmem:[%s18197_s1 + $0x68] sm:$0xff] }
 0x196   : > { %v3033_v7 = vrot.slane %v3031_v36, 2  ;;  %4281 = vmatpush.bf16.msra.mxu2 %v13347_v0 }
 0x197   : > { %v2145_v11 = vpop.permute.xlu0 %2144 }
 0x198   : > { %v3034_v16 = vor.u32 %v3033_v7, %v3030_v60 }
 0x199   : > { %v1678_v57 = vpop.f32.mrf.mxu2  ;;  %v1306_v37 = vpop.f32.mrf.mxu0 }
 0x19a   : > { %v1901_v27 = vpop.f32.mrf.mxu3  ;;  %v1699_v41 = vadd.f32 %v1678_v57, %v1484_v14  ;;  %v1466_v39 = vpop.f32.mrf.mxu1  ;;  %v1325_v35 = vadd.f32 %v1306_v37, %v14739_v26  ;;  %v3036_v26 = vshrl.u32 %v14997_v61, 16  ;;  %v2870_v14 = vrot.slane %v14997_v61, 1 }
 0x19c   : > { %v15001_v50 = vadd.f32 %v1901_v27, %v1699_v41  ;;  %v1485_v52 = vadd.f32 %v1466_v39, %v1325_v35  ;;  %2063 = vmatmul.bf16.gmra.mxu0 %v1963_v32  ;;  %v3038_v45 = vrot.slane %v3036_v26, 1  ;;  %v2871_v39 = vsel %vm750_vm1, %v2869_v24, %v2870_v14 }
 0x19d   : > { %2524 = vmatmul.bf16.gmra.mxu1 %v2424_v40  ;;  %v15052_v40 = vld [vmem:[%s14240_s21 + $0x58] sm:$0xff]  ;;  %v3250_v35 = vsel %vm1348_vm3, %v3248_v6, %v3249_v54  ;;  %v2150_v61 = vpop.permute.xlu1 %2149 }
 0x19e   : > { %2629 = vmatmul.bf16.gmra.mxu2 %v14931_v13  ;;  %v3437_v13 = vunpack.c.l.b16 %v15006_v10  ;;  %v15041_v18 = vor.u32 %v3041_v46, %v3038_v45  ;;  %v3045_v36 = vshrl.u32 %v15052_v40, 16  ;;  %v3048_v26 = vshll.u32 %v15052_v40, 16  ;;  %v13322_v45 = vld [vmem:[%s18197_s1 + $0x1e8] sm:$0xff] }
 0x19f   : > { %2771 = vmatmul.bf16.gmra.mxu3 %v2671_v44  ;;  %v13330_v46 = vld [vmem:[%s18197_s1 + $0x228] sm:$0xff]  ;;  %v2872_v15 = vrot.slane %v15052_v40, 1  ;;  %3758 = vmatpush.bf16.msra.mxu0 %v13322_v45 }
 0x1a0   : > { %v15026_v2 = vpack.c.b16 %v3437_v13, %v3436_v63  ;;  %v3043_v32 = vsel %vm1125_vm2, %v3034_v16, %v15041_v18  ;;  %v3047_v60 = vrot.slane %v3045_v36, 1  ;;  %3916 = vmatpush.bf16.msra.mxu1 %v13330_v46 }
 0x1a1   : > { %v1681_v29 = vpop.f32.mrf.mxu2  ;;  %v1308_v58 = vpop.f32.mrf.mxu0 }
 0x1a2   : > { %v1904_v34 = vpop.f32.mrf.mxu3  ;;  %v1700_v19 = vadd.f32 %v1681_v29, %v1485_v52  ;;  %v1468_v43 = vpop.f32.mrf.mxu1  ;;  %v1326_v38 = vadd.f32 %v1308_v58, %v14756_v55  ;;  %v2135_v55 = vld [vmem:[%s18202_s6 + $0x70] sm:$0xff]  ;;  %v3462_v59 = vrot.slane %v15026_v2, 2 }
 0x1a3   : > { %2209 = vperm.xlu2 %14082, %v2135_v55  }
 0x1a4   : > { %v15028_v3 = vadd.f32 %v1904_v34, %v1700_v19  ;;  %v1486_v17 = vadd.f32 %v1468_v43, %v1326_v38  ;;  %v3464_v44 = vsel %vm1348_vm3, %v3462_v59, %v3463_v48  ;;  %v3050_v19 = vrot.slane %v3048_v26, 2  ;;  %v15075_v43 = vld [vmem:[%s14240_s21 + $0x60] sm:$0xff] }
 0x1a5   : > { %v3465_v24 = vrot.slane %v15075_v43, 2 }
 0x1a9   : > { %v1683_v57 = vpop.f32.mrf.mxu2  ;;  %v2029_v37 = vpop.f32.mrf.mxu0 }
 0x1aa   : > { %v1906_v27 = vpop.f32.mrf.mxu3  ;;  %v1701_v41 = vadd.f32 %v1683_v57, %v1486_v17  ;;  %v2490_v20 = vpop.f32.mrf.mxu1  ;;  %v2069_v52 = vadd.f32 %v2029_v37, %v14774_v1  ;;  %v13339_v1 = vld [vmem:[%s18197_s1 + $0x28] sm:$0xff]  ;;  %v3251_v17 = vrot.slane %v15052_v40, 2 }
 0x1ab   : > { %4350 = vmatpush.bf16.msra.mxu3 %v13339_v1 }
 0x1ac   : > { %v15056_v51 = vadd.f32 %v1906_v27, %v1701_v41  ;;  %2950 = vmatmul.bf16.vlgmr.msrb.gmra.mxu0 %v2871_v39  ;;  %v2089_v22 = vadd.f32 %v15062_v62, %v2069_v52 }
 0x1ad   : > { %3171 = vmatmul.bf16.vlgmr.msrb.gmra.mxu1 %v3043_v32  ;;  %v15100_v32 = vld [vmem:[%s14240_s21 + $0x60] sm:$0xff] }
 0x1ae   : > { %3329 = vmatmul.bf16.vlgmr.msrb.gmra.mxu2 %v3250_v35  ;;  %v2105_v38 = vmax.f32 %v2089_v22, 0.0  ;;  %v3057_v36 = vshll.u32 %v15100_v32, 16 }
 0x1af   : > { %3543 = vmatmul.bf16.vlgmr.msrb.gmra.mxu3 %v3464_v44  ;;  %v3252_v44 = vsel %vm1348_vm3, %v3249_v54, %v3251_v17  ;;  %v13346_v54 = vld [vmem:[%s18197_s1 + $0x60] sm:$0xff] }
 0x1b0   : > { %v2217_v16 = vmul.f32 %v2140_v12, %v2105_v38  ;;  %v3466_v12 = vsel %vm1348_vm3, %v3463_v48, %v3465_v24  ;;  %v13338_v48 = vld [vmem:[%s18197_s1 + $0x20] sm:$0xff]  ;;  %4282 = vmatpush.bf16.msra.mxu2 %v13346_v54  ;;  %v2155_v38 = vpop.permute.xlu1 %2154 }
 0x1b1   : > { %v2595_v9 = vpop.f32.mrf.mxu2  ;;  %v2031_v29 = vpop.f32.mrf.mxu0  ;;  %4351 = vmatpush.bf16.msra.mxu3 %v13338_v48 }
 0x1b2   : > { %v2737_v8 = vpop.f32.mrf.mxu3  ;;  %v2596_v63 = vadd.f32 %v2595_v9, %v2490_v20  ;;  %v2492_v34 = vpop.f32.mrf.mxu1  ;;  %v2070_v58 = vadd.f32 %v2031_v29, %v14791_v23  ;;  %v15087_v23 = vor.u32 %v3050_v19, %v3047_v60  ;;  %v2873_v20 = vsel %vm750_vm1, %v2870_v14, %v2872_v15  ;;  %v13321_v19 = vld [vmem:[%s18197_s1 + $0x1e0] sm:$0xff] }
 0x1b3   : > { %3759 = vmatpush.bf16.msra.mxu0 %v13321_v19  ;;  %v4017_v19 = vld [vmem:[%s18202_s6 + $0x90] sm:$0xff] }
 0x1b4   : > { %v15077_v7 = vadd.f32 %v2737_v8, %v2596_v63  ;;  %v2090_v47 = vadd.f32 %v15062_v62, %v2070_v58  ;;  %v3052_v39 = vsel %vm1125_vm2, %v15041_v18, %v15087_v23  ;;  %v3054_v18 = vshrl.u32 %v15100_v32, 16  ;;  %v13329_v58 = vld [vmem:[%s18197_s1 + $0x220] sm:$0xff]  ;;  %4043 = vperm.xlu0 %14080, %v4017_v19  }
 0x1b5   : > { %v3059_v63 = vrot.slane %v3057_v36, 2  ;;  %3917 = vmatpush.bf16.msra.mxu1 %v13329_v58  ;;  %v13345_v36 = vld [vmem:[%s18197_s1 + $0x58] sm:$0xff] }
 0x1b6   : > { %v2106_v55 = vmax.f32 %v2090_v47, 0.0  ;;  %v3056_v8 = vrot.slane %v3054_v18, 1  ;;  %v2874_v47 = vrot.slane %v15100_v32, 1  ;;  %v2160_v18 = vpop.permute.xlu2 %2159  ;;  %4283 = vmatpush.bf16.msra.mxu2 %v13345_v36  ;;  %v13328_v58 = vld [vmem:[%s18197_s1 + $0x218] sm:$0xff]  ;;  %v4015_v36 = vld [vmem:[%s18202_s6 + $0x80] sm:$0xff] }
 0x1b7   : > { %4033 = vperm.xlu1 %14081, %v4015_v36  }
 0x1b8   : > { %v2218_v6 = vmul.f32 %v2145_v11, %v2106_v55  ;;  %v3253_v55 = vrot.slane %v15100_v32, 2  ;;  %v4020_v32 = vld [vmem:[%s18202_s6 + $0xa8] sm:$0xff] }
 0x1b9   : > { %v2597_v59 = vpop.f32.mrf.mxu2  ;;  %v2034_v41 = vpop.f32.mrf.mxu0  ;;  %3918 = vmatpush.bf16.msra.mxu1 %v13328_v58  ;;  %v13319_v58 = vld [vmem:[%s18197_s1 + $0x1d0] sm:$0xff] }
 0x1ba   : > { %v2739_v57 = vpop.f32.mrf.mxu3  ;;  %v2598_v27 = vadd.f32 %v2597_v59, %v2492_v34  ;;  %v2495_v37 = vpop.f32.mrf.mxu1  ;;  %v13679_v35 = vpack.c.bf16 %v2218_v6, %v2217_v16  ;;  %v2071_v14 = vadd.f32 %v2034_v41, %v14806_v53  ;;  %v15122_v34 = vld [vmem:[%s14240_s21 + $0x68] sm:$0xff] }
 0x1bb   : > { %v3467_v16 = vrot.slane %v15122_v34, 2 }
 0x1bc   : > { %v15108_v52 = vadd.f32 %v2739_v57, %v2598_v27  ;;  %13861 = vst [vmem:[#allocation2 + $0x10] sm:$0xff] %v13679_v35   ;;  %2955 = vmatmul.bf16.gmra.mxu0 %v2873_v20  ;;  %v2091_v53 = vadd.f32 %v15062_v62, %v2071_v14  ;;  %4058 = vperm.xlu0 %14080, %v4020_v32  }
 0x1bd   : > { %3176 = vmatmul.bf16.gmra.mxu1 %v3052_v39  ;;  %v2875_v39 = vsel %vm750_vm1, %v2872_v15, %v2874_v47  ;;  %v3468_v14 = vsel %vm1348_vm3, %v3465_v24, %v3467_v16  ;;  %v13337_v24 = vld [vmem:[%s18197_s1 + $0x18] sm:$0xff] }
 0x1be   : > { %3334 = vmatmul.bf16.gmra.mxu2 %v3252_v44  ;;  %v2107_v45 = vmax.f32 %v2091_v53, 0.0  ;;  %v15147_v44 = vld [vmem:[%s14240_s21 + $0x68] sm:$0xff]  ;;  %4352 = vmatpush.bf16.msra.mxu3 %v13337_v24  ;;  %v13336_v24 = vld [vmem:[%s18197_s1 + $0x10] sm:$0xff] }
 0x1bf   : > { %3548 = vmatmul.bf16.gmra.mxu3 %v3466_v12  ;;  %v3063_v40 = vshrl.u32 %v15147_v44, 16 }
 0x1c0   : > { %v2219_v6 = vmul.f32 %v2150_v61, %v2107_v45  ;;  %v3254_v61 = vsel %vm1348_vm3, %v3251_v17, %v3253_v55  ;;  %v3066_v17 = vshll.u32 %v15147_v44, 16 }
 0x1c1   : > { %v2600_v26 = vpop.f32.mrf.mxu2  ;;  %v2036_v22 = vpop.f32.mrf.mxu0 }
 0x1c2   : > { %v2742_v0 = vpop.f32.mrf.mxu3  ;;  %v2601_v1 = vadd.f32 %v2600_v26, %v2495_v37  ;;  %v2497_v9 = vpop.f32.mrf.mxu1  ;;  %v2072_v29 = vadd.f32 %v2036_v22, %v14820_v4  ;;  %v15134_v4 = vor.u32 %v3059_v63, %v3056_v8  ;;  %v3068_v22 = vrot.slane %v3066_v17, 2  ;;  %v15173_v8 = vld [vmem:[%s14240_s21 + $0x70] sm:$0xff]  ;;  %4353 = vmatpush.bf16.msra.mxu3 %v13336_v24 }
 0x1c4   : > { %v15124_v60 = vadd.f32 %v2742_v0, %v2601_v1  ;;  %v2092_v46 = vadd.f32 %v15062_v62, %v2072_v29  ;;  %v3061_v35 = vsel %vm1125_vm2, %v15087_v23, %v15134_v4  ;;  %v3065_v1 = vrot.slane %v3063_v40, 1  ;;  %v13320_v29 = vld [vmem:[%s18197_s1 + $0x1d8] sm:$0xff] }
 0x1c5   : > { %3760 = vmatpush.bf16.msra.mxu0 %v13320_v29  ;;  %v15233_v29 = vld [vmem:[%s14240_s21 + $0x78] sm:$0xff] }
 0x1c6   : > { %v2108_v11 = vmax.f32 %v2092_v46, 0.0 }
 0x1c8   : > { %v2220_v59 = vmul.f32 %v2155_v38, %v2108_v11  ;;  %v2876_v38 = vrot.slane %v15147_v44, 1  ;;  %v15188_v11 = vor.u32 %v3068_v22, %v3065_v1 }
 0x1c9   : > { %v2602_v57 = vpop.f32.mrf.mxu2  ;;  %v2039_v37 = vpop.f32.mrf.mxu0  ;;  %3761 = vmatpush.bf16.msra.mxu0 %v13319_v58 }
 0x1ca   : > { %v2744_v27 = vpop.f32.mrf.mxu3  ;;  %v2603_v41 = vadd.f32 %v2602_v57, %v2497_v9  ;;  %v2500_v20 = vpop.f32.mrf.mxu1  ;;  %v13684_v12 = vpack.c.bf16 %v2220_v59, %v2219_v6  ;;  %v2073_v23 = vadd.f32 %v2039_v37, %v14838_v28  ;;  %v3255_v59 = vrot.slane %v15147_v44, 2  ;;  %v4026_v44 = vld [vmem:[%s18202_s6 + $0xd8] sm:$0xff] }
 0x1cb   : > { %v3469_v57 = vrot.slane %v15173_v8, 2 }
 0x1cc   : > { %v15159_v15 = vadd.f32 %v2744_v27, %v2603_v41  ;;  %13862 = vst [vmem:[#allocation2 + $0x18] sm:$0xff] %v13684_v12   ;;  %2960 = vmatmul.bf16.gmra.mxu0 %v2875_v39  ;;  %v2093_v28 = vadd.f32 %v15062_v62, %v2073_v23  ;;  %v15201_v23 = vld [vmem:[%s14240_s21 + $0x70] sm:$0xff] }
 0x1cd   : > { %3181 = vmatmul.bf16.gmra.mxu1 %v3061_v35  ;;  %v3470_v17 = vsel %vm1348_vm3, %v3467_v16, %v3469_v57  ;;  %v3075_v16 = vshll.u32 %v15201_v23, 16 }
 0x1ce   : > { %3339 = vmatmul.bf16.gmra.mxu2 %v3254_v61  ;;  %v2109_v45 = vmax.f32 %v2093_v28, 0.0  ;;  %v2877_v61 = vsel %vm750_vm1, %v2874_v47, %v2876_v38 }
 0x1cf   : > { %3553 = vmatmul.bf16.gmra.mxu3 %v3468_v14  ;;  %v3070_v14 = vsel %vm1125_vm2, %v15134_v4, %v15188_v11  ;;  %v3077_v22 = vrot.slane %v3075_v16, 2  ;;  %v15264_v16 = vld [vmem:[%s14240_s21 + $0x78] sm:$0xff] }
 0x1d0   : > { %v2221_v27 = vmul.f32 %v2160_v18, %v2109_v45  ;;  %v3256_v18 = vsel %vm1348_vm3, %v3253_v55, %v3255_v59  ;;  %v3072_v55 = vshrl.u32 %v15201_v23, 16  ;;  %v4018_v45 = vld [vmem:[%s18202_s6 + $0x98] sm:$0xff] }
 0x1d1   : > { %v2605_v54 = vpop.f32.mrf.mxu2  ;;  %v2041_v26 = vpop.f32.mrf.mxu0  ;;  %4048 = vperm.xlu1 %14081, %v4018_v45  }
 0x1d2   : > { %v2747_v48 = vpop.f32.mrf.mxu3  ;;  %v2606_v53 = vadd.f32 %v2605_v54, %v2500_v20  ;;  %v2502_v0 = vpop.f32.mrf.mxu1  ;;  %v2074_v9 = vadd.f32 %v2041_v26, %v14858_v30  ;;  %v3074_v1 = vrot.slane %v3072_v55, 1 }
 0x1d3   : > { %v2165_v30 = vpop.permute.xlu2 %2164 }
 0x1d4   : > { %v15175_v63 = vadd.f32 %v2747_v48, %v2606_v53  ;;  %v2094_v46 = vadd.f32 %v15062_v62, %v2074_v9 }
 0x1d6   : > { %v2110_v6 = vmax.f32 %v2094_v46, 0.0  ;;  %v4023_v46 = vld [vmem:[%s18202_s6 + $0xc0] sm:$0xff] }
 0x1d7   : > { %4073 = vperm.xlu0 %14080, %v4023_v46  }
 0x1d8   : > { %v2222_v41 = vmul.f32 %v2165_v30, %v2110_v6 }
 0x1d9   : > { %v2607_v37 = vpop.f32.mrf.mxu2  ;;  %v2044_v35 = vpop.f32.mrf.mxu0 }
 0x1da   : > { %v2749_v20 = vpop.f32.mrf.mxu3  ;;  %v2608_v39 = vadd.f32 %v2607_v37, %v2502_v0  ;;  %v2505_v12 = vpop.f32.mrf.mxu1  ;;  %v13689_v40 = vpack.c.bf16 %v2222_v41, %v2221_v27  ;;  %v2075_v4 = vadd.f32 %v2044_v35, %v14876_v5  ;;  %v13344_v5 = vld [vmem:[%s18197_s1 + $0x50] sm:$0xff]  ;;  %v2878_v37 = vrot.slane %v15201_v23, 1 }
 0x1db   : > { %4284 = vmatpush.bf16.msra.mxu2 %v13344_v5  ;;  %v2170_v27 = vpop.permute.xlu0 %2169  ;;  %v2175_v41 = vpop.permute.xlu1 %2174  ;;  %v3257_v35 = vrot.slane %v15201_v23, 2  ;;  %v4027_v23 = vld [vmem:[%s18202_s6 + $0xe0] sm:$0xff] }
 0x1dc   : > { %v15213_v47 = vadd.f32 %v2749_v20, %v2608_v39  ;;  %13863 = vst [vmem:[#allocation2 + $0x20] sm:$0xff] %v13689_v40   ;;  %2965 = vmatmul.bf16.gmra.mxu0 %v2877_v61  ;;  %v2095_v28 = vadd.f32 %v15062_v62, %v2075_v4  ;;  %v15251_v20 = vor.u32 %v3077_v22, %v3074_v1 }
 0x1dd   : > { %3186 = vmatmul.bf16.gmra.mxu1 %v3070_v14  ;;  %v2879_v32 = vsel %vm750_vm1, %v2876_v38, %v2878_v37  ;;  %v3258_v24 = vsel %vm1348_vm3, %v3255_v59, %v3257_v35  ;;  %v3081_v59 = vshrl.u32 %v15264_v16, 16 }
 0x1de   : > { %3344 = vmatmul.bf16.gmra.mxu2 %v3256_v18  ;;  %v2111_v30 = vmax.f32 %v2095_v28, 0.0  ;;  %v3079_v55 = vsel %vm1125_vm2, %v15188_v11, %v15251_v20 }
 0x1df   : > { %3558 = vmatmul.bf16.gmra.mxu3 %v3470_v17  ;;  %4088 = vperm.xlu0 %14080, %v4026_v44   ;;  %v3083_v58 = vrot.slane %v3081_v59, 1 }
 0x1e0   : > { %v2223_v61 = vmul.f32 %v2170_v27, %v2111_v30  ;;  %v15296_v30 = vld [vmem:[%s14240_s21 + $0x80] sm:$0xff]  ;;  %v4024_v27 = vld [vmem:[%s18202_s6 + $0xc8] sm:$0xff] }
 0x1e1   : > { %v2610_v54 = vpop.f32.mrf.mxu2  ;;  %v2046_v26 = vpop.f32.mrf.mxu0 }
 0x1e2   : > { %v2752_v48 = vpop.f32.mrf.mxu3  ;;  %v2611_v53 = vadd.f32 %v2610_v54, %v2505_v12  ;;  %v2507_v0 = vpop.f32.mrf.mxu1  ;;  %v2076_v9 = vadd.f32 %v2046_v26, %v14893_v21  ;;  %v13327_v21 = vld [vmem:[%s18197_s1 + $0x210] sm:$0xff]  ;;  %v3471_v12 = vrot.slane %v15233_v29, 2 }
 0x1e3   : > { %3919 = vmatpush.bf16.msra.mxu1 %v13327_v21  ;;  %v4021_v54 = vld [vmem:[%s18202_s6 + $0xb0] sm:$0xff]  ;;  %v13318_v21 = vld [vmem:[%s18197_s1 + $0x1c8] sm:$0xff] }
 0x1e4   : > { %v15235_v19 = vadd.f32 %v2752_v48, %v2611_v53  ;;  %v2096_v6 = vadd.f32 %v15062_v62, %v2076_v9  ;;  %v3472_v28 = vsel %vm1348_vm3, %v3469_v57, %v3471_v12  ;;  %v3084_v57 = vshll.u32 %v15264_v16, 16  ;;  %v13335_v48 = vld [vmem:[%s18197_s1 + $0x8] sm:$0xff]  ;;  %4063 = vperm.xlu1 %14081, %v4021_v54   ;;  %3762 = vmatpush.bf16.msra.mxu0 %v13318_v21 }
 0x1e5   : > { %4354 = vmatpush.bf16.msra.mxu3 %v13335_v48  ;;  %v15329_v48 = vld [vmem:[#allocation2 + $0x20] sm:$0xff] }
 0x1e6   : > { %v2112_v39 = vmax.f32 %v2096_v6, 0.0  ;;  %v3086_v45 = vrot.slane %v3084_v57, 2 }
 0x1e8   : > { %v2224_v14 = vmul.f32 %v2175_v41, %v2112_v39  ;;  %v4029_v41 = vld [vmem:[%s18202_s6 + $0xf0] sm:$0xff] }
 0x1e9   : > { %v2612_v40 = vpop.f32.mrf.mxu2  ;;  %v2049_v4 = vpop.f32.mrf.mxu0  ;;  %4103 = vperm.xlu0 %14080, %v4029_v41  }
 0x1ea   : > { %v2754_v18 = vpop.f32.mrf.mxu3  ;;  %v2613_v17 = vadd.f32 %v2612_v40, %v2507_v0  ;;  %v2510_v36 = vpop.f32.mrf.mxu1  ;;  %v13694_v5 = vpack.c.bf16 %v2224_v14, %v2223_v61  ;;  %v2077_v11 = vadd.f32 %v2049_v4, %v14911_v25  ;;  %v13343_v25 = vld [vmem:[%s18197_s1 + $0x48] sm:$0xff] }
 0x1eb   : > { %4285 = vmatpush.bf16.msra.mxu2 %v13343_v25  ;;  %v2180_v14 = vpop.permute.xlu2 %2179  ;;  %v2185_v40 = vpop.permute.xlu0 %2184 }
 0x1ec   : > { %v15276_v38 = vadd.f32 %v2754_v18, %v2613_v17  ;;  %13864 = vst [vmem:[#allocation2 + $0x28] sm:$0xff] %v13694_v5   ;;  %2970 = vmatmul.bf16.gmra.mxu0 %v2879_v32  ;;  %v2097_v53 = vadd.f32 %v15062_v62, %v2077_v11  ;;  %v2880_v18 = vrot.slane %v15264_v16, 1  ;;  %v15314_v17 = vor.u32 %v3086_v45, %v3083_v58  ;;  %v15319_v11 = vld [vmem:[%s14240_s21 + $0x80] sm:$0xff] }
 0x1ed   : > { %3191 = vmatmul.bf16.gmra.mxu1 %v3079_v55  ;;  %v3473_v32 = vrot.slane %v15296_v30, 2  ;;  %4078 = vperm.xlu1 %14081, %v4024_v27   ;;  %v3093_v29 = vshll.u32 %v15319_v11, 16  ;;  %v13357_v30 = vld [vmem:[%s18197_s1 + $0xb8] sm:$0xff] }
 0x1ee   : > { %3349 = vmatmul.bf16.gmra.mxu2 %v3258_v24  ;;  %v2113_v39 = vmax.f32 %v2097_v53, 0.0  ;;  %v2881_v57 = vsel %vm750_vm1, %v2878_v37, %v2880_v18  ;;  %v3088_v25 = vsel %vm1125_vm2, %v15251_v20, %v15314_v17 }
 0x1ef   : > { %3563 = vmatmul.bf16.gmra.mxu3 %v3472_v28 }
 0x1f0   : > { %v2225_v55 = vmul.f32 %v2180_v14, %v2113_v39 }
 0x1f1   : > { %v2615_v26 = vpop.f32.mrf.mxu2  ;;  %v2051_v22 = vpop.f32.mrf.mxu0 }
 0x1f2   : > { %v2757_v0 = vpop.f32.mrf.mxu3  ;;  %v2616_v1 = vadd.f32 %v2615_v26, %v2510_v36  ;;  %v2512_v9 = vpop.f32.mrf.mxu1  ;;  %v2078_v46 = vadd.f32 %v2051_v22, %v14928_v42  ;;  %v13326_v42 = vld [vmem:[%s18197_s1 + $0x208] sm:$0xff]  ;;  %v3259_v36 = vrot.slane %v15264_v16, 2  ;;  %v18215_v22 = vshll.u32 %v15329_v48, 16  ;;  %v4019_v16 = vld [vmem:[%s18202_s6 + $0xa0] sm:$0xff] }
 0x1f3   : > { %3920 = vmatpush.bf16.msra.mxu1 %v13326_v42 }
 0x1f4   : > { %v15298_v6 = vadd.f32 %v2757_v0, %v2616_v1  ;;  %v2098_v61 = vadd.f32 %v15062_v62, %v2078_v46  ;;  %v3260_v26 = vsel %vm1348_vm3, %v3257_v35, %v3259_v36  ;;  %v3474_v0 = vsel %vm1348_vm3, %v3471_v12, %v3473_v32  ;;  %v5136_v35 = vld [vmem:[%s18202_s6 + $0x108] sm:$0xff]  ;;  %v13334_v12 = vld [vmem:[%s18197_s1] sm:$0xff] }
 0x1f5   : > { %v3090_v1 = vshrl.u32 %v15319_v11, 16  ;;  %4093 = vperm.xlu1 %14081, %v4027_v23   ;;  %5146 = vperm.xlu0 %14080, %v5136_v35   ;;  %v6913_v14 = vrot.slane %v18215_v22, 2  ;;  %v3261_v23 = vrot.slane %v15319_v11, 2 }
 0x1f6   : > { %v2114_v4 = vmax.f32 %v2098_v61, 0.0  ;;  %4355 = vmatpush.bf16.msra.mxu3 %v13334_v12  ;;  %v3095_v61 = vrot.slane %v3093_v29, 2 }
 0x1f7   : > { %v3092_v21 = vrot.slane %v3090_v1, 1 }
 0x1f8   : > { %v2226_v5 = vmul.f32 %v2185_v40, %v2114_v4  ;;  %v15367_v4 = vld [vmem:[%s14240_s21 + $0x88] sm:$0xff] }
 0x1f9   : > { %v2617_v24 = vpop.f32.mrf.mxu2  ;;  %v2054_v44 = vpop.f32.mrf.mxu0  ;;  %v3475_v35 = vrot.slane %v15367_v4, 2 }
 0x1fa   : > { %v2759_v28 = vpop.f32.mrf.mxu3  ;;  %v2618_v54 = vadd.f32 %v2617_v24, %v2512_v9  ;;  %v2515_v59 = vpop.f32.mrf.mxu1  ;;  %v13699_v53 = vpack.c.bf16 %v2226_v5, %v2225_v55  ;;  %v2079_v20 = vadd.f32 %v2054_v44, %v14946_v31  ;;  %v13342_v31 = vld [vmem:[%s18197_s1 + $0x40] sm:$0xff]  ;;  %v18212_v9 = vshrl.u32 %v15329_v48, 16  ;;  %v3007_v55 = vld [vmem:[%s14240_s21 + $0x88] sm:$0x3] }
 0x1fb   : > { %4286 = vmatpush.bf16.msra.mxu2 %v13342_v31  ;;  %v13317_v24 = vld [vmem:[%s18197_s1 + $0x1c0] sm:$0xff] }
 0x1fc   : > { %v15341_v37 = vadd.f32 %v2759_v28, %v2618_v54  ;;  %13865 = vst [vmem:[#allocation2 + $0x30] sm:$0xff] %v13699_v53   ;;  %2975 = vmatmul.bf16.gmra.mxu0 %v2881_v57  ;;  %v2099_v58 = vadd.f32 %v15062_v62, %v2079_v20  ;;  %v6912_v42 = vrot.slane %v18212_v9, 1  ;;  %v4016_v28 = vld [vmem:[%s18202_s6 + $0x88] sm:$0xff]  ;;  %v4030_v54 = vld [vmem:[%s18202_s6 + $0xf8] sm:$0xff]  ;;  %v2190_v57 = vpop.permute.xlu1 %2189  ;;  %v2882_v53 = vrot.slane %v15319_v11, 1 }
 0x1fd   : > { %3196 = vmatmul.bf16.gmra.mxu1 %v3088_v25  ;;  %4038 = vperm.xlu2 %14082, %v4016_v28   ;;  %v2195_v25 = vpop.permute.xlu2 %2194  ;;  %v13366_v28 = vld [vmem:[%s18197_s1 + $0xf8] sm:$0xff] }
 0x1fe   : > { %3354 = vmatmul.bf16.gmra.mxu2 %v3260_v26  ;;  %v2115_v44 = vmax.f32 %v2099_v58, 0.0  ;;  %v15386_v26 = vor.u32 %v3095_v61, %v3092_v21  ;;  %3763 = vmatpush.bf16.msra.mxu0 %v13317_v24  ;;  %v15388_v20 = vor.u32 %v6913_v14, %v6912_v42  ;;  %v3476_v14 = vsel %vm1348_vm3, %v3473_v32, %v3475_v35 }
 0x1ff   : > { %3568 = vmatmul.bf16.gmra.mxu3 %v3474_v0  ;;  %v3025_v0 = vunpack.c.l.b16 %v3007_v55  ;;  %4108 = vperm.xlu1 %14081, %v4030_v54   ;;  %v3402_v55 = vld [vmem:[%s14240_s21 + $0x90] sm:$0x3] }
 0x200   : > { %v2227_v29 = vmul.f32 %v2190_v57, %v2115_v44  ;;  %v3452_v54 = vunpack.c.l.b16 %v3402_v55  ;;  %4442 = vmatpush.bf16.msrb.mxu2 %v13357_v30  ;;  %4554 = vmatpush.bf16.msrb.mxu3 %v13366_v28  ;;  %v13356_v57 = vld [vmem:[%s18197_s1 + $0xb0] sm:$0xff]  ;;  %v2200_v55 = vpop.permute.xlu0 %2199  ;;  %v13430_v30 = vld [vmem:[%s18199_s3 + $0x78] sm:$0xff] }
 0x201   : > { %v2620_v45 = vpop.f32.mrf.mxu2  ;;  %v2056_v41 = vpop.f32.mrf.mxu0  ;;  %v15400_v61 = vpack.c.b16 %v3025_v0, %v3025_v0 }
 0x202   : > { %v2762_v46 = vpop.f32.mrf.mxu3  ;;  %v2621_v27 = vadd.f32 %v2620_v45, %v2515_v59  ;;  %v2517_v39 = vpop.f32.mrf.mxu1  ;;  %v2080_v40 = vadd.f32 %v2056_v41, %v14964_v33  ;;  %v13325_v59 = vld [vmem:[%s18197_s1 + $0x200] sm:$0xff]  ;;  %v3097_v41 = vsel %vm1125_vm2, %v15314_v17, %v15386_v26 }
 0x203   : > { %3921 = vmatpush.bf16.msra.mxu1 %v13325_v59  ;;  %v3099_v24 = vshrl.u32 %v15400_v61, 16 }
 0x204   : > { %v15370_v5 = vadd.f32 %v2762_v46, %v2621_v27  ;;  %v2100_v33 = vadd.f32 %v15062_v62, %v2080_v40  ;;  %v2883_v27 = vsel %vm750_vm1, %v2880_v18, %v2882_v53  ;;  %v2809_v18 = vld [vmem:[%s14240_s21 + $0x88] sm:$0x1]  ;;  %4443 = vmatpush.bf16.msrb.mxu2 %v13356_v57 }
 0x205   : > { %v2859_v32 = vunpack.c.l.b16 %v2809_v18  ;;  %4053 = vperm.xlu2 %14082, %v4019_v16   ;;  %v4022_v18 = vld [vmem:[%s18202_s6 + $0xb8] sm:$0xff] }
 0x206   : > { %v2116_v1 = vmax.f32 %v2100_v33, 0.0 }
 0x207   : > { %5339 = vmatpush.bf16.msrb.mxu1 %v13430_v30 }
 0x208   : > { %v2228_v31 = vmul.f32 %v2195_v25, %v2116_v1  ;;  %v13365_v25 = vld [vmem:[%s18197_s1 + $0xf0] sm:$0xff] }
 0x209   : > { %v2622_v12 = vpop.f32.mrf.mxu2  ;;  %v2059_v46 = vpop.f32.mrf.mxu0  ;;  %4555 = vmatpush.bf16.msrb.mxu3 %v13365_v25  ;;  %v13354_v25 = vld [vmem:[%s18197_s1 + $0xa0] sm:$0xff] }
 0x20a   : > { %v2764_v58 = vpop.f32.mrf.mxu3  ;;  %v2623_v45 = vadd.f32 %v2622_v12, %v2517_v39  ;;  %v2520_v21 = vpop.f32.mrf.mxu1  ;;  %v13704_v42 = vpack.c.bf16 %v2228_v31, %v2227_v29  ;;  %v3262_v39 = vsel %vm1348_vm3, %v3259_v36, %v3261_v23  ;;  %v2081_v17 = vadd.f32 %v2059_v46, %v14980_v56  ;;  %v5137_v36 = vld [vmem:[%s18202_s6 + $0x110] sm:$0xff] }
 0x20b   : > { %v3102_v56 = vshll.u32 %v15400_v61, 16  ;;  %5151 = vperm.xlu1 %14081, %v5137_v36   ;;  %v2868_v31 = vpack.c.b16 %v2859_v32, %v2859_v32  ;;  %v3101_v12 = vrot.slane %v3099_v24, 1  ;;  %v3461_v46 = vpack.c.b16 %v3452_v54, %v3452_v54  ;;  %v13364_v32 = vld [vmem:[%s18197_s1 + $0xe8] sm:$0xff] }
 0x20c   : > { %v15413_v40 = vadd.f32 %v2764_v58, %v2623_v45  ;;  %13866 = vst [vmem:[#allocation2 + $0x38] sm:$0xff] %v13704_v42   ;;  %2980 = vmatmul.bf16.gmra.mxu0 %v2883_v27  ;;  %v2101_v44 = vadd.f32 %v15062_v62, %v2081_v17  ;;  %v13897_v42 = vld [vmem:[#allocation2 + $0x18] sm:$0xe]  ;;  %v2205_v17 = vpop.permute.xlu1 %2204 }
 0x20d   : > { %3201 = vmatmul.bf16.gmra.mxu1 %v3097_v41  ;;  %v3104_v58 = vrot.slane %v3102_v56, 2  ;;  %v13896_v41 = vld [vmem:[#allocation2 + $0x18] sm:$0xf0]  ;;  %v2884_v16 = vrot.slane %v2868_v31, 1  ;;  %v3263_v56 = vrot.slane %v15400_v61, 2  ;;  %v3477_v28 = vrot.slane %v3461_v46, 2  ;;  %4068 = vperm.xlu2 %14082, %v4022_v18  }
 0x20e   : > { %3359 = vmatmul.bf16.gmra.mxu2 %v3262_v39  ;;  %v2117_v39 = vmax.f32 %v2101_v44, 0.0  ;;  %v15458_v54 = vor.u32 %v13897_v42, %v13896_v41  ;;  %4556 = vmatpush.bf16.msrb.mxu3 %v13364_v32  ;;  %v3821_v41 = vld [vmem:[%s14240_s21 + $0x50] sm:$0x8] }
 0x20f   : > { %3573 = vmatmul.bf16.gmra.mxu3 %v3476_v14  ;;  %v3105_v36 = vor.u32 %v3104_v58, %v3101_v12  ;;  %v2885_v31 = vsel %vm750_vm1, %v2882_v53, %v2884_v16  ;;  %v3478_v46 = vsel %vm1348_vm3, %v3475_v35, %v3477_v28  ;;  %v15481_v53 = vld [vmem:[%s14240_s21 + $0x80] sm:$0xff]   ;;  %v3624_v35 = vshll.u32 %v15026_v2, 16  ;;  %v13352_v28 = vld [vmem:[%s18197_s1 + $0x90] sm:$0xff] }
 0x210   : > { %v2229_v44 = vmul.f32 %v2200_v55, %v2117_v39  ;;  %v6908_v11 = vshll.u32 %v15458_v54, 16  ;;  %v4025_v39 = vld [vmem:[%s18202_s6 + $0xd0] sm:$0xff]  ;;  %v3839_v18 = vunpack.c.l.b16 %v3821_v41  ;;  %v4212_v55 = vshll.u32 %v15481_v53, 16 }
 0x211   : > { %v2625_v33 = vpop.f32.mrf.mxu2  ;;  %v2061_v1 = vpop.f32.mrf.mxu0  ;;  %v3106_v12 = vsel %vm1125_vm2, %v15386_v26, %v3105_v36  ;;  %v6905_v26 = vshrl.u32 %v15458_v54, 16 }
 0x212   : > { %v2767_v59 = vpop.f32.mrf.mxu3  ;;  %v2626_v0 = vadd.f32 %v2625_v33, %v2520_v21  ;;  %v2522_v29 = vpop.f32.mrf.mxu1  ;;  %v2082_v45 = vadd.f32 %v2061_v1, %v15001_v50  ;;  %v13407_v21 = vld [vmem:[%s18197_s1 + $0x238] sm:$0xff]  ;;  %v13355_v50 = vld [vmem:[%s18197_s1 + $0xa8] sm:$0xff]  ;;  %v6910_v16 = vrot.slane %v6908_v11, 2 }
 0x213   : > { %5100 = vmatpush.bf16.msrb.mxu0 %v13407_v21  ;;  %4444 = vmatpush.bf16.msrb.mxu2 %v13355_v50  ;;  %v3629_v21 = vshrl.u32 %v15022_v49, 16  ;;  %v15497_v50 = vld [vmem:[%s14240_s21 + $0x88] sm:$0xff]  ;;  %v2210_v11 = vpop.permute.xlu2 %2209 }
 0x214   : > { %v15439_v27 = vadd.f32 %v2767_v59, %v2626_v0  ;;  %v2102_v14 = vadd.f32 %v15062_v62, %v2082_v45  ;;  %v3264_v45 = vsel %vm1348_vm3, %v3261_v23, %v3263_v56  ;;  %v3621_v23 = vshrl.u32 %v15026_v2, 16  ;;  %v13362_v2 = vld [vmem:[%s18197_s1 + $0xd8] sm:$0xff] }
 0x215   : > { %4083 = vperm.xlu2 %14082, %v4025_v39   ;;  %v3626_v56 = vrot.slane %v3624_v35, 3  ;;  %v13429_v39 = vld [vmem:[%s18199_s3 + $0x70] sm:$0xff] }
 0x216   : > { %v2118_v24 = vmax.f32 %v2102_v14, 0.0  ;;  %v13353_v14 = vld [vmem:[%s18197_s1 + $0x98] sm:$0xff]  ;;  %5340 = vmatpush.bf16.msrb.mxu1 %v13429_v39 }
 0x217   : > { %4445 = vmatpush.bf16.msrb.mxu2 %v13354_v25 }
 0x218   : > { %v2230_v33 = vmul.f32 %v2205_v17, %v2118_v24  ;;  %v6907_v17 = vrot.slane %v6905_v26, 1  ;;  %v3623_v24 = vrot.slane %v3621_v23, 2  ;;  %v13351_v26 = vld [vmem:[%s18197_s1 + $0x88] sm:$0xff] }
 0x219   : > { %v2627_v59 = vpop.f32.mrf.mxu2  ;;  %v2064_v61 = vpop.f32.mrf.mxu0 }
 0x21a   : > { %v2769_v57 = vpop.f32.mrf.mxu3  ;;  %v2628_v0 = vadd.f32 %v2627_v59, %v2522_v29  ;;  %v2525_v1 = vpop.f32.mrf.mxu1  ;;  %v13709_v58 = vpack.c.bf16 %v2230_v33, %v2229_v44  ;;  %v13363_v29 = vld [vmem:[%s18197_s1 + $0xe0] sm:$0xff]  ;;  %v2083_v4 = vadd.f32 %v2064_v61, %v15028_v3  ;;  %v3632_v3 = vshll.u32 %v15022_v49, 16 }
 0x21b   : > { %4557 = vmatpush.bf16.msrb.mxu3 %v13363_v29  ;;  %4446 = vmatpush.bf16.msrb.mxu2 %v13353_v14  ;;  %v4028_v29 = vld [vmem:[%s18202_s6 + $0xe8] sm:$0xff] }
 0x21c   : > { %v15478_v42 = vadd.f32 %v2769_v57, %v2628_v0  ;;  %13867 = vst [vmem:[#allocation2 + $0x40] sm:$0xff] %v13709_v58   ;;  %2985 = vmatmul.bf16.gmra.mxu0 %v2885_v31  ;;  %v2103_v36 = vadd.f32 %v15062_v62, %v2083_v4  ;;  %v3631_v57 = vrot.slane %v3629_v21, 2  ;;  %v3634_v25 = vrot.slane %v3632_v3, 3  ;;  %v2215_v4 = vpop.permute.xlu0 %2214 }
 0x21d   : > { %3206 = vmatmul.bf16.gmra.mxu1 %v3106_v12  ;;  %v3840_v0 = vpack.c.b16 %v3437_v13, %v3839_v18  ;;  %v4210_v31 = vshrl.u32 %v15481_v53, 16  ;;  %v4214_v12 = vrot.slane %v4212_v55, 1  ;;  %v4217_v58 = vshll.u32 %v15497_v50, 16  ;;  %v13360_v55 = vld [vmem:[%s18197_s1 + $0xc8] sm:$0xff]  ;;  %4098 = vperm.xlu2 %14082, %v4028_v29   ;;  %v13373_v29 = vld [vmem:[%s18197_s1 + $0x130] sm:$0xff] }
 0x21e   : > { %3364 = vmatmul.bf16.gmra.mxu2 %v3264_v45  ;;  %v13361_v45 = vld [vmem:[%s18197_s1 + $0xd0] sm:$0xff]  ;;  %v2119_v41 = vmax.f32 %v2103_v36, 0.0  ;;  %v3627_v13 = vor.u32 %v3626_v56, %v3623_v24  ;;  %v15527_v23 = vor.u32 %v3634_v25, %v3631_v57 }
 0x21f   : > { %3578 = vmatmul.bf16.gmra.mxu3 %v3478_v46  ;;  %4447 = vmatpush.bf16.msrb.mxu2 %v13352_v28  ;;  %v6911_v46 = vor.u32 %v6910_v16, %v6907_v17  ;;  %v3841_v35 = vrot.slane %v3840_v0, 3  ;;  %v4215_v3 = vor.u32 %v4214_v12, %v4210_v31  ;;  %v15537_v18 = vrot.slane %v4217_v58, 1  ;;  %v13374_v58 = vld [vmem:[%s18197_s1 + $0x138] sm:$0xff] }
 0x220   : > { %4558 = vmatpush.bf16.msrb.mxu3 %v13362_v2  ;;  %v4179_v2 = vld [vmem:[%s14240_s21 + $0x90] sm:$0x1]  ;;  %v2231_v17 = vmul.f32 %v2210_v11, %v2119_v41  ;;  %v3641_v41 = vshll.u32 %v15075_v43, 16 }
 0x221   : > { %v2630_v30 = vpop.f32.mrf.mxu2  ;;  %v2066_v33 = vpop.f32.mrf.mxu0  ;;  %v15535_v14 = vsel %vm1125_vm2, %v6911_v46, %v15388_v20  ;;  %v4220_v0 = vsel %vm450_vm0, %v4215_v3, %v15537_v18  ;;  %v3638_v46 = vshrl.u32 %v15075_v43, 16  ;;  %v4221_v3 = vshrl.u32 %v15497_v50, 16 }
 0x222   : > { %v2772_v32 = vpop.f32.mrf.mxu3  ;;  %v2631_v44 = vadd.f32 %v2630_v30, %v2525_v1  ;;  %v2527_v59 = vpop.f32.mrf.mxu1  ;;  %v2084_v61 = vadd.f32 %v2066_v33, %v15056_v51  ;;  %v13406_v51 = vld [vmem:[%s18197_s1 + $0x230] sm:$0xff]  ;;  %v3643_v39 = vrot.slane %v3641_v41, 3  ;;  %v4465_v41 = vld [vmem:[%s14240_s21 + $0x88] sm:$0xe] }
 0x223   : > { %5101 = vmatpush.bf16.msrb.mxu0 %v13406_v51  ;;  %4448 = vmatpush.bf16.msrb.mxu2 %v13351_v26 }
 0x224   : > { %v15515_v1 = vadd.f32 %v2772_v32, %v2631_v44  ;;  %v2104_v10 = vadd.f32 %v15062_v62, %v2084_v61  ;;  %v3842_v62 = vrot.slane %v15022_v49, 3  ;;  %4559 = vmatpush.bf16.msrb.mxu3 %v13361_v45  ;;  %v13350_v32 = vld [vmem:[%s18197_s1 + $0x80] sm:$0xff]  ;;  %v3636_v44 = vsel %vm1723_vm4, %v3627_v13, %v15527_v23  ;;  %v13382_v45 = vld [vmem:[%s18197_s1 + $0x178] sm:$0xff] }
 0x225   : > { %v4205_v61 = vunpack.c.l.b16 %v4179_v2  ;;  %v13370_v49 = vld [vmem:[%s18197_s1 + $0x118] sm:$0xff] }
 0x226   : > { %v2120_v21 = vmax.f32 %v2104_v10, 0.0  ;;  %v3843_v33 = vsel %vm1946_vm5, %v3841_v35, %v3842_v62  ;;  %v3640_v35 = vrot.slane %v3638_v46, 2 }
 0x227   : > { %4449 = vmatpush.bf16.msrb.mxu2 %v13350_v32  ;;  %v15571_v10 = vpack.c.b16 %v4205_v61, %v4205_v61  ;;  %v3844_v32 = vrot.slane %v15075_v43, 3  ;;  %v13375_v43 = vld [vmem:[%s18197_s1 + $0x140] sm:$0xff] }
 0x228   : > { %v2232_v16 = vmul.f32 %v2215_v4, %v2120_v21  ;;  %4560 = vmatpush.bf16.msrb.mxu3 %v13360_v55 }
 0x229   : > { %v2632_v36 = vpop.f32.mrf.mxu2  ;;  %v2951_v56 = vpop.f32.mrf.mxu0  ;;  %v4225_v55 = vshll.u32 %v15571_v10, 16 }
 0x22a   : > { %v2774_v30 = vpop.f32.mrf.mxu3  ;;  %v2633_v24 = vadd.f32 %v2632_v36, %v2527_v59  ;;  %v3172_v28 = vpop.f32.mrf.mxu1  ;;  %v13714_v57 = vpack.c.bf16 %v2232_v16, %v2231_v17  ;;  %v2991_v25 = vadd.f32 %v2951_v56, %v15077_v7  ;;  %v13359_v59 = vld [vmem:[%s18197_s1 + $0xc0] sm:$0xff]  ;;  %v13405_v16 = vld [vmem:[%s18197_s1 + $0x228] sm:$0xff]  ;;  %v5138_v36 = vld [vmem:[%s18202_s6 + $0x118] sm:$0xff] }
 0x22b   : > { %v5135_v7 = vld [vmem:[%s18202_s6 + $0x100] sm:$0xff]  ;;  %v13380_v56 = vld [vmem:[%s18197_s1 + $0x168] sm:$0xff]  ;;  %5102 = vmatpush.bf16.msrb.mxu0 %v13405_v16  ;;  %v15640_v16 = vld [vmem:[#allocation2 + $0x30] sm:$0xff] }
 0x22c   : > { %v15557_v31 = vadd.f32 %v2774_v30, %v2633_v24  ;;  %13868 = vst [vmem:[#allocation2 + $0x48] sm:$0xff] %v13714_v57   ;;  %v3212_v12 = vadd.f32 %v3172_v28, %v2991_v25  ;;  %3764 = vmatmul.bf16.vlgmr.msra.gmra.mxu0 %v3636_v44  ;;  %4561 = vmatpush.bf16.msrb.mxu3 %v13359_v59  ;;  %v13428_v24 = vld [vmem:[%s18199_s3 + $0x68] sm:$0xff]  ;;  %v4227_v44 = vrot.slane %v4225_v55, 1  ;;  %v13371_v25 = vld [vmem:[%s18197_s1 + $0x120] sm:$0xff] }
 0x22d   : > { %3922 = vmatmul.bf16.vlgmr.msra.gmra.mxu1 %v3843_v33  ;;  %5141 = vperm.xlu2 %14082, %v5135_v7   ;;  %v15593_v30 = vor.u32 %v3643_v39, %v3640_v35  ;;  %v4223_v28 = vor.u32 %v4221_v3, %v15537_v18  ;;  %v13369_v39 = vld [vmem:[%s18197_s1 + $0x110] sm:$0xff] }
 0x22e   : > { %4287 = vmatmul.bf16.vlgmr.msra.gmra.mxu2 %v4220_v0  ;;  %5341 = vmatpush.bf16.msrb.mxu1 %v13428_v24  ;;  %v15644_v24 = vld [vmem:[%s14240_s21 + $0x90] sm:$0xff] }
 0x22f   : > { %4356 = vmatmul.bf16.vlgmr.msra.gmra.mxu3 %v15481_v53  ;;  %4673 = vmatpush.bf16.msra.mxu2 %v13374_v58  ;;  %v13381_v53 = vld [vmem:[%s18197_s1 + $0x170] sm:$0xff]  ;;  %v3645_v18 = vsel %vm1723_vm4, %v15527_v23, %v15593_v30  ;;  %v4228_v58 = vsel %vm450_vm0, %v4223_v28, %v4227_v44  ;;  %v15623_v23 = vld [vmem:[%s14240_s21 + $0x8c] sm:$0xf] }
 0x230   : > { %4771 = vmatpush.bf16.msra.mxu3 %v13382_v45  ;;  %v13379_v45 = vld [vmem:[%s18197_s1 + $0x160] sm:$0xff]  ;;  %v13377_v28 = vld [vmem:[%s18197_s1 + $0x150] sm:$0xff] }
 0x231   : > { %v3330_v13 = vpop.f32.mrf.mxu2  ;;  %v2953_v11 = vpop.f32.mrf.mxu0 }
 0x232   : > { %v3544_v51 = vpop.f32.mrf.mxu3  ;;  %v3370_v26 = vadd.f32 %v3330_v13, %v3212_v12  ;;  %v3174_v4 = vpop.f32.mrf.mxu1  ;;  %v2992_v21 = vadd.f32 %v2953_v11, %v15108_v52  ;;  %v13372_v52 = vld [vmem:[%s18197_s1 + $0x128] sm:$0xff]  ;;  %v3845_v12 = vsel %vm1946_vm5, %v3842_v62, %v3844_v32  ;;  %v3650_v62 = vshll.u32 %v15122_v34, 16  ;;  %v13883_v11 = vld [vmem:[%s14240_s21 + $0x80] sm:$0xe] }
 0x233   : > { %4674 = vmatpush.bf16.msra.mxu2 %v13373_v29  ;;  %v4492_v29 = vunpack.c.l.b16 %v15623_v23  ;;  %v13425_v23 = vld [vmem:[%s18199_s3 + $0x50] sm:$0xff] }
 0x234   : > { %v15582_v2 = vadd.f32 %v3544_v51, %v3370_v26  ;;  %4772 = vmatpush.bf16.msra.mxu3 %v13381_v53  ;;  %v3213_v17 = vadd.f32 %v3174_v4, %v2992_v21  ;;  %v4491_v51 = vunpack.c.l.b16 %v4465_v41  ;;  %v13378_v53 = vld [vmem:[%s18197_s1 + $0x158] sm:$0xff]  ;;  %v13882_v26 = vld [vmem:[%s14240_s21 + $0x80] sm:$0xf0]  ;;  %v4500_v41 = vrot.slane %v15644_v24, 1 }
 0x235   : > { %5156 = vperm.xlu2 %14082, %v5138_v36  }
 0x237   : > { %4675 = vmatpush.bf16.msra.mxu2 %v13372_v52  ;;  %v13884_v52 = vor.u32 %v13883_v11, %v13882_v26 }
 0x238   : > { %4773 = vmatpush.bf16.msra.mxu3 %v13380_v56  ;;  %v15648_v56 = vpack.c.b16 %v4492_v29, %v4491_v51  ;;  %v18211_v51 = vshll.u32 %v15640_v16, 16 }
 0x239   : > { %v3332_v33 = vpop.f32.mrf.mxu2  ;;  %v2956_v61 = vpop.f32.mrf.mxu0 }
 0x23a   : > { %v3546_v57 = vpop.f32.mrf.mxu3  ;;  %v3371_v0 = vadd.f32 %v3332_v33, %v3213_v17  ;;  %v3177_v59 = vpop.f32.mrf.mxu1  ;;  %v2993_v7 = vadd.f32 %v2956_v61, %v15124_v60  ;;  %v3647_v60 = vshrl.u32 %v15122_v34, 16  ;;  %v3652_v17 = vrot.slane %v3650_v62, 3  ;;  %v15655_v33 = vld [vmem:[#allocation2 + $0x38] sm:$0xff]  ;;  %v13367_v62 = vld [vmem:[%s18197_s1 + $0x100] sm:$0xff] }
 0x23b   : > { %4676 = vmatpush.bf16.msra.mxu2 %v13371_v25  ;;  %v13368_v25 = vld [vmem:[%s18197_s1 + $0x108] sm:$0xff] }
 0x23c   : > { %v15619_v46 = vadd.f32 %v3546_v57, %v3371_v0  ;;  %v3214_v13 = vadd.f32 %v3177_v59, %v2993_v7  ;;  %3769 = vmatmul.bf16.gmra.mxu0 %v3645_v18  ;;  %4774 = vmatpush.bf16.msra.mxu3 %v13379_v45  ;;  %v3649_v55 = vrot.slane %v3647_v60, 2  ;;  %v13427_v0 = vld [vmem:[%s18199_s3 + $0x60] sm:$0xff]  ;;  %v15669_v59 = vld [vmem:[%s14240_s21 + $0x68] sm:$0xff]  ;;  %v4387_v7 = vrot.slane %v13884_v52, 1  ;;  %v13399_v52 = vld [vmem:[%s18197_s1 + $0x1f8] sm:$0xff] }
 0x23d   : > { %3927 = vmatmul.bf16.gmra.mxu1 %v3845_v12  ;;  %v3846_v18 = vrot.slane %v15669_v59, 3  ;;  %v18209_v12 = vshrl.u32 %v15640_v16, 16  ;;  %v4499_v45 = vrot.slane %v15648_v56, 1 }
 0x23e   : > { %4292 = vmatmul.bf16.gmra.mxu2 %v4228_v58  ;;  %v15666_v61 = vor.u32 %v3652_v17, %v3649_v55  ;;  %v4388_v58 = vrot.slane %v15497_v50, 1  ;;  %5342 = vmatpush.bf16.msrb.mxu1 %v13427_v0 }
 0x23f   : > { %4361 = vmatmul.bf16.gmra.mxu3 %v15497_v50  ;;  %4677 = vmatpush.bf16.msra.mxu2 %v13370_v49  ;;  %v4501_v55 = vsel %vm750_vm1, %v4499_v45, %v4500_v41  ;;  %v15792_v50 = vld [vmem:[%s14240_s21 + $0x78] sm:$0xff] }
 0x240   : > { %4775 = vmatpush.bf16.msra.mxu3 %v13378_v53  ;;  %v18210_v53 = vshll.u32 %v15655_v33, 16 }
 0x241   : > { %v3335_v4 = vpop.f32.mrf.mxu2  ;;  %v2958_v34 = vpop.f32.mrf.mxu0 }
 0x242   : > { %v3549_v35 = vpop.f32.mrf.mxu3  ;;  %v3372_v21 = vadd.f32 %v3335_v4, %v3214_v13  ;;  %v3179_v3 = vpop.f32.mrf.mxu1  ;;  %v2994_v36 = vadd.f32 %v2958_v34, %v15159_v15  ;;  %v13404_v15 = vld [vmem:[%s18197_s1 + $0x220] sm:$0xff]  ;;  %v13376_v13 = vld [vmem:[%s18197_s1 + $0x148] sm:$0xff] }
 0x243   : > { %4678 = vmatpush.bf16.msra.mxu2 %v13369_v39  ;;  %5103 = vmatpush.bf16.msrb.mxu0 %v13404_v15  ;;  %v3847_v39 = vsel %vm1946_vm5, %v3844_v32, %v3846_v18  ;;  %v15718_v15 = vld [vmem:[%s14240_s21 + $0x70] sm:$0xff] }
 0x244   : > { %v15653_v44 = vadd.f32 %v3549_v35, %v3372_v21  ;;  %v3215_v57 = vadd.f32 %v3179_v3, %v2994_v36  ;;  %4776 = vmatpush.bf16.msra.mxu3 %v13377_v28  ;;  %v3654_v35 = vsel %vm1723_vm4, %v15593_v30, %v15666_v61  ;;  %v18205_v21 = vshrl.u32 %v15655_v33, 16  ;;  %v13391_v36 = vld [vmem:[%s18197_s1 + $0x1b8] sm:$0xff] }
 0x245   : > { %v4389_v3 = vsel %vm750_vm1, %v4387_v7, %v4388_v58  ;;  %v6920_v30 = vrot.slane %v18209_v12, 1  ;;  %v6921_v28 = vrot.slane %v18211_v51, 2  ;;  %v4906_v12 = vld [vmem:[%s14240_s21 + $0xa0] sm:$0x7] }
 0x246   : > { %v6924_v0 = vrot.slane %v18205_v21, 1  ;;  %v15825_v21 = vld [vmem:[#allocation2 + $0x48] sm:$0xff] }
 0x247   : > { %4679 = vmatpush.bf16.msra.mxu2 %v13368_v25  ;;  %v3659_v25 = vshll.u32 %v15718_v15, 16  ;;  %v15723_v45 = vor.u32 %v6921_v28, %v6920_v30  ;;  %v15738_v30 = vld [vmem:[#allocation2 + $0x40] sm:$0xff] }
 0x248   : > { %4777 = vmatpush.bf16.msra.mxu3 %v13376_v13  ;;  %v6925_v13 = vrot.slane %v18210_v53, 2 }
 0x249   : > { %v3337_v49 = vpop.f32.mrf.mxu2  ;;  %v2961_v11 = vpop.f32.mrf.mxu0 }
 0x24a   : > { %v3551_v60 = vpop.f32.mrf.mxu3  ;;  %v3373_v26 = vadd.f32 %v3337_v49, %v3215_v57  ;;  %v3182_v4 = vpop.f32.mrf.mxu1  ;;  %v2995_v34 = vadd.f32 %v2961_v11, %v15175_v63  ;;  %v4469_v63 = vld [vmem:[%s14240_s21 + $0x98] sm:$0x1]  ;;  %v3656_v57 = vshrl.u32 %v15173_v8, 16  ;;  %v13390_v8 = vld [vmem:[%s18197_s1 + $0x1b0] sm:$0xff] }
 0x24b   : > { %4680 = vmatpush.bf16.msra.mxu2 %v13367_v62  ;;  %v4495_v7 = vunpack.c.l.b16 %v4469_v63  ;;  %v13398_v62 = vld [vmem:[%s18197_s1 + $0x1f0] sm:$0xff] }
 0x24c   : > { %v15705_v32 = vadd.f32 %v3551_v60, %v3373_v26  ;;  %v3216_v17 = vadd.f32 %v3182_v4, %v2995_v34  ;;  %3774 = vmatmul.bf16.gmra.mxu0 %v3654_v35  ;;  %4778 = vmatpush.bf16.msra.mxu3 %v13375_v43  ;;  %v15733_v26 = vor.u32 %v6925_v13, %v6924_v0  ;;  %v3661_v34 = vrot.slane %v3659_v25, 3  ;;  %v13397_v25 = vld [vmem:[%s18197_s1 + $0x1e8] sm:$0xff] }
 0x24d   : > { %3932 = vmatmul.bf16.gmra.mxu1 %v3847_v39  ;;  %v3658_v39 = vrot.slane %v3656_v57, 2  ;;  %v3848_v57 = vrot.slane %v15718_v15, 3  ;;  %v4390_v0 = vrot.slane %v15571_v10, 1  ;;  %v18208_v13 = vshll.u32 %v15738_v30, 16  ;;  %v13396_v10 = vld [vmem:[%s18197_s1 + $0x1e0] sm:$0xff] }
 0x24e   : > { %4450 = vmatmul.bf16.vlgmr.msrb.gmra.mxu2 %v4389_v3  ;;  %v15743_v63 = vsel %vm1125_vm2, %v15723_v45, %v15733_v26 }
 0x24f   : > { %4562 = vmatmul.bf16.vlgmr.msrb.gmra.mxu3 %v4501_v55  ;;  %4883 = vmatpush.bf16.msrb.mxu2 %v13391_v36  ;;  %v4498_v55 = vpack.c.b16 %v4495_v7, %v4495_v7  ;;  %v15754_v28 = vor.u32 %v3661_v34, %v3658_v39  ;;  %v3849_v34 = vsel %vm1946_vm5, %v3846_v18, %v3848_v57  ;;  %v6929_v18 = vrot.slane %v18208_v13, 2 }
 0x250   : > { %5002 = vmatpush.bf16.msrb.mxu3 %v13399_v52  ;;  %v13426_v52 = vld [vmem:[%s18199_s3 + $0x58] sm:$0xff] }
 0x251   : > { %v3340_v49 = vpop.f32.mrf.mxu2  ;;  %v2963_v4 = vpop.f32.mrf.mxu0  ;;  %v4502_v7 = vrot.slane %v4498_v55, 1  ;;  %5343 = vmatpush.bf16.msrb.mxu1 %v13426_v52  ;;  %v3663_v39 = vsel %vm1723_vm4, %v15666_v61, %v15754_v28  ;;  %v4391_v55 = vsel %vm750_vm1, %v4388_v58, %v4390_v0  ;;  %v4696_v61 = vld [vmem:[%s14240_s21 + $0x88] sm:$0xc]  ;;  %v3665_v58 = vshrl.u32 %v15792_v50, 16 }
 0x252   : > { %v3554_v60 = vpop.f32.mrf.mxu3  ;;  %v3374_v11 = vadd.f32 %v3340_v49, %v3216_v17  ;;  %v3184_v35 = vpop.f32.mrf.mxu1  ;;  %v2996_v3 = vadd.f32 %v2963_v4, %v15213_v47  ;;  %v13403_v17 = vld [vmem:[%s18197_s1 + $0x218] sm:$0xff]  ;;  %v13389_v47 = vld [vmem:[%s18197_s1 + $0x1a8] sm:$0xff]  ;;  %v18204_v49 = vshrl.u32 %v15738_v30, 16  ;;  %v3668_v52 = vshll.u32 %v15792_v50, 16 }
 0x253   : > { %4884 = vmatpush.bf16.msrb.mxu2 %v13390_v8  ;;  %5104 = vmatpush.bf16.msrb.mxu0 %v13403_v17  ;;  %v4601_v0 = vshll.u32 %v15648_v56, 16 }
 0x254   : > { %v15736_v43 = vadd.f32 %v3554_v60, %v3374_v11  ;;  %5003 = vmatpush.bf16.msrb.mxu3 %v13398_v62  ;;  %v3217_v36 = vadd.f32 %v3184_v35, %v2996_v3  ;;  %v13388_v62 = vld [vmem:[%s18197_s1 + $0x1a0] sm:$0xff]  ;;  %v6928_v59 = vrot.slane %v18204_v49, 1  ;;  %v4577_v49 = vld [vmem:[%s14240_s21 + $0x98] sm:$0x3] }
 0x255   : > { %5344 = vmatpush.bf16.msrb.mxu1 %v13425_v23 }
 0x257   : > { %4885 = vmatpush.bf16.msrb.mxu2 %v13389_v47  ;;  %v13395_v47 = vld [vmem:[%s18197_s1 + $0x1d8] sm:$0xff] }
 0x258   : > { %5004 = vmatpush.bf16.msrb.mxu3 %v13397_v25  ;;  %v4598_v25 = vshrl.u32 %v15648_v56, 16  ;;  %v13386_v56 = vld [vmem:[%s18197_s1 + $0x190] sm:$0xff] }
 0x259   : > { %v3342_v60 = vpop.f32.mrf.mxu2  ;;  %v2966_v4 = vpop.f32.mrf.mxu0 }
 0x25a   : > { %v3556_v8 = vpop.f32.mrf.mxu3  ;;  %v3375_v11 = vadd.f32 %v3342_v60, %v3217_v36  ;;  %v3187_v35 = vpop.f32.mrf.mxu1  ;;  %v2997_v3 = vadd.f32 %v2966_v4, %v15235_v19  ;;  %v4503_v36 = vsel %vm750_vm1, %v4500_v41, %v4502_v7  ;;  %v13387_v41 = vld [vmem:[%s18197_s1 + $0x198] sm:$0xff]  ;;  %v15804_v7 = vor.u32 %v6929_v18, %v6928_v59 }
 0x25b   : > { %4886 = vmatpush.bf16.msrb.mxu2 %v13388_v62  ;;  %v4606_v60 = vshrl.u32 %v15644_v24, 16  ;;  %v4714_v62 = vunpack.c.l.b16 %v4696_v61  ;;  %v4600_v61 = vrot.slane %v4598_v25, 1  ;;  %v4603_v59 = vrot.slane %v4601_v0, 2 }
 0x25c   : > { %v15784_v17 = vadd.f32 %v3556_v8, %v3375_v11  ;;  %5005 = vmatpush.bf16.msrb.mxu3 %v13396_v10  ;;  %v3218_v19 = vadd.f32 %v3187_v35, %v2997_v3  ;;  %3779 = vmatmul.bf16.gmra.mxu0 %v3663_v39  ;;  %v4609_v8 = vshll.u32 %v15644_v24, 16  ;;  %v15811_v10 = vsel %vm1125_vm2, %v15733_v26, %v15804_v7  ;;  %v13394_v39 = vld [vmem:[%s18197_s1 + $0x1d0] sm:$0xff] }
 0x25d   : > { %3937 = vmatmul.bf16.gmra.mxu1 %v3849_v34  ;;  %v3667_v35 = vrot.slane %v3665_v58, 2  ;;  %v4608_v18 = vrot.slane %v4606_v60, 1  ;;  %v4715_v58 = vpack.c.b16 %v4492_v29, %v4714_v62  ;;  %v3850_v25 = vrot.slane %v15792_v50, 3  ;;  %v13393_v60 = vld [vmem:[%s18197_s1 + $0x1c8] sm:$0xff] }
 0x25e   : > { %4455 = vmatmul.bf16.gmra.mxu2 %v4391_v55  ;;  %v4604_v0 = vor.u32 %v4603_v59, %v4600_v61 }
 0x25f   : > { %4567 = vmatmul.bf16.gmra.mxu3 %v4503_v36  ;;  %4887 = vmatpush.bf16.msrb.mxu2 %v13387_v41  ;;  %v3670_v36 = vrot.slane %v3668_v52, 3  ;;  %v4611_v41 = vrot.slane %v4609_v8, 2  ;;  %v13402_v52 = vld [vmem:[%s18197_s1 + $0x210] sm:$0xff]  ;;  %v4716_v62 = vrot.slane %v4715_v58, 2  ;;  %v3851_v59 = vsel %vm1946_vm5, %v3848_v57, %v3850_v25  ;;  %v13438_v57 = vld [vmem:[%s18199_s3 + $0xb8] sm:$0xff] }
 0x260   : > { %5006 = vmatpush.bf16.msrb.mxu3 %v13395_v47  ;;  %5105 = vmatpush.bf16.msrb.mxu0 %v13402_v52  ;;  %v15878_v52 = vld [vmem:[%s14240_s21 + $0x80] sm:$0xff] }
 0x261   : > { %v3345_v11 = vpop.f32.mrf.mxu2  ;;  %v2968_v3 = vpop.f32.mrf.mxu0  ;;  %v15836_v29 = vor.u32 %v3670_v36, %v3667_v35  ;;  %v15842_v8 = vor.u32 %v4611_v41, %v4608_v18  ;;  %v3677_v23 = vshll.u32 %v15878_v52, 16 }
 0x262   : > { %v3559_v4 = vpop.f32.mrf.mxu3  ;;  %v3376_v34 = vadd.f32 %v3345_v11, %v3218_v19  ;;  %v3189_v55 = vpop.f32.mrf.mxu1  ;;  %v2998_v26 = vadd.f32 %v2968_v3, %v15276_v38  ;;  %v13385_v38 = vld [vmem:[%s18197_s1 + $0x188] sm:$0xff]  ;;  %v4717_v11 = vrot.slane %v15644_v24, 2  ;;  %v18207_v3 = vshll.u32 %v15825_v21, 16 }
 0x263   : > { %4888 = vmatpush.bf16.msrb.mxu2 %v13386_v56  ;;  %v4613_v41 = vsel %vm1125_vm2, %v4604_v0, %v15842_v8  ;;  %v15961_v24 = vld [vmem:[%s14240_s21 + $0x88] sm:$0xff] }
 0x264   : > { %v15822_v47 = vadd.f32 %v3559_v4, %v3376_v34  ;;  %5007 = vmatpush.bf16.msrb.mxu3 %v13394_v39  ;;  %v3219_v19 = vadd.f32 %v3189_v55, %v2998_v26  ;;  %v4595_v4 = vunpack.c.l.b16 %v4577_v49  ;;  %v13384_v39 = vld [vmem:[%s18197_s1 + $0x180] sm:$0xff]  ;;  %v3672_v49 = vsel %vm1723_vm4, %v15754_v28, %v15836_v29 }
 0x265   : > { %v13392_v34 = vld [vmem:[%s18197_s1 + $0x1c0] sm:$0xff]  ;;  %v18206_v26 = vshrl.u32 %v15825_v21, 16  ;;  %v4718_v58 = vsel %vm1348_vm3, %v4716_v62, %v4717_v11 }
 0x267   : > { %4889 = vmatpush.bf16.msrb.mxu2 %v13385_v38  ;;  %v3674_v38 = vshrl.u32 %v15878_v52, 16  ;;  %v6932_v0 = vrot.slane %v18206_v26, 1  ;;  %v15899_v26 = vld [vmem:[%s14240_s21 + $0x94] sm:$0xf] }
 0x268   : > { %5008 = vmatpush.bf16.msrb.mxu3 %v13393_v60 }
 0x269   : > { %v3347_v56 = vpop.f32.mrf.mxu2  ;;  %v2971_v36 = vpop.f32.mrf.mxu0 }
 0x26a   : > { %v3561_v35 = vpop.f32.mrf.mxu3  ;;  %v3377_v55 = vadd.f32 %v3347_v56, %v3219_v19  ;;  %v3192_v61 = vpop.f32.mrf.mxu1  ;;  %v2999_v18 = vadd.f32 %v2971_v36, %v15298_v6  ;;  %v15867_v19 = vpack.c.b16 %v4595_v4, %v4595_v4  ;;  %v13422_v6 = vld [vmem:[%s18199_s3 + $0x38] sm:$0xff]  ;;  %v6933_v4 = vrot.slane %v18207_v3, 2 }
 0x26b   : > { %4890 = vmatpush.bf16.msrb.mxu2 %v13384_v39  ;;  %v13421_v39 = vld [vmem:[%s18199_s3 + $0x30] sm:$0xff] }
 0x26c   : > { %v15869_v28 = vadd.f32 %v3561_v35, %v3377_v55  ;;  %5009 = vmatpush.bf16.msrb.mxu3 %v13392_v34  ;;  %v3220_v15 = vadd.f32 %v3192_v61, %v2999_v18  ;;  %3784 = vmatmul.bf16.gmra.mxu0 %v3672_v49  ;;  %v4615_v60 = vshrl.u32 %v15867_v19, 16  ;;  %v4618_v62 = vshll.u32 %v15867_v19, 16  ;;  %v13437_v34 = vld [vmem:[%s18199_s3 + $0xb0] sm:$0xff] }
 0x26d   : > { %3942 = vmatmul.bf16.gmra.mxu1 %v3851_v59  ;;  %v15894_v55 = vor.u32 %v6933_v4, %v6932_v0  ;;  %v3676_v59 = vrot.slane %v3674_v38, 2  ;;  %v3679_v18 = vrot.slane %v3677_v23, 3  ;;  %v13401_v38 = vld [vmem:[%s18197_s1 + $0x208] sm:$0xff]  ;;  %v4821_v4 = vunpack.c.l.b16 %v15899_v26 }
 0x26e   : > { %4681 = vmatmul.bf16.vlgmr.msra.gmra.mxu2 %v4613_v41  ;;  %v13420_v23 = vld [vmem:[%s18199_s3 + $0x28] sm:$0xff]  ;;  %5106 = vmatpush.bf16.msrb.mxu0 %v13401_v38  ;;  %v15950_v38 = vld [vmem:[%s14240_s21 + $0x98] sm:$0xff] }
 0x26f   : > { %4779 = vmatmul.bf16.vlgmr.msra.gmra.mxu3 %v4718_v58  ;;  %5528 = vmatpush.bf16.msra.mxu2 %v13422_v6  ;;  %v4617_v58 = vrot.slane %v4615_v60, 1  ;;  %v4620_v6 = vrot.slane %v4618_v62, 2  ;;  %v15904_v3 = vsel %vm1125_vm2, %v15804_v7, %v15894_v55  ;;  %v15917_v60 = vor.u32 %v3679_v18, %v3676_v59 }
 0x270   : > { %5700 = vmatpush.bf16.msra.mxu3 %v13438_v57  ;;  %v4794_v57 = vld [vmem:[%s14240_s21 + $0x90] sm:$0xc]  ;;  %v3852_v7 = vrot.slane %v15878_v52, 3 }
 0x271   : > { %v3350_v56 = vpop.f32.mrf.mxu2  ;;  %v2973_v61 = vpop.f32.mrf.mxu0  ;;  %v4820_v62 = vunpack.c.l.b16 %v4794_v57 }
 0x272   : > { %v3564_v35 = vpop.f32.mrf.mxu3  ;;  %v3378_v36 = vadd.f32 %v3350_v56, %v3220_v15  ;;  %v3194_v49 = vpop.f32.mrf.mxu1  ;;  %v3000_v41 = vadd.f32 %v2973_v61, %v15341_v37  ;;  %v13424_v37 = vld [vmem:[%s18199_s3 + $0x48] sm:$0xff]  ;;  %v13419_v61 = vld [vmem:[%s18199_s3 + $0x20] sm:$0xff] }
 0x273   : > { %5529 = vmatpush.bf16.msra.mxu2 %v13421_v39  ;;  %v13436_v56 = vld [vmem:[%s18199_s3 + $0xa8] sm:$0xff]  ;;  %v4719_v39 = vrot.slane %v15867_v19, 2  ;;  %5345 = vmatpush.bf16.msrb.mxu1 %v13424_v37  ;;  %v3681_v19 = vsel %vm1723_vm4, %v15836_v29, %v15917_v60 }
 0x274   : > { %5701 = vmatpush.bf16.msra.mxu3 %v13437_v34  ;;  %v15906_v0 = vadd.f32 %v3564_v35, %v3378_v36  ;;  %v3221_v15 = vadd.f32 %v3194_v49, %v3000_v41  ;;  %v4621_v35 = vor.u32 %v4620_v6, %v4617_v58  ;;  %v13435_v49 = vld [vmem:[%s18199_s3 + $0xa0] sm:$0xff]  ;;  %v3853_v58 = vsel %vm1946_vm5, %v3850_v25, %v3852_v7  ;;  %v13434_v25 = vld [vmem:[%s18199_s3 + $0x98] sm:$0xff] }
 0x275   : > { %v15941_v6 = vpack.c.b16 %v4821_v4, %v4820_v62  ;;  %v4720_v29 = vsel %vm1348_vm3, %v4717_v11, %v4719_v39  ;;  %v3686_v11 = vshll.u32 %v15961_v24, 16 }
 0x277   : > { %5530 = vmatpush.bf16.msra.mxu2 %v13420_v23  ;;  %v4927_v23 = vshrl.u32 %v15941_v6, 16  ;;  %v4930_v62 = vshll.u32 %v15941_v6, 16 }
 0x278   : > { %5702 = vmatpush.bf16.msra.mxu3 %v13436_v56  ;;  %v4935_v56 = vshrl.u32 %v15950_v38, 16 }
 0x279   : > { %v3352_v34 = vpop.f32.mrf.mxu2  ;;  %v2976_v18 = vpop.f32.mrf.mxu0 }
 0x27a   : > { %v3566_v36 = vpop.f32.mrf.mxu3  ;;  %v3379_v59 = vadd.f32 %v3352_v34, %v3221_v15  ;;  %v3197_v41 = vpop.f32.mrf.mxu1  ;;  %v3001_v57 = vadd.f32 %v2976_v18, %v15370_v5  ;;  %v4622_v15 = vsel %vm1125_vm2, %v15842_v8, %v4621_v35  ;;  %v13418_v5 = vld [vmem:[%s18199_s3 + $0x18] sm:$0xff]  ;;  %v3683_v8 = vshrl.u32 %v15961_v24, 16 }
 0x27b   : > { %5531 = vmatpush.bf16.msra.mxu2 %v13419_v61  ;;  %v4938_v35 = vshll.u32 %v15950_v38, 16  ;;  %v13433_v61 = vld [vmem:[%s18199_s3 + $0x90] sm:$0xff] }
 0x27c   : > { %v15952_v37 = vadd.f32 %v3566_v36, %v3379_v59  ;;  %5703 = vmatpush.bf16.msra.mxu3 %v13435_v49  ;;  %v3222_v50 = vadd.f32 %v3197_v41, %v3001_v57  ;;  %3789 = vmatmul.bf16.gmra.mxu0 %v3681_v19  ;;  %v13417_v36 = vld [vmem:[%s18199_s3 + $0x10] sm:$0xff]  ;;  %v3685_v41 = vrot.slane %v3683_v8, 2  ;;  %v3688_v19 = vrot.slane %v3686_v11, 3  ;;  %v13423_v8 = vld [vmem:[%s18199_s3 + $0x40] sm:$0xff] }
 0x27d   : > { %3947 = vmatmul.bf16.gmra.mxu1 %v3853_v58  ;;  %v4929_v58 = vrot.slane %v4927_v23, 2  ;;  %v3854_v23 = vrot.slane %v15961_v24, 3  ;;  %v13443_v24 = vld [vmem:[%s18199_s3 + $0xe0] sm:$0xff] }
 0x27e   : > { %4686 = vmatmul.bf16.gmra.mxu2 %v4622_v15  ;;  %v4932_v15 = vrot.slane %v4930_v62, 3  ;;  %v15989_v11 = vor.u32 %v3688_v19, %v3685_v41  ;;  %v4828_v62 = vrot.slane %v15941_v6, 2  ;;  %5346 = vmatpush.bf16.msrb.mxu1 %v13423_v8  ;;  %v13415_v6 = vld [vmem:[%s18199_s3] sm:$0xff] }
 0x27f   : > { %4784 = vmatmul.bf16.gmra.mxu3 %v4720_v29  ;;  %5532 = vmatpush.bf16.msra.mxu2 %v13418_v5  ;;  %v4937_v29 = vrot.slane %v4935_v56, 2  ;;  %v4940_v5 = vrot.slane %v4938_v35, 3  ;;  %v13432_v35 = vld [vmem:[%s18199_s3 + $0x88] sm:$0xff] }
 0x280   : > { %5704 = vmatpush.bf16.msra.mxu3 %v13434_v25  ;;  %v3600_v25 = vld [vmem:[%s14240_s21 + $0x90] sm:$0x7] }
 0x281   : > { %v3355_v39 = vpop.f32.mrf.mxu2  ;;  %v2978_v59 = vpop.f32.mrf.mxu0  ;;  %v3618_v56 = vunpack.c.l.b16 %v3600_v25 }
 0x282   : > { %v3569_v34 = vpop.f32.mrf.mxu3  ;;  %v3380_v49 = vadd.f32 %v3355_v39, %v3222_v50  ;;  %v3199_v18 = vpop.f32.mrf.mxu1  ;;  %v3002_v57 = vadd.f32 %v2978_v59, %v15413_v40  ;;  %v13400_v50 = vld [vmem:[%s18197_s1 + $0x200] sm:$0xff]  ;;  %v13416_v40 = vld [vmem:[%s18199_s3 + $0x8] sm:$0xff]  ;;  %v4829_v39 = vrot.slane %v15950_v38, 2 }
 0x283   : > { %5533 = vmatpush.bf16.msra.mxu2 %v13417_v36  ;;  %v15997_v36 = vor.u32 %v4940_v5, %v4937_v29  ;;  %5107 = vmatpush.bf16.msrb.mxu0 %v13400_v50 }
 0x284   : > { %v15977_v13 = vadd.f32 %v3569_v34, %v3380_v49  ;;  %5705 = vmatpush.bf16.msra.mxu3 %v13433_v61  ;;  %v3223_v53 = vadd.f32 %v3199_v18, %v3002_v57  ;;  %v4933_v34 = vor.u32 %v4932_v15, %v4929_v58  ;;  %v4924_v61 = vunpack.c.l.b16 %v4906_v12  ;;  %v13431_v18 = vld [vmem:[%s18199_s3 + $0x80] sm:$0xff] }
 0x285   : > { %v3690_v12 = vsel %vm1723_vm4, %v15917_v60, %v15989_v11  ;;  %v3855_v57 = vsel %vm1946_vm5, %v3852_v7, %v3854_v23  ;;  %v3619_v15 = vpack.c.b16 %v3618_v56, %v3618_v56  ;;  %v4830_v5 = vsel %vm1348_vm3, %v4828_v62, %v4829_v39  ;;  %v4798_v60 = vld [vmem:[%s14240_s21 + $0xa0] sm:$0x3]  ;;  %v13446_v56 = vld [vmem:[%s18199_s3 + $0xf8] sm:$0xff] }
 0x286   : > { %v16019_v25 = vpack.c.b16 %v4924_v61, %v4924_v61  ;;  %v4824_v8 = vunpack.c.l.b16 %v4798_v60  ;;  %v5171_v60 = vld [vmem:[#allocation2 + $0x4] sm:$0xc] }
 0x287   : > { %5534 = vmatpush.bf16.msra.mxu2 %v13416_v40  ;;  %v3695_v7 = vshll.u32 %v3619_v15, 16  ;;  %5978 = vmatpush.bf16.msra.mxu0 %v13446_v56 }
 0x288   : > { %5706 = vmatpush.bf16.msra.mxu3 %v13432_v35  ;;  %v4944_v40 = vshrl.u32 %v16019_v25, 16  ;;  %v4947_v62 = vshll.u32 %v16019_v25, 16 }
 0x289   : > { %v3357_v49 = vpop.f32.mrf.mxu2  ;;  %v2981_v19 = vpop.f32.mrf.mxu0 }
 0x28a   : > { %v3571_v59 = vpop.f32.mrf.mxu3  ;;  %v3381_v41 = vadd.f32 %v3357_v49, %v3223_v53  ;;  %v3202_v58 = vpop.f32.mrf.mxu1  ;;  %v3003_v29 = vadd.f32 %v2981_v19, %v15439_v27  ;;  %v4942_v53 = vsel %vm1723_vm4, %v4933_v34, %v15997_v36  ;;  %v3692_v27 = vshrl.u32 %v3619_v15, 16 }
 0x28b   : > { %5535 = vmatpush.bf16.msra.mxu2 %v13415_v6  ;;  %v4827_v19 = vpack.c.b16 %v4824_v8, %v4824_v8  ;;  %v3856_v8 = vrot.slane %v3619_v15, 3 }
 0x28c   : > { %v16021_v50 = vadd.f32 %v3571_v59, %v3381_v41  ;;  %5707 = vmatpush.bf16.msra.mxu3 %v13431_v18  ;;  %v3224_v52 = vadd.f32 %v3202_v58, %v3003_v29  ;;  %3794 = vmatmul.bf16.gmra.mxu0 %v3690_v12  ;;  %v3694_v6 = vrot.slane %v3692_v27, 2  ;;  %v3697_v18 = vrot.slane %v3695_v7, 3  ;;  %v13485_v29 = vld [vmem:[%s18199_s3 + $0x1b8] sm:$0xff]  ;;  %v5204_v27 = vld [vmem:[#allocation2 + $0x4] sm:$0x8] }
 0x28d   : > { %3952 = vmatmul.bf16.gmra.mxu1 %v3855_v57  ;;  %v4946_v58 = vrot.slane %v4944_v40, 2  ;;  %v4949_v12 = vrot.slane %v4947_v62, 3  ;;  %v13470_v57 = vld [vmem:[%s18199_s3 + $0x178] sm:$0xff]  ;;  %v4831_v40 = vrot.slane %v4827_v19, 2  ;;  %v3857_v15 = vsel %vm1946_vm5, %v3854_v23, %v3856_v8 }
 0x28e   : > { %4891 = vmatmul.bf16.vlgmr.msrb.gmra.mxu2 %v4830_v5  ;;  %v3698_v7 = vor.u32 %v3697_v18, %v3694_v6 }
 0x28f   : > { %5010 = vmatmul.bf16.vlgmr.msrb.gmra.mxu3 %v4942_v53  ;;  %v5172_v53 = vld [vmem:[#allocation2 + $0x8] sm:$0xf]  ;;  %6391 = vmatpush.bf16.msrb.mxu2 %v13470_v57  ;;  %v4950_v62 = vor.u32 %v4949_v12, %v4946_v58  ;;  %v4832_v19 = vsel %vm1348_vm3, %v4829_v39, %v4831_v40  ;;  %v5025_v12 = vld [vmem:[%s14240_s21 + $0x90] sm:$0x8] }
 0x290   : > { %6657 = vmatpush.bf16.msrb.mxu3 %v13485_v29  ;;  %v5240_v56 = vunpack.c.l.b16 %v5172_v53  ;;  %v3699_v6 = vsel %vm1723_vm4, %v15989_v11, %v3698_v7  ;;  %v16058_v53 = vld [vmem:[#allocation2 + $0xc] sm:$0xff] }
 0x291   : > { %v3360_v35 = vpop.f32.mrf.mxu2  ;;  %v2983_v49 = vpop.f32.mrf.mxu0  ;;  %v4951_v58 = vsel %vm1723_vm4, %v15997_v36, %v4950_v62  ;;  %v5404_v7 = vshll.u32 %v16058_v53, 16 }
 0x292   : > { %v3574_v34 = vpop.f32.mrf.mxu3  ;;  %v3382_v61 = vadd.f32 %v3360_v35, %v3224_v52  ;;  %v3204_v59 = vpop.f32.mrf.mxu1  ;;  %v3004_v41 = vadd.f32 %v2983_v49, %v15478_v42  ;;  %v13445_v52 = vld [vmem:[%s18199_s3 + $0xf0] sm:$0xff]  ;;  %v5389_v35 = vunpack.c.l.b16 %v5171_v60 }
 0x293   : > { %5979 = vmatpush.bf16.msra.mxu0 %v13445_v52 }
 0x294   : > { %v16036_v5 = vadd.f32 %v3574_v34, %v3382_v61  ;;  %v3225_v42 = vadd.f32 %v3204_v59, %v3004_v41  ;;  %v5239_v34 = vunpack.c.l.b16 %v5204_v27  ;;  %v13444_v61 = vld [vmem:[%s18199_s3 + $0xe8] sm:$0xff]  ;;  %v5390_v57 = vpack.c.b16 %v5240_v56, %v5389_v35  ;;  %v13442_v35 = vld [vmem:[%s18199_s3 + $0xd8] sm:$0xff] }
 0x296   : > { %v5256_v11 = vpack.c.b16 %v5240_v56, %v5239_v34  ;;  %v5393_v39 = vshrl.u32 %v5390_v57, 16  ;;  %v5396_v60 = vshll.u32 %v5390_v57, 16  ;;  %v5046_v57 = vrot.slane %v15950_v38, 3 }
 0x297   : > { %5980 = vmatpush.bf16.msra.mxu0 %v13444_v61 }
 0x298   : > { %v5600_v36 = vshrl.u32 %v5256_v11, 16  ;;  %v5603_v52 = vshll.u32 %v5256_v11, 16  ;;  %v5395_v61 = vrot.slane %v5393_v39, 2 }
 0x299   : > { %v3362_v49 = vpop.f32.mrf.mxu2  ;;  %v2986_v59 = vpop.f32.mrf.mxu0 }
 0x29a   : > { %v3576_v51 = vpop.f32.mrf.mxu3  ;;  %v3383_v9 = vadd.f32 %v3362_v49, %v3225_v42  ;;  %v3207_v41 = vpop.f32.mrf.mxu1  ;;  %v3005_v18 = vadd.f32 %v2986_v59, %v15515_v1  ;;  %v5043_v1 = vunpack.c.l.b16 %v5025_v12  ;;  %v5398_v49 = vrot.slane %v5396_v60, 3  ;;  %v13469_v59 = vld [vmem:[%s18199_s3 + $0x170] sm:$0xff] }
 0x29b   : > { %5981 = vmatpush.bf16.msra.mxu0 %v13443_v24  ;;  %6392 = vmatpush.bf16.msrb.mxu2 %v13469_v59  ;;  %v13441_v24 = vld [vmem:[%s18199_s3 + $0xd0] sm:$0xff]  ;;  %v16115_v59 = vld [vmem:[%s18198_s2] ss:$0 sm:$0xff] }
 0x29c   : > { %v16056_v29 = vadd.f32 %v3576_v51, %v3383_v9  ;;  %v3226_v23 = vadd.f32 %v3207_v41, %v3005_v18  ;;  %3799 = vmatmul.bf16.gmra.mxu0 %v3699_v6  ;;  %v13454_v9 = vld [vmem:[%s18199_s3 + $0x138] sm:$0xff]  ;;  %v5401_v51 = vshrl.u32 %v16058_v53, 16  ;;  %v5044_v56 = vpack.c.b16 %v4821_v4, %v5043_v1  ;;  %v13484_v41 = vld [vmem:[%s18199_s3 + $0x1b0] sm:$0xff] }
 0x29d   : > { %3957 = vmatmul.bf16.gmra.mxu1 %v3857_v15  ;;  %v5602_v4 = vrot.slane %v5600_v36, 3  ;;  %v5605_v15 = vrot.slane %v5603_v52, 4  ;;  %6658 = vmatpush.bf16.msrb.mxu3 %v13484_v41  ;;  %v5267_v1 = vrot.slane %v16058_v53, 3  ;;  %v13453_v41 = vld [vmem:[%s18199_s3 + $0x130] sm:$0xff] }
 0x29e   : > { %4896 = vmatmul.bf16.gmra.mxu2 %v4832_v19  ;;  %6124 = vmatpush.bf16.msra.mxu1 %v13454_v9  ;;  %v5403_v26 = vrot.slane %v5401_v51, 2  ;;  %v5406_v19 = vrot.slane %v5404_v7, 3  ;;  %v5045_v12 = vrot.slane %v5044_v56, 3  ;;  %v5399_v9 = vor.u32 %v5398_v49, %v5395_v61 }
 0x29f   : > { %5015 = vmatmul.bf16.gmra.mxu3 %v4951_v58  ;;  %5982 = vmatpush.bf16.msra.mxu0 %v13442_v35  ;;  %v5607_v58 = vrot.slane %v5401_v51, 3  ;;  %v5606_v51 = vor.u32 %v5605_v15, %v5602_v4  ;;  %v16103_v35 = vld [vmem:[#allocation2 + $0x14] sm:$0xff] }
 0x2a0   : > { %v16087_v36 = vor.u32 %v5406_v19, %v5403_v26  ;;  %v5410_v26 = vshrl.u32 %v16103_v35, 16 }
 0x2a1   : > { %v3365_v42 = vpop.f32.mrf.mxu2  ;;  %v2988_v40 = vpop.f32.mrf.mxu0 }
 0x2a2   : > { %v3579_v27 = vpop.f32.mrf.mxu3  ;;  %v3384_v8 = vadd.f32 %v3365_v42, %v3226_v23  ;;  %v3209_v62 = vpop.f32.mrf.mxu1  ;;  %v3006_v34 = vadd.f32 %v2988_v40, %v15557_v31  ;;  %v5608_v31 = vrot.slane %v5404_v7, 4  ;;  %v5266_v23 = vrot.slane %v5256_v11, 3  ;;  %v13440_v11 = vld [vmem:[%s18199_s3 + $0xc8] sm:$0xff]  ;;  %6125 = vmatpush.bf16.msra.mxu1 %v13453_v41 }
 0x2a3   : > { %5983 = vmatpush.bf16.msra.mxu0 %v13441_v24 }
 0x2a4   : > { %v16080_v6 = vadd.f32 %v3579_v27, %v3384_v8  ;;  %v3227_v18 = vadd.f32 %v3209_v62, %v3006_v34  ;;  %v16089_v52 = vor.u32 %v5608_v31, %v5607_v58  ;;  %v5047_v8 = vsel %vm1946_vm5, %v5045_v12, %v5046_v57 }
 0x2a5   : > { %v5268_v56 = vsel %vm1946_vm5, %v5266_v23, %v5267_v1  ;;  %v5408_v34 = vsel %vm1723_vm4, %v5399_v9, %v16087_v36  ;;  %v13468_v23 = vld [vmem:[%s18199_s3 + $0x168] sm:$0xff] }
 0x2a6   : > { %v5610_v61 = vsel %vm5598_vm6, %v5606_v51, %v16089_v52  ;;  %6393 = vmatpush.bf16.msrb.mxu2 %v13468_v23 }
 0x2a7   : > { %5984 = vmatpush.bf16.msra.mxu0 %v13440_v11  ;;  %v4034_v11 = vpop.permute.xlu1 %4033 }
 0x2a9   : > { %v3367_v39 = vpop.f32.mrf.mxu2  ;;  %v3765_v27 = vpop.f32.mrf.mxu0 }
 0x2aa   : > { %v3581_v60 = vpop.f32.mrf.mxu3  ;;  %v3385_v42 = vadd.f32 %v3367_v39, %v3227_v18  ;;  %v3923_v7 = vpop.f32.mrf.mxu1  ;;  %v3805_v40 = vadd.f32 %v3765_v27, %v15582_v2  ;;  %v13439_v2 = vld [vmem:[%s18199_s3 + $0xc0] sm:$0xff]  ;;  %v5413_v18 = vshll.u32 %v16103_v35, 16  ;;  %v13483_v39 = vld [vmem:[%s18199_s3 + $0x1a8] sm:$0xff] }
 0x2ab   : > { %5985 = vmatpush.bf16.msra.mxu0 %v13439_v2  ;;  %6659 = vmatpush.bf16.msrb.mxu3 %v13483_v39  ;;  %v16150_v39 = vld [vmem:[#allocation2 + $0x1c] sm:$0xff] }
 0x2ac   : > { %v16098_v62 = vadd.f32 %v3581_v60, %v3385_v42  ;;  %5108 = vmatmul.bf16.vlgmr.msrb.gmra.mxu0 %v5047_v8  ;;  %v3963_v49 = vadd.f32 %v3923_v7, %v3805_v40  ;;  %v5412_v60 = vrot.slane %v5410_v26, 2  ;;  %v5415_v51 = vrot.slane %v5413_v18, 3  ;;  %v4039_v40 = vpop.permute.xlu2 %4038 }
 0x2ad   : > { %5347 = vmatmul.bf16.vlgmr.msrb.gmra.mxu1 %v5268_v56  ;;  %v5611_v42 = vrot.slane %v5410_v26, 3  ;;  %v5612_v27 = vrot.slane %v5413_v18, 4  ;;  %v5048_v7 = vrot.slane %v16019_v25, 3  ;;  %v5269_v56 = vrot.slane %v16103_v35, 3 }
 0x2ae   : > { %5536 = vmatmul.bf16.vlgmr.msra.gmra.mxu2 %v5408_v34  ;;  %v3983_v12 = vadd.f32 %v16115_v59, %v3963_v49  ;;  %v16135_v49 = vor.u32 %v5415_v51, %v5412_v60  ;;  %v14023_v60 = vld [vmem:[#allocation2 + $0x14] sm:$0xff]   ;;  %v13452_v51 = vld [vmem:[%s18199_s3 + $0x128] sm:$0xff] }
 0x2af   : > { %5708 = vmatmul.bf16.vlgmr.msra.gmra.mxu3 %v5610_v61  ;;  %v16137_v41 = vor.u32 %v5612_v27, %v5611_v42  ;;  %v5049_v25 = vsel %vm1946_vm5, %v5046_v57, %v5048_v7  ;;  %v5270_v23 = vsel %vm1946_vm5, %v5267_v1, %v5269_v56  ;;  %v13493_v1 = vld [vmem:[%s18199_s3 + $0x1f8] sm:$0xff]  ;;  %v5419_v42 = vshrl.u32 %v16150_v39, 16  ;;  %6126 = vmatpush.bf16.msra.mxu1 %v13452_v51 }
 0x2b0   : > { %v3999_v8 = vmax.f32 %v3983_v12, 0.0  ;;  %v13919_v12 = vld [vmem:[#allocation2 + $0xc] sm:$0x8]  ;;  %v5417_v38 = vsel %vm1723_vm4, %v16087_v36, %v16135_v49  ;;  %v5851_v36 = vshrl.u32 %v14023_v60, 16  ;;  %v5854_v27 = vshll.u32 %v14023_v60, 16  ;;  %6817 = vmatpush.bf16.msrb.mxu0 %v13493_v1 }
 0x2b1   : > { %v4288_v4 = vpop.f32.mrf.mxu2  ;;  %v3767_v58 = vpop.f32.mrf.mxu0  ;;  %v5271_v1 = vrot.slane %v16150_v39, 3 }
 0x2b2   : > { %v4357_v15 = vpop.f32.mrf.mxu3  ;;  %v3925_v31 = vpop.f32.mrf.mxu1  ;;  %v3806_v24 = vadd.f32 %v3767_v58, %v15619_v46  ;;  %v4111_v18 = vmul.f32 %v4034_v11, %v3999_v8 }
 0x2b3   : > { %v16122_v19 = vadd.f32 %v4357_v15, %v4288_v4 }
 0x2b4   : > { %v3964_v9 = vadd.f32 %v3925_v31, %v3806_v24  ;;  %v14021_v24 = vld [vmem:[#allocation2 + $0xc] sm:$0xf0]  }
 0x2b5   : > { %v13920_v57 = vor.u32 %v14021_v24, %v13919_v12 }
 0x2b6   : > { %v3984_v46 = vadd.f32 %v16115_v59, %v3964_v9 }
 0x2b8   : > { %v4000_v34 = vmax.f32 %v3984_v46, 0.0 }
 0x2b9   : > { %v4290_v61 = vpop.f32.mrf.mxu2  ;;  %v3770_v4 = vpop.f32.mrf.mxu0 }
 0x2ba   : > { %v4359_v2 = vpop.f32.mrf.mxu3  ;;  %v3928_v15 = vpop.f32.mrf.mxu1  ;;  %v4112_v58 = vmul.f32 %v4039_v40, %v4000_v34  ;;  %v3807_v31 = vadd.f32 %v3770_v4, %v15653_v44  ;;  %v5614_v44 = vsel %vm5598_vm6, %v16089_v52, %v16137_v41  ;;  %v5422_v52 = vshll.u32 %v16150_v39, 16 }
 0x2bb   : > { %v16139_v26 = vadd.f32 %v4359_v2, %v4290_v61  ;;  %v5843_v34 = vshrl.u32 %v13920_v57, 16  ;;  %v5846_v61 = vshll.u32 %v13920_v57, 16  ;;  %v4044_v57 = vpop.permute.xlu0 %4043 }
 0x2bc   : > { %v13723_v9 = vpack.c.bf16 %v4112_v58, %v4111_v18  ;;  %5113 = vmatmul.bf16.gmra.mxu0 %v5049_v25  ;;  %v3965_v53 = vadd.f32 %v3928_v15, %v3807_v31  ;;  %v13467_v15 = vld [vmem:[%s18199_s3 + $0x160] sm:$0xff]  ;;  %v5421_v18 = vrot.slane %v5419_v42, 2  ;;  %v5853_v58 = vrot.slane %v5851_v36, 3 }
 0x2bd   : > { %5352 = vmatmul.bf16.gmra.mxu1 %v5270_v23  ;;  %v13482_v25 = vld [vmem:[%s18199_s3 + $0x1a0] sm:$0xff]  ;;  %v5856_v31 = vrot.slane %v5854_v27, 4  ;;  %v5424_v24 = vrot.slane %v5422_v52, 3  ;;  %v5615_v23 = vrot.slane %v5419_v42, 3  ;;  %v5616_v60 = vrot.slane %v5422_v52, 4  ;;  %6394 = vmatpush.bf16.msrb.mxu2 %v13467_v15 }
 0x2be   : > { %5541 = vmatmul.bf16.gmra.mxu2 %v5417_v38  ;;  %13873 = vst [vmem:[#allocation2 + $0x50] sm:$0xff] %v13723_v9   ;;  %v3985_v2 = vadd.f32 %v16115_v59, %v3965_v53  ;;  %6660 = vmatpush.bf16.msrb.mxu3 %v13482_v25  ;;  %v5845_v9 = vrot.slane %v5843_v34, 3  ;;  %v5848_v38 = vrot.slane %v5846_v61, 4  ;;  %v4049_v53 = vpop.permute.xlu1 %4048  ;;  %v5272_v15 = vsel %vm1946_vm5, %v5269_v56, %v5271_v1  ;;  %v13492_v56 = vld [vmem:[%s18199_s3 + $0x1f0] sm:$0xff] }
 0x2bf   : > { %5713 = vmatmul.bf16.gmra.mxu3 %v5614_v44  ;;  %v16178_v51 = vor.u32 %v5856_v31, %v5853_v58  ;;  %v16182_v42 = vor.u32 %v5616_v60, %v5615_v23  ;;  %v14025_v58 = vld [vmem:[#allocation2 + $0x1c] sm:$0xff]   ;;  %6818 = vmatpush.bf16.msrb.mxu0 %v13492_v56 }
 0x2c0   : > { %v5849_v34 = vor.u32 %v5848_v38, %v5845_v9  ;;  %v5863_v60 = vshll.u32 %v14025_v58, 16 }
 0x2c1   : > { %v4293_v7 = vpop.f32.mrf.mxu2  ;;  %v3772_v11 = vpop.f32.mrf.mxu0 }
 0x2c2   : > { %v4362_v8 = vpop.f32.mrf.mxu3  ;;  %v3930_v40 = vpop.f32.mrf.mxu1  ;;  %v3808_v4 = vadd.f32 %v3772_v11, %v15705_v32  ;;  %v4001_v32 = vmax.f32 %v3985_v2, 0.0  ;;  %v5858_v25 = vsel %vm5598_vm6, %v5849_v34, %v16178_v51 }
 0x2c3   : > { %v16166_v46 = vadd.f32 %v4362_v8, %v4293_v7  ;;  %v16180_v8 = vor.u32 %v5424_v24, %v5421_v18  ;;  %v16194_v18 = vld [vmem:[#allocation2 + $0x24] sm:$0xff] }
 0x2c4   : > { %v3966_v12 = vadd.f32 %v3930_v40, %v3808_v4  ;;  %v4113_v61 = vmul.f32 %v4044_v57, %v4001_v32  ;;  %v13451_v24 = vld [vmem:[%s18199_s3 + $0x120] sm:$0xff]  ;;  %v5428_v23 = vshrl.u32 %v16194_v18, 16 }
 0x2c5   : > { %6127 = vmatpush.bf16.msra.mxu1 %v13451_v24 }
 0x2c6   : > { %v3986_v44 = vadd.f32 %v16115_v59, %v3966_v12  ;;  %v5426_v12 = vsel %vm1723_vm4, %v16135_v49, %v16180_v8  ;;  %v5860_v49 = vshrl.u32 %v14025_v58, 16  ;;  %v4059_v58 = vpop.permute.xlu0 %4058 }
 0x2c8   : > { %v4002_v7 = vmax.f32 %v3986_v44, 0.0  ;;  %v5862_v34 = vrot.slane %v5860_v49, 3 }
 0x2c9   : > { %v4295_v36 = vpop.f32.mrf.mxu2  ;;  %v3775_v11 = vpop.f32.mrf.mxu0 }
 0x2ca   : > { %v4364_v27 = vpop.f32.mrf.mxu3  ;;  %v3933_v40 = vpop.f32.mrf.mxu1  ;;  %v4114_v2 = vmul.f32 %v4049_v53, %v4002_v7  ;;  %v3809_v4 = vadd.f32 %v3775_v11, %v15736_v43  ;;  %v5618_v43 = vsel %vm5598_vm6, %v16137_v41, %v16182_v42  ;;  %v5431_v41 = vshll.u32 %v16194_v18, 16 }
 0x2cb   : > { %v16184_v52 = vadd.f32 %v4364_v27, %v4295_v36  ;;  %v13466_v36 = vld [vmem:[%s18199_s3 + $0x158] sm:$0xff] }
 0x2cc   : > { %v13728_v31 = vpack.c.bf16 %v4114_v2, %v4113_v61  ;;  %5986 = vmatmul.bf16.vlgmr.msra.gmra.mxu0 %v5858_v25  ;;  %v3967_v35 = vadd.f32 %v3933_v40, %v3809_v4  ;;  %v13481_v27 = vld [vmem:[%s18199_s3 + $0x198] sm:$0xff]  ;;  %v5430_v40 = vrot.slane %v5428_v23, 2  ;;  %v5865_v61 = vrot.slane %v5863_v60, 4  ;;  %6395 = vmatpush.bf16.msrb.mxu2 %v13466_v36  ;;  %v16241_v36 = vld [vmem:[#allocation2 + $0x2c] sm:$0xff] }
 0x2cd   : > { %5357 = vmatmul.bf16.gmra.mxu1 %v5272_v15  ;;  %v5433_v2 = vrot.slane %v5431_v41, 3  ;;  %v5619_v4 = vrot.slane %v5428_v23, 3  ;;  %v5620_v15 = vrot.slane %v5431_v41, 4  ;;  %6661 = vmatpush.bf16.msrb.mxu3 %v13481_v27 }
 0x2ce   : > { %5546 = vmatmul.bf16.gmra.mxu2 %v5426_v12  ;;  %13874 = vst [vmem:[#allocation2 + $0x58] sm:$0xff] %v13728_v31   ;;  %v3987_v53 = vadd.f32 %v16115_v59, %v3967_v35  ;;  %v4054_v31 = vpop.permute.xlu2 %4053  ;;  %v5273_v12 = vrot.slane %v16194_v18, 3 }
 0x2cf   : > { %5718 = vmatmul.bf16.gmra.mxu3 %v5618_v43  ;;  %v16223_v43 = vor.u32 %v5865_v61, %v5862_v34  ;;  %v16225_v49 = vor.u32 %v5433_v2, %v5430_v40  ;;  %v16227_v60 = vor.u32 %v5620_v15, %v5619_v4  ;;  %v5437_v34 = vshrl.u32 %v16241_v36, 16 }
 0x2d1   : > { %v4451_v9 = vpop.f32.mrf.mxu2  ;;  %v3777_v44 = vpop.f32.mrf.mxu0  ;;  %v5622_v40 = vsel %vm5598_vm6, %v16182_v42, %v16227_v60  ;;  %v5440_v42 = vshll.u32 %v16241_v36, 16 }
 0x2d2   : > { %v4563_v38 = vpop.f32.mrf.mxu3  ;;  %v4461_v32 = vadd.f32 %v4451_v9, %v16122_v19  ;;  %v3935_v57 = vpop.f32.mrf.mxu1  ;;  %v3810_v7 = vadd.f32 %v3777_v44, %v15784_v17  ;;  %v4003_v17 = vmax.f32 %v3987_v53, 0.0  ;;  %v5274_v53 = vsel %vm1946_vm5, %v5271_v1, %v5273_v12  ;;  %v13491_v1 = vld [vmem:[%s18199_s3 + $0x1e8] sm:$0xff] }
 0x2d3   : > { %6819 = vmatpush.bf16.msrb.mxu0 %v13491_v1 }
 0x2d4   : > { %v16219_v11 = vadd.f32 %v4563_v38, %v4461_v32  ;;  %v3968_v19 = vadd.f32 %v3935_v57, %v3810_v7  ;;  %v4115_v41 = vmul.f32 %v4054_v31, %v4003_v17  ;;  %v5867_v7 = vsel %vm5598_vm6, %v16178_v51, %v16223_v43  ;;  %v13450_v51 = vld [vmem:[%s18199_s3 + $0x118] sm:$0xff]  ;;  %v13465_v31 = vld [vmem:[%s18199_s3 + $0x150] sm:$0xff] }
 0x2d5   : > { %6128 = vmatpush.bf16.msra.mxu1 %v13450_v51  ;;  %6396 = vmatpush.bf16.msrb.mxu2 %v13465_v31 }
 0x2d6   : > { %v3988_v25 = vadd.f32 %v16115_v59, %v3968_v19 }
 0x2d8   : > { %v4004_v35 = vmax.f32 %v3988_v25, 0.0 }
 0x2d9   : > { %v4453_v56 = vpop.f32.mrf.mxu2  ;;  %v3780_v9 = vpop.f32.mrf.mxu0 }
 0x2da   : > { %v4565_v24 = vpop.f32.mrf.mxu3  ;;  %v4462_v23 = vadd.f32 %v4453_v56, %v16139_v26  ;;  %v3938_v38 = vpop.f32.mrf.mxu1  ;;  %v4116_v32 = vmul.f32 %v4059_v58, %v4004_v35  ;;  %v3811_v44 = vadd.f32 %v3780_v9, %v15822_v47  ;;  %v14027_v26 = vld [vmem:[#allocation2 + $0x24] sm:$0xff]   ;;  %v5435_v47 = vsel %vm1723_vm4, %v16180_v8, %v16225_v49  ;;  %v13480_v35 = vld [vmem:[%s18199_s3 + $0x190] sm:$0xff] }
 0x2db   : > { %v5869_v8 = vshrl.u32 %v14027_v26, 16  ;;  %v5872_v61 = vshll.u32 %v14027_v26, 16  ;;  %6662 = vmatpush.bf16.msrb.mxu3 %v13480_v35  ;;  %v5275_v26 = vrot.slane %v16241_v36, 3 }
 0x2dc   : > { %v16231_v57 = vadd.f32 %v4565_v24, %v4462_v23  ;;  %v13733_v27 = vpack.c.bf16 %v4116_v32, %v4115_v41  ;;  %5991 = vmatmul.bf16.gmra.mxu0 %v5867_v7  ;;  %v3969_v39 = vadd.f32 %v3938_v38, %v3811_v44  ;;  %v5439_v24 = vrot.slane %v5437_v34, 2  ;;  %v4069_v7 = vpop.permute.xlu2 %4068 }
 0x2dd   : > { %5362 = vmatmul.bf16.gmra.mxu1 %v5274_v53  ;;  %v5871_v23 = vrot.slane %v5869_v8, 3  ;;  %v5874_v9 = vrot.slane %v5872_v61, 4  ;;  %v5442_v38 = vrot.slane %v5440_v42, 3  ;;  %v5623_v41 = vrot.slane %v5437_v34, 3  ;;  %v4064_v53 = vpop.permute.xlu1 %4063 }
 0x2de   : > { %5551 = vmatmul.bf16.gmra.mxu2 %v5435_v47  ;;  %13875 = vst [vmem:[#allocation2 + $0x60] sm:$0xff] %v13733_v27   ;;  %v3989_v25 = vadd.f32 %v16115_v59, %v3969_v39  ;;  %v5624_v32 = vrot.slane %v5440_v42, 4 }
 0x2df   : > { %5723 = vmatmul.bf16.gmra.mxu3 %v5622_v40  ;;  %v16270_v27 = vor.u32 %v5874_v9, %v5871_v23  ;;  %v16272_v1 = vor.u32 %v5442_v38, %v5439_v24 }
 0x2e0   : > { %v16274_v51 = vor.u32 %v5624_v32, %v5623_v41 }
 0x2e1   : > { %v4456_v19 = vpop.f32.mrf.mxu2  ;;  %v3782_v15 = vpop.f32.mrf.mxu0 }
 0x2e2   : > { %v4568_v2 = vpop.f32.mrf.mxu3  ;;  %v4463_v4 = vadd.f32 %v4456_v19, %v16166_v46  ;;  %v3940_v17 = vpop.f32.mrf.mxu1  ;;  %v3812_v58 = vadd.f32 %v3782_v15, %v15869_v28  ;;  %v4005_v28 = vmax.f32 %v3989_v25, 0.0  ;;  %v5276_v15 = vsel %vm1946_vm5, %v5273_v12, %v5275_v26  ;;  %v16288_v25 = vld [vmem:[#allocation2 + $0x34] sm:$0xff]  ;;  %v13490_v12 = vld [vmem:[%s18199_s3 + $0x1e0] sm:$0xff] }
 0x2e3   : > { %v5626_v31 = vsel %vm5598_vm6, %v16227_v60, %v16274_v51  ;;  %v5446_v35 = vshrl.u32 %v16288_v25, 16  ;;  %v5449_v9 = vshll.u32 %v16288_v25, 16  ;;  %6820 = vmatpush.bf16.msrb.mxu0 %v13490_v12 }
 0x2e4   : > { %v16266_v56 = vadd.f32 %v4568_v2, %v4463_v4  ;;  %v3970_v46 = vadd.f32 %v3940_v17, %v3812_v58  ;;  %v4117_v19 = vmul.f32 %v4064_v53, %v4005_v28  ;;  %v5876_v17 = vsel %vm5598_vm6, %v16223_v43, %v16270_v27  ;;  %v13449_v43 = vld [vmem:[%s18199_s3 + $0x110] sm:$0xff]  ;;  %v13464_v28 = vld [vmem:[%s18199_s3 + $0x148] sm:$0xff] }
 0x2e5   : > { %6129 = vmatpush.bf16.msra.mxu1 %v13449_v43  ;;  %v5448_v53 = vrot.slane %v5446_v35, 2  ;;  %6397 = vmatpush.bf16.msrb.mxu2 %v13464_v28  ;;  %v14031_v28 = vld [vmem:[#allocation2 + $0x34] sm:$0xff]  }
 0x2e6   : > { %v3990_v44 = vadd.f32 %v16115_v59, %v3970_v46 }
 0x2e8   : > { %v4006_v47 = vmax.f32 %v3990_v44, 0.0  ;;  %v13479_v44 = vld [vmem:[%s18199_s3 + $0x188] sm:$0xff] }
 0x2e9   : > { %v4458_v40 = vpop.f32.mrf.mxu2  ;;  %v3785_v8 = vpop.f32.mrf.mxu0  ;;  %6663 = vmatpush.bf16.msrb.mxu3 %v13479_v44 }
 0x2ea   : > { %v4570_v39 = vpop.f32.mrf.mxu3  ;;  %v4464_v34 = vadd.f32 %v4458_v40, %v16184_v52  ;;  %v3943_v61 = vpop.f32.mrf.mxu1  ;;  %v4118_v2 = vmul.f32 %v4069_v7, %v4006_v47  ;;  %v3813_v42 = vadd.f32 %v3785_v8, %v15906_v0  ;;  %v14029_v52 = vld [vmem:[#allocation2 + $0x2c] sm:$0xff]   ;;  %v5444_v0 = vsel %vm1723_vm4, %v16225_v49, %v16272_v1 }
 0x2eb   : > { %v5878_v49 = vshrl.u32 %v14029_v52, 16  ;;  %v5881_v24 = vshll.u32 %v14029_v52, 16  ;;  %v5628_v8 = vrot.slane %v5449_v9, 4 }
 0x2ec   : > { %v16278_v4 = vadd.f32 %v4570_v39, %v4464_v34  ;;  %v13738_v58 = vpack.c.bf16 %v4118_v2, %v4117_v19  ;;  %5996 = vmatmul.bf16.gmra.mxu0 %v5876_v17  ;;  %v3971_v18 = vadd.f32 %v3943_v61, %v3813_v42  ;;  %v5451_v39 = vrot.slane %v5449_v9, 3  ;;  %v16316_v61 = vld [vmem:[#allocation2 + $0x50] sm:$0xff]  ;;  %v4074_v2 = vpop.permute.xlu0 %4073  ;;  %v4079_v42 = vpop.permute.xlu1 %4078 }
 0x2ed   : > { %5367 = vmatmul.bf16.gmra.mxu1 %v5276_v15  ;;  %v5880_v7 = vrot.slane %v5878_v49, 3  ;;  %v5883_v47 = vrot.slane %v5881_v24, 4  ;;  %v5627_v34 = vrot.slane %v5446_v35, 3  ;;  %v5277_v15 = vrot.slane %v16288_v25, 3 }
 0x2ee   : > { %5556 = vmatmul.bf16.gmra.mxu2 %v5444_v0  ;;  %13876 = vst [vmem:[#allocation2 + $0x68] sm:$0xff] %v13738_v58   ;;  %v3991_v41 = vadd.f32 %v16115_v59, %v3971_v18  ;;  %v18214_v35 = vshll.u32 %v16316_v61, 16  ;;  %v18213_v49 = vshrl.u32 %v16316_v61, 16 }
 0x2ef   : > { %5728 = vmatmul.bf16.gmra.mxu3 %v5626_v31  ;;  %v16320_v17 = vor.u32 %v5883_v47, %v5880_v7  ;;  %v16326_v31 = vor.u32 %v5451_v39, %v5448_v53  ;;  %v16328_v18 = vor.u32 %v5628_v8, %v5627_v34  ;;  %v13489_v7 = vld [vmem:[%s18199_s3 + $0x1d8] sm:$0xff]  ;;  %v5887_v47 = vshrl.u32 %v14031_v28, 16 }
 0x2f0   : > { %v6936_v36 = vrot.slane %v18213_v49, 1  ;;  %6821 = vmatpush.bf16.msrb.mxu0 %v13489_v7 }
 0x2f1   : > { %v16303_v23 = vpop.f32.mrf.mxu2  ;;  %v3787_v46 = vpop.f32.mrf.mxu0  ;;  %v5453_v53 = vsel %vm1723_vm4, %v16272_v1, %v16326_v31  ;;  %v13448_v1 = vld [vmem:[%s18199_s3 + $0x108] sm:$0xff] }
 0x2f2   : > { %v16305_v60 = vpop.f32.mrf.mxu3  ;;  %v3945_v38 = vpop.f32.mrf.mxu1  ;;  %v3814_v32 = vadd.f32 %v3787_v46, %v15952_v37  ;;  %v4007_v37 = vmax.f32 %v3991_v41, 0.0  ;;  %v5885_v41 = vsel %vm5598_vm6, %v16270_v27, %v16320_v17  ;;  %6130 = vmatpush.bf16.msra.mxu1 %v13448_v1 }
 0x2f4   : > { %v3972_v40 = vadd.f32 %v3945_v38, %v3814_v32  ;;  %v4119_v24 = vmul.f32 %v4074_v2, %v4007_v37  ;;  %v5278_v38 = vsel %vm1946_vm5, %v5275_v26, %v5277_v15  ;;  %v16341_v32 = vld [vmem:[#allocation2 + $0x3c] sm:$0xff]  ;;  %v6937_v26 = vrot.slane %v18214_v35, 2 }
 0x2f5   : > { %v5458_v37 = vshll.u32 %v16341_v32, 16  ;;  %v18216_v7 = vrot.slane %v16341_v32, 3 }
 0x2f6   : > { %v3992_v19 = vadd.f32 %v16115_v59, %v3972_v40  ;;  %v5890_v40 = vshll.u32 %v14031_v28, 16  ;;  %v16360_v39 = vor.u32 %v6937_v26, %v6936_v36  ;;  %v4089_v26 = vpop.permute.xlu0 %4088 }
 0x2f8   : > { %v4008_v52 = vmax.f32 %v3992_v19, 0.0  ;;  %18242 = vst [vmem:[#allocation3_spill] sm:$0xff] %v16360_v39 }
 0x2f9   : > { %v16322_v58 = vpop.f32.mrf.mxu2  ;;  %v3790_v12 = vpop.f32.mrf.mxu0 }
 0x2fa   : > { %v16324_v0 = vpop.f32.mrf.mxu3  ;;  %v3948_v43 = vpop.f32.mrf.mxu1  ;;  %v4120_v9 = vmul.f32 %v4079_v42, %v4008_v52  ;;  %v3815_v46 = vadd.f32 %v3790_v12, %v15977_v13  ;;  %v5630_v13 = vsel %vm5598_vm6, %v16274_v51, %v16328_v18  ;;  %v5455_v51 = vshrl.u32 %v16341_v32, 16 }
 0x2fb   : > { %v16370_v42 = vsel %vm1125_vm2, %v15894_v55, %v16360_v39 }
 0x2fc   : > { %v13743_v44 = vpack.c.bf16 %v4120_v9, %v4119_v24  ;;  %6001 = vmatmul.bf16.gmra.mxu0 %v5885_v41  ;;  %v3973_v27 = vadd.f32 %v3948_v43, %v3815_v46  ;;  %v13463_v43 = vld [vmem:[%s18199_s3 + $0x140] sm:$0xff]  ;;  %v5457_v9 = vrot.slane %v5455_v51, 2  ;;  %v5889_v46 = vrot.slane %v5887_v47, 3 }
 0x2fd   : > { %5372 = vmatmul.bf16.gmra.mxu1 %v5278_v38  ;;  %v13478_v24 = vld [vmem:[%s18199_s3 + $0x180] sm:$0xff]  ;;  %v5892_v38 = vrot.slane %v5890_v40, 4  ;;  %v5631_v55 = vrot.slane %v5455_v51, 3  ;;  %6398 = vmatpush.bf16.msrb.mxu2 %v13463_v43 }
 0x2fe   : > { %5561 = vmatmul.bf16.gmra.mxu2 %v5453_v53  ;;  %13877 = vst [vmem:[#allocation2 + $0x70] sm:$0xff] %v13743_v44   ;;  %v3993_v52 = vadd.f32 %v16115_v59, %v3973_v27  ;;  %v5187_v41 = vld [vmem:[#allocation2 + $0x44] sm:$0x7]  ;;  %v5460_v44 = vrot.slane %v5458_v37, 3  ;;  %v5632_v53 = vrot.slane %v5458_v37, 4  ;;  %6664 = vmatpush.bf16.msrb.mxu3 %v13478_v24  ;;  %v4084_v27 = vpop.permute.xlu2 %4083 }
 0x2ff   : > { %5733 = vmatmul.bf16.gmra.mxu3 %v5630_v13  ;;  %v5577_v13 = vld [vmem:[#allocation2 + $0x44] sm:$0xf]  ;;  %v16382_v1 = vor.u32 %v5892_v38, %v5889_v46  ;;  %v5280_v46 = vsel %vm1946_vm5, %v5277_v15, %v18216_v7  ;;  %v13488_v15 = vld [vmem:[%s18199_s3 + $0x1d0] sm:$0xff] }
 0x300   : > { %v5596_v47 = vunpack.c.l.b16 %v5577_v13  ;;  %v16388_v51 = vor.u32 %v5460_v44, %v5457_v9  ;;  %v16390_v37 = vor.u32 %v5632_v53, %v5631_v55  ;;  %v14033_v44 = vld [vmem:[#allocation2 + $0x3c] sm:$0xff]   ;;  %6822 = vmatpush.bf16.msrb.mxu0 %v13488_v15 }
 0x301   : > { %v16362_v34 = vpop.f32.mrf.mxu2  ;;  %v3792_v19 = vpop.f32.mrf.mxu0  ;;  %v5894_v38 = vsel %vm5598_vm6, %v16320_v17, %v16382_v1  ;;  %v13447_v17 = vld [vmem:[%s18199_s3 + $0x100] sm:$0xff] }
 0x302   : > { %v16364_v8 = vpop.f32.mrf.mxu3  ;;  %v3950_v2 = vpop.f32.mrf.mxu1  ;;  %v3816_v12 = vadd.f32 %v3792_v19, %v16021_v50  ;;  %v4009_v50 = vmax.f32 %v3993_v52, 0.0  ;;  %v5255_v19 = vunpack.c.l.b16 %v5187_v41  ;;  %v5597_v41 = vpack.c.b16 %v5596_v47, %v5596_v47  ;;  %6131 = vmatpush.bf16.msra.mxu1 %v13447_v17  ;;  %v13524_v47 = vld [vmem:[%s18199_s3 + $0x78] sm:$0xff] }
 0x303   : > { %v5462_v53 = vsel %vm1723_vm4, %v16326_v31, %v16388_v51  ;;  %v5899_v31 = vshll.u32 %v14033_v44, 16  ;;  %7308 = vmatpush.bf16.msra.mxu2 %v13524_v47  ;;  %v4094_v17 = vpop.permute.xlu1 %4093 }
 0x304   : > { %v3974_v28 = vadd.f32 %v3950_v2, %v3816_v12  ;;  %v4121_v43 = vmul.f32 %v4084_v27, %v4009_v50  ;;  %v5264_v9 = vpack.c.b16 %v5255_v19, %v5255_v19  ;;  %v5896_v50 = vshrl.u32 %v14033_v44, 16 }
 0x305   : > { %v5636_v27 = vshrl.u32 %v5597_v41, 16  ;;  %v5639_v19 = vshll.u32 %v5597_v41, 16 }
 0x306   : > { %v3994_v36 = vadd.f32 %v16115_v59, %v3974_v28  ;;  %v5464_v13 = vshrl.u32 %v5264_v9, 16  ;;  %v4099_v35 = vpop.permute.xlu2 %4098  ;;  %v5281_v22 = vrot.slane %v5264_v9, 3 }
 0x308   : > { %v4010_v40 = vmax.f32 %v3994_v36, 0.0 }
 0x309   : > { %v16384_v49 = vpop.f32.mrf.mxu2  ;;  %v3795_v52 = vpop.f32.mrf.mxu0 }
 0x30a   : > { %v16386_v2 = vpop.f32.mrf.mxu3  ;;  %v3953_v12 = vpop.f32.mrf.mxu1  ;;  %v4122_v24 = vmul.f32 %v4089_v26, %v4010_v40  ;;  %v3817_v28 = vadd.f32 %v3795_v52, %v16036_v5  ;;  %v5634_v5 = vsel %vm5598_vm6, %v16328_v18, %v16390_v37  ;;  %v5467_v18 = vshll.u32 %v5264_v9, 16  ;;  %v13516_v40 = vld [vmem:[%s18199_s3 + $0x38] sm:$0xff] }
 0x30b   : > { %7496 = vmatpush.bf16.msra.mxu3 %v13516_v40  ;;  %v18243_v40 = vrot.slane %v16341_v32, 3  ;;  %v16451_v32 = vld [vmem:[#allocation2 + $0x60] sm:$0xff] }
 0x30c   : > { %v13748_v55 = vpack.c.bf16 %v4122_v24, %v4121_v43  ;;  %6006 = vmatmul.bf16.gmra.mxu0 %v5894_v38  ;;  %v3975_v25 = vadd.f32 %v3953_v12, %v3817_v28  ;;  %v5466_v28 = vrot.slane %v5464_v13, 2  ;;  %v5901_v38 = vrot.slane %v5899_v31, 4 }
 0x30d   : > { %5377 = vmatmul.bf16.gmra.mxu1 %v5280_v46  ;;  %v5898_v46 = vrot.slane %v5896_v50, 3  ;;  %v5469_v44 = vrot.slane %v5467_v18, 3 }
 0x30e   : > { %5566 = vmatmul.bf16.gmra.mxu2 %v5462_v53  ;;  %13878 = vst [vmem:[#allocation2 + $0x78] sm:$0xff] %v13748_v55   ;;  %v3995_v43 = vadd.f32 %v16115_v59, %v3975_v25  ;;  %v5638_v55 = vrot.slane %v5636_v27, 3  ;;  %v5641_v53 = vrot.slane %v5639_v19, 4 }
 0x30f   : > { %5738 = vmatmul.bf16.gmra.mxu3 %v5634_v5  ;;  %v16426_v7 = vor.u32 %v5901_v38, %v5898_v46  ;;  %v5470_v13 = vor.u32 %v5469_v44, %v5466_v28  ;;  %v16455_v46 = vld [vmem:[#allocation2 + $0x18] sm:$0xff]  }
 0x310   : > { %v4011_v5 = vmax.f32 %v3995_v43, 0.0  ;;  %v5642_v50 = vor.u32 %v5641_v53, %v5638_v55  ;;  %v16439_v43 = vld [vmem:[#allocation2 + $0x10] sm:$0xff] }
 0x311   : > { %v16413_v36 = vpop.f32.mrf.mxu2  ;;  %v3797_v52 = vpop.f32.mrf.mxu0  ;;  %v5903_v9 = vsel %vm5598_vm6, %v16382_v1, %v16426_v7  ;;  %v5471_v28 = vsel %vm1723_vm4, %v16388_v51, %v5470_v13  ;;  %v16453_v1 = vld [vmem:[#allocation2 + $0x18] sm:$0xff]  ;;  %v6270_v53 = vshll.u32 %v16439_v43, 16 }
 0x312   : > { %v16415_v26 = vpop.f32.mrf.mxu3  ;;  %v3955_v12 = vpop.f32.mrf.mxu1  ;;  %v3818_v24 = vadd.f32 %v3797_v52, %v16056_v29  ;;  %v4123_v18 = vmul.f32 %v4094_v17, %v4011_v5  ;;  %v5282_v52 = vsel %vm1946_vm5, %v18243_v40, %v5281_v22  ;;  %v13487_v22 = vld [vmem:[%s18199_s3 + $0x1c8] sm:$0xff]  ;;  %v13523_v5 = vld [vmem:[%s18199_s3 + $0x70] sm:$0xff]  ;;  %v18226_v17 = vshrl.u32 %v16451_v32, 16 }
 0x313   : > { %6823 = vmatpush.bf16.msrb.mxu0 %v13487_v22  ;;  %7309 = vmatpush.bf16.msra.mxu2 %v13523_v5 }
 0x314   : > { %v3976_v41 = vadd.f32 %v3955_v12, %v3818_v24  ;;  %v14034_v12 = vld [vmem:[#allocation2 + $0x44] sm:$0xff]  }
 0x315   : > { %v5908_v38 = vshll.u32 %v14034_v12, 16 }
 0x316   : > { %v3996_v15 = vadd.f32 %v16115_v59, %v3976_v41  ;;  %v4692_v41 = vadd.f32 %v16303_v23, %v16219_v11  ;;  %v6275_v11 = vshll.u32 %v16453_v1, 16  ;;  %v6536_v23 = vshll.u32 %v16455_v46, 16 }
 0x318   : > { %v4012_v25 = vmax.f32 %v3996_v15, 0.0  ;;  %v13515_v15 = vld [vmem:[%s18199_s3 + $0x30] sm:$0xff]  ;;  %v4790_v40 = vadd.f32 %v16305_v60, %v4692_v41 }
 0x319   : > { %v16428_v39 = vpop.f32.mrf.mxu2  ;;  %v3800_v31 = vpop.f32.mrf.mxu0  ;;  %7497 = vmatpush.bf16.msra.mxu3 %v13515_v15 }
 0x31a   : > { %v16430_v29 = vpop.f32.mrf.mxu3  ;;  %v3958_v47 = vpop.f32.mrf.mxu1  ;;  %v4124_v27 = vmul.f32 %v4099_v35, %v4012_v25  ;;  %v3819_v19 = vadd.f32 %v3800_v31, %v16080_v6  ;;  %v5643_v35 = vsel %vm5598_vm6, %v16390_v37, %v5642_v50  ;;  %v13501_v6 = vld [vmem:[%s18199_s3 + $0x238] sm:$0xff]  ;;  %v5905_v37 = vshrl.u32 %v14034_v12, 16 }
 0x31b   : > { %7005 = vmatpush.bf16.msrb.mxu1 %v13501_v6  ;;  %v18229_v50 = vshll.u32 %v16451_v32, 16  ;;  %v6272_v12 = vrot.slane %v6270_v53, 1  ;;  %v4693_v6 = vadd.f32 %v16322_v58, %v16231_v57  ;;  %v18244_v53 = vshll.u32 %v15329_v48, 16 }
 0x31c   : > { %v13753_v24 = vpack.c.bf16 %v4124_v27, %v4123_v18  ;;  %6011 = vmatmul.bf16.gmra.mxu0 %v5903_v9  ;;  %v3977_v51 = vadd.f32 %v3958_v47, %v3819_v19  ;;  %v5907_v18 = vrot.slane %v5905_v37, 3  ;;  %v5910_v27 = vrot.slane %v5908_v38, 4  ;;  %v4109_v38 = vpop.permute.xlu1 %4108 }
 0x31d   : > { %5382 = vmatmul.bf16.gmra.mxu1 %v5282_v52  ;;  %v8869_v19 = vrot.slane %v18226_v17, 1  ;;  %v6268_v9 = vshrl.u32 %v16439_v43, 16  ;;  %v8870_v22 = vrot.slane %v18229_v50, 2  ;;  %v4104_v43 = vpop.permute.xlu0 %4103  ;;  %v16495_v5 = vrot.slane %v18244_v53, 1 }
 0x31e   : > { %5571 = vmatmul.bf16.gmra.mxu2 %v5471_v28  ;;  %13879 = vst [vmem:[#allocation2 + $0x80] sm:$0xff] %v13753_v24   ;;  %v3997_v31 = vadd.f32 %v16115_v59, %v3977_v51  ;;  %v16480_v24 = vld [vmem:[#allocation2 + $0x48] sm:$0xff]   ;;  %v16482_v28 = vrot.slane %v6275_v11, 1  ;;  %v4902_v51 = vadd.f32 %v16413_v36, %v4790_v40  ;;  %v16491_v41 = vor.u32 %v5910_v27, %v5907_v18 }
 0x31f   : > { %5743 = vmatmul.bf16.gmra.mxu3 %v5643_v35  ;;  %v6534_v35 = vshrl.u32 %v16455_v46, 16  ;;  %v13805_v15 = vunpack.c.h.b16 %v16480_v24  ;;  %v18251_v17 = vshrl.u32 %v15655_v33, 16 }
 0x320   : > { %v4013_v60 = vmax.f32 %v3997_v31, 0.0  ;;  %v4791_v31 = vadd.f32 %v16324_v0, %v4693_v6  ;;  %v5912_v40 = vsel %vm5598_vm6, %v16426_v7, %v16491_v41  ;;  %v13500_v7 = vld [vmem:[%s18199_s3 + $0x230] sm:$0xff]  ;;  %v16525_v6 = vld [vmem:[#allocation2 + $0x68] sm:$0xff] }
 0x321   : > { %v16459_v44 = vpop.f32.mrf.mxu2  ;;  %v3802_v25 = vpop.f32.mrf.mxu0  ;;  %7006 = vmatpush.bf16.msrb.mxu1 %v13500_v7 }
 0x322   : > { %v16461_v55 = vpop.f32.mrf.mxu3  ;;  %v3960_v13 = vpop.f32.mrf.mxu1  ;;  %v3820_v47 = vadd.f32 %v3802_v25, %v16098_v62  ;;  %v6538_v62 = vrot.slane %v6536_v23, 1  ;;  %v16498_v25 = vor.u32 %v8870_v22, %v8869_v19  ;;  %v4125_v18 = vmul.f32 %v4104_v43, %v4013_v60  ;;  %v16509_v19 = vld [vmem:[%s18198_s2] ss:$0 sm:$0xff]  ;;  %v13514_v60 = vld [vmem:[%s18199_s3 + $0x28] sm:$0xff] }
 0x323   : > { %v13486_v22 = vld [vmem:[%s18199_s3 + $0x1c0] sm:$0xff]  ;;  %v4694_v43 = vadd.f32 %v16362_v34, %v16266_v56  ;;  %7498 = vmatpush.bf16.msra.mxu3 %v13514_v60  ;;  %v4695_v60 = vadd.f32 %v16384_v49, %v16278_v4 }
 0x324   : > { %v3978_v52 = vadd.f32 %v3960_v13, %v3820_v47  ;;  %v6539_v23 = vor.u32 %v6538_v62, %v6534_v35  ;;  %v5021_v47 = vadd.f32 %v16415_v26, %v4902_v51  ;;  %v4903_v26 = vadd.f32 %v16428_v39, %v4791_v31  ;;  %v16527_v51 = vld [vmem:[#allocation2 + $0x20] sm:$0xff]  ;;  %v13522_v39 = vld [vmem:[%s18199_s3 + $0x68] sm:$0xff]  ;;  %6824 = vmatpush.bf16.msrb.mxu0 %v13486_v22 }
 0x325   : > { %7310 = vmatpush.bf16.msra.mxu2 %v13522_v39 }
 0x326   : > { %v3998_v37 = vadd.f32 %v16115_v59, %v3978_v52  ;;  %v6273_v59 = vor.u32 %v6272_v12, %v6268_v9  ;;  %v13887_v52 = vld [vmem:[#allocation2 + $0x10] sm:$0xff]   ;;  %v6544_v0 = vsel %vm450_vm0, %v6539_v23, %v16495_v5  ;;  %v5841_v12 = vpack.c.b16 %v13805_v15, %v13805_v15 }
 0x327   : > { %v5022_v15 = vadd.f32 %v16430_v29, %v4903_v26  ;;  %v18223_v23 = vshrl.u32 %v16525_v6, 16  ;;  %v8706_v29 = vrot.slane %v16525_v6, 1 }
 0x328   : > { %v4014_v13 = vmax.f32 %v3998_v37, 0.0  ;;  %v6278_v9 = vsel %vm450_vm0, %v6273_v59, %v16482_v28  ;;  %v16535_v37 = vld [vmem:[#allocation2 + $0x28] sm:$0xff]  ;;  %v5917_v53 = vshll.u32 %v5841_v12, 16 }
 0x329   : > { %v16500_v11 = vpop.f32.mrf.mxu2  ;;  %v5109_v58 = vpop.f32.mrf.mxu0  ;;  %v18231_v34 = vshll.u32 %v16535_v37, 16  ;;  %v8873_v7 = vrot.slane %v18223_v23, 1 }
 0x32a   : > { %v16502_v57 = vpop.f32.mrf.mxu3  ;;  %v5348_v36 = vpop.f32.mrf.mxu1  ;;  %v4126_v27 = vmul.f32 %v4109_v38, %v4014_v13  ;;  %v5119_v62 = vadd.f32 %v5109_v58, %v5021_v47  ;;  %v5914_v38 = vshrl.u32 %v5841_v12, 16  ;;  %v5919_v26 = vrot.slane %v5917_v53, 4 }
 0x32b   : > { %v5147_v53 = vpop.permute.xlu0 %5146 }
 0x32c   : > { %v13758_v35 = vpack.c.bf16 %v4126_v27, %v4125_v18  ;;  %6016 = vmatmul.bf16.gmra.mxu0 %v5912_v40  ;;  %v5127_v13 = vadd.f32 %v16509_v19, %v5119_v62  ;;  %v6283_v27 = vshll.u32 %v16527_v51, 16  ;;  %v18227_v40 = vshll.u32 %v16525_v6, 16 }
 0x32d   : > { %6132 = vmatmul.bf16.vlgmr.msra.gmra.mxu1 %v13887_v52  ;;  %v18218_v52 = vrot.slane %v16451_v32, 1  ;;  %v5916_v12 = vrot.slane %v5914_v38, 3 }
 0x32e   : > { %6399 = vmatmul.bf16.vlgmr.msrb.gmra.mxu2 %v6278_v9  ;;  %13880 = vst [vmem:[#allocation2 + $0x88] sm:$0xff] %v13758_v35   ;;  %v4792_v9 = vadd.f32 %v16364_v8, %v4694_v43  ;;  %v13499_v35 = vld [vmem:[%s18199_s3 + $0x228] sm:$0xff]  ;;  %v5131_v62 = vmax.f32 %v5127_v13, 0.0  ;;  %v8874_v39 = vrot.slane %v18227_v40, 2 }
 0x32f   : > { %6665 = vmatmul.bf16.vlgmr.msrb.gmra.mxu3 %v6544_v0  ;;  %v16562_v8 = vsel %vm750_vm1, %v18218_v52, %v8706_v29  ;;  %7007 = vmatpush.bf16.msrb.mxu1 %v13499_v35  ;;  %v5920_v13 = vor.u32 %v5919_v26, %v5916_v12  ;;  %v16578_v52 = vrot.slane %v18231_v34, 1  ;;  %v18256_v34 = vshrl.u32 %v15738_v30, 16 }
 0x330   : > { %v4904_v43 = vadd.f32 %v16459_v44, %v4792_v9 }
 0x331   : > { %v5537_v58 = vpop.f32.mrf.mxu2  ;;  %v5111_v47 = vpop.f32.mrf.mxu0 }
 0x332   : > { %v5709_v59 = vpop.f32.mrf.mxu3  ;;  %v5538_v31 = vadd.f32 %v5537_v58, %v5348_v36  ;;  %v5350_v18 = vpop.f32.mrf.mxu1  ;;  %v5120_v56 = vadd.f32 %v5111_v47, %v5022_v15  ;;  %v13532_v36 = vld [vmem:[%s18199_s3 + $0xb8] sm:$0xff]  ;;  %v6279_v58 = vshrl.u32 %v16453_v1, 16  ;;  %v5023_v12 = vadd.f32 %v16461_v55, %v4904_v43  ;;  %v13521_v55 = vld [vmem:[%s18199_s3 + $0x60] sm:$0xff] }
 0x333   : > { %7666 = vmatpush.bf16.msra.mxu0 %v13532_v36  ;;  %v5142_v15 = vpop.permute.xlu2 %5141  ;;  %7311 = vmatpush.bf16.msra.mxu2 %v13521_v55 }
 0x334   : > { %v16548_v0 = vadd.f32 %v5709_v59, %v5538_v31  ;;  %v5128_v22 = vadd.f32 %v16509_v19, %v5120_v56  ;;  %v16572_v59 = vrot.slane %v6283_v27, 1  ;;  %v16574_v31 = vor.u32 %v8874_v39, %v8873_v7  ;;  %v16597_v39 = vld [vmem:[#allocation2 + $0x70] sm:$0xff] }
 0x335   : > { %v5159_v47 = vmul.f32 %v5142_v15, %v5131_v62  ;;  %v6281_v9 = vor.u32 %v6279_v58, %v16482_v28  ;;  %v4793_v27 = vadd.f32 %v16386_v2, %v4695_v60  ;;  %v18245_v62 = vshrl.u32 %v15329_v48, 16 }
 0x336   : > { %v5132_v38 = vmax.f32 %v5128_v22, 0.0  ;;  %v16584_v1 = vsel %vm1125_vm2, %v16498_v25, %v16574_v31  ;;  %v18220_v15 = vshrl.u32 %v16597_v39, 16 }
 0x337   : > { %v6547_v22 = vor.u32 %v18245_v62, %v16495_v5  ;;  %v6286_v28 = vsel %vm450_vm0, %v6281_v9, %v16572_v59  ;;  %v18224_v5 = vshll.u32 %v16597_v39, 16 }
 0x338   : > { %v5160_v56 = vmul.f32 %v5147_v53, %v5132_v38  ;;  %v4905_v38 = vadd.f32 %v16500_v11, %v4793_v27  ;;  %v16612_v53 = vld [vmem:[#allocation2 + $0x28] sm:$0xff] }
 0x339   : > { %v5539_v36 = vpop.f32.mrf.mxu2  ;;  %v5114_v49 = vpop.f32.mrf.mxu0  ;;  %v6552_v48 = vsel %vm450_vm0, %v6547_v22, %v16578_v52 }
 0x33a   : > { %v5711_v35 = vpop.f32.mrf.mxu3  ;;  %v5540_v4 = vadd.f32 %v5539_v36, %v5350_v18  ;;  %v5353_v44 = vpop.f32.mrf.mxu1  ;;  %v13767_v26 = vpack.c.bf16 %v5160_v56, %v5159_v47  ;;  %v5921_v18 = vsel %vm5598_vm6, %v16491_v41, %v5920_v13  ;;  %v5121_v2 = vadd.f32 %v5114_v49, %v5023_v12  ;;  %v13513_v41 = vld [vmem:[%s18199_s3 + $0x20] sm:$0xff] }
 0x33b   : > { %7499 = vmatpush.bf16.msra.mxu3 %v13513_v41  ;;  %v5024_v11 = vadd.f32 %v16502_v57, %v4905_v38  ;;  %v13498_v57 = vld [vmem:[%s18199_s3 + $0x220] sm:$0xff]  ;;  %v8877_v49 = vrot.slane %v18220_v15, 1  ;;  %v6291_v12 = vshll.u32 %v16612_v53, 16  ;;  %v6287_v38 = vshrl.u32 %v16527_v51, 16  ;;  %v13890_v15 = vld [vmem:[#allocation2 + $0x28] sm:$0xff]  }
 0x33c   : > { %v16591_v7 = vadd.f32 %v5711_v35, %v5540_v4  ;;  %13885 = vst [vmem:[#allocation2 + $0x90] sm:$0xff] %v13767_v26   ;;  %6021 = vmatmul.bf16.gmra.mxu0 %v5921_v18  ;;  %v13531_v35 = vld [vmem:[%s18199_s3 + $0xb0] sm:$0xff]  ;;  %v8708_v4 = vrot.slane %v16597_v39, 1  ;;  %7008 = vmatpush.bf16.msrb.mxu1 %v13498_v57  ;;  %v5152_v18 = vpop.permute.xlu1 %5151 }
 0x33d   : > { %6137 = vmatmul.bf16.gmra.mxu1 %v16455_v46  ;;  %v5129_v46 = vadd.f32 %v16509_v19, %v5121_v2  ;;  %7667 = vmatpush.bf16.msra.mxu0 %v13531_v35  ;;  %v18232_v2 = vshrl.u32 %v16535_v37, 16  ;;  %v6744_v35 = vrot.slane %v15458_v54, 1 }
 0x33e   : > { %6404 = vmatmul.bf16.gmra.mxu2 %v6286_v28  ;;  %v16633_v26 = vsel %vm750_vm1, %v8706_v29, %v8708_v4  ;;  %v5157_v28 = vpop.permute.xlu2 %5156 }
 0x33f   : > { %6670 = vmatmul.bf16.gmra.mxu3 %v6552_v48  ;;  %v5133_v9 = vmax.f32 %v5129_v46, 0.0  ;;  %v16637_v48 = vld [vmem:[#allocation2 + $0x20] sm:$0xff] }
 0x341   : > { %v5542_v60 = vpop.f32.mrf.mxu2  ;;  %v5116_v58 = vpop.f32.mrf.mxu0  ;;  %v5161_v41 = vmul.f32 %v5152_v18, %v5133_v9 }
 0x342   : > { %v5714_v43 = vpop.f32.mrf.mxu3  ;;  %v5543_v13 = vadd.f32 %v5542_v60, %v5353_v44  ;;  %v5355_v47 = vpop.f32.mrf.mxu1  ;;  %v5122_v56 = vadd.f32 %v5116_v58, %v5024_v11  ;;  %v8878_v44 = vrot.slane %v18224_v5, 2  ;;  %v6293_v60 = vrot.slane %v6291_v12, 1  ;;  %v16659_v12 = vld [vmem:[#allocation2 + $0x78] sm:$0xff] }
 0x343   : > { %v18219_v18 = vshrl.u32 %v16659_v12, 16 }
 0x344   : > { %v16615_v36 = vadd.f32 %v5714_v43, %v5543_v13  ;;  %v5130_v27 = vadd.f32 %v16509_v19, %v5122_v56  ;;  %v8879_v62 = vor.u32 %v8878_v44, %v8877_v49  ;;  %v6745_v19 = vrot.slane %v16637_v48, 1 }
 0x345   : > { %v18246_v43 = vshll.u32 %v15640_v16, 16  ;;  %v6555_v44 = vor.u32 %v18232_v2, %v16578_v52  ;;  %v13520_v52 = vld [vmem:[%s18199_s3 + $0x58] sm:$0xff] }
 0x346   : > { %v5134_v22 = vmax.f32 %v5130_v27, 0.0  ;;  %v16642_v55 = vsel %vm1125_vm2, %v16574_v31, %v8879_v62  ;;  %v6289_v31 = vor.u32 %v6287_v38, %v16572_v59  ;;  %v13889_v27 = vld [vmem:[#allocation2 + $0x20] sm:$0xff]   ;;  %v13512_v59 = vld [vmem:[%s18199_s3 + $0x18] sm:$0xff]  ;;  %7312 = vmatpush.bf16.msra.mxu2 %v13520_v52  ;;  %v6295_v52 = vshrl.u32 %v16612_v53, 16 }
 0x347   : > { %v6559_v13 = vrot.slane %v18246_v43, 1  ;;  %7500 = vmatpush.bf16.msra.mxu3 %v13512_v59 }
 0x348   : > { %v5162_v11 = vmul.f32 %v5157_v28, %v5134_v22  ;;  %v6294_v54 = vsel %vm450_vm0, %v6289_v31, %v6293_v60  ;;  %v18222_v22 = vshll.u32 %v16659_v12, 16  ;;  %v8710_v28 = vrot.slane %v16659_v12, 1  ;;  %v13530_v31 = vld [vmem:[%s18199_s3 + $0xa8] sm:$0xff] }
 0x349   : > { %v5544_v29 = vpop.f32.mrf.mxu2  ;;  %v5987_v56 = vpop.f32.mrf.mxu0  ;;  %7668 = vmatpush.bf16.msra.mxu0 %v13530_v31 }
 0x34a   : > { %v5716_v46 = vpop.f32.mrf.mxu3  ;;  %v5545_v58 = vadd.f32 %v5544_v29, %v5355_v47  ;;  %v5358_v51 = vpop.f32.mrf.mxu1  ;;  %v13772_v57 = vpack.c.bf16 %v5162_v11, %v5161_v41  ;;  %v16648_v49 = vadd.f32 %v5987_v56, %v16548_v0  ;;  %v6746_v47 = vsel %vm750_vm1, %v6744_v35, %v6745_v19  ;;  %v16672_v11 = vld [vmem:[#allocation2 + $0x30] sm:$0xff] }
 0x34b   : > { %v6560_v0 = vsel %vm450_vm0, %v6555_v44, %v6559_v13  ;;  %v8881_v35 = vrot.slane %v18219_v18, 1  ;;  %v6299_v44 = vshll.u32 %v16672_v11, 16 }
 0x34c   : > { %v16654_v9 = vadd.f32 %v5716_v46, %v5545_v58  ;;  %13886 = vst [vmem:[#allocation2 + $0x98] sm:$0xff] %v13772_v57   ;;  %6825 = vmatmul.bf16.vlgmr.msrb.gmra.mxu0 %v6746_v47  ;;  %v16677_v58 = vsel %vm750_vm1, %v8708_v4, %v8710_v28  ;;  %v8882_v4 = vrot.slane %v18222_v22, 2 }
 0x34d   : > { %6142 = vmatmul.bf16.gmra.mxu1 %v13889_v27  ;;  %v6747_v27 = vrot.slane %v16535_v37, 1  ;;  %v6301_v59 = vrot.slane %v6299_v44, 1 }
 0x34e   : > { %6409 = vmatmul.bf16.gmra.mxu2 %v6294_v54 }
 0x34f   : > { %6675 = vmatmul.bf16.gmra.mxu3 %v6560_v0  ;;  %v6748_v53 = vsel %vm750_vm1, %v6745_v19, %v6747_v27 }
 0x351   : > { %v5547_v38 = vpop.f32.mrf.mxu2  ;;  %v5989_v43 = vpop.f32.mrf.mxu0 }
 0x352   : > { %v5719_v41 = vpop.f32.mrf.mxu3  ;;  %v5548_v29 = vadd.f32 %v5547_v38, %v5358_v51  ;;  %v5360_v46 = vpop.f32.mrf.mxu1  ;;  %v16680_v56 = vadd.f32 %v5989_v43, %v16591_v7  ;;  %v13497_v51 = vld [vmem:[%s18199_s3 + $0x218] sm:$0xff]  ;;  %v16695_v7 = vor.u32 %v8882_v4, %v8881_v35  ;;  %v18247_v38 = vshll.u32 %v15655_v33, 16  ;;  %v13518_v33 = vld [vmem:[%s18199_s3 + $0x48] sm:$0xff] }
 0x353   : > { %7009 = vmatpush.bf16.msrb.mxu1 %v13497_v51  ;;  %v6297_v51 = vor.u32 %v6295_v52, %v6293_v60  ;;  %v18248_v4 = vshrl.u32 %v15640_v16, 16  ;;  %v13519_v16 = vld [vmem:[%s18199_s3 + $0x50] sm:$0xff]  ;;  %v16727_v60 = vld [vmem:[#allocation2 + $0x80] sm:$0xff] }
 0x354   : > { %v16684_v57 = vadd.f32 %v5719_v41, %v5548_v29  ;;  %v16700_v47 = vsel %vm1125_vm2, %v8879_v62, %v16695_v7  ;;  %v6567_v41 = vrot.slane %v18247_v38, 1  ;;  %7313 = vmatpush.bf16.msra.mxu2 %v13519_v16  ;;  %v13529_v38 = vld [vmem:[%s18199_s3 + $0xa0] sm:$0xff] }
 0x355   : > { %v6563_v18 = vor.u32 %v18248_v4, %v6559_v13  ;;  %7669 = vmatpush.bf16.msra.mxu0 %v13529_v38 }
 0x357   : > { %v6568_v44 = vsel %vm450_vm0, %v6563_v18, %v6567_v41 }
 0x358   : > { %7314 = vmatpush.bf16.msra.mxu2 %v13518_v33 }
 0x359   : > { %v5549_v54 = vpop.f32.mrf.mxu2  ;;  %v5992_v31 = vpop.f32.mrf.mxu0 }
 0x35a   : > { %v5721_v0 = vpop.f32.mrf.mxu3  ;;  %v5550_v29 = vadd.f32 %v5549_v54, %v5360_v46  ;;  %v5363_v43 = vpop.f32.mrf.mxu1  ;;  %v16706_v35 = vadd.f32 %v5992_v31, %v16615_v36  ;;  %v6302_v46 = vsel %vm450_vm0, %v6297_v51, %v6301_v59  ;;  %v13511_v36 = vld [vmem:[%s18199_s3 + $0x10] sm:$0xff]  ;;  %v18225_v51 = vshll.u32 %v16727_v60, 16 }
 0x35b   : > { %7501 = vmatpush.bf16.msra.mxu3 %v13511_v36 }
 0x35c   : > { %v16710_v62 = vadd.f32 %v5721_v0, %v5550_v29  ;;  %6830 = vmatmul.bf16.gmra.mxu0 %v6748_v53  ;;  %v13496_v29 = vld [vmem:[%s18199_s3 + $0x210] sm:$0xff] }
 0x35d   : > { %6147 = vmatmul.bf16.gmra.mxu1 %v13890_v15  ;;  %v16725_v15 = vld [vmem:[#allocation2 + $0x38] sm:$0xff]  ;;  %v16746_v53 = vld [vmem:[#allocation2 + $0x30] sm:$0xff] }
 0x35e   : > { %6414 = vmatmul.bf16.gmra.mxu2 %v6302_v46  ;;  %v6307_v31 = vshll.u32 %v16725_v15, 16  ;;  %7010 = vmatpush.bf16.msrb.mxu1 %v13496_v29  ;;  %v6749_v46 = vrot.slane %v16746_v53, 1 }
 0x35f   : > { %6680 = vmatmul.bf16.gmra.mxu3 %v6568_v44  ;;  %v8886_v44 = vrot.slane %v18225_v51, 2 }
 0x361   : > { %v5552_v48 = vpop.f32.mrf.mxu2  ;;  %v5994_v54 = vpop.f32.mrf.mxu0 }
 0x362   : > { %v5724_v19 = vpop.f32.mrf.mxu3  ;;  %v5553_v13 = vadd.f32 %v5552_v48, %v5363_v43  ;;  %v5365_v18 = vpop.f32.mrf.mxu1  ;;  %v16730_v0 = vadd.f32 %v5994_v54, %v16654_v9  ;;  %v18221_v43 = vshrl.u32 %v16727_v60, 16  ;;  %v8712_v9 = vrot.slane %v16727_v60, 1 }
 0x363   : > { %v6303_v48 = vshrl.u32 %v16672_v11, 16  ;;  %v6571_v11 = vor.u32 %v18251_v17, %v6567_v41  ;;  %v13510_v17 = vld [vmem:[%s18199_s3 + $0x8] sm:$0xff] }
 0x364   : > { %v16732_v52 = vadd.f32 %v5724_v19, %v5553_v13  ;;  %v8885_v4 = vrot.slane %v18221_v43, 1  ;;  %v6309_v19 = vrot.slane %v6307_v31, 1  ;;  %v18249_v13 = vshll.u32 %v15738_v30, 16  ;;  %v16764_v31 = vld [vmem:[#allocation2 + $0x88] sm:$0xff]  ;;  %7502 = vmatpush.bf16.msra.mxu3 %v13510_v17  ;;  %v13517_v30 = vld [vmem:[%s18199_s3 + $0x40] sm:$0xff] }
 0x365   : > { %v16757_v38 = vsel %vm750_vm1, %v8710_v28, %v8712_v9  ;;  %v6305_v51 = vor.u32 %v6303_v48, %v6301_v59  ;;  %v6750_v28 = vsel %vm750_vm1, %v6747_v27, %v6749_v46  ;;  %v18233_v59 = vrot.slane %v16764_v31, 1  ;;  %7315 = vmatpush.bf16.msra.mxu2 %v13517_v30 }
 0x366   : > { %v6575_v54 = vrot.slane %v18249_v13, 1  ;;  %18250 = vst [vmem:[#allocation4_spill] sm:$0xff] %v16757_v38  ;;  %v8887_v23 = vor.u32 %v8886_v44, %v8885_v4  ;;  %v13891_v13 = vld [vmem:[#allocation2 + $0x30] sm:$0xff]   ;;  %v16787_v4 = vld [vmem:[#allocation2 + $0x40] sm:$0xff]  ;;  %v18230_v44 = vshll.u32 %v16764_v31, 16 }
 0x367   : > { %v6319_v30 = vshrl.u32 %v16787_v4, 16 }
 0x368   : > { %v16784_v27 = vsel %vm1125_vm2, %v16695_v7, %v8887_v23  ;;  %v16796_v7 = vsel %vm750_vm1, %v8712_v9, %v18233_v59  ;;  %v6579_v2 = vor.u32 %v18256_v34, %v6575_v54  ;;  %v13509_v34 = vld [vmem:[%s18199_s3] sm:$0xff] }
 0x369   : > { %v5554_v16 = vpop.f32.mrf.mxu2  ;;  %v5997_v22 = vpop.f32.mrf.mxu0  ;;  %18252 = vst [vmem:[#allocation5_spill] sm:$0xff] %v16784_v27  ;;  %7503 = vmatpush.bf16.msra.mxu3 %v13509_v34  ;;  %v16872_v34 = vld [vmem:[#allocation2 + $0x40] sm:$0xff]  ;;  %v6205_v27 = vld [vmem:[#allocation2 + $0x50] sm:$0x1] }
 0x36a   : > { %v5726_v36 = vpop.f32.mrf.mxu3  ;;  %v5555_v29 = vadd.f32 %v5554_v16, %v5365_v18  ;;  %v5368_v43 = vpop.f32.mrf.mxu1  ;;  %v16760_v5 = vadd.f32 %v5997_v22, %v16684_v57  ;;  %v6310_v18 = vsel %vm450_vm0, %v6305_v51, %v6309_v19  ;;  %v6576_v22 = vsel %vm450_vm0, %v6571_v11, %v6575_v54  ;;  %18253 = vst [vmem:[#allocation6_spill] sm:$0xff] %v16796_v7 }
 0x36b   : > { %v18228_v57 = vshrl.u32 %v16764_v31, 16 }
 0x36c   : > { %v16766_v40 = vadd.f32 %v5726_v36, %v5555_v29  ;;  %6835 = vmatmul.bf16.gmra.mxu0 %v6750_v28  ;;  %v13528_v28 = vld [vmem:[%s18199_s3 + $0x98] sm:$0xff] }
 0x36d   : > { %6152 = vmatmul.bf16.gmra.mxu1 %v13891_v13  ;;  %v8889_v11 = vrot.slane %v18228_v57, 1  ;;  %7670 = vmatpush.bf16.msra.mxu0 %v13528_v28 }
 0x36e   : > { %6419 = vmatmul.bf16.gmra.mxu2 %v6310_v18  ;;  %v8890_v18 = vrot.slane %v18230_v44, 2 }
 0x36f   : > { %6685 = vmatmul.bf16.gmra.mxu3 %v6576_v22  ;;  %v16813_v22 = vld [vmem:[#allocation2 + $0x38] sm:$0xff] }
 0x370   : > { %v16811_v9 = vor.u32 %v8890_v18, %v8889_v11  ;;  %v18235_v33 = vrot.slane %v16813_v22, 1 }
 0x371   : > { %v5557_v41 = vpop.f32.mrf.mxu2  ;;  %v5999_v48 = vpop.f32.mrf.mxu0 }
 0x372   : > { %v5729_v51 = vpop.f32.mrf.mxu3  ;;  %v5558_v16 = vadd.f32 %v5557_v41, %v5368_v43  ;;  %v5370_v36 = vpop.f32.mrf.mxu1  ;;  %v16791_v29 = vadd.f32 %v5999_v48, %v16710_v62  ;;  %v13495_v43 = vld [vmem:[%s18199_s3 + $0x208] sm:$0xff]  ;;  %v6315_v62 = vshll.u32 %v16787_v4, 16  ;;  %v18254_v48 = vshll.u32 %v15825_v21, 16  ;;  %v6472_v4 = vld [vmem:[#allocation2 + $0x58] sm:$0x1] }
 0x373   : > { %7011 = vmatpush.bf16.msrb.mxu1 %v13495_v43  ;;  %v16821_v50 = vsel %vm1125_vm2, %v8887_v23, %v16811_v9  ;;  %v6752_v23 = vsel %vm750_vm1, %v6749_v46, %v18235_v33 }
 0x374   : > { %v16800_v13 = vadd.f32 %v5729_v51, %v5558_v16  ;;  %v6311_v51 = vshrl.u32 %v16725_v15, 16  ;;  %v6317_v16 = vrot.slane %v6315_v62, 1  ;;  %v6583_v57 = vrot.slane %v18254_v48, 1  ;;  %18255 = vst [vmem:[#allocation7_spill] sm:$0xff] %v16821_v50  ;;  %v13892_v15 = vld [vmem:[#allocation2 + $0x38] sm:$0xff]  }
 0x376   : > { %v6313_v44 = vor.u32 %v6311_v51, %v6309_v19  ;;  %v6584_v62 = vsel %vm450_vm0, %v6579_v2, %v6583_v57  ;;  %v16845_v19 = vld [vmem:[#allocation2 + $0x48] sm:$0xff] }
 0x379   : > { %v5559_v17 = vpop.f32.mrf.mxu2  ;;  %v6002_v11 = vpop.f32.mrf.mxu0 }
 0x37a   : > { %v5731_v41 = vpop.f32.mrf.mxu3  ;;  %v5560_v28 = vadd.f32 %v5559_v17, %v5370_v36  ;;  %v5373_v43 = vpop.f32.mrf.mxu1  ;;  %v16824_v18 = vadd.f32 %v6002_v11, %v16732_v52  ;;  %v6318_v36 = vsel %vm450_vm0, %v6313_v44, %v6317_v16  ;;  %v16837_v52 = vld [vmem:[#allocation2 + $0x90] sm:$0xff]  ;;  %v13494_v11 = vld [vmem:[%s18199_s3 + $0x200] sm:$0xff] }
 0x37b   : > { %v18234_v2 = vshrl.u32 %v16837_v52, 16  ;;  %7012 = vmatpush.bf16.msrb.mxu1 %v13494_v11 }
 0x37c   : > { %v16828_v59 = vadd.f32 %v5731_v41, %v5560_v28  ;;  %6840 = vmatmul.bf16.gmra.mxu0 %v6752_v23  ;;  %v18236_v41 = vshll.u32 %v16837_v52, 16  ;;  %v13527_v28 = vld [vmem:[%s18199_s3 + $0x90] sm:$0xff] }
 0x37d   : > { %6157 = vmatmul.bf16.gmra.mxu1 %v13892_v15  ;;  %v8716_v15 = vrot.slane %v16837_v52, 1  ;;  %v8893_v23 = vrot.slane %v18234_v2, 1  ;;  %7671 = vmatpush.bf16.msra.mxu0 %v13527_v28  ;;  %v18260_v2 = vshll.u32 %v16316_v61, 16 }
 0x37e   : > { %6424 = vmatmul.bf16.gmra.mxu2 %v6318_v36 }
 0x37f   : > { %6690 = vmatmul.bf16.gmra.mxu3 %v6584_v62  ;;  %v8894_v62 = vrot.slane %v18236_v41, 2  ;;  %v6591_v33 = vrot.slane %v18260_v2, 1  ;;  %v6321_v41 = vor.u32 %v6319_v30, %v6317_v16  ;;  %v18263_v16 = vrot.slane %v16872_v34, 1 }
 0x380   : > { %v18264_v30 = vrot.slane %v16813_v22, 1  ;;  %v13564_v22 = vld [vmem:[%s18199_s3 + $0x178] sm:$0xff] }
 0x381   : > { %v5562_v53 = vpop.f32.mrf.mxu2  ;;  %v6004_v17 = vpop.f32.mrf.mxu0  ;;  %8353 = vmatpush.bf16.msrb.mxu3 %v13564_v22 }
 0x382   : > { %v5734_v46 = vpop.f32.mrf.mxu3  ;;  %v5563_v54 = vadd.f32 %v5562_v53, %v5373_v43  ;;  %v5375_v44 = vpop.f32.mrf.mxu1  ;;  %v16850_v51 = vadd.f32 %v6004_v17, %v16766_v40  ;;  %v6323_v43 = vshll.u32 %v16845_v19, 16  ;;  %v18257_v40 = vrot.slane %v16764_v31, 1 }
 0x383   : > { %v18261_v53 = vshrl.u32 %v15825_v21, 16 }
 0x384   : > { %v16852_v48 = vadd.f32 %v5734_v46, %v5563_v54  ;;  %v16867_v36 = vsel %vm750_vm1, %v18257_v40, %v8716_v15  ;;  %v8434_v46 = vld [vmem:[#allocation2 + $0x98] sm:$0x1]  ;;  %v16875_v54 = vor.u32 %v8894_v62, %v8893_v23  ;;  %v6325_v11 = vrot.slane %v6323_v43, 1 }
 0x385   : > { %18258 = vst [vmem:[#allocation8_spill] sm:$0xff] %v16867_v36  ;;  %v8484_v40 = vunpack.c.l.b16 %v8434_v46  ;;  %v6587_v23 = vor.u32 %v18261_v53, %v6583_v57  ;;  %v6523_v53 = vunpack.c.l.b16 %v6472_v4 }
 0x386   : > { %18259 = vst [vmem:[#allocation9_spill] sm:$0xff] %v16875_v54  ;;  %v16889_v43 = vsel %vm1125_vm2, %v16811_v9, %v16875_v54  ;;  %v6326_v21 = vsel %vm450_vm0, %v6321_v41, %v6325_v11  ;;  %v13548_v9 = vld [vmem:[%s18199_s3 + $0x138] sm:$0xff] }
 0x387   : > { %v16884_v62 = vpack.c.b16 %v8484_v40, %v8484_v40  ;;  %18262 = vst [vmem:[#allocation10_spill] sm:$0xff] %v16889_v43  ;;  %v6592_v57 = vsel %vm450_vm0, %v6587_v23, %v6591_v33  ;;  %8088 = vmatpush.bf16.msrb.mxu2 %v13548_v9  ;;  %v6327_v9 = vshrl.u32 %v16845_v19, 16  ;;  %v18268_v19 = vrot.slane %v16872_v34, 1  ;;  %v13563_v34 = vld [vmem:[%s18199_s3 + $0x170] sm:$0xff] }
 0x388   : > { %8354 = vmatpush.bf16.msrb.mxu3 %v13563_v34 }
 0x389   : > { %v5564_v17 = vpop.f32.mrf.mxu2  ;;  %v6007_v7 = vpop.f32.mrf.mxu0 }
 0x38a   : > { %v5736_v28 = vpop.f32.mrf.mxu3  ;;  %v5565_v36 = vadd.f32 %v5564_v17, %v5375_v44  ;;  %v5378_v50 = vpop.f32.mrf.mxu1  ;;  %v16880_v38 = vadd.f32 %v6007_v7, %v16800_v13  ;;  %v13893_v44 = vld [vmem:[#allocation2 + $0x40] sm:$0xff]   ;;  %v6754_v7 = vsel %vm750_vm1, %v18264_v30, %v18263_v16  ;;  %v6256_v13 = vunpack.c.l.b16 %v6205_v27  ;;  %v13526_v30 = vld [vmem:[%s18199_s3 + $0x88] sm:$0xff] }
 0x38b   : > { %7672 = vmatpush.bf16.msra.mxu0 %v13526_v30  ;;  %v6329_v30 = vor.u32 %v6327_v9, %v6325_v11  ;;  %v16943_v11 = vld [vmem:[#allocation2 + $0x4c] sm:$0xff] }
 0x38c   : > { %v16891_v2 = vadd.f32 %v5736_v28, %v5565_v36  ;;  %6845 = vmatmul.bf16.gmra.mxu0 %v6754_v7  ;;  %v8718_v36 = vrot.slane %v16884_v62, 1  ;;  %v6265_v17 = vpack.c.b16 %v6256_v13, %v6256_v13  ;;  %v16910_v28 = vpack.c.b16 %v6523_v53, %v6523_v53 }
 0x38d   : > { %6162 = vmatmul.bf16.gmra.mxu1 %v13893_v44 }
 0x38e   : > { %6429 = vmatmul.bf16.gmra.mxu2 %v6326_v21  ;;  %v16908_v41 = vsel %vm750_vm1, %v8716_v15, %v8718_v36  ;;  %v13540_v15 = vld [vmem:[%s18199_s3 + $0xf8] sm:$0xff]  ;;  %v6331_v7 = vshll.u32 %v6265_v17, 16  ;;  %v6597_v21 = vshll.u32 %v16910_v28, 16 }
 0x38f   : > { %6695 = vmatmul.bf16.gmra.mxu3 %v6592_v57  ;;  %18265 = vst [vmem:[#allocation11_spill] sm:$0xff] %v16908_v41  ;;  %7943 = vmatpush.bf16.msra.mxu1 %v13540_v15  ;;  %v7143_v57 = vld [vmem:[#allocation2 + $0x48] sm:$0xf]  ;;  %v18266_v15 = vshrl.u32 %v16316_v61, 16 }
 0x390   : > { %v6333_v22 = vrot.slane %v6331_v7, 1  ;;  %v6599_v36 = vrot.slane %v6597_v21, 1  ;;  %v7210_v41 = vunpack.c.l.b16 %v7143_v57  ;;  %v7372_v57 = vshll.u32 %v16943_v11, 16 }
 0x391   : > { %v5567_v46 = vpop.f32.mrf.mxu2  ;;  %v6009_v23 = vpop.f32.mrf.mxu0  ;;  %v6595_v54 = vor.u32 %v18266_v15, %v6591_v33  ;;  %v13547_v33 = vld [vmem:[%s18199_s3 + $0x130] sm:$0xff] }
 0x392   : > { %v5739_v27 = vpop.f32.mrf.mxu3  ;;  %v5568_v40 = vadd.f32 %v5567_v46, %v5378_v50  ;;  %v5380_v4 = vpop.f32.mrf.mxu1  ;;  %v16913_v44 = vadd.f32 %v6009_v23, %v16828_v59  ;;  %v16924_v50 = vld [vmem:[#allocation2 + $0x48] sm:$0xff]  ;;  %v7142_v23 = vld [vmem:[#allocation2 + $0x44] sm:$0xc]  ;;  %8089 = vmatpush.bf16.msrb.mxu2 %v13547_v33  ;;  %v13539_v15 = vld [vmem:[%s18199_s3 + $0xf0] sm:$0xff] }
 0x393   : > { %v18267_v43 = vrot.slane %v16924_v50, 1  ;;  %v7358_v61 = vunpack.c.l.b16 %v7142_v23  ;;  %7944 = vmatpush.bf16.msra.mxu1 %v13539_v15 }
 0x394   : > { %v16915_v16 = vadd.f32 %v5739_v27, %v5568_v40 }
 0x395   : > { %v6756_v7 = vsel %vm750_vm1, %v18268_v19, %v18267_v43  ;;  %v7359_v43 = vpack.c.b16 %v7210_v41, %v7358_v61  ;;  %v14102_v61 = vld [vmem:[#allocation2 + $0x50] sm:$0xff] }
 0x396   : > { %v6757_v33 = vrot.slane %v14102_v61, 1 }
 0x399   : > { %v5569_v13 = vpop.f32.mrf.mxu2  ;;  %v6012_v40 = vpop.f32.mrf.mxu0 }
 0x39a   : > { %v5741_v53 = vpop.f32.mrf.mxu3  ;;  %v5570_v46 = vadd.f32 %v5569_v13, %v5380_v4  ;;  %v5383_v27 = vpop.f32.mrf.mxu1  ;;  %v16929_v17 = vadd.f32 %v6012_v40, %v16852_v48  ;;  %v6334_v4 = vsel %vm450_vm0, %v6329_v30, %v6333_v22  ;;  %v6600_v48 = vsel %vm450_vm0, %v6595_v54, %v6599_v36  ;;  %v7175_v22 = vld [vmem:[#allocation2 + $0x44] sm:$0x8] }
 0x39b   : > { %v18238_v54 = vshrl.u32 %v16943_v11, 16  ;;  %v7364_v40 = vshll.u32 %v7359_v43, 16  ;;  %v13525_v30 = vld [vmem:[%s18199_s3 + $0x80] sm:$0xff]  ;;  %v7209_v19 = vunpack.c.l.b16 %v7175_v22 }
 0x39c   : > { %v16933_v59 = vadd.f32 %v5741_v53, %v5570_v46  ;;  %6850 = vmatmul.bf16.gmra.mxu0 %v6756_v7  ;;  %v7361_v46 = vshrl.u32 %v7359_v43, 16 }
 0x39d   : > { %6167 = vmatmul.bf16.gmra.mxu1 %v16480_v24  ;;  %7673 = vmatpush.bf16.msra.mxu0 %v13525_v30  ;;  %v16968_v7 = vpack.c.b16 %v7210_v41, %v7209_v19 }
 0x39e   : > { %6434 = vmatmul.bf16.gmra.mxu2 %v6334_v4  ;;  %v7363_v4 = vrot.slane %v7361_v46, 2 }
 0x39f   : > { %6700 = vmatmul.bf16.gmra.mxu3 %v6600_v48  ;;  %v7366_v48 = vrot.slane %v7364_v40, 3  ;;  %v7235_v41 = vrot.slane %v16968_v7, 3  ;;  %v18269_v40 = vrot.slane %v16924_v50, 1  ;;  %v13562_v50 = vld [vmem:[%s18199_s3 + $0x168] sm:$0xff] }
 0x3a0   : > { %8355 = vmatpush.bf16.msrb.mxu3 %v13562_v50 }
 0x3a1   : > { %v5572_v24 = vpop.f32.mrf.mxu2  ;;  %v6014_v9 = vpop.f32.mrf.mxu0  ;;  %v7367_v15 = vor.u32 %v7366_v48, %v7363_v4  ;;  %v6758_v19 = vsel %vm750_vm1, %v18269_v40, %v6757_v33  ;;  %v18271_v40 = vshll.u32 %v16535_v37, 16 }
 0x3a2   : > { %v5744_v21 = vpop.f32.mrf.mxu3  ;;  %v5573_v13 = vadd.f32 %v5572_v24, %v5383_v27  ;;  %v5385_v53 = vpop.f32.mrf.mxu1  ;;  %v16954_v36 = vadd.f32 %v6014_v9, %v16891_v2  ;;  %v7371_v27 = vrot.slane %v18238_v54, 2  ;;  %v7374_v2 = vrot.slane %v7372_v57, 3 }
 0x3a3   : > { %v7236_v24 = vrot.slane %v16943_v11, 3 }
 0x3a4   : > { %v16956_v23 = vadd.f32 %v5744_v21, %v5573_v13  ;;  %v7375_v21 = vor.u32 %v7374_v2, %v7371_v27 }
 0x3a6   : > { %v7376_v27 = vsel %vm1723_vm4, %v7367_v15, %v7375_v21 }
 0x3a9   : > { %v5574_v34 = vpop.f32.mrf.mxu2  ;;  %v6017_v9 = vpop.f32.mrf.mxu0 }
 0x3aa   : > { %v5746_v43 = vpop.f32.mrf.mxu3  ;;  %v5575_v13 = vadd.f32 %v5574_v34, %v5385_v53  ;;  %v6133_v22 = vpop.f32.mrf.mxu1  ;;  %v16972_v54 = vadd.f32 %v6017_v9, %v16915_v16  ;;  %v7237_v53 = vsel %vm1946_vm5, %v7235_v41, %v7236_v24  ;;  %v16984_v16 = vld [vmem:[#allocation2 + $0x54] sm:$0xff]  ;;  %v18270_v41 = vshrl.u32 %v16535_v37, 16 }
 0x3ab   : > { %v6173_v30 = vadd.f32 %v6133_v22, %v16648_v49  ;;  %v13546_v49 = vld [vmem:[%s18199_s3 + $0x128] sm:$0xff]  ;;  %v18239_v4 = vshrl.u32 %v16984_v16, 16  ;;  %v7381_v48 = vshll.u32 %v16984_v16, 16 }
 0x3ac   : > { %v16976_v46 = vadd.f32 %v5746_v43, %v5575_v13  ;;  %6855 = vmatmul.bf16.gmra.mxu0 %v6758_v19  ;;  %8090 = vmatpush.bf16.msrb.mxu2 %v13546_v49  ;;  %v6916_v15 = vrot.slane %v18270_v41, 1  ;;  %v6917_v19 = vrot.slane %v18271_v40, 2 }
 0x3ad   : > { %7013 = vmatmul.bf16.vlgmr.msrb.gmra.mxu1 %v15535_v14 }
 0x3ae   : > { %7316 = vmatmul.bf16.vlgmr.msra.gmra.mxu2 %v7237_v53  ;;  %v13579_v53 = vld [vmem:[%s18199_s3 + $0x1b8] sm:$0xff]  ;;  %v6918_v37 = vor.u32 %v6917_v19, %v6916_v15 }
 0x3af   : > { %7504 = vmatmul.bf16.vlgmr.msra.gmra.mxu3 %v7376_v27  ;;  %8618 = vmatpush.bf16.msrb.mxu0 %v13579_v53  ;;  %v6759_v27 = vrot.slane %v16910_v28, 1  ;;  %v17027_v19 = vld [vmem:[#allocation2 + $0x5c] sm:$0xff] }
 0x3b0   : > { %v6919_v28 = vsel %vm1125_vm2, %v15388_v20, %v6918_v37 }
 0x3b1   : > { %v6400_v2 = vpop.f32.mrf.mxu2  ;;  %v6019_v34 = vpop.f32.mrf.mxu0  ;;  %v6760_v53 = vsel %vm750_vm1, %v6757_v33, %v6759_v27  ;;  %v7566_v27 = vshrl.u32 %v16968_v7, 16 }
 0x3b2   : > { %v6666_v14 = vpop.f32.mrf.mxu3  ;;  %v6440_v61 = vadd.f32 %v6400_v2, %v6173_v30  ;;  %v6135_v43 = vpop.f32.mrf.mxu1  ;;  %v16995_v13 = vadd.f32 %v6019_v34, %v16933_v59  ;;  %v13538_v30 = vld [vmem:[%s18199_s3 + $0xe8] sm:$0xff]  ;;  %v7380_v59 = vrot.slane %v18239_v4, 2  ;;  %v7238_v2 = vrot.slane %v16984_v16, 3 }
 0x3b3   : > { %v6174_v9 = vadd.f32 %v6135_v43, %v16680_v56  ;;  %v7383_v56 = vrot.slane %v7381_v48, 3  ;;  %7945 = vmatpush.bf16.msra.mxu1 %v13538_v30 }
 0x3b4   : > { %v16998_v22 = vadd.f32 %v6666_v14, %v6440_v61  ;;  %v7239_v15 = vsel %vm1946_vm5, %v7236_v24, %v7238_v2  ;;  %v18240_v24 = vshrl.u32 %v17027_v19, 16 }
 0x3b5   : > { %v7384_v14 = vor.u32 %v7383_v56, %v7380_v59 }
 0x3b9   : > { %v6402_v49 = vpop.f32.mrf.mxu2  ;;  %v6022_v34 = vpop.f32.mrf.mxu0 }
 0x3ba   : > { %v6668_v50 = vpop.f32.mrf.mxu3  ;;  %v6441_v61 = vadd.f32 %v6402_v49, %v6174_v9  ;;  %v6138_v43 = vpop.f32.mrf.mxu1  ;;  %v17017_v41 = vadd.f32 %v6022_v34, %v16956_v23  ;;  %v7385_v9 = vsel %vm1723_vm4, %v7375_v21, %v7384_v14  ;;  %v13561_v23 = vld [vmem:[%s18199_s3 + $0x160] sm:$0xff]  ;;  %v18241_v21 = vshll.u32 %v17027_v19, 16 }
 0x3bb   : > { %v6175_v40 = vadd.f32 %v6138_v43, %v16706_v35  ;;  %v13545_v35 = vld [vmem:[%s18199_s3 + $0x120] sm:$0xff]  ;;  %8356 = vmatpush.bf16.msrb.mxu3 %v13561_v23  ;;  %v7569_v49 = vshll.u32 %v16968_v7, 16  ;;  %v18272_v43 = vshrl.u32 %v16943_v11, 16  ;;  %v7240_v23 = vrot.slane %v17027_v19, 3 }
 0x3bc   : > { %v17020_v4 = vadd.f32 %v6668_v50, %v6441_v61  ;;  %6860 = vmatmul.bf16.gmra.mxu0 %v6760_v53  ;;  %8091 = vmatpush.bf16.msrb.mxu2 %v13545_v35  ;;  %v13537_v7 = vld [vmem:[%s18199_s3 + $0xe0] sm:$0xff] }
 0x3bd   : > { %7018 = vmatmul.bf16.gmra.mxu1 %v6919_v28  ;;  %v7573_v53 = vrot.slane %v18272_v43, 3  ;;  %v7574_v28 = vrot.slane %v7372_v57, 4 }
 0x3be   : > { %7321 = vmatmul.bf16.gmra.mxu2 %v7239_v15  ;;  %v7568_v15 = vrot.slane %v7566_v27, 3  ;;  %7946 = vmatpush.bf16.msra.mxu1 %v13537_v7  ;;  %v6923_v27 = vsel %vm1125_vm2, %v6918_v37, %v15723_v45  ;;  %v13560_v45 = vld [vmem:[%s18199_s3 + $0x158] sm:$0xff] }
 0x3bf   : > { %7509 = vmatmul.bf16.gmra.mxu3 %v7385_v9  ;;  %v7571_v9 = vrot.slane %v7569_v49, 4  ;;  %v7575_v11 = vor.u32 %v7574_v28, %v7573_v53  ;;  %v7241_v53 = vsel %vm1946_vm5, %v7238_v2, %v7240_v23  ;;  %v17071_v28 = vld [vmem:[#allocation2 + $0x64] sm:$0xff] }
 0x3c0   : > { %8357 = vmatpush.bf16.msrb.mxu3 %v13560_v45  ;;  %v7396_v2 = vshrl.u32 %v17071_v28, 16 }
 0x3c1   : > { %v6405_v20 = vpop.f32.mrf.mxu2  ;;  %v6024_v59 = vpop.f32.mrf.mxu0 }
 0x3c2   : > { %v6671_v33 = vpop.f32.mrf.mxu3  ;;  %v6442_v30 = vadd.f32 %v6405_v20, %v6175_v40  ;;  %v6140_v56 = vpop.f32.mrf.mxu1  ;;  %v17040_v50 = vadd.f32 %v6024_v59, %v16976_v46  ;;  %v13578_v40 = vld [vmem:[%s18199_s3 + $0x1b0] sm:$0xff]  ;;  %v7389_v46 = vrot.slane %v18240_v24, 2 }
 0x3c3   : > { %v6176_v61 = vadd.f32 %v6140_v56, %v16730_v0  ;;  %v7392_v0 = vrot.slane %v18241_v21, 3  ;;  %8619 = vmatpush.bf16.msrb.mxu0 %v13578_v40  ;;  %v7572_v56 = vor.u32 %v7571_v9, %v7568_v15 }
 0x3c4   : > { %v17043_v34 = vadd.f32 %v6671_v33, %v6442_v30 }
 0x3c5   : > { %v7393_v20 = vor.u32 %v7392_v0, %v7389_v46  ;;  %v7576_v49 = vsel %vm5598_vm6, %v7572_v56, %v7575_v11 }
 0x3c9   : > { %v6407_v57 = vpop.f32.mrf.mxu2  ;;  %v6826_v59 = vpop.f32.mrf.mxu0 }
 0x3ca   : > { %v6673_v35 = vpop.f32.mrf.mxu3  ;;  %v6443_v33 = vadd.f32 %v6407_v57, %v6176_v61  ;;  %v6143_v30 = vpop.f32.mrf.mxu1  ;;  %v17062_v24 = vadd.f32 %v6826_v59, %v16998_v22  ;;  %v7394_v61 = vsel %vm1723_vm4, %v7384_v14, %v7393_v20  ;;  %v7399_v14 = vshll.u32 %v17071_v28, 16  ;;  %v13536_v59 = vld [vmem:[%s18199_s3 + $0xd8] sm:$0xff] }
 0x3cb   : > { %v6177_v43 = vadd.f32 %v6143_v30, %v16760_v5  ;;  %v13544_v5 = vld [vmem:[%s18199_s3 + $0x118] sm:$0xff]  ;;  %v18273_v57 = vshrl.u32 %v16984_v16, 16  ;;  %v13577_v30 = vld [vmem:[%s18199_s3 + $0x1a8] sm:$0xff]  ;;  %7947 = vmatpush.bf16.msra.mxu1 %v13536_v59 }
 0x3cc   : > { %v17064_v21 = vadd.f32 %v6673_v35, %v6443_v33  ;;  %7674 = vmatmul.bf16.vlgmr.msra.gmra.mxu0 %v7576_v49  ;;  %8092 = vmatpush.bf16.msrb.mxu2 %v13544_v5  ;;  %v7578_v33 = vrot.slane %v7381_v48, 4  ;;  %v7242_v48 = vrot.slane %v17071_v28, 3 }
 0x3cd   : > { %7023 = vmatmul.bf16.gmra.mxu1 %v6923_v27  ;;  %v7577_v35 = vrot.slane %v18273_v57, 3  ;;  %8620 = vmatpush.bf16.msrb.mxu0 %v13577_v30 }
 0x3ce   : > { %7326 = vmatmul.bf16.gmra.mxu2 %v7241_v53 }
 0x3cf   : > { %7514 = vmatmul.bf16.gmra.mxu3 %v7394_v61  ;;  %v7579_v56 = vor.u32 %v7578_v33, %v7577_v35 }
 0x3d1   : > { %v6410_v22 = vpop.f32.mrf.mxu2  ;;  %v6828_v46 = vpop.f32.mrf.mxu0 }
 0x3d2   : > { %v6676_v37 = vpop.f32.mrf.mxu3  ;;  %v6444_v40 = vadd.f32 %v6410_v22, %v6177_v43  ;;  %v6145_v7 = vpop.f32.mrf.mxu1  ;;  %v17083_v15 = vadd.f32 %v6828_v46, %v17020_v4  ;;  %v7401_v4 = vrot.slane %v7399_v14, 3  ;;  %v17108_v46 = vld [vmem:[#allocation2 + $0x6c] sm:$0xff] }
 0x3d3   : > { %v6178_v0 = vadd.f32 %v6145_v7, %v16791_v29  ;;  %v7398_v29 = vrot.slane %v7396_v2, 2 }
 0x3d4   : > { %v6710_v9 = vadd.f32 %v6676_v37, %v6444_v40  ;;  %v7580_v37 = vsel %vm5598_vm6, %v7575_v11, %v7579_v56  ;;  %v7243_v40 = vsel %vm1946_vm5, %v7240_v23, %v7242_v48  ;;  %v7405_v23 = vshrl.u32 %v17108_v46, 16 }
 0x3d5   : > { %v7402_v27 = vor.u32 %v7401_v4, %v7398_v29  ;;  %v18274_v29 = vshrl.u32 %v17027_v19, 16 }
 0x3d7   : > { %v7403_v7 = vsel %vm1723_vm4, %v7393_v20, %v7402_v27  ;;  %v7408_v20 = vshll.u32 %v17108_v46, 16  ;;  %v7581_v4 = vrot.slane %v18274_v29, 3 }
 0x3d9   : > { %v6412_v43 = vpop.f32.mrf.mxu2  ;;  %v6831_v61 = vpop.f32.mrf.mxu0 }
 0x3da   : > { %v6678_v16 = vpop.f32.mrf.mxu3  ;;  %v6445_v49 = vadd.f32 %v6412_v43, %v6178_v0  ;;  %v6148_v53 = vpop.f32.mrf.mxu1  ;;  %v17102_v45 = vadd.f32 %v6831_v61, %v17043_v34  ;;  %v13559_v34 = vld [vmem:[%s18199_s3 + $0x150] sm:$0xff]  ;;  %v18275_v43 = vshll.u32 %v17027_v19, 16 }
 0x3db   : > { %v6179_v5 = vadd.f32 %v6148_v53, %v16824_v18  ;;  %v13543_v18 = vld [vmem:[%s18199_s3 + $0x110] sm:$0xff]  ;;  %8358 = vmatpush.bf16.msrb.mxu3 %v13559_v34 }
 0x3dc   : > { %v6711_v22 = vadd.f32 %v6678_v16, %v6445_v49  ;;  %7679 = vmatmul.bf16.gmra.mxu0 %v7580_v37  ;;  %8093 = vmatpush.bf16.msrb.mxu2 %v13543_v18  ;;  %v7582_v16 = vrot.slane %v18275_v43, 4  ;;  %v13576_v49 = vld [vmem:[%s18199_s3 + $0x1a0] sm:$0xff]  ;;  %v13535_v53 = vld [vmem:[%s18199_s3 + $0xd0] sm:$0xff]  ;;  %v7244_v37 = vrot.slane %v17108_v46, 3 }
 0x3dd   : > { %7028 = vmatmul.bf16.gmra.mxu1 %v15743_v63  ;;  %8621 = vmatpush.bf16.msrb.mxu0 %v13576_v49 }
 0x3de   : > { %7331 = vmatmul.bf16.gmra.mxu2 %v7243_v40  ;;  %7948 = vmatpush.bf16.msra.mxu1 %v13535_v53  ;;  %v7583_v61 = vor.u32 %v7582_v16, %v7581_v4  ;;  %v17144_v4 = vld [vmem:[#allocation2 + $0x74] sm:$0xff] }
 0x3df   : > { %7519 = vmatmul.bf16.gmra.mxu3 %v7403_v7 }
 0x3e1   : > { %v6415_v63 = vpop.f32.mrf.mxu2  ;;  %v6833_v35 = vpop.f32.mrf.mxu0 }
 0x3e2   : > { %v6681_v11 = vpop.f32.mrf.mxu3  ;;  %v6446_v0 = vadd.f32 %v6415_v63, %v6179_v5  ;;  %v6150_v57 = vpop.f32.mrf.mxu1  ;;  %v17120_v30 = vadd.f32 %v6833_v35, %v17064_v21  ;;  %v7410_v21 = vrot.slane %v7408_v20, 3  ;;  %v7245_v35 = vsel %vm1946_vm5, %v7242_v48, %v7244_v37 }
 0x3e3   : > { %v6180_v33 = vadd.f32 %v6150_v57, %v16850_v51  ;;  %v7407_v51 = vrot.slane %v7405_v23, 2  ;;  %v7584_v57 = vsel %vm5598_vm6, %v7579_v56, %v7583_v61  ;;  %v7414_v48 = vshrl.u32 %v17144_v4, 16 }
 0x3e4   : > { %v6712_v59 = vadd.f32 %v6681_v11, %v6446_v0 }
 0x3e5   : > { %v7411_v40 = vor.u32 %v7410_v21, %v7407_v51  ;;  %v7585_v21 = vrot.slane %v7396_v2, 3 }
 0x3e7   : > { %v7412_v29 = vsel %vm1723_vm4, %v7402_v27, %v7411_v40  ;;  %v7417_v27 = vshll.u32 %v17144_v4, 16 }
 0x3e9   : > { %v6417_v5 = vpop.f32.mrf.mxu2  ;;  %v6836_v34 = vpop.f32.mrf.mxu0 }
 0x3ea   : > { %v6683_v19 = vpop.f32.mrf.mxu3  ;;  %v6447_v7 = vadd.f32 %v6417_v5, %v6180_v33  ;;  %v6153_v18 = vpop.f32.mrf.mxu1  ;;  %v17138_v11 = vadd.f32 %v6836_v34, %v6710_v9  ;;  %v13558_v9 = vld [vmem:[%s18199_s3 + $0x148] sm:$0xff]  ;;  %v7586_v5 = vrot.slane %v7399_v14, 4  ;;  %v7246_v14 = vrot.slane %v17144_v4, 3 }
 0x3eb   : > { %v6181_v63 = vadd.f32 %v6153_v18, %v16880_v38  ;;  %v13542_v38 = vld [vmem:[%s18199_s3 + $0x108] sm:$0xff]  ;;  %8359 = vmatpush.bf16.msrb.mxu3 %v13558_v9 }
 0x3ec   : > { %v6713_v0 = vadd.f32 %v6683_v19, %v6447_v7  ;;  %7684 = vmatmul.bf16.gmra.mxu0 %v7584_v57  ;;  %8094 = vmatpush.bf16.msrb.mxu2 %v13542_v38  ;;  %v13575_v19 = vld [vmem:[%s18199_s3 + $0x198] sm:$0xff]  ;;  %v13534_v7 = vld [vmem:[%s18199_s3 + $0xc8] sm:$0xff]  ;;  %v7587_v2 = vor.u32 %v7586_v5, %v7585_v21 }
 0x3ed   : > { %7033 = vmatmul.bf16.gmra.mxu1 %v15811_v10  ;;  %8622 = vmatpush.bf16.msrb.mxu0 %v13575_v19 }
 0x3ee   : > { %7336 = vmatmul.bf16.gmra.mxu2 %v7245_v35  ;;  %7949 = vmatpush.bf16.msra.mxu1 %v13534_v7 }
 0x3ef   : > { %7524 = vmatmul.bf16.gmra.mxu3 %v7412_v29 }
 0x3f1   : > { %v6420_v10 = vpop.f32.mrf.mxu2  ;;  %v6838_v16 = vpop.f32.mrf.mxu0 }
 0x3f2   : > { %v6686_v56 = vpop.f32.mrf.mxu3  ;;  %v6448_v33 = vadd.f32 %v6420_v10, %v6181_v63  ;;  %v6155_v43 = vpop.f32.mrf.mxu1  ;;  %v17155_v53 = vadd.f32 %v6838_v16, %v6711_v22  ;;  %v7419_v22 = vrot.slane %v7417_v27, 3  ;;  %v7588_v10 = vsel %vm5598_vm6, %v7583_v61, %v7587_v2 }
 0x3f3   : > { %v6182_v49 = vadd.f32 %v6155_v43, %v16913_v44  ;;  %v7416_v44 = vrot.slane %v7414_v48, 2  ;;  %v17183_v43 = vld [vmem:[#allocation2 + $0x7c] sm:$0xff] }
 0x3f4   : > { %v17157_v51 = vadd.f32 %v6686_v56, %v6448_v33  ;;  %v7247_v56 = vsel %vm1946_vm5, %v7244_v37, %v7246_v14  ;;  %v7423_v37 = vshrl.u32 %v17183_v43, 16 }
 0x3f5   : > { %v7420_v34 = vor.u32 %v7419_v22, %v7416_v44  ;;  %v7589_v44 = vrot.slane %v7405_v23, 3  ;;  %v7590_v22 = vrot.slane %v7408_v20, 4 }
 0x3f7   : > { %v7421_v33 = vsel %vm1723_vm4, %v7411_v40, %v7420_v34  ;;  %v7426_v40 = vshll.u32 %v17183_v43, 16  ;;  %v7591_v23 = vor.u32 %v7590_v22, %v7589_v44 }
 0x3f9   : > { %v6422_v18 = vpop.f32.mrf.mxu2  ;;  %v6841_v35 = vpop.f32.mrf.mxu0 }
 0x3fa   : > { %v6688_v28 = vpop.f32.mrf.mxu3  ;;  %v6449_v63 = vadd.f32 %v6422_v18, %v6182_v49  ;;  %v6158_v57 = vpop.f32.mrf.mxu1  ;;  %v17175_v38 = vadd.f32 %v6841_v35, %v6712_v59  ;;  %v13557_v59 = vld [vmem:[%s18199_s3 + $0x140] sm:$0xff]  ;;  %v6882_v18 = vld [vmem:[#allocation2 + $0x58] sm:$0x3] }
 0x3fb   : > { %v6183_v29 = vadd.f32 %v6158_v57, %v16929_v17  ;;  %v13541_v17 = vld [vmem:[%s18199_s3 + $0x100] sm:$0xff]  ;;  %8360 = vmatpush.bf16.msrb.mxu3 %v13557_v59  ;;  %v6901_v46 = vunpack.c.l.b16 %v6882_v18 }
 0x3fc   : > { %v17177_v9 = vadd.f32 %v6688_v28, %v6449_v63  ;;  %7689 = vmatmul.bf16.gmra.mxu0 %v7588_v10  ;;  %8095 = vmatpush.bf16.msrb.mxu2 %v13541_v17  ;;  %v13574_v28 = vld [vmem:[%s18199_s3 + $0x190] sm:$0xff]  ;;  %v13533_v63 = vld [vmem:[%s18199_s3 + $0xc0] sm:$0xff] }
 0x3fd   : > { %7038 = vmatmul.bf16.gmra.mxu1 %v15904_v3  ;;  %v7158_v57 = vld [vmem:[#allocation2 + $0x84] sm:$0x7]  ;;  %8623 = vmatpush.bf16.msrb.mxu0 %v13574_v28 }
 0x3fe   : > { %7341 = vmatmul.bf16.gmra.mxu2 %v7247_v56  ;;  %7950 = vmatpush.bf16.msra.mxu1 %v13533_v63  ;;  %v7225_v56 = vunpack.c.l.b16 %v7158_v57 }
 0x3ff   : > { %7529 = vmatmul.bf16.gmra.mxu3 %v7421_v33 }
 0x401   : > { %v6425_v3 = vpop.f32.mrf.mxu2  ;;  %v6843_v21 = vpop.f32.mrf.mxu0 }
 0x402   : > { %v6691_v61 = vpop.f32.mrf.mxu3  ;;  %v6450_v16 = vadd.f32 %v6425_v3, %v6183_v29  ;;  %v6160_v49 = vpop.f32.mrf.mxu1  ;;  %v17194_v19 = vadd.f32 %v6843_v21, %v6713_v0  ;;  %v7428_v0 = vrot.slane %v7426_v40, 3  ;;  %v7248_v29 = vrot.slane %v17183_v43, 3  ;;  %v17285_v43 = vld [vmem:[%s18200_s4] ss:$0 sm:$0xff] }
 0x403   : > { %v6184_v5 = vadd.f32 %v6160_v49, %v16954_v36  ;;  %v7425_v36 = vrot.slane %v7423_v37, 2  ;;  %v7592_v21 = vsel %vm5598_vm6, %v7587_v2, %v7591_v23 }
 0x404   : > { %v17196_v7 = vadd.f32 %v6691_v61, %v6450_v16  ;;  %v6902_v16 = vpack.c.b16 %v6901_v46, %v6901_v46  ;;  %v7249_v44 = vsel %vm1946_vm5, %v7246_v14, %v7248_v29 }
 0x405   : > { %v7429_v10 = vor.u32 %v7428_v0, %v7425_v36 }
 0x406   : > { %v6941_v18 = vshrl.u32 %v6902_v16, 16 }
 0x407   : > { %v7430_v22 = vsel %vm1723_vm4, %v7420_v34, %v7429_v10  ;;  %v13595_v34 = vld [vmem:[%s18199_s3 + $0x238] sm:$0xff] }
 0x408   : > { %v6943_v14 = vrot.slane %v6941_v18, 1  ;;  %8962 = vmatpush.bf16.msra.mxu2 %v13595_v34 }
 0x409   : > { %v6427_v20 = vpop.f32.mrf.mxu2  ;;  %v6846_v59 = vpop.f32.mrf.mxu0 }
 0x40a   : > { %v6693_v35 = vpop.f32.mrf.mxu3  ;;  %v6451_v33 = vadd.f32 %v6427_v20, %v6184_v5  ;;  %v6163_v17 = vpop.f32.mrf.mxu1  ;;  %v17215_v61 = vadd.f32 %v6846_v59, %v17157_v51  ;;  %v7234_v5 = vpack.c.b16 %v7225_v56, %v7225_v56  ;;  %v13612_v20 = vld [vmem:[%s18199_s3 + $0x78] sm:$0xff] }
 0x40b   : > { %v6185_v3 = vadd.f32 %v6163_v17, %v16972_v54  ;;  %v6944_v54 = vshll.u32 %v6902_v16, 16  ;;  %9205 = vmatpush.bf16.msra.mxu3 %v13612_v20  ;;  %v13549_v20 = vld [vmem:[#allocation2 + $0x50] sm:$0xff] }
 0x40c   : > { %v17217_v49 = vadd.f32 %v6693_v35, %v6451_v33  ;;  %7694 = vmatmul.bf16.gmra.mxu0 %v7592_v21  ;;  %v7432_v63 = vshrl.u32 %v7234_v5, 16  ;;  %v7435_v36 = vshll.u32 %v7234_v5, 16  ;;  %v7593_v33 = vrot.slane %v7414_v48, 3 }
 0x40d   : > { %7043 = vmatmul.bf16.gmra.mxu1 %v16370_v42  ;;  %v6946_v56 = vrot.slane %v6944_v54, 2 }
 0x40e   : > { %7346 = vmatmul.bf16.gmra.mxu2 %v7249_v44  ;;  %v7437_v17 = vrot.slane %v7435_v36, 3  ;;  %v7250_v44 = vrot.slane %v7234_v5, 3  ;;  %v13587_v36 = vld [vmem:[%s18199_s3 + $0x1f8] sm:$0xff] }
 0x40f   : > { %7534 = vmatmul.bf16.gmra.mxu3 %v7430_v22  ;;  %v6947_v59 = vor.u32 %v6946_v56, %v6943_v14  ;;  %8776 = vmatpush.bf16.msrb.mxu1 %v13587_v36 }
 0x411   : > { %v6430_v28 = vpop.f32.mrf.mxu2  ;;  %v6848_v46 = vpop.f32.mrf.mxu0 }
 0x412   : > { %v6696_v51 = vpop.f32.mrf.mxu3  ;;  %v6452_v0 = vadd.f32 %v6430_v28, %v6185_v3  ;;  %v6165_v57 = vpop.f32.mrf.mxu1  ;;  %v17225_v42 = vadd.f32 %v6848_v46, %v17177_v9  ;;  %v7434_v9 = vrot.slane %v7432_v63, 2  ;;  %v13573_v63 = vld [vmem:[%s18199_s3 + $0x188] sm:$0xff] }
 0x413   : > { %v6186_v2 = vadd.f32 %v6165_v57, %v16995_v13  ;;  %v7594_v13 = vrot.slane %v7417_v27, 4  ;;  %v14038_v27 = vld [vmem:[#allocation2 + $0x54] sm:$0xff]   ;;  %8624 = vmatpush.bf16.msrb.mxu0 %v13573_v63 }
 0x414   : > { %v17233_v35 = vadd.f32 %v6696_v51, %v6452_v0  ;;  %v7438_v22 = vor.u32 %v7437_v17, %v7434_v9  ;;  %v14036_v51 = vld [vmem:[#allocation2 + $0x4c] sm:$0xf0]   ;;  %v7816_v34 = vshrl.u32 %v14038_v27, 16  ;;  %v7819_v56 = vshll.u32 %v14038_v27, 16  ;;  %v17259_v9 = vld [vmem:[#allocation2 + $0x58] sm:$0xff] }
 0x415   : > { %v17239_v3 = vor.u32 %v7594_v13, %v7593_v33  ;;  %v18276_v0 = vld [vmem:[#allocation3_spill] sm:$0xff]  ;;  %v7545_v27 = vld [vmem:[#allocation2 + $0x84] sm:$0xf] }
 0x416   : > { %v6948_v57 = vsel %vm1125_vm2, %v18276_v0, %v6947_v59  ;;  %v7439_v46 = vsel %vm1723_vm4, %v7429_v10, %v7438_v22  ;;  %v8232_v22 = vshll.u32 %v13549_v20, 16 }
 0x418   : > { %v8234_v0 = vrot.slane %v8232_v22, 1 }
 0x419   : > { %v6432_v16 = vpop.f32.mrf.mxu2  ;;  %v6851_v54 = vpop.f32.mrf.mxu0 }
 0x41a   : > { %v6698_v21 = vpop.f32.mrf.mxu3  ;;  %v6453_v18 = vadd.f32 %v6432_v16, %v6186_v2  ;;  %v6168_v28 = vpop.f32.mrf.mxu1  ;;  %v17243_v4 = vadd.f32 %v6851_v54, %v17196_v7  ;;  %v7251_v7 = vsel %vm1946_vm5, %v7248_v29, %v7250_v44  ;;  %v13958_v2 = vld [vmem:[#allocation2 + $0x4c] sm:$0x8]  ;;  %v7818_v44 = vrot.slane %v7816_v34, 3 }
 0x41b   : > { %v6187_v48 = vadd.f32 %v6168_v28, %v17017_v41  ;;  %v7596_v41 = vsel %vm5598_vm6, %v7591_v23, %v17239_v3  ;;  %v13959_v14 = vor.u32 %v14036_v51, %v13958_v2  ;;  %v13611_v28 = vld [vmem:[%s18199_s3 + $0x70] sm:$0xff]  ;;  %v7597_v51 = vrot.slane %v7423_v37, 3 }
 0x41c   : > { %v17251_v5 = vadd.f32 %v6698_v21, %v6453_v18  ;;  %7699 = vmatmul.bf16.gmra.mxu0 %v7596_v41  ;;  %v13594_v18 = vld [vmem:[%s18199_s3 + $0x230] sm:$0xff]  ;;  %9206 = vmatpush.bf16.msra.mxu3 %v13611_v28 }
 0x41d   : > { %7048 = vmatmul.bf16.gmra.mxu1 %v6948_v57  ;;  %v7808_v29 = vshrl.u32 %v13959_v14, 16  ;;  %v7811_v16 = vshll.u32 %v13959_v14, 16  ;;  %8963 = vmatpush.bf16.msra.mxu2 %v13594_v18  ;;  %v13899_v18 = vld [vmem:[#allocation2 + $0x50] sm:$0xff]  }
 0x41e   : > { %7351 = vmatmul.bf16.gmra.mxu2 %v7251_v7  ;;  %v7563_v7 = vunpack.c.l.b16 %v7545_v27 }
 0x41f   : > { %7539 = vmatmul.bf16.gmra.mxu3 %v7439_v46  ;;  %v7810_v63 = vrot.slane %v7808_v29, 3  ;;  %v7813_v36 = vrot.slane %v7811_v16, 4  ;;  %v13586_v29 = vld [vmem:[%s18199_s3 + $0x1f0] sm:$0xff] }
 0x420   : > { %8777 = vmatpush.bf16.msrb.mxu1 %v13586_v29 }
 0x421   : > { %v6435_v33 = vpop.f32.mrf.mxu2  ;;  %v6853_v59 = vpop.f32.mrf.mxu0 }
 0x422   : > { %v6701_v13 = vpop.f32.mrf.mxu3  ;;  %v6454_v23 = vadd.f32 %v6435_v33, %v6187_v48  ;;  %v6170_v17 = vpop.f32.mrf.mxu1  ;;  %v17263_v21 = vadd.f32 %v6853_v59, %v17217_v49  ;;  %v7821_v49 = vrot.slane %v7819_v56, 4  ;;  %v8237_v48 = vshll.u32 %v17259_v9, 16 }
 0x423   : > { %v6188_v10 = vadd.f32 %v6170_v17, %v17040_v50  ;;  %v7598_v50 = vrot.slane %v7426_v40, 4  ;;  %v8230_v40 = vshrl.u32 %v13549_v20, 16  ;;  %v7814_v33 = vor.u32 %v7813_v36, %v7810_v63  ;;  %v17296_v17 = vld [vmem:[%s18201_s5] ss:$0 sm:$0xff] }
 0x424   : > { %v17271_v54 = vadd.f32 %v6701_v13, %v6454_v23  ;;  %v17280_v41 = vor.u32 %v7821_v49, %v7818_v44  ;;  %v17287_v2 = vrot.slane %v8237_v48, 1  ;;  %v13572_v20 = vld [vmem:[%s18199_s3 + $0x180] sm:$0xff] }
 0x425   : > { %v17278_v57 = vor.u32 %v7598_v50, %v7597_v51  ;;  %v8235_v59 = vor.u32 %v8234_v0, %v8230_v40  ;;  %v14040_v44 = vld [vmem:[#allocation2 + $0x5c] sm:$0xff]   ;;  %8625 = vmatpush.bf16.msrb.mxu0 %v13572_v20 }
 0x426   : > { %v7825_v49 = vshrl.u32 %v14040_v44, 16  ;;  %v7828_v48 = vshll.u32 %v14040_v44, 16  ;;  %v17321_v0 = vld [vmem:[#allocation2 + $0x60] sm:$0xff] }
 0x427   : > { %v8240_v28 = vsel %vm450_vm0, %v8235_v59, %v17287_v2 }
 0x428   : > { %v7827_v59 = vrot.slane %v7825_v49, 3  ;;  %v7830_v20 = vrot.slane %v7828_v48, 4 }
 0x429   : > { %v6437_v46 = vpop.f32.mrf.mxu2  ;;  %v6856_v34 = vpop.f32.mrf.mxu0 }
 0x42a   : > { %v6703_v37 = vpop.f32.mrf.mxu3  ;;  %v6455_v14 = vadd.f32 %v6437_v46, %v6188_v10  ;;  %v7014_v56 = vpop.f32.mrf.mxu1  ;;  %v17290_v13 = vadd.f32 %v6856_v34, %v17233_v35  ;;  %v7823_v35 = vsel %vm5598_vm6, %v7814_v33, %v17280_v41  ;;  %v7564_v10 = vpack.c.b16 %v7563_v7, %v7563_v7  ;;  %v13593_v34 = vld [vmem:[%s18199_s3 + $0x228] sm:$0xff] }
 0x42b   : > { %v7054_v23 = vadd.f32 %v7014_v56, %v17062_v24  ;;  %v7600_v24 = vsel %vm5598_vm6, %v17239_v3, %v17278_v57  ;;  %v13610_v56 = vld [vmem:[%s18199_s3 + $0x68] sm:$0xff]  ;;  %8964 = vmatpush.bf16.msra.mxu2 %v13593_v34 }
 0x42c   : > { %v17304_v16 = vadd.f32 %v6703_v37, %v6455_v14  ;;  %7704 = vmatmul.bf16.gmra.mxu0 %v7600_v24  ;;  %v7602_v3 = vshrl.u32 %v7564_v10, 16  ;;  %v7605_v50 = vshll.u32 %v7564_v10, 16  ;;  %9207 = vmatpush.bf16.msra.mxu3 %v13610_v56 }
 0x42d   : > { %v7074_v22 = vmul.f32 %v17285_v43, %v7054_v23  ;;  %7951 = vmatmul.bf16.vlgmr.msra.gmra.mxu1 %v7823_v35  ;;  %v17339_v35 = vor.u32 %v7830_v20, %v7827_v59 }
 0x42e   : > { %8096 = vmatmul.bf16.vlgmr.msrb.gmra.mxu2 %v13899_v18  ;;  %v7604_v33 = vrot.slane %v7602_v3, 3  ;;  %v7607_v23 = vrot.slane %v7605_v50, 4  ;;  %v8241_v18 = vshrl.u32 %v17259_v9, 16  ;;  %v13585_v9 = vld [vmem:[%s18199_s3 + $0x1e8] sm:$0xff] }
 0x42f   : > { %8361 = vmatmul.bf16.vlgmr.msrb.gmra.mxu3 %v8240_v28  ;;  %v7094_v51 = vadd.f32 %v17296_v17, %v7074_v22  ;;  %8778 = vmatpush.bf16.msrb.mxu1 %v13585_v9 }
 0x430   : > { %v7608_v24 = vor.u32 %v7607_v23, %v7604_v33  ;;  %v17364_v23 = vld [vmem:[#allocation2 + $0x68] sm:$0xff] }
 0x431   : > { %v7110_v27 = vmax.f32 %v7094_v51, 0.0  ;;  %v7317_v63 = vpop.f32.mrf.mxu2  ;;  %v6858_v46 = vpop.f32.mrf.mxu0 }
 0x432   : > { %v7505_v36 = vpop.f32.mrf.mxu3  ;;  %v7016_v37 = vpop.f32.mrf.mxu1  ;;  %v17327_v40 = vadd.f32 %v6858_v46, %v17251_v5  ;;  %v8245_v5 = vshll.u32 %v17321_v0, 16  ;;  %v14042_v46 = vld [vmem:[#allocation2 + $0x64] sm:$0xff]  }
 0x433   : > { %v17323_v7 = vadd.f32 %v7505_v36, %v7317_v63  ;;  %7126 = vst [vmem:[%s17319_s28] sm:$0xff] %v7110_v27  ;;  %v7055_v14 = vadd.f32 %v7016_v37, %v17083_v15  ;;  %v8243_v27 = vor.u32 %v8241_v18, %v17287_v2  ;;  %v13604_v63 = vld [vmem:[%s18199_s3 + $0x38] sm:$0xff]  ;;  %v7609_v36 = vsel %vm5598_vm6, %v17278_v57, %v7608_v24 }
 0x434   : > { %v8247_v28 = vrot.slane %v8245_v5, 1  ;;  %v13900_v2 = vld [vmem:[#allocation2 + $0x58] sm:$0xff]   ;;  %9303 = vmatpush.bf16.msra.mxu0 %v13604_v63  ;;  %v7834_v57 = vshrl.u32 %v14042_v46, 16  ;;  %v7837_v34 = vshll.u32 %v14042_v46, 16  ;;  %v18277_v63 = vshll.u32 %v16451_v32, 16 }
 0x435   : > { %v7075_v29 = vmul.f32 %v17285_v43, %v7055_v14  ;;  %v8497_v5 = vshll.u32 %v13900_v2, 16 }
 0x436   : > { %v8248_v37 = vsel %vm450_vm0, %v8243_v27, %v8247_v28  ;;  %v7839_v18 = vrot.slane %v7837_v34, 4  ;;  %v8495_v27 = vshrl.u32 %v13900_v2, 16  ;;  %v8504_v9 = vrot.slane %v18277_v63, 1 }
 0x437   : > { %v7095_v15 = vadd.f32 %v17296_v17, %v7075_v29 }
 0x439   : > { %v7111_v10 = vmax.f32 %v7095_v15, 0.0  ;;  %v7319_v44 = vpop.f32.mrf.mxu2  ;;  %v6861_v3 = vpop.f32.mrf.mxu0 }
 0x43a   : > { %v7507_v22 = vpop.f32.mrf.mxu3  ;;  %v7019_v50 = vpop.f32.mrf.mxu1  ;;  %v17346_v49 = vadd.f32 %v6861_v3, %v17271_v54  ;;  %v7832_v54 = vsel %vm5598_vm6, %v17280_v41, %v17339_v35 }
 0x43b   : > { %v17342_v51 = vadd.f32 %v7507_v22, %v7319_v44  ;;  %7127 = vst [vmem:[%s17319_s28 + $0x8] sm:$0xff] %v7111_v10  ;;  %v7056_v48 = vadd.f32 %v7019_v50, %v17102_v45  ;;  %v13592_v10 = vld [vmem:[%s18199_s3 + $0x220] sm:$0xff]  ;;  %v7836_v22 = vrot.slane %v7834_v57, 3  ;;  %v8253_v50 = vshll.u32 %v17364_v23, 16 }
 0x43c   : > { %7709 = vmatmul.bf16.gmra.mxu0 %v7609_v36  ;;  %v13609_v44 = vld [vmem:[%s18199_s3 + $0x60] sm:$0xff]  ;;  %8965 = vmatpush.bf16.msra.mxu2 %v13592_v10 }
 0x43d   : > { %v7076_v45 = vmul.f32 %v17285_v43, %v7056_v48  ;;  %7956 = vmatmul.bf16.gmra.mxu1 %v7832_v54  ;;  %9208 = vmatpush.bf16.msra.mxu3 %v13609_v44  ;;  %v17382_v48 = vor.u32 %v7839_v18, %v7836_v22 }
 0x43e   : > { %8101 = vmatmul.bf16.gmra.mxu2 %v13900_v2 }
 0x43f   : > { %8366 = vmatmul.bf16.gmra.mxu3 %v8248_v37  ;;  %v7096_v14 = vadd.f32 %v17296_v17, %v7076_v45  ;;  %v8249_v45 = vshrl.u32 %v17321_v0, 16  ;;  %v8255_v37 = vrot.slane %v8253_v50, 1  ;;  %v13584_v0 = vld [vmem:[%s18199_s3 + $0x1e0] sm:$0xff]  ;;  %v17407_v50 = vld [vmem:[#allocation2 + $0x70] sm:$0xff] }
 0x440   : > { %8779 = vmatpush.bf16.msrb.mxu1 %v13584_v0 }
 0x441   : > { %v7112_v56 = vmax.f32 %v7096_v14, 0.0  ;;  %v7322_v33 = vpop.f32.mrf.mxu2  ;;  %v6863_v20 = vpop.f32.mrf.mxu0  ;;  %v8251_v2 = vor.u32 %v8249_v45, %v8247_v28 }
 0x442   : > { %v7510_v41 = vpop.f32.mrf.mxu3  ;;  %v7021_v29 = vpop.f32.mrf.mxu1  ;;  %v17370_v15 = vadd.f32 %v6863_v20, %v17304_v16  ;;  %v8499_v16 = vrot.slane %v8497_v5, 1  ;;  %v13603_v20 = vld [vmem:[%s18199_s3 + $0x30] sm:$0xff] }
 0x443   : > { %v17366_v59 = vadd.f32 %v7510_v41, %v7322_v33  ;;  %7128 = vst [vmem:[%s17319_s28 + $0x10] sm:$0xff] %v7112_v56  ;;  %v7057_v24 = vadd.f32 %v7021_v29, %v17120_v30  ;;  %v7841_v29 = vsel %vm5598_vm6, %v17339_v35, %v17382_v48  ;;  %v8256_v28 = vsel %vm450_vm0, %v8251_v2, %v8255_v37 }
 0x444   : > { %v8500_v56 = vor.u32 %v8499_v16, %v8495_v27  ;;  %9304 = vmatpush.bf16.msra.mxu0 %v13603_v20 }
 0x445   : > { %v7077_v3 = vmul.f32 %v17285_v43, %v7057_v24  ;;  %v14044_v24 = vld [vmem:[#allocation2 + $0x6c] sm:$0xff]  }
 0x446   : > { %v8505_v5 = vsel %vm450_vm0, %v8500_v56, %v8504_v9  ;;  %v7843_v44 = vshrl.u32 %v14044_v24, 16  ;;  %v7846_v22 = vshll.u32 %v14044_v24, 16  ;;  %v8261_v56 = vshll.u32 %v17407_v50, 16 }
 0x447   : > { %v7097_v30 = vadd.f32 %v17296_v17, %v7077_v3 }
 0x448   : > { %v7845_v45 = vrot.slane %v7843_v44, 3  ;;  %v8263_v24 = vrot.slane %v8261_v56, 1 }
 0x449   : > { %v7113_v36 = vmax.f32 %v7097_v30, 0.0  ;;  %v7324_v54 = vpop.f32.mrf.mxu2  ;;  %v7675_v34 = vpop.f32.mrf.mxu0 }
 0x44a   : > { %v7512_v46 = vpop.f32.mrf.mxu3  ;;  %v7024_v57 = vpop.f32.mrf.mxu1  ;;  %v17392_v41 = vadd.f32 %v7675_v34, %v17323_v7  ;;  %v13901_v7 = vld [vmem:[#allocation2 + $0x60] sm:$0xff]  }
 0x44b   : > { %v17387_v14 = vadd.f32 %v7512_v46, %v7324_v54  ;;  %7129 = vst [vmem:[%s17319_s28 + $0x18] sm:$0xff] %v7113_v36  ;;  %v7058_v33 = vadd.f32 %v7024_v57, %v17138_v11  ;;  %v13591_v54 = vld [vmem:[%s18199_s3 + $0x218] sm:$0xff]  ;;  %v7848_v57 = vrot.slane %v7846_v22, 4 }
 0x44c   : > { %8626 = vmatmul.bf16.vlgmr.msrb.gmra.mxu0 %v8505_v5  ;;  %v13608_v46 = vld [vmem:[%s18199_s3 + $0x58] sm:$0xff]  ;;  %8966 = vmatpush.bf16.msra.mxu2 %v13591_v54  ;;  %v8257_v5 = vshrl.u32 %v17364_v23, 16 }
 0x44d   : > { %v7078_v11 = vmul.f32 %v17285_v43, %v7058_v33  ;;  %7961 = vmatmul.bf16.gmra.mxu1 %v7841_v29  ;;  %9209 = vmatpush.bf16.msra.mxu3 %v13608_v46  ;;  %v18278_v33 = vshll.u32 %v16525_v6, 16  ;;  %v13583_v23 = vld [vmem:[%s18199_s3 + $0x1d8] sm:$0xff] }
 0x44e   : > { %8106 = vmatmul.bf16.gmra.mxu2 %v13901_v7  ;;  %8780 = vmatpush.bf16.msrb.mxu1 %v13583_v23 }
 0x44f   : > { %8371 = vmatmul.bf16.gmra.mxu3 %v8256_v28  ;;  %v7098_v10 = vadd.f32 %v17296_v17, %v7078_v11  ;;  %v8512_v2 = vrot.slane %v18278_v33, 1 }
 0x451   : > { %v7114_v35 = vmax.f32 %v7098_v10, 0.0  ;;  %v7327_v18 = vpop.f32.mrf.mxu2  ;;  %v7677_v27 = vpop.f32.mrf.mxu0  ;;  %v18279_v10 = vshrl.u32 %v16451_v32, 16 }
 0x452   : > { %v7515_v3 = vpop.f32.mrf.mxu3  ;;  %v7026_v30 = vpop.f32.mrf.mxu1  ;;  %v17414_v36 = vadd.f32 %v7677_v27, %v17342_v51  ;;  %v17425_v51 = vor.u32 %v7848_v57, %v7845_v45  ;;  %v14046_v27 = vld [vmem:[#allocation2 + $0x74] sm:$0xff]  }
 0x453   : > { %v17409_v16 = vadd.f32 %v7515_v3, %v7327_v18  ;;  %7130 = vst [vmem:[%s17319_s28 + $0x20] sm:$0xff] %v7114_v35  ;;  %v7059_v63 = vadd.f32 %v7026_v30, %v17155_v53  ;;  %v8508_v44 = vor.u32 %v18279_v10, %v8504_v9  ;;  %v8259_v18 = vor.u32 %v8257_v5, %v8255_v37  ;;  %v13602_v3 = vld [vmem:[%s18199_s3 + $0x28] sm:$0xff]  ;;  %v13607_v5 = vld [vmem:[%s18199_s3 + $0x50] sm:$0xff] }
 0x454   : > { %v7850_v30 = vsel %vm5598_vm6, %v17382_v48, %v17425_v51  ;;  %9305 = vmatpush.bf16.msra.mxu0 %v13602_v3  ;;  %v7852_v54 = vshrl.u32 %v14046_v27, 16  ;;  %v7855_v46 = vshll.u32 %v14046_v27, 16  ;;  %9210 = vmatpush.bf16.msra.mxu3 %v13607_v5 }
 0x455   : > { %v7079_v34 = vmul.f32 %v17285_v43, %v7059_v63  ;;  %v8513_v9 = vsel %vm450_vm0, %v8508_v44, %v8512_v2  ;;  %v8264_v37 = vsel %vm450_vm0, %v8259_v18, %v8263_v24 }
 0x457   : > { %v7099_v53 = vadd.f32 %v17296_v17, %v7079_v34  ;;  %v17452_v34 = vld [vmem:[#allocation2 + $0x78] sm:$0xff] }
 0x458   : > { %v8269_v44 = vshll.u32 %v17452_v34, 16 }
 0x459   : > { %v7115_v20 = vmax.f32 %v7099_v53, 0.0  ;;  %v7329_v0 = vpop.f32.mrf.mxu2  ;;  %v7680_v28 = vpop.f32.mrf.mxu0 }
 0x45a   : > { %v7517_v29 = vpop.f32.mrf.mxu3  ;;  %v7029_v7 = vpop.f32.mrf.mxu1  ;;  %v17437_v35 = vadd.f32 %v7680_v28, %v17366_v59  ;;  %v13902_v59 = vld [vmem:[#allocation2 + $0x68] sm:$0xff]   ;;  %v7857_v28 = vrot.slane %v7855_v46, 4  ;;  %v8271_v27 = vrot.slane %v8269_v44, 1 }
 0x45b   : > { %v17430_v11 = vadd.f32 %v7517_v29, %v7329_v0  ;;  %7131 = vst [vmem:[%s17319_s28 + $0x28] sm:$0xff] %v7115_v20  ;;  %v7060_v22 = vadd.f32 %v7029_v7, %v17175_v38  ;;  %v13590_v29 = vld [vmem:[%s18199_s3 + $0x210] sm:$0xff]  ;;  %v7854_v7 = vrot.slane %v7852_v54, 3 }
 0x45c   : > { %8631 = vmatmul.bf16.gmra.mxu0 %v8513_v9  ;;  %8967 = vmatpush.bf16.msra.mxu2 %v13590_v29  ;;  %v8265_v9 = vshrl.u32 %v17407_v50, 16  ;;  %v13582_v50 = vld [vmem:[%s18199_s3 + $0x1d0] sm:$0xff] }
 0x45d   : > { %v7080_v38 = vmul.f32 %v17285_v43, %v7060_v22  ;;  %7966 = vmatmul.bf16.gmra.mxu1 %v7850_v30  ;;  %v18280_v22 = vshll.u32 %v16597_v39, 16 }
 0x45e   : > { %8111 = vmatmul.bf16.gmra.mxu2 %v13902_v59  ;;  %8781 = vmatpush.bf16.msrb.mxu1 %v13582_v50 }
 0x45f   : > { %8376 = vmatmul.bf16.gmra.mxu3 %v8264_v37  ;;  %v7100_v63 = vadd.f32 %v17296_v17, %v7080_v38  ;;  %v8520_v18 = vrot.slane %v18280_v22, 1 }
 0x461   : > { %v7116_v48 = vmax.f32 %v7100_v63, 0.0  ;;  %v7332_v45 = vpop.f32.mrf.mxu2  ;;  %v7682_v33 = vpop.f32.mrf.mxu0  ;;  %v18281_v63 = vshrl.u32 %v16525_v6, 16 }
 0x462   : > { %v7520_v57 = vpop.f32.mrf.mxu3  ;;  %v7031_v53 = vpop.f32.mrf.mxu1  ;;  %v17459_v0 = vadd.f32 %v7682_v33, %v17387_v14  ;;  %v17470_v14 = vor.u32 %v7857_v28, %v7854_v7  ;;  %v17497_v28 = vld [vmem:[#allocation2 + $0x80] sm:$0xff] }
 0x463   : > { %v17454_v56 = vadd.f32 %v7520_v57, %v7332_v45  ;;  %7132 = vst [vmem:[%s17319_s28 + $0x30] sm:$0xff] %v7116_v48  ;;  %v7061_v20 = vadd.f32 %v7031_v53, %v17194_v19  ;;  %v8516_v54 = vor.u32 %v18281_v63, %v8512_v2  ;;  %v8267_v45 = vor.u32 %v8265_v9, %v8263_v24  ;;  %v13601_v57 = vld [vmem:[%s18199_s3 + $0x20] sm:$0xff] }
 0x464   : > { %v7859_v6 = vsel %vm5598_vm6, %v17425_v51, %v17470_v14  ;;  %v14048_v53 = vld [vmem:[#allocation2 + $0x7c] sm:$0xff]   ;;  %9306 = vmatpush.bf16.msra.mxu0 %v13601_v57  ;;  %v8277_v63 = vshll.u32 %v17497_v28, 16 }
 0x465   : > { %v7081_v10 = vmul.f32 %v17285_v43, %v7061_v20  ;;  %v8521_v2 = vsel %vm450_vm0, %v8516_v54, %v8520_v18  ;;  %v8272_v24 = vsel %vm450_vm0, %v8267_v45, %v8271_v27  ;;  %v7861_v20 = vshrl.u32 %v14048_v53, 16 }
 0x466   : > { %v7864_v29 = vshll.u32 %v14048_v53, 16  ;;  %v18282_v54 = vshll.u32 %v16659_v12, 16 }
 0x467   : > { %v7101_v19 = vadd.f32 %v17296_v17, %v7081_v10  ;;  %v7863_v9 = vrot.slane %v7861_v20, 3 }
 0x469   : > { %v7117_v3 = vmax.f32 %v7101_v19, 0.0  ;;  %v7334_v23 = vpop.f32.mrf.mxu2  ;;  %v7685_v37 = vpop.f32.mrf.mxu0 }
 0x46a   : > { %v7522_v30 = vpop.f32.mrf.mxu3  ;;  %v7034_v59 = vpop.f32.mrf.mxu1  ;;  %v17482_v48 = vadd.f32 %v7685_v37, %v17409_v16  ;;  %v13903_v16 = vld [vmem:[#allocation2 + $0x70] sm:$0xff]  }
 0x46b   : > { %v17475_v38 = vadd.f32 %v7522_v30, %v7334_v23  ;;  %7133 = vst [vmem:[%s17319_s28 + $0x38] sm:$0xff] %v7117_v3  ;;  %v7062_v46 = vadd.f32 %v7034_v59, %v17215_v61  ;;  %v13589_v23 = vld [vmem:[%s18199_s3 + $0x208] sm:$0xff]  ;;  %v7866_v59 = vrot.slane %v7864_v29, 4 }
 0x46c   : > { %8636 = vmatmul.bf16.gmra.mxu0 %v8521_v2  ;;  %v13606_v30 = vld [vmem:[%s18199_s3 + $0x48] sm:$0xff]  ;;  %8968 = vmatpush.bf16.msra.mxu2 %v13589_v23  ;;  %v8279_v2 = vrot.slane %v8277_v63, 1 }
 0x46d   : > { %v7082_v61 = vmul.f32 %v17285_v43, %v7062_v46  ;;  %7971 = vmatmul.bf16.gmra.mxu1 %v7859_v6  ;;  %9211 = vmatpush.bf16.msra.mxu3 %v13606_v30  ;;  %v8528_v46 = vrot.slane %v18282_v54, 1  ;;  %v8273_v6 = vshrl.u32 %v17452_v34, 16  ;;  %v13581_v34 = vld [vmem:[%s18199_s3 + $0x1c8] sm:$0xff] }
 0x46e   : > { %8116 = vmatmul.bf16.gmra.mxu2 %v13903_v16  ;;  %8782 = vmatpush.bf16.msrb.mxu1 %v13581_v34 }
 0x46f   : > { %8381 = vmatmul.bf16.gmra.mxu3 %v8272_v24  ;;  %v7102_v33 = vadd.f32 %v17296_v17, %v7082_v61  ;;  %v18283_v24 = vshrl.u32 %v16597_v39, 16 }
 0x471   : > { %v7118_v51 = vmax.f32 %v7102_v33, 0.0  ;;  %v7337_v5 = vpop.f32.mrf.mxu2  ;;  %v7687_v19 = vpop.f32.mrf.mxu0  ;;  %v8524_v33 = vor.u32 %v18283_v24, %v8520_v18  ;;  %v17559_v24 = vld [vmem:[#allocation2 + $0x88] sm:$0xff]  }
 0x472   : > { %v7525_v7 = vpop.f32.mrf.mxu3  ;;  %v7036_v44 = vpop.f32.mrf.mxu1  ;;  %v17504_v3 = vadd.f32 %v7687_v19, %v17430_v11  ;;  %v17515_v11 = vor.u32 %v7866_v59, %v7863_v9  ;;  %v17542_v9 = vld [vmem:[#allocation2 + $0x88] sm:$0xff] }
 0x473   : > { %v17499_v10 = vadd.f32 %v7525_v7, %v7337_v5  ;;  %7134 = vst [vmem:[%s17319_s28 + $0x40] sm:$0xff] %v7118_v51  ;;  %v7063_v22 = vadd.f32 %v7036_v44, %v17225_v42  ;;  %v8275_v51 = vor.u32 %v8273_v6, %v8271_v27  ;;  %v13600_v5 = vld [vmem:[%s18199_s3 + $0x18] sm:$0xff]  ;;  %v8529_v18 = vsel %vm450_vm0, %v8524_v33, %v8528_v46  ;;  %v14049_v7 = vld [vmem:[#allocation2 + $0x84] sm:$0xff]  }
 0x474   : > { %v7868_v39 = vsel %vm5598_vm6, %v17470_v14, %v17515_v11  ;;  %9307 = vmatpush.bf16.msra.mxu0 %v13600_v5  ;;  %v7870_v19 = vshrl.u32 %v14049_v7, 16  ;;  %v18284_v33 = vshll.u32 %v16727_v60, 16 }
 0x475   : > { %v7083_v37 = vmul.f32 %v17285_v43, %v7063_v22  ;;  %v8280_v27 = vsel %vm450_vm0, %v8275_v51, %v8279_v2  ;;  %v7873_v22 = vshll.u32 %v14049_v7, 16  ;;  %v13841_v51 = vunpack.c.h.b16 %v17559_v24 }
 0x477   : > { %v7103_v42 = vadd.f32 %v17296_v17, %v7083_v37  ;;  %v7875_v6 = vrot.slane %v7873_v22, 4  ;;  %v8169_v22 = vld [vmem:[#allocation2 + $0x90] sm:$0x1] }
 0x479   : > { %v7119_v45 = vmax.f32 %v7103_v42, 0.0  ;;  %v7339_v57 = vpop.f32.mrf.mxu2  ;;  %v7690_v16 = vpop.f32.mrf.mxu0 }
 0x47a   : > { %v7527_v50 = vpop.f32.mrf.mxu3  ;;  %v7039_v61 = vpop.f32.mrf.mxu1  ;;  %v17527_v29 = vadd.f32 %v7690_v16, %v17454_v56  ;;  %v13904_v56 = vld [vmem:[#allocation2 + $0x78] sm:$0xff]   ;;  %v8285_v16 = vshll.u32 %v17542_v9, 16 }
 0x47b   : > { %v17520_v53 = vadd.f32 %v7527_v50, %v7339_v57  ;;  %7135 = vst [vmem:[%s17319_s28 + $0x48] sm:$0xff] %v7119_v45  ;;  %v7064_v20 = vadd.f32 %v7039_v61, %v17243_v4  ;;  %v13588_v45 = vld [vmem:[%s18199_s3 + $0x200] sm:$0xff]  ;;  %v7872_v50 = vrot.slane %v7870_v19, 3 }
 0x47c   : > { %8641 = vmatmul.bf16.gmra.mxu0 %v8529_v18  ;;  %v13605_v57 = vld [vmem:[%s18199_s3 + $0x40] sm:$0xff]  ;;  %8969 = vmatpush.bf16.msra.mxu2 %v13588_v45  ;;  %v8281_v18 = vshrl.u32 %v17497_v28, 16  ;;  %v17570_v7 = vrot.slane %v8285_v16, 1  ;;  %v13599_v28 = vld [vmem:[%s18199_s3 + $0x10] sm:$0xff]  ;;  %v17598_v45 = vld [vmem:[%s18199_s3 + $0x1f8] sm:$0xff] }
 0x47d   : > { %v7084_v4 = vmul.f32 %v17285_v43, %v7064_v20  ;;  %7976 = vmatmul.bf16.gmra.mxu1 %v7868_v39  ;;  %9212 = vmatpush.bf16.msra.mxu3 %v13605_v57  ;;  %v17566_v20 = vrot.slane %v18284_v33, 1 }
 0x47e   : > { %8121 = vmatmul.bf16.gmra.mxu2 %v13904_v56  ;;  %9308 = vmatpush.bf16.msra.mxu0 %v13599_v28 }
 0x47f   : > { %8386 = vmatmul.bf16.gmra.mxu3 %v8280_v27  ;;  %v7104_v44 = vadd.f32 %v17296_v17, %v7084_v4 }
 0x480   : > { %14004 = vmatpush.bf16.msrb.mxu2 %v17598_v45 }
 0x481   : > { %v7120_v14 = vmax.f32 %v7104_v44, 0.0  ;;  %v7342_v23 = vpop.f32.mrf.mxu2  ;;  %v7692_v63 = vpop.f32.mrf.mxu0  ;;  %v18285_v44 = vshrl.u32 %v16659_v12, 16 }
 0x482   : > { %v7530_v30 = vpop.f32.mrf.mxu3  ;;  %v7041_v37 = vpop.f32.mrf.mxu1  ;;  %v17549_v54 = vadd.f32 %v7692_v63, %v17475_v38  ;;  %v17562_v38 = vor.u32 %v7875_v6, %v7872_v50 }
 0x483   : > { %v17544_v59 = vadd.f32 %v7530_v30, %v7342_v23  ;;  %7136 = vst [vmem:[%s17319_s28 + $0x50] sm:$0xff] %v7120_v14  ;;  %v7065_v42 = vadd.f32 %v7041_v37, %v17263_v21  ;;  %v8532_v19 = vor.u32 %v18285_v44, %v8528_v46  ;;  %v8283_v30 = vor.u32 %v8281_v18, %v8279_v2  ;;  %v13580_v37 = vld [vmem:[%s18199_s3 + $0x1c0] sm:$0xff]  ;;  %v13619_v44 = vld [vmem:[%s18199_s3 + $0xb0] sm:$0xff] }
 0x484   : > { %v7877_v12 = vsel %vm5598_vm6, %v17515_v11, %v17562_v38  ;;  %v13905_v2 = vld [vmem:[#allocation2 + $0x80] sm:$0xff]   ;;  %v13620_v11 = vld [vmem:[%s18199_s3 + $0xb8] sm:$0xff]  ;;  %8783 = vmatpush.bf16.msrb.mxu1 %v13580_v37  ;;  %v18286_v37 = vshll.u32 %v16764_v31, 16 }
 0x485   : > { %v7085_v61 = vmul.f32 %v17285_v43, %v7065_v42  ;;  %v8537_v46 = vsel %vm450_vm0, %v8532_v19, %v17566_v20  ;;  %v8288_v63 = vsel %vm450_vm0, %v8283_v30, %v17570_v7  ;;  %v8219_v42 = vunpack.c.l.b16 %v8169_v22  ;;  %9413 = vmatpush.bf16.msrb.mxu3 %v13620_v11  ;;  %v13598_v19 = vld [vmem:[%s18199_s3 + $0x8] sm:$0xff]  ;;  %v17621_v22 = vld [vmem:[%s18199_s3 + $0x238] sm:$0xff] }
 0x486   : > { %9309 = vmatpush.bf16.msra.mxu0 %v13598_v19 }
 0x487   : > { %v7105_v21 = vadd.f32 %v17296_v17, %v7085_v61  ;;  %v8228_v33 = vpack.c.b16 %v8219_v42, %v8219_v42 }
 0x488   : > { %10103 = vmatpush.bf16.msra.mxu1 %v17621_v22 }
 0x489   : > { %v7121_v5 = vmax.f32 %v7105_v21, 0.0  ;;  %v7344_v34 = vpop.f32.mrf.mxu2  ;;  %v7695_v27 = vpop.f32.mrf.mxu0  ;;  %9414 = vmatpush.bf16.msrb.mxu3 %v13619_v44 }
 0x48a   : > { %v7532_v39 = vpop.f32.mrf.mxu3  ;;  %v7044_v56 = vpop.f32.mrf.mxu1  ;;  %v17579_v23 = vadd.f32 %v7695_v27, %v17499_v10 }
 0x48b   : > { %v17572_v4 = vadd.f32 %v7532_v39, %v7344_v34  ;;  %7137 = vst [vmem:[%s17319_s28 + $0x58] sm:$0xff] %v7121_v5  ;;  %v7066_v14 = vadd.f32 %v7044_v56, %v17290_v13  ;;  %v7806_v13 = vpack.c.b16 %v13841_v51, %v13841_v51 }
 0x48c   : > { %8646 = vmatmul.bf16.gmra.mxu0 %v8537_v46 }
 0x48d   : > { %v7086_v10 = vmul.f32 %v17285_v43, %v7066_v14  ;;  %7981 = vmatmul.bf16.gmra.mxu1 %v7877_v12  ;;  %v7879_v50 = vshrl.u32 %v7806_v13, 16  ;;  %v7882_v6 = vshll.u32 %v7806_v13, 16  ;;  %v8293_v14 = vshll.u32 %v8228_v33, 16  ;;  %v13908_v33 = vld [vmem:[#allocation2 + $0x58] sm:$0xf0] }
 0x48e   : > { %8126 = vmatmul.bf16.gmra.mxu2 %v13905_v2  ;;  %v17631_v12 = vrot.slane %v18286_v37, 1  ;;  %v8289_v2 = vshrl.u32 %v17542_v9, 16  ;;  %v13909_v9 = vld [vmem:[#allocation2 + $0x58] sm:$0xe] }
 0x48f   : > { %8391 = vmatmul.bf16.gmra.mxu3 %v8288_v63  ;;  %v7106_v57 = vadd.f32 %v17296_v17, %v7086_v10  ;;  %v7881_v56 = vrot.slane %v7879_v50, 3  ;;  %v7884_v27 = vrot.slane %v7882_v6, 4  ;;  %v8295_v63 = vrot.slane %v8293_v14, 1 }
 0x490   : > { %v18287_v50 = vshrl.u32 %v16727_v60, 16  ;;  %v13617_v60 = vld [vmem:[%s18199_s3 + $0xa0] sm:$0xff] }
 0x491   : > { %v7122_v61 = vmax.f32 %v7106_v57, 0.0  ;;  %v7347_v16 = vpop.f32.mrf.mxu2  ;;  %v7697_v34 = vpop.f32.mrf.mxu0  ;;  %v7885_v28 = vor.u32 %v7884_v27, %v7881_v56  ;;  %v17664_v56 = vld [vmem:[#allocation2 + $0x88] sm:$0xf] }
 0x492   : > { %v7535_v21 = vpop.f32.mrf.mxu3  ;;  %v7046_v5 = vpop.f32.mrf.mxu1  ;;  %v17610_v18 = vadd.f32 %v7697_v34, %v17520_v53  ;;  %v13618_v53 = vld [vmem:[%s18199_s3 + $0xa8] sm:$0xff]  ;;  %v8540_v6 = vor.u32 %v18287_v50, %v17566_v20 }
 0x493   : > { %v17605_v51 = vadd.f32 %v7535_v21, %v7347_v16  ;;  %7138 = vst [vmem:[%s17319_s28 + $0x60] sm:$0xff] %v7122_v61  ;;  %v7067_v39 = vadd.f32 %v7046_v5, %v17327_v40  ;;  %9415 = vmatpush.bf16.msrb.mxu3 %v13618_v53  ;;  %v8291_v21 = vor.u32 %v8289_v2, %v17570_v7  ;;  %v13597_v2 = vld [vmem:[%s18199_s3] sm:$0xff] }
 0x494   : > { %v7886_v5 = vsel %vm5598_vm6, %v17562_v38, %v7885_v28  ;;  %v8545_v34 = vsel %vm450_vm0, %v8540_v6, %v17631_v12  ;;  %v17658_v38 = vld [vmem:[%s18199_s3 + $0x1f0] sm:$0xff]  ;;  %9310 = vmatpush.bf16.msra.mxu0 %v13597_v2 }
 0x495   : > { %v7087_v40 = vmul.f32 %v17285_v43, %v7067_v39  ;;  %v13616_v39 = vld [vmem:[%s18199_s3 + $0x98] sm:$0xff]  ;;  %14005 = vmatpush.bf16.msrb.mxu2 %v17658_v38 }
 0x497   : > { %v7107_v30 = vadd.f32 %v17296_v17, %v7087_v40  ;;  %9416 = vmatpush.bf16.msrb.mxu3 %v13617_v60 }
 0x499   : > { %v7123_v46 = vmax.f32 %v7107_v30, 0.0  ;;  %v7349_v13 = vpop.f32.mrf.mxu2  ;;  %v7700_v57 = vpop.f32.mrf.mxu0  ;;  %v9120_v30 = vld [vmem:[#allocation2 + $0x84] sm:$0x8] }
 0x49a   : > { %v7537_v10 = vpop.f32.mrf.mxu3  ;;  %v7049_v11 = vpop.f32.mrf.mxu1  ;;  %v17642_v16 = vadd.f32 %v7700_v57, %v17544_v59  ;;  %v13910_v59 = vor.u32 %v13909_v9, %v13908_v33 }
 0x49b   : > { %v17634_v42 = vadd.f32 %v7537_v10, %v7349_v13  ;;  %7139 = vst [vmem:[%s17319_s28 + $0x68] sm:$0xff] %v7123_v46  ;;  %v7068_v61 = vadd.f32 %v7049_v11, %v17346_v49  ;;  %v8296_v49 = vsel %vm450_vm0, %v8291_v21, %v8295_v63  ;;  %v9143_v13 = vunpack.c.l.b16 %v17664_v56  ;;  %9417 = vmatpush.bf16.msrb.mxu3 %v13616_v39  ;;  %v13615_v10 = vld [vmem:[%s18199_s3 + $0x90] sm:$0xff] }
 0x49c   : > { %8651 = vmatmul.bf16.gmra.mxu0 %v8545_v34  ;;  %v8862_v53 = vshrl.u32 %v13910_v59, 16  ;;  %v8865_v46 = vshll.u32 %v13910_v59, 16  ;;  %v17684_v63 = vld [vmem:[%s18199_s3 + $0x230] sm:$0xff]  ;;  %v9142_v11 = vunpack.c.l.b16 %v9120_v30  ;;  %v18288_v21 = vshll.u32 %v16837_v52, 16 }
 0x49d   : > { %v7088_v20 = vmul.f32 %v17285_v43, %v7068_v61  ;;  %7986 = vmatmul.bf16.gmra.mxu1 %v7886_v5  ;;  %v18290_v30 = vrot.slane %v16451_v32, 1  ;;  %v17727_v32 = vld [vmem:[%s18199_s3 + $0x1e8] sm:$0xff] }
 0x49e   : > { %8131 = vmatmul.bf16.gmra.mxu2 %v17559_v24  ;;  %10104 = vmatpush.bf16.msra.mxu1 %v17684_v63  ;;  %v8864_v50 = vrot.slane %v8862_v53, 1  ;;  %v8867_v6 = vrot.slane %v8865_v46, 2  ;;  %v17693_v61 = vpack.c.b16 %v9143_v13, %v9142_v11  ;;  %v8552_v33 = vrot.slane %v18288_v21, 1 }
 0x49f   : > { %8396 = vmatmul.bf16.gmra.mxu3 %v8296_v49  ;;  %v7108_v7 = vadd.f32 %v17296_v17, %v7088_v20  ;;  %14006 = vmatpush.bf16.msrb.mxu2 %v17727_v32  ;;  %v8558_v21 = vshll.u32 %v16884_v62, 16  ;;  %v13626_v62 = vld [vmem:[%s18199_s3 + $0xe8] sm:$0xff] }
 0x4a0   : > { %9418 = vmatpush.bf16.msrb.mxu3 %v13615_v10 }
 0x4a1   : > { %v7124_v24 = vmax.f32 %v7108_v7, 0.0  ;;  %v7352_v27 = vpop.f32.mrf.mxu2  ;;  %v7702_v14 = vpop.f32.mrf.mxu0  ;;  %v18289_v7 = vshrl.u32 %v16764_v31, 16  ;;  %v13613_v31 = vld [vmem:[%s18199_s3 + $0x80] sm:$0xff] }
 0x4a2   : > { %v7540_v44 = vpop.f32.mrf.mxu3  ;;  %v7051_v40 = vpop.f32.mrf.mxu1  ;;  %v17672_v37 = vadd.f32 %v7702_v14, %v17572_v4  ;;  %v17687_v4 = vld [vmem:[#allocation2 + $0x8c] sm:$0xff]  ;;  %v9150_v14 = vrot.slane %v17693_v61, 3 }
 0x4a3   : > { %v17667_v19 = vadd.f32 %v7540_v44, %v7352_v27  ;;  %7140 = vst [vmem:[%s17319_s28 + $0x70] sm:$0xff] %v7124_v24  ;;  %v7069_v28 = vadd.f32 %v7051_v40, %v17370_v15  ;;  %v8548_v39 = vor.u32 %v18289_v7, %v17631_v12  ;;  %v8703_v24 = vrot.slane %v13910_v59, 1  ;;  %v9103_v12 = vld [vmem:[#allocation2 + $0x94] sm:$0x7]  ;;  %v13628_v59 = vld [vmem:[%s18199_s3 + $0xf8] sm:$0xff] }
 0x4a4   : > { %v8868_v40 = vor.u32 %v8867_v6, %v8864_v50  ;;  %9546 = vmatpush.bf16.msrb.mxu0 %v13628_v59  ;;  %v9146_v2 = vunpack.c.l.b16 %v9103_v12  ;;  %v13625_v59 = vld [vmem:[%s18199_s3 + $0xe0] sm:$0xff]  ;;  %v9239_v56 = vshll.u32 %v17687_v4, 16 }
 0x4a5   : > { %v7089_v15 = vmul.f32 %v17285_v43, %v7069_v28  ;;  %v13614_v43 = vld [vmem:[%s18199_s3 + $0x88] sm:$0xff]  ;;  %v8553_v53 = vsel %vm450_vm0, %v8548_v39, %v8552_v33  ;;  %v8705_v28 = vsel %vm750_vm1, %v8703_v24, %v18290_v30  ;;  %v9099_v24 = vld [vmem:[#allocation2 + $0x84] sm:$0xc] }
 0x4a6   : > { %9419 = vmatpush.bf16.msrb.mxu3 %v13614_v43  ;;  %v9225_v12 = vunpack.c.l.b16 %v9099_v24 }
 0x4a7   : > { %v7109_v57 = vadd.f32 %v17296_v17, %v7089_v15  ;;  %v9151_v17 = vrot.slane %v17687_v4, 3 }
 0x4a9   : > { %v7125_v9 = vmax.f32 %v7109_v57, 0.0  ;;  %v7354_v5 = vpop.f32.mrf.mxu2  ;;  %v7705_v20 = vpop.f32.mrf.mxu0 }
 0x4aa   : > { %v7542_v34 = vpop.f32.mrf.mxu3  ;;  %v7952_v49 = vpop.f32.mrf.mxu1  ;;  %v17708_v27 = vadd.f32 %v7705_v20, %v17605_v51  ;;  %v8872_v51 = vsel %vm1125_vm2, %v8868_v40, %v16498_v25  ;;  %v13636_v25 = vld [vmem:[%s18199_s3 + $0x138] sm:$0xff]  ;;  %9420 = vmatpush.bf16.msrb.mxu3 %v13613_v31  ;;  %v8560_v20 = vrot.slane %v8558_v21, 1  ;;  %v9343_v21 = vshrl.u32 %v17693_v61, 16 }
 0x4ab   : > { %v17701_v60 = vadd.f32 %v7542_v34, %v7354_v5  ;;  %7141 = vst [vmem:[%s17319_s28 + $0x78] sm:$0xff] %v7125_v9  ;;  %v7992_v44 = vadd.f32 %v7952_v49, %v17392_v41  ;;  %v9152_v41 = vsel %vm1946_vm5, %v9150_v14, %v9151_v17  ;;  %v13627_v9 = vld [vmem:[%s18199_s3 + $0xf0] sm:$0xff]  ;;  %v17752_v34 = vld [vmem:[%s18199_s3 + $0x228] sm:$0xff] }
 0x4ac   : > { %8656 = vmatmul.bf16.gmra.mxu0 %v8553_v53  ;;  %v13635_v5 = vld [vmem:[%s18199_s3 + $0x130] sm:$0xff]  ;;  %10105 = vmatpush.bf16.msra.mxu1 %v17752_v34  ;;  %v18291_v53 = vshrl.u32 %v16837_v52, 16  ;;  %v13633_v52 = vld [vmem:[%s18199_s3 + $0x120] sm:$0xff]  ;;  %v9345_v24 = vrot.slane %v9343_v21, 3 }
 0x4ad   : > { %8784 = vmatmul.bf16.vlgmr.msrb.gmra.mxu1 %v8705_v28  ;;  %9547 = vmatpush.bf16.msrb.mxu0 %v13627_v9  ;;  %v9346_v9 = vshll.u32 %v17693_v61, 16 }
 0x4ae   : > { %8970 = vmatmul.bf16.vlgmr.msra.gmra.mxu2 %v8872_v51  ;;  %v8556_v30 = vor.u32 %v18291_v53, %v8552_v33  ;;  %v17789_v33 = vld [vmem:[%s18199_s3 + $0x1e0] sm:$0xff] }
 0x4af   : > { %9213 = vmatmul.bf16.vlgmr.msra.gmra.mxu3 %v9152_v41  ;;  %14007 = vmatpush.bf16.msrb.mxu2 %v17789_v33 }
 0x4b0   : > { %9637 = vmatpush.bf16.msra.mxu3 %v13636_v25  ;;  %v8561_v41 = vsel %vm450_vm0, %v8556_v30, %v8560_v20  ;;  %v9351_v20 = vrot.slane %v9239_v56, 4 }
 0x4b1   : > { %v8097_v46 = vpop.f32.mrf.mxu2  ;;  %v7707_v11 = vpop.f32.mrf.mxu0  ;;  %9548 = vmatpush.bf16.msrb.mxu0 %v13626_v62  ;;  %v9241_v62 = vrot.slane %v9239_v56, 3 }
 0x4b2   : > { %v8362_v10 = vpop.f32.mrf.mxu3  ;;  %v8137_v15 = vadd.f32 %v8097_v46, %v7992_v44  ;;  %v7954_v57 = vpop.f32.mrf.mxu1  ;;  %v17737_v50 = vadd.f32 %v7707_v11, %v17634_v42  ;;  %v17754_v42 = vpack.c.b16 %v9146_v2, %v9146_v2 }
 0x4b3   : > { %v7993_v6 = vadd.f32 %v7954_v57, %v17414_v36  ;;  %v13634_v36 = vld [vmem:[%s18199_s3 + $0x128] sm:$0xff] }
 0x4b4   : > { %v17740_v43 = vadd.f32 %v8362_v10, %v8137_v15  ;;  %9638 = vmatpush.bf16.msra.mxu3 %v13635_v5  ;;  %v9153_v39 = vrot.slane %v17754_v42, 3 }
 0x4b5   : > { %9549 = vmatpush.bf16.msrb.mxu0 %v13625_v59 }
 0x4b8   : > { %9639 = vmatpush.bf16.msra.mxu3 %v13634_v36  ;;  %v13623_v36 = vld [vmem:[%s18199_s3 + $0xd0] sm:$0xff] }
 0x4b9   : > { %v8099_v49 = vpop.f32.mrf.mxu2  ;;  %v7710_v40 = vpop.f32.mrf.mxu0 }
 0x4ba   : > { %v8364_v7 = vpop.f32.mrf.mxu3  ;;  %v8138_v44 = vadd.f32 %v8099_v49, %v7993_v6  ;;  %v7957_v14 = vpop.f32.mrf.mxu1  ;;  %v17767_v28 = vadd.f32 %v7710_v40, %v17667_v19  ;;  %v9226_v19 = vpack.c.b16 %v9143_v13, %v9225_v12  ;;  %v13622_v40 = vld [vmem:[%s18199_s3 + $0xc8] sm:$0xff] }
 0x4bb   : > { %v7994_v31 = vadd.f32 %v7957_v14, %v17437_v35  ;;  %v9154_v35 = vsel %vm1946_vm5, %v9151_v17, %v9153_v39  ;;  %v13632_v17 = vld [vmem:[%s18199_s3 + $0x118] sm:$0xff]  ;;  %v9322_v39 = vld [vmem:[#allocation2 + $0x94] sm:$0xf]  ;;  %v13630_v14 = vld [vmem:[%s18199_s3 + $0x108] sm:$0xff] }
 0x4bc   : > { %v17770_v51 = vadd.f32 %v8364_v7, %v8138_v44  ;;  %8661 = vmatmul.bf16.gmra.mxu0 %v8561_v41  ;;  %9640 = vmatpush.bf16.msra.mxu3 %v13633_v52  ;;  %v9228_v15 = vshrl.u32 %v9226_v19, 16  ;;  %v9231_v11 = vshll.u32 %v9226_v19, 16  ;;  %v9348_v44 = vrot.slane %v9346_v9, 4 }
 0x4bd   : > { %8789 = vmatmul.bf16.gmra.mxu1 %v16562_v8  ;;  %v13624_v8 = vld [vmem:[%s18199_s3 + $0xd8] sm:$0xff]  ;;  %v9340_v12 = vunpack.c.l.b16 %v9322_v39  ;;  %v13654_v39 = vld [vmem:[%s18199_s3 + $0x1b0] sm:$0xff] }
 0x4be   : > { %8975 = vmatmul.bf16.gmra.mxu2 %v16584_v1  ;;  %v9236_v1 = vshrl.u32 %v17687_v4, 16  ;;  %9550 = vmatpush.bf16.msrb.mxu0 %v13624_v8  ;;  %v9230_v49 = vrot.slane %v9228_v15, 2  ;;  %v9233_v7 = vrot.slane %v9231_v11, 3  ;;  %v9245_v15 = vshrl.u32 %v17754_v42, 16 }
 0x4bf   : > { %9218 = vmatmul.bf16.gmra.mxu3 %v9154_v35 }
 0x4c0   : > { %9641 = vmatpush.bf16.msra.mxu3 %v13632_v17  ;;  %v9238_v5 = vrot.slane %v9236_v1, 2  ;;  %v9350_v61 = vrot.slane %v9236_v1, 3  ;;  %v9234_v19 = vor.u32 %v9233_v7, %v9230_v49  ;;  %v9349_v1 = vor.u32 %v9348_v44, %v9345_v24  ;;  %v13645_v7 = vld [vmem:[%s18199_s3 + $0x170] sm:$0xff]  ;;  %v17877_v24 = vld [vmem:[%s18199_s3 + $0x218] sm:$0xff]  ;;  %v13644_v44 = vld [vmem:[%s18199_s3 + $0x168] sm:$0xff] }
 0x4c1   : > { %v8102_v13 = vpop.f32.mrf.mxu2  ;;  %v7712_v10 = vpop.f32.mrf.mxu0  ;;  %v9247_v49 = vrot.slane %v9245_v15, 2 }
 0x4c2   : > { %v8367_v25 = vpop.f32.mrf.mxu3  ;;  %v8139_v46 = vadd.f32 %v8102_v13, %v7994_v31  ;;  %v7959_v2 = vpop.f32.mrf.mxu1  ;;  %v17801_v57 = vadd.f32 %v7712_v10, %v17701_v60  ;;  %v13631_v60 = vld [vmem:[%s18199_s3 + $0x110] sm:$0xff]  ;;  %9551 = vmatpush.bf16.msrb.mxu0 %v13623_v36  ;;  %v17826_v53 = vor.u32 %v9241_v62, %v9238_v5  ;;  %v17828_v41 = vor.u32 %v9351_v20, %v9350_v61  ;;  %v17851_v10 = vld [vmem:[%s18199_s3 + $0x1d8] sm:$0xff] }
 0x4c3   : > { %v7995_v6 = vadd.f32 %v7959_v2, %v17459_v0  ;;  %v17817_v0 = vld [vmem:[%s18199_s3 + $0x220] sm:$0xff]  ;;  %v13646_v2 = vld [vmem:[%s18199_s3 + $0x178] sm:$0xff]  ;;  %14008 = vmatpush.bf16.msrb.mxu2 %v17851_v10 }
 0x4c4   : > { %v17806_v4 = vadd.f32 %v8367_v25, %v8139_v46  ;;  %10106 = vmatpush.bf16.msra.mxu1 %v17817_v0  ;;  %9642 = vmatpush.bf16.msra.mxu3 %v13631_v60  ;;  %v9243_v13 = vsel %vm1723_vm4, %v9234_v19, %v17826_v53  ;;  %v13621_v25 = vld [vmem:[%s18199_s3 + $0xc0] sm:$0xff] }
 0x4c5   : > { %v13629_v46 = vld [vmem:[%s18199_s3 + $0x100] sm:$0xff] }
 0x4c6   : > { %9552 = vmatpush.bf16.msrb.mxu0 %v13622_v40  ;;  %v13653_v40 = vld [vmem:[%s18199_s3 + $0x1a8] sm:$0xff] }
 0x4c8   : > { %9643 = vmatpush.bf16.msra.mxu3 %v13630_v14  ;;  %10107 = vmatpush.bf16.msra.mxu1 %v17877_v24 }
 0x4c9   : > { %v8104_v30 = vpop.f32.mrf.mxu2  ;;  %v8627_v35 = vpop.f32.mrf.mxu0 }
 0x4ca   : > { %v8369_v31 = vpop.f32.mrf.mxu3  ;;  %v8140_v59 = vadd.f32 %v8104_v30, %v7995_v6  ;;  %v7962_v52 = vpop.f32.mrf.mxu1  ;;  %v17832_v17 = vadd.f32 %v8627_v35, %v17740_v43  ;;  %v9341_v43 = vpack.c.b16 %v9340_v12, %v9340_v12  ;;  %9553 = vmatpush.bf16.msrb.mxu0 %v13621_v25 }
 0x4cb   : > { %v7996_v8 = vadd.f32 %v7962_v52, %v17482_v48  ;;  %v9353_v48 = vsel %vm5598_vm6, %v9349_v1, %v17828_v41  ;;  %v14051_v1 = vld [vmem:[#allocation2 + $0x8c] sm:$0xf0]  }
 0x4cc   : > { %v17834_v56 = vadd.f32 %v8369_v31, %v8140_v59  ;;  %9311 = vmatmul.bf16.vlgmr.msra.gmra.mxu0 %v9243_v13  ;;  %9644 = vmatpush.bf16.msra.mxu3 %v13629_v46  ;;  %v9355_v21 = vshrl.u32 %v9341_v43, 16  ;;  %v9358_v9 = vshll.u32 %v9341_v43, 16  ;;  %v14052_v46 = vld [vmem:[#allocation2 + $0x94] sm:$0xff]   ;;  %v13652_v43 = vld [vmem:[%s18199_s3 + $0x1a0] sm:$0xff] }
 0x4cd   : > { %8794 = vmatmul.bf16.gmra.mxu1 %v16633_v26  ;;  %v13655_v26 = vld [vmem:[%s18199_s3 + $0x1b8] sm:$0xff]  ;;  %v9482_v15 = vshll.u32 %v14052_v46, 16 }
 0x4ce   : > { %8980 = vmatmul.bf16.gmra.mxu2 %v16642_v55  ;;  %v9248_v55 = vshll.u32 %v17754_v42, 16  ;;  %9764 = vmatpush.bf16.msra.mxu0 %v13646_v2  ;;  %v17907_v2 = vld [vmem:[%s18199_s3 + $0x1d0] sm:$0xff] }
 0x4cf   : > { %9421 = vmatmul.bf16.vlgmr.msrb.gmra.mxu3 %v9353_v48  ;;  %v13643_v48 = vld [vmem:[%s18199_s3 + $0x160] sm:$0xff]  ;;  %14009 = vmatpush.bf16.msrb.mxu2 %v17907_v2 }
 0x4d0   : > { %9891 = vmatpush.bf16.msrb.mxu3 %v13655_v26  ;;  %v9250_v42 = vrot.slane %v9248_v55, 3  ;;  %v9479_v26 = vshrl.u32 %v14052_v46, 16 }
 0x4d1   : > { %v8107_v11 = vpop.f32.mrf.mxu2  ;;  %v8629_v36 = vpop.f32.mrf.mxu0 }
 0x4d2   : > { %v8372_v6 = vpop.f32.mrf.mxu3  ;;  %v8141_v5 = vadd.f32 %v8107_v11, %v7996_v8  ;;  %v7964_v62 = vpop.f32.mrf.mxu1  ;;  %v17864_v61 = vadd.f32 %v8629_v36, %v17770_v51  ;;  %v9360_v51 = vrot.slane %v9358_v9, 4  ;;  %9765 = vmatpush.bf16.msra.mxu0 %v13645_v7  ;;  %v9251_v14 = vor.u32 %v9250_v42, %v9247_v49  ;;  %v13641_v7 = vld [vmem:[%s18199_s3 + $0x150] sm:$0xff] }
 0x4d3   : > { %v7997_v60 = vadd.f32 %v7964_v62, %v17504_v3  ;;  %v9357_v3 = vrot.slane %v9355_v21, 3  ;;  %v9481_v49 = vrot.slane %v9479_v26, 3  ;;  %v9484_v42 = vrot.slane %v9482_v15, 4 }
 0x4d4   : > { %v17866_v20 = vadd.f32 %v8372_v6, %v8141_v5  ;;  %9892 = vmatpush.bf16.msrb.mxu3 %v13654_v39  ;;  %v9252_v25 = vsel %vm1723_vm4, %v17826_v53, %v9251_v14  ;;  %v13650_v39 = vld [vmem:[%s18199_s3 + $0x190] sm:$0xff] }
 0x4d5   : > { %v9361_v12 = vor.u32 %v9360_v51, %v9357_v3  ;;  %v9485_v14 = vor.u32 %v9484_v42, %v9481_v49 }
 0x4d6   : > { %9766 = vmatpush.bf16.msra.mxu0 %v13644_v44  ;;  %v13640_v44 = vld [vmem:[%s18199_s3 + $0x148] sm:$0xff] }
 0x4d8   : > { %9893 = vmatpush.bf16.msrb.mxu3 %v13653_v40  ;;  %v13649_v40 = vld [vmem:[%s18199_s3 + $0x188] sm:$0xff] }
 0x4d9   : > { %v8109_v30 = vpop.f32.mrf.mxu2  ;;  %v8632_v35 = vpop.f32.mrf.mxu0 }
 0x4da   : > { %v8374_v31 = vpop.f32.mrf.mxu3  ;;  %v8142_v59 = vadd.f32 %v8109_v30, %v7997_v60  ;;  %v7967_v52 = vpop.f32.mrf.mxu1  ;;  %v17888_v8 = vadd.f32 %v8632_v35, %v17806_v4  ;;  %v13997_v4 = vld [vmem:[#allocation2 + $0x8c] sm:$0x8]  ;;  %9767 = vmatpush.bf16.msra.mxu0 %v13643_v48 }
 0x4db   : > { %v7998_v19 = vadd.f32 %v7967_v52, %v17527_v29  ;;  %v9362_v29 = vsel %vm5598_vm6, %v17828_v41, %v9361_v12  ;;  %v13998_v53 = vor.u32 %v14051_v1, %v13997_v4  ;;  %v13651_v41 = vld [vmem:[%s18199_s3 + $0x198] sm:$0xff]  ;;  %v13648_v4 = vld [vmem:[%s18199_s3 + $0x180] sm:$0xff] }
 0x4dc   : > { %v17890_v13 = vadd.f32 %v8374_v31, %v8142_v59  ;;  %9316 = vmatmul.bf16.gmra.mxu0 %v9252_v25  ;;  %9894 = vmatpush.bf16.msrb.mxu3 %v13652_v43 }
 0x4dd   : > { %8799 = vmatmul.bf16.gmra.mxu1 %v16677_v58  ;;  %v13642_v58 = vld [vmem:[%s18199_s3 + $0x158] sm:$0xff]  ;;  %v9471_v9 = vshrl.u32 %v13998_v53, 16  ;;  %v9474_v5 = vshll.u32 %v13998_v53, 16 }
 0x4de   : > { %8985 = vmatmul.bf16.gmra.mxu2 %v16700_v47  ;;  %9768 = vmatpush.bf16.msra.mxu0 %v13642_v58  ;;  %v18292_v53 = vld [vmem:[#allocation4_spill] sm:$0xff]  ;;  %v17961_v58 = vld [vmem:[%s18199_s3 + $0x1c8] sm:$0xff] }
 0x4df   : > { %9426 = vmatmul.bf16.gmra.mxu3 %v9362_v29  ;;  %v9473_v3 = vrot.slane %v9471_v9, 3  ;;  %v9476_v51 = vrot.slane %v9474_v5, 4  ;;  %v13639_v29 = vld [vmem:[%s18199_s3 + $0x140] sm:$0xff]  ;;  %14010 = vmatpush.bf16.msrb.mxu2 %v17961_v58 }
 0x4e0   : > { %9895 = vmatpush.bf16.msrb.mxu3 %v13651_v41 }
 0x4e1   : > { %v8112_v47 = vpop.f32.mrf.mxu2  ;;  %v8634_v21 = vpop.f32.mrf.mxu0 }
 0x4e2   : > { %v8377_v55 = vpop.f32.mrf.mxu3  ;;  %v8143_v11 = vadd.f32 %v8112_v47, %v7998_v19  ;;  %v7969_v6 = vpop.f32.mrf.mxu1  ;;  %v17918_v36 = vadd.f32 %v8634_v21, %v17834_v56  ;;  %v17933_v56 = vld [vmem:[#allocation2 + $0x98] sm:$0xff]   ;;  %9769 = vmatpush.bf16.msra.mxu0 %v13641_v7  ;;  %v9477_v19 = vor.u32 %v9476_v51, %v9473_v3 }
 0x4e3   : > { %v7999_v62 = vadd.f32 %v7969_v6, %v17549_v54  ;;  %v17931_v54 = vld [vmem:[%s18199_s3 + $0x210] sm:$0xff]  ;;  %v13853_v30 = vunpack.c.h.b16 %v17933_v56 }
 0x4e4   : > { %v17920_v60 = vadd.f32 %v8377_v55, %v8143_v11  ;;  %10108 = vmatpush.bf16.msra.mxu1 %v17931_v54  ;;  %9896 = vmatpush.bf16.msrb.mxu3 %v13650_v39  ;;  %v9486_v48 = vsel %vm5598_vm6, %v9477_v19, %v9485_v14 }
 0x4e5   : > { %v9469_v43 = vpack.c.b16 %v13853_v30, %v13853_v30  ;;  %v9824_v30 = vshll.u32 %v17933_v56, 16 }
 0x4e6   : > { %9770 = vmatpush.bf16.msra.mxu0 %v13640_v44  ;;  %v18294_v44 = vld [vmem:[#allocation6_spill] sm:$0xff] }
 0x4e7   : > { %v9488_v41 = vshrl.u32 %v9469_v43, 16  ;;  %v9491_v26 = vshll.u32 %v9469_v43, 16 }
 0x4e8   : > { %9897 = vmatpush.bf16.msrb.mxu3 %v13649_v40 }
 0x4e9   : > { %v8114_v31 = vpop.f32.mrf.mxu2  ;;  %v8637_v35 = vpop.f32.mrf.mxu0  ;;  %v9493_v49 = vrot.slane %v9491_v26, 4 }
 0x4ea   : > { %v8379_v12 = vpop.f32.mrf.mxu3  ;;  %v8144_v59 = vadd.f32 %v8114_v31, %v7999_v62  ;;  %v7972_v52 = vpop.f32.mrf.mxu1  ;;  %v17945_v25 = vadd.f32 %v8637_v35, %v17866_v20  ;;  %v18293_v20 = vld [vmem:[#allocation5_spill] sm:$0xff]  ;;  %9771 = vmatpush.bf16.msra.mxu0 %v13639_v29  ;;  %v9490_v62 = vrot.slane %v9488_v41, 3 }
 0x4eb   : > { %v8000_v1 = vadd.f32 %v7972_v52, %v17579_v23  ;;  %v13911_v23 = vld [vmem:[#allocation2 + $0x90] sm:$0xff]  }
 0x4ec   : > { %v17947_v46 = vadd.f32 %v8379_v12, %v8144_v59  ;;  %9554 = vmatmul.bf16.vlgmr.msrb.gmra.mxu0 %v9486_v48  ;;  %9898 = vmatpush.bf16.msrb.mxu3 %v13648_v4  ;;  %v9826_v48 = vrot.slane %v9824_v30, 1 }
 0x4ed   : > { %8804 = vmatmul.bf16.gmra.mxu1 %v18292_v53  ;;  %v9791_v53 = vld [vmem:[#allocation2 + $0xa8] sm:$0x1] }
 0x4ee   : > { %8990 = vmatmul.bf16.gmra.mxu2 %v18293_v20  ;;  %9989 = vmatpush.bf16.msrb.mxu0 %v17598_v45  ;;  %v17976_v45 = vld [vmem:[%s18199_s3 + $0x208] sm:$0xff] }
 0x4ef   : > { %9645 = vmatmul.bf16.vlgmr.msra.gmra.mxu3 %v13911_v23  ;;  %10109 = vmatpush.bf16.msra.mxu1 %v17976_v45 }
 0x4f0   : > { %14012 = vmatpush.bf16.msra.mxu3 %v17621_v22  ;;  %v9494_v22 = vor.u32 %v9493_v49, %v9490_v62 }
 0x4f1   : > { %v8117_v15 = vpop.f32.mrf.mxu2  ;;  %v8639_v6 = vpop.f32.mrf.mxu0 }
 0x4f2   : > { %v8382_v47 = vpop.f32.mrf.mxu3  ;;  %v8145_v55 = vadd.f32 %v8117_v15, %v8000_v1  ;;  %v7974_v11 = vpop.f32.mrf.mxu1  ;;  %v17968_v9 = vadd.f32 %v8639_v6, %v17890_v13  ;;  %9990 = vmatpush.bf16.msrb.mxu0 %v17658_v38  ;;  %v13664_v1 = vld [vmem:[%s18199_s3 + $0x200] sm:$0xff] }
 0x4f3   : > { %v8001_v21 = vadd.f32 %v7974_v11, %v17610_v18  ;;  %10110 = vmatpush.bf16.msra.mxu1 %v13664_v1  ;;  %v9664_v15 = vld [vmem:[#allocation2 + $0xa0] sm:$0x1] }
 0x4f4   : > { %v17970_v5 = vadd.f32 %v8382_v47, %v8145_v55  ;;  %14013 = vmatpush.bf16.msra.mxu3 %v17684_v63  ;;  %v9495_v63 = vsel %vm5598_vm6, %v9485_v14, %v9494_v22  ;;  %v18000_v14 = vld [vmem:[#allocation2 + $0xa0] sm:$0xff]  ;;  %v9690_v49 = vunpack.c.l.b16 %v9664_v15  ;;  %v18296_v22 = vld [vmem:[#allocation8_spill] sm:$0xff] }
 0x4f5   : > { %v9829_v43 = vshll.u32 %v18000_v14, 16 }
 0x4f6   : > { %9991 = vmatpush.bf16.msrb.mxu0 %v17727_v32  ;;  %v18295_v32 = vld [vmem:[#allocation7_spill] sm:$0xff] }
 0x4f7   : > { %v9831_v41 = vrot.slane %v9829_v43, 1 }
 0x4f8   : > { %14014 = vmatpush.bf16.msra.mxu3 %v17752_v34  ;;  %v13637_v34 = vld [vmem:[#allocation2 + $0x90] sm:$0xff] }
 0x4f9   : > { %v8119_v18 = vpop.f32.mrf.mxu2  ;;  %v8642_v39 = vpop.f32.mrf.mxu0  ;;  %v9697_v52 = vshll.u32 %v13637_v34, 16 }
 0x4fa   : > { %v8384_v13 = vpop.f32.mrf.mxu3  ;;  %v8146_v42 = vadd.f32 %v8119_v18, %v8001_v21  ;;  %v7977_v7 = vpop.f32.mrf.mxu1  ;;  %v17984_v3 = vadd.f32 %v8642_v39, %v17920_v60  ;;  %9992 = vmatpush.bf16.msrb.mxu0 %v17789_v33  ;;  %v17997_v60 = vld [vmem:[#allocation2 + $0x98] sm:$0xff]  ;;  %v9817_v21 = vunpack.c.l.b16 %v9791_v53 }
 0x4fb   : > { %v8002_v38 = vadd.f32 %v7977_v7, %v17642_v16  ;;  %v13656_v16 = vld [vmem:[%s18199_s3 + $0x1c0] sm:$0xff]  ;;  %v9699_v29 = vrot.slane %v9697_v52, 1  ;;  %v9833_v52 = vshrl.u32 %v18000_v14, 16  ;;  %v13915_v53 = vld [vmem:[#allocation2 + $0x98] sm:$0xe] }
 0x4fc   : > { %v17986_v51 = vadd.f32 %v8384_v13, %v8146_v42  ;;  %9559 = vmatmul.bf16.gmra.mxu0 %v9495_v63  ;;  %14015 = vmatpush.bf16.msra.mxu3 %v17817_v0  ;;  %v18297_v42 = vld [vmem:[#allocation10_spill] sm:$0xff] }
 0x4fd   : > { %8809 = vmatmul.bf16.gmra.mxu1 %v18294_v44  ;;  %14011 = vmatpush.bf16.msrb.mxu2 %v13656_v16 }
 0x4fe   : > { %8995 = vmatmul.bf16.gmra.mxu2 %v18295_v32  ;;  %9993 = vmatpush.bf16.msrb.mxu0 %v17851_v10  ;;  %v9702_v10 = vshll.u32 %v17997_v60, 16 }
 0x4ff   : > { %9650 = vmatmul.bf16.gmra.mxu3 %v17933_v56 }
 0x500   : > { %14016 = vmatpush.bf16.msra.mxu3 %v17877_v24  ;;  %v9695_v24 = vshrl.u32 %v13637_v34, 16  ;;  %v9704_v4 = vrot.slane %v9702_v10, 1  ;;  %v9835_v10 = vor.u32 %v9833_v52, %v9831_v41 }
 0x501   : > { %v8122_v33 = vpop.f32.mrf.mxu2  ;;  %v8644_v59 = vpop.f32.mrf.mxu0 }
 0x502   : > { %v8387_v40 = vpop.f32.mrf.mxu3  ;;  %v8147_v31 = vadd.f32 %v8122_v33, %v8002_v38  ;;  %v7979_v12 = vpop.f32.mrf.mxu1  ;;  %v18005_v19 = vadd.f32 %v8644_v59, %v17947_v46  ;;  %9994 = vmatpush.bf16.msrb.mxu0 %v17907_v2  ;;  %v9822_v46 = vshrl.u32 %v17933_v56, 16  ;;  %v9700_v6 = vor.u32 %v9699_v29, %v9695_v24  ;;  %v13914_v24 = vld [vmem:[#allocation2 + $0x98] sm:$0xf0] }
 0x503   : > { %v8003_v35 = vadd.f32 %v7979_v12, %v17672_v37  ;;  %v8841_v37 = vld [vmem:[#allocation2 + $0x98] sm:$0x3] }
 0x504   : > { %v18008_v0 = vadd.f32 %v8387_v40, %v8147_v31  ;;  %14017 = vmatpush.bf16.msra.mxu3 %v17931_v54  ;;  %v9827_v20 = vor.u32 %v9826_v48, %v9822_v46  ;;  %v8859_v26 = vunpack.c.l.b16 %v8841_v37  ;;  %v9705_v62 = vsel %vm450_vm0, %v9700_v6, %v9704_v4  ;;  %v10012_v31 = vld [vmem:[#allocation2 + $0xa8] sm:$0x3]  ;;  %v18299_v6 = vld [vmem:[#allocation9_spill] sm:$0xff] }
 0x505   : > { %v10030_v48 = vunpack.c.l.b16 %v10012_v31 }
 0x506   : > { %9995 = vmatpush.bf16.msrb.mxu0 %v17961_v58  ;;  %v9832_v18 = vsel %vm450_vm0, %v9827_v20, %v9831_v41  ;;  %v8860_v13 = vpack.c.b16 %v8859_v26, %v8859_v26 }
 0x507   : > { %v10031_v41 = vpack.c.b16 %v10030_v48, %v10030_v48 }
 0x508   : > { %14018 = vmatpush.bf16.msra.mxu3 %v17976_v45  ;;  %v8898_v39 = vshrl.u32 %v8860_v13, 16  ;;  %v8901_v38 = vshll.u32 %v8860_v13, 16 }
 0x509   : > { %v8124_v2 = vpop.f32.mrf.mxu2  ;;  %v8647_v11 = vpop.f32.mrf.mxu0 }
 0x50a   : > { %v8389_v23 = vpop.f32.mrf.mxu3  ;;  %v8148_v47 = vadd.f32 %v8124_v2, %v8003_v35  ;;  %v7982_v55 = vpop.f32.mrf.mxu1  ;;  %v18023_v54 = vadd.f32 %v8647_v11, %v17970_v5  ;;  %9996 = vmatpush.bf16.msrb.mxu0 %v13656_v16  ;;  %v9693_v5 = vpack.c.b16 %v9690_v49, %v9690_v49  ;;  %v8900_v12 = vrot.slane %v8898_v39, 1  ;;  %v18298_v11 = vld [vmem:[#allocation11_spill] sm:$0xff] }
 0x50b   : > { %v8004_v56 = vadd.f32 %v7982_v55, %v17708_v27  ;;  %v18032_v27 = vpack.c.b16 %v9817_v21, %v9817_v21  ;;  %v8903_v59 = vrot.slane %v8901_v38, 2  ;;  %v9706_v35 = vshrl.u32 %v17997_v60, 16 }
 0x50c   : > { %v18026_v58 = vadd.f32 %v8389_v23, %v8148_v47  ;;  %9772 = vmatmul.bf16.vlgmr.msra.gmra.mxu0 %v9705_v62  ;;  %14019 = vmatpush.bf16.msra.mxu3 %v13664_v1  ;;  %v9710_v30 = vshll.u32 %v9693_v5, 16  ;;  %v13916_v55 = vor.u32 %v13915_v53, %v13914_v24  ;;  %v10045_v21 = vshrl.u32 %v10031_v41, 16  ;;  %v18073_v53 = vld [vmem:[%s18201_s5] ss:$0 sm:$0xff] }
 0x50d   : > { %8814 = vmatmul.bf16.gmra.mxu1 %v18296_v22  ;;  %v9837_v33 = vshll.u32 %v18032_v27, 16  ;;  %v9708_v29 = vor.u32 %v9706_v35, %v9704_v4 }
 0x50e   : > { %9000 = vmatmul.bf16.gmra.mxu2 %v18297_v42  ;;  %v9712_v37 = vrot.slane %v9710_v30, 1  ;;  %v10033_v62 = vshrl.u32 %v13916_v55, 16  ;;  %v10047_v39 = vrot.slane %v10045_v21, 1  ;;  %v9934_v31 = vrot.slane %v13916_v55, 1 }
 0x50f   : > { %9899 = vmatmul.bf16.vlgmr.msrb.gmra.mxu3 %v9832_v18  ;;  %v9839_v1 = vrot.slane %v9837_v33, 1  ;;  %v10040_v18 = vrot.slane %v9833_v52, 1  ;;  %v9937_v33 = vrot.slane %v18032_v27, 1 }
 0x510   : > { %v9713_v4 = vsel %vm450_vm0, %v9708_v29, %v9712_v37 }
 0x511   : > { %v8127_v45 = vpop.f32.mrf.mxu2  ;;  %v8649_v32 = vpop.f32.mrf.mxu0  ;;  %v9840_v60 = vsel %vm450_vm0, %v9835_v10, %v9839_v1 }
 0x512   : > { %v8392_v7 = vpop.f32.mrf.mxu3  ;;  %v8149_v63 = vadd.f32 %v8127_v45, %v8004_v56  ;;  %v7984_v44 = vpop.f32.mrf.mxu1  ;;  %v18036_v16 = vadd.f32 %v8649_v32, %v17986_v51  ;;  %v8904_v51 = vor.u32 %v8903_v59, %v8900_v12  ;;  %v9935_v12 = vrot.slane %v18000_v14, 1 }
 0x513   : > { %v8005_v34 = vadd.f32 %v7984_v44, %v17737_v50  ;;  %v10035_v44 = vrot.slane %v10033_v62, 1 }
 0x514   : > { %v8414_v40 = vadd.f32 %v8392_v7, %v8149_v63  ;;  %v8905_v56 = vsel %vm1125_vm2, %v18299_v6, %v8904_v51  ;;  %v9938_v29 = vsel %vm750_vm1, %v9935_v12, %v9937_v33  ;;  %v9936_v27 = vsel %vm750_vm1, %v9934_v31, %v9935_v12 }
 0x519   : > { %v8129_v50 = vpop.f32.mrf.mxu2  ;;  %v8652_v20 = vpop.f32.mrf.mxu0 }
 0x51a   : > { %v8394_v46 = vpop.f32.mrf.mxu3  ;;  %v8150_v2 = vadd.f32 %v8129_v50, %v8005_v34  ;;  %v7987_v23 = vpop.f32.mrf.mxu1  ;;  %v18043_v15 = vadd.f32 %v8652_v20, %v18008_v0  ;;  %v10036_v0 = vshll.u32 %v13916_v55, 16  ;;  %v10041_v34 = vrot.slane %v9829_v43, 2 }
 0x51b   : > { %v8006_v26 = vadd.f32 %v7987_v23, %v17767_v28  ;;  %v10048_v28 = vshll.u32 %v10031_v41, 16 }
 0x51c   : > { %v8415_v47 = vadd.f32 %v8394_v46, %v8150_v2  ;;  %9777 = vmatmul.bf16.gmra.mxu0 %v9713_v4  ;;  %v10038_v32 = vrot.slane %v10036_v0, 2  ;;  %v10042_v52 = vor.u32 %v10041_v34, %v10040_v18 }
 0x51d   : > { %8819 = vmatmul.bf16.gmra.mxu1 %v18298_v11  ;;  %v10050_v38 = vrot.slane %v10048_v28, 2 }
 0x51e   : > { %9005 = vmatmul.bf16.gmra.mxu2 %v8905_v56  ;;  %v10039_v59 = vor.u32 %v10038_v32, %v10035_v44 }
 0x51f   : > { %9904 = vmatmul.bf16.gmra.mxu3 %v9840_v60  ;;  %v10051_v30 = vor.u32 %v10050_v38, %v10047_v39 }
 0x520   : > { %v10043_v50 = vsel %vm1125_vm2, %v10039_v59, %v10042_v52 }
 0x521   : > { %v8132_v49 = vpop.f32.mrf.mxu2  ;;  %v8654_v5 = vpop.f32.mrf.mxu0  ;;  %v10052_v37 = vsel %vm1125_vm2, %v10042_v52, %v10051_v30 }
 0x522   : > { %v8397_v22 = vpop.f32.mrf.mxu3  ;;  %v8151_v13 = vadd.f32 %v8132_v49, %v8006_v26  ;;  %v7989_v42 = vpop.f32.mrf.mxu1  ;;  %v18052_v7 = vadd.f32 %v8654_v5, %v18026_v58 }
 0x523   : > { %v8007_v45 = vadd.f32 %v7989_v42, %v17801_v57 }
 0x524   : > { %v8416_v63 = vadd.f32 %v8397_v22, %v8151_v13 }
 0x529   : > { %v8134_v57 = vpop.f32.mrf.mxu2  ;;  %v8657_v10 = vpop.f32.mrf.mxu0 }
 0x52a   : > { %v8399_v35 = vpop.f32.mrf.mxu3  ;;  %v8152_v58 = vadd.f32 %v8134_v57, %v8007_v45  ;;  %v8785_v1 = vpop.f32.mrf.mxu1  ;;  %v18058_v48 = vadd.f32 %v8657_v10, %v8414_v40  ;;  %v18068_v40 = vld [vmem:[%s18200_s4] ss:$0 sm:$0xff] }
 0x52b   : > { %v8825_v14 = vadd.f32 %v8785_v1, %v17832_v17 }
 0x52c   : > { %v8417_v43 = vadd.f32 %v8399_v35, %v8152_v58  ;;  %9997 = vmatmul.bf16.vlgmr.msrb.gmra.mxu0 %v9936_v27 }
 0x52d   : > { %10111 = vmatmul.bf16.vlgmr.msra.gmra.mxu1 %v10043_v50 }
 0x52e   : > { %10002 = vmatmul.bf16.vlgmr.msrb.gmra.mxu2 %v9938_v29 }
 0x52f   : > { %10116 = vmatmul.bf16.vlgmr.msra.gmra.mxu3 %v10052_v37 }
 0x531   : > { %v8971_v46 = vpop.f32.mrf.mxu2  ;;  %v8659_v2 = vpop.f32.mrf.mxu0 }
 0x532   : > { %v9214_v51 = vpop.f32.mrf.mxu3  ;;  %v9011_v24 = vadd.f32 %v8971_v46, %v8825_v14  ;;  %v8787_v23 = vpop.f32.mrf.mxu1  ;;  %v18075_v20 = vadd.f32 %v8659_v2, %v8415_v47 }
 0x533   : > { %v8826_v41 = vadd.f32 %v8787_v23, %v17864_v61 }
 0x534   : > { %v9031_v26 = vmul.f32 %v18068_v40, %v9011_v24 }
 0x536   : > { %v9051_v17 = vadd.f32 %v18073_v53, %v9031_v26 }
 0x538   : > { %v9067_v60 = vmax.f32 %v9051_v17, 0.0 }
 0x539   : > { %v8973_v4 = vpop.f32.mrf.mxu2  ;;  %v8662_v6 = vpop.f32.mrf.mxu0 }
 0x53a   : > { %v9216_v55 = vpop.f32.mrf.mxu3  ;;  %9083 = vst [vmem:[%s17319_s28 + $0x80] sm:$0xff] %v9067_v60  ;;  %v9012_v11 = vadd.f32 %v8973_v4, %v8826_v41  ;;  %v8790_v56 = vpop.f32.mrf.mxu1  ;;  %v18081_v21 = vadd.f32 %v8662_v6, %v8416_v63 }
 0x53b   : > { %v8827_v0 = vadd.f32 %v8790_v56, %v17888_v8 }
 0x53c   : > { %v9032_v28 = vmul.f32 %v18068_v40, %v9012_v11 }
 0x53e   : > { %v9052_v47 = vadd.f32 %v18073_v53, %v9032_v28 }
 0x540   : > { %v9068_v62 = vmax.f32 %v9052_v47, 0.0 }
 0x541   : > { %v8976_v49 = vpop.f32.mrf.mxu2  ;;  %v8664_v18 = vpop.f32.mrf.mxu0 }
 0x542   : > { %v9219_v22 = vpop.f32.mrf.mxu3  ;;  %9084 = vst [vmem:[%s17319_s28 + $0x88] sm:$0xff] %v9068_v62  ;;  %v9013_v61 = vadd.f32 %v8976_v49, %v8827_v0  ;;  %v8792_v13 = vpop.f32.mrf.mxu1  ;;  %v18087_v42 = vadd.f32 %v8664_v18, %v8417_v43 }
 0x543   : > { %v8828_v38 = vadd.f32 %v8792_v13, %v17918_v36 }
 0x544   : > { %v9033_v5 = vmul.f32 %v18068_v40, %v9013_v61 }
 0x546   : > { %v9053_v45 = vadd.f32 %v18073_v53, %v9033_v5 }
 0x548   : > { %v9069_v39 = vmax.f32 %v9053_v45, 0.0 }
 0x549   : > { %v8978_v63 = vpop.f32.mrf.mxu2  ;;  %v9312_v34 = vpop.f32.mrf.mxu0 }
 0x54a   : > { %v9221_v44 = vpop.f32.mrf.mxu3  ;;  %9085 = vst [vmem:[%s17319_s28 + $0x90] sm:$0xff] %v9069_v39  ;;  %v9014_v8 = vadd.f32 %v8978_v63, %v8828_v38  ;;  %v8795_v32 = vpop.f32.mrf.mxu1  ;;  %v9313_v33 = vadd.f32 %v9312_v34, %v9214_v51 }
 0x54b   : > { %v8829_v59 = vadd.f32 %v8795_v32, %v17945_v25 }
 0x54c   : > { %v9034_v30 = vmul.f32 %v18068_v40, %v9014_v8 }
 0x54e   : > { %v9054_v31 = vadd.f32 %v18073_v53, %v9034_v30 }
 0x550   : > { %v9070_v12 = vmax.f32 %v9054_v31, 0.0 }
 0x551   : > { %v8981_v52 = vpop.f32.mrf.mxu2  ;;  %v9314_v10 = vpop.f32.mrf.mxu0 }
 0x552   : > { %v9422_v57 = vpop.f32.mrf.mxu3  ;;  %9086 = vst [vmem:[%s17319_s28 + $0x98] sm:$0xff] %v9070_v12  ;;  %v9015_v35 = vadd.f32 %v8981_v52, %v8829_v59  ;;  %v8797_v58 = vpop.f32.mrf.mxu1  ;;  %v9315_v1 = vadd.f32 %v9314_v10, %v9216_v55 }
 0x553   : > { %v18097_v36 = vadd.f32 %v9422_v57, %v9313_v33  ;;  %v8830_v27 = vadd.f32 %v8797_v58, %v17968_v9 }
 0x554   : > { %v9035_v29 = vmul.f32 %v18068_v40, %v9015_v35 }
 0x556   : > { %v9055_v37 = vadd.f32 %v18073_v53, %v9035_v29 }
 0x558   : > { %v9071_v43 = vmax.f32 %v9055_v37, 0.0 }
 0x559   : > { %v8983_v50 = vpop.f32.mrf.mxu2  ;;  %v9317_v24 = vpop.f32.mrf.mxu0 }
 0x55a   : > { %v9424_v14 = vpop.f32.mrf.mxu3  ;;  %9087 = vst [vmem:[%s17319_s28 + $0xa0] sm:$0xff] %v9071_v43  ;;  %v9016_v25 = vadd.f32 %v8983_v50, %v8830_v27  ;;  %v8800_v51 = vpop.f32.mrf.mxu1  ;;  %v9318_v2 = vadd.f32 %v9317_v24, %v9219_v22 }
 0x55b   : > { %v18103_v46 = vadd.f32 %v9424_v14, %v9315_v1  ;;  %v8831_v60 = vadd.f32 %v8800_v51, %v17984_v3 }
 0x55c   : > { %v9036_v23 = vmul.f32 %v18068_v40, %v9016_v25 }
 0x55e   : > { %v9056_v26 = vadd.f32 %v18073_v53, %v9036_v23 }
 0x560   : > { %v9072_v17 = vmax.f32 %v9056_v26, 0.0 }
 0x561   : > { %v8986_v41 = vpop.f32.mrf.mxu2  ;;  %v9319_v6 = vpop.f32.mrf.mxu0 }
 0x562   : > { %v9427_v4 = vpop.f32.mrf.mxu3  ;;  %9088 = vst [vmem:[%s17319_s28 + $0xa8] sm:$0xff] %v9072_v17  ;;  %v9017_v9 = vadd.f32 %v8986_v41, %v8831_v60  ;;  %v8802_v11 = vpop.f32.mrf.mxu1  ;;  %v9320_v56 = vadd.f32 %v9319_v6, %v9221_v44 }
 0x563   : > { %v18109_v55 = vadd.f32 %v9427_v4, %v9318_v2  ;;  %v8832_v0 = vadd.f32 %v8802_v11, %v18005_v19 }
 0x564   : > { %v9037_v28 = vmul.f32 %v18068_v40, %v9017_v9 }
 0x566   : > { %v9057_v47 = vadd.f32 %v18073_v53, %v9037_v28 }
 0x568   : > { %v9073_v62 = vmax.f32 %v9057_v47, 0.0 }
 0x569   : > { %v8988_v49 = vpop.f32.mrf.mxu2  ;;  %v18117_v13 = vpop.f32.mrf.mxu0 }
 0x56a   : > { %v9429_v22 = vpop.f32.mrf.mxu3  ;;  %9089 = vst [vmem:[%s17319_s28 + $0xb0] sm:$0xff] %v9073_v62  ;;  %v9018_v3 = vadd.f32 %v8988_v49, %v8832_v0  ;;  %v8805_v18 = vpop.f32.mrf.mxu1 }
 0x56b   : > { %v18115_v61 = vadd.f32 %v9429_v22, %v9320_v56  ;;  %v8833_v38 = vadd.f32 %v8805_v18, %v18023_v54 }
 0x56c   : > { %v9038_v5 = vmul.f32 %v18068_v40, %v9018_v3 }
 0x56e   : > { %v9058_v45 = vadd.f32 %v18073_v53, %v9038_v5 }
 0x570   : > { %v9074_v39 = vmax.f32 %v9058_v45, 0.0 }
 0x571   : > { %v8991_v63 = vpop.f32.mrf.mxu2  ;;  %v18125_v32 = vpop.f32.mrf.mxu0 }
 0x572   : > { %v18122_v44 = vpop.f32.mrf.mxu3  ;;  %9090 = vst [vmem:[%s17319_s28 + $0xb8] sm:$0xff] %v9074_v39  ;;  %v9019_v19 = vadd.f32 %v8991_v63, %v8833_v38  ;;  %v8807_v8 = vpop.f32.mrf.mxu1 }
 0x573   : > { %v8834_v31 = vadd.f32 %v8807_v8, %v18036_v16 }
 0x574   : > { %v9039_v34 = vmul.f32 %v18068_v40, %v9019_v19 }
 0x576   : > { %v9059_v33 = vadd.f32 %v18073_v53, %v9039_v34 }
 0x578   : > { %v9075_v30 = vmax.f32 %v9059_v33, 0.0  ;;  %v9565_v33 = vadd.f32 %v18117_v13, %v18097_v36  ;;  %v9566_v36 = vadd.f32 %v18125_v32, %v18103_v46 }
 0x579   : > { %v8993_v12 = vpop.f32.mrf.mxu2  ;;  %v9560_v57 = vpop.f32.mrf.mxu0 }
 0x57a   : > { %v18130_v59 = vpop.f32.mrf.mxu3  ;;  %9091 = vst [vmem:[%s17319_s28 + $0xc0] sm:$0xff] %v9075_v30  ;;  %v9020_v54 = vadd.f32 %v8993_v12, %v8834_v31  ;;  %v8810_v52 = vpop.f32.mrf.mxu1  ;;  %v9656_v31 = vadd.f32 %v18122_v44, %v9565_v33  ;;  %v14090_v44 = vld [vmem:[%s18200_s4] ss:$0 sm:$0xff] }
 0x57b   : > { %v8835_v1 = vadd.f32 %v8810_v52, %v18043_v15 }
 0x57c   : > { %v9040_v35 = vmul.f32 %v18068_v40, %v9020_v54 }
 0x57e   : > { %v9060_v58 = vadd.f32 %v18073_v53, %v9040_v35 }
 0x580   : > { %v9076_v10 = vmax.f32 %v9060_v58, 0.0 }
 0x581   : > { %v8996_v29 = vpop.f32.mrf.mxu2  ;;  %v18139_v27 = vpop.f32.mrf.mxu0 }
 0x582   : > { %v18136_v37 = vpop.f32.mrf.mxu3  ;;  %9092 = vst [vmem:[%s17319_s28 + $0xc8] sm:$0xff] %v9076_v10  ;;  %v9021_v16 = vadd.f32 %v8996_v29, %v8835_v1  ;;  %v8812_v43 = vpop.f32.mrf.mxu1  ;;  %v9567_v1 = vadd.f32 %v9560_v57, %v18109_v55  ;;  %v14091_v57 = vld [vmem:[%s18201_s5] ss:$0 sm:$0xff] }
 0x583   : > { %v8836_v51 = vadd.f32 %v8812_v43, %v18052_v7 }
 0x584   : > { %v9041_v50 = vmul.f32 %v18068_v40, %v9021_v16 }
 0x586   : > { %v9061_v14 = vadd.f32 %v18073_v53, %v9041_v50  ;;  %v9658_v50 = vadd.f32 %v18136_v37, %v9567_v1 }
 0x588   : > { %v9077_v25 = vmax.f32 %v9061_v14, 0.0  ;;  %v9657_v14 = vadd.f32 %v18130_v59, %v9566_v36 }
 0x589   : > { %v8998_v24 = vpop.f32.mrf.mxu2  ;;  %v9773_v26 = vpop.f32.mrf.mxu0 }
 0x58a   : > { %v18144_v2 = vpop.f32.mrf.mxu3  ;;  %9093 = vst [vmem:[%s17319_s28 + $0xd0] sm:$0xff] %v9077_v25  ;;  %v9022_v15 = vadd.f32 %v8998_v24, %v8836_v51  ;;  %v8815_v23 = vpop.f32.mrf.mxu1  ;;  %v9783_v54 = vadd.f32 %v9773_v26, %v9656_v31 }
 0x58b   : > { %v8837_v4 = vadd.f32 %v8815_v23, %v18058_v48 }
 0x58c   : > { %v9042_v17 = vmul.f32 %v18068_v40, %v9022_v15 }
 0x58e   : > { %v9062_v60 = vadd.f32 %v18073_v53, %v9042_v17 }
 0x590   : > { %v9078_v41 = vmax.f32 %v9062_v60, 0.0 }
 0x591   : > { %v9001_v9 = vpop.f32.mrf.mxu2  ;;  %v9775_v56 = vpop.f32.mrf.mxu0 }
 0x592   : > { %v9900_v11 = vpop.f32.mrf.mxu3  ;;  %9094 = vst [vmem:[%s17319_s28 + $0xd8] sm:$0xff] %v9078_v41  ;;  %v9023_v6 = vadd.f32 %v9001_v9, %v8837_v4  ;;  %v8817_v7 = vpop.f32.mrf.mxu1  ;;  %v9784_v32 = vadd.f32 %v9775_v56, %v9657_v14 }
 0x593   : > { %v8838_v0 = vadd.f32 %v8817_v7, %v18075_v20  ;;  %v9910_v35 = vadd.f32 %v9900_v11, %v9783_v54 }
 0x594   : > { %v9043_v28 = vmul.f32 %v18068_v40, %v9023_v6 }
 0x596   : > { %v9063_v47 = vadd.f32 %v18073_v53, %v9043_v28 }
 0x598   : > { %v9079_v62 = vmax.f32 %v9063_v47, 0.0 }
 0x599   : > { %v9003_v49 = vpop.f32.mrf.mxu2  ;;  %v9778_v48 = vpop.f32.mrf.mxu0 }
 0x59a   : > { %v9902_v22 = vpop.f32.mrf.mxu3  ;;  %9095 = vst [vmem:[%s17319_s28 + $0xe0] sm:$0xff] %v9079_v62  ;;  %v9024_v3 = vadd.f32 %v9003_v49, %v8838_v0  ;;  %v8820_v18 = vpop.f32.mrf.mxu1  ;;  %v9785_v25 = vadd.f32 %v9778_v48, %v9658_v50 }
 0x59b   : > { %v8839_v38 = vadd.f32 %v8820_v18, %v18081_v21  ;;  %v9911_v23 = vadd.f32 %v9902_v22, %v9784_v32 }
 0x59c   : > { %v9044_v5 = vmul.f32 %v18068_v40, %v9024_v3 }
 0x59e   : > { %v9064_v45 = vadd.f32 %v18073_v53, %v9044_v5 }
 0x5a0   : > { %v9080_v39 = vmax.f32 %v9064_v45, 0.0 }
 0x5a1   : > { %v9006_v63 = vpop.f32.mrf.mxu2  ;;  %v9780_v20 = vpop.f32.mrf.mxu0 }
 0x5a2   : > { %v9905_v19 = vpop.f32.mrf.mxu3  ;;  %9096 = vst [vmem:[%s17319_s28 + $0xe8] sm:$0xff] %v9080_v39  ;;  %v9025_v8 = vadd.f32 %v9006_v63, %v8839_v38  ;;  %v8822_v34 = vpop.f32.mrf.mxu1 }
 0x5a3   : > { %v8840_v21 = vadd.f32 %v8822_v34, %v18087_v42  ;;  %v9912_v24 = vadd.f32 %v9905_v19, %v9785_v25 }
 0x5a4   : > { %v9045_v30 = vmul.f32 %v18068_v40, %v9025_v8 }
 0x5a6   : > { %v9065_v12 = vadd.f32 %v18073_v53, %v9045_v30 }
 0x5a8   : > { %v9081_v52 = vmax.f32 %v9065_v12, 0.0 }
 0x5a9   : > { %v9008_v58 = vpop.f32.mrf.mxu2  ;;  %v9998_v16 = vpop.f32.mrf.mxu0 }
 0x5aa   : > { %v9907_v10 = vpop.f32.mrf.mxu3  ;;  %9097 = vst [vmem:[%s17319_s28 + $0xf0] sm:$0xff] %v9081_v52  ;;  %v9026_v29 = vadd.f32 %v9008_v58, %v8840_v21  ;;  %v10112_v43 = vpop.f32.mrf.mxu1  ;;  %v10008_v13 = vadd.f32 %v9998_v16, %v9910_v35 }
 0x5ac   : > { %v9046_v42 = vmul.f32 %v18068_v40, %v9026_v29  ;;  %v10122_v55 = vadd.f32 %v10112_v43, %v10008_v13  ;;  %v9568_v40 = vadd.f32 %v18139_v27, %v18115_v61 }
 0x5ae   : > { %v9066_v46 = vadd.f32 %v18073_v53, %v9046_v42  ;;  %v10130_v51 = vmul.f32 %v14090_v44, %v10122_v55  ;;  %v9659_v9 = vadd.f32 %v18144_v2, %v9568_v40 }
 0x5b0   : > { %v9082_v15 = vmax.f32 %v9066_v46, 0.0  ;;  %v10138_v37 = vadd.f32 %v14091_v57, %v10130_v51  ;;  %v9786_v7 = vadd.f32 %v9780_v20, %v9659_v9 }
 0x5b1   : > { %v10003_v26 = vpop.f32.mrf.mxu2  ;;  %v10000_v60 = vpop.f32.mrf.mxu0 }
 0x5b2   : > { %v10117_v17 = vpop.f32.mrf.mxu3  ;;  %9098 = vst [vmem:[%s17319_s28 + $0xf8] sm:$0xff] %v9082_v15  ;;  %v10010_v59 = vadd.f32 %v10003_v26, %v9912_v24  ;;  %v10142_v41 = vmax.f32 %v10138_v37, 0.0  ;;  %v10009_v4 = vadd.f32 %v10000_v60, %v9911_v23  ;;  %v10114_v11 = vpop.f32.mrf.mxu1  ;;  %v9913_v47 = vadd.f32 %v9907_v10, %v9786_v7 }
 0x5b4   : > { %v10124_v53 = vadd.f32 %v10117_v17, %v10010_v59  ;;  %10146 = vst [vmem:[%s17319_s28 + $0x100] sm:$0xff] %v10142_v41  ;;  %v10123_v6 = vadd.f32 %v10114_v11, %v10009_v4 }
 0x5b6   : > { %v10132_v56 = vmul.f32 %v14090_v44, %v10124_v53  ;;  %v10131_v28 = vmul.f32 %v14090_v44, %v10123_v6 }
 0x5b8   : > { %v10140_v62 = vadd.f32 %v14091_v57, %v10132_v56  ;;  %v10139_v61 = vadd.f32 %v14091_v57, %v10131_v28 }
 0x5b9   : > { %v10005_v27 = vpop.f32.mrf.mxu2 }
 0x5ba   : > { %v10144_v0 = vmax.f32 %v10140_v62, 0.0  ;;  %v10011_v49 = vadd.f32 %v10005_v27, %v9913_v47  ;;  %v10143_v22 = vmax.f32 %v10139_v61, 0.0  ;;  %v10119_v3 = vpop.f32.mrf.mxu3 }
 0x5bc   : > { %10148 = vst [vmem:[%s17319_s28 + $0x110] sm:$0xff] %v10144_v0  ;;  %v10125_v2 = vadd.f32 %v10119_v3, %v10011_v49 }
 0x5bd   : > { %10147 = vst [vmem:[%s17319_s28 + $0x108] sm:$0xff] %v10143_v22 }
 0x5be   : > { %v10133_v18 = vmul.f32 %v14090_v44, %v10125_v2 }
 0x5c0   : > { %v10141_v48 = vadd.f32 %v14091_v57, %v10133_v18 }
 0x5c2   : > { %v10145_v5 = vmax.f32 %v10141_v48, 0.0 }
 0x5c4   : > { %10149 = vst [vmem:[%s17319_s28 + $0x118] sm:$0xff] %v10145_v5 }
 0x5c5 PF: > { %s17_s26 = sadd.s32 1, %s14125_s26   ;;  %s18300_s24 = smov %s14121_s25 }
 0x5c6   : > { %p14_p5 = scmp.ge.s32.totalorder %s17_s26, 4   ;;  %s18301_s25 = smov %s18303_s27 }
 0x5c8   :  { %16 = sbr.rel (!%p14_p5) target bundleno = 2 (0x2), region = 107 }

</bundles_post_ra>
